<compile_context>
chip_gen: v5e
topology: v5e:2x2
jax: 0.10.0
libtpu: 0.0.40
codegen_flags: <defaults>
</compile_context>

<pallas_src>
import functools

import jax
import jax.numpy as jnp
from jax.experimental import pallas as pl
from jax.experimental.pallas import tpu as pltpu


def _round_up(x, m):
    return ((x + m - 1) // m) * m


# ----------------------------------------------------------------------------
# Pallas kernel: fused "conv as shifted matmul".
#
# Inputs per concat-slab: a flat (1, L, Cin) f32 activation block (resident in
# VMEM across M-tiles) and a (kh*kw, Cin, Cout) bf16 weight block.  For each
# tap t the kernel loads the row window [m0 + shift_t, m0 + shift_t + TM) of
# the flat slab, casts to bf16 and accumulates an MXU dot into an f32
# accumulator; bias + activation are fused before the single lane-dense store.
# ----------------------------------------------------------------------------
def _conv_tap_kernel(*args, shifts_per_slab, activation, n_m_tiles):
    nslab = len(shifts_per_slab)
    x_refs = args[:nslab]
    w_refs = args[nslab:2 * nslab]
    b_ref = args[2 * nslab]
    o_ref = args[2 * nslab + 1]

    tm = o_ref.shape[1]
    cout = o_ref.shape[2]

    if n_m_tiles == 1:
        base = 0  # fully static slicing in the common (small image) case
    else:
        base = pl.multiple_of(pl.program_id(1) * tm, tm)

    acc = jnp.zeros((tm, cout), jnp.float32)
    for x_ref, w_ref, shifts in zip(x_refs, w_refs, shifts_per_slab):
        for t, sh in enumerate(shifts):  # static unrolled tap loop (<= 9 per slab)
            xa = x_ref[0, pl.ds(base + sh, tm), :].astype(jnp.bfloat16)
            acc = acc + jnp.dot(xa, w_ref[t],
                                preferred_element_type=jnp.float32)

    acc = acc + b_ref[...]                 # (1, Cout) broadcast
    if activation == "relu":
        acc = jnp.maximum(acc, 0.0)
    elif activation == "sigmoid":
        acc = jax.nn.sigmoid(acc)
    o_ref[0] = acc.astype(o_ref.dtype)


# ----------------------------------------------------------------------------
# Host-side layout: rearrange an NHWC activation so every conv tap is a pure
# row shift of a flat (rows, Cin) slab.  This is ~1x data movement (pad +
# stride-phase split + reshape), NOT an im2col blow-up.
# ----------------------------------------------------------------------------
def _flatten_for_conv(x_nhwc, kh, kw, stride, padding):
    n, h, w, c = x_nhwc.shape
    s = stride
    ho = (h + 2 * padding - kh) // s + 1
    wo = (w + 2 * padding - kw) // s + 1
    xp = jnp.pad(x_nhwc, ((0, 0), (padding, padding), (padding, padding), (0, 0)))

    if s == 1:
        wrow = w + 2 * padding                        # row pitch of the flat grid
        flat = xp.reshape(n, -1, c)
        shifts = [di * wrow + dj for di in range(kh) for dj in range(kw)]
    else:
        hph = ho + (kh - 1) // s
        wph = wo + (kw - 1) // s
        mph = hph * wph
        wrow = wph
        hp_tgt, wp_tgt = s * hph, s * wph
        pad_h = max(0, hp_tgt - xp.shape[1])
        pad_w = max(0, wp_tgt - xp.shape[2])
        if pad_h or pad_w:
            xp = jnp.pad(xp, ((0, 0), (0, pad_h), (0, pad_w), (0, 0)))
        phases = [
            xp[:, u::s, v::s, :][:, :hph, :wph, :].reshape(n, mph, c)
            for u in range(s) for v in range(s)
        ]
        flat = jnp.concatenate(phases, axis=1)        # (n, s*s*mph, c)
        shifts = [((di % s) * s + (dj % s)) * mph + (di // s) * wph + (dj // s)
                  for di in range(kh) for dj in range(kw)]
    return flat, shifts, (ho, wo, wrow)


def _conv_pallas(slabs, bias, activation, ho, wo, wrow, tm_max=512):
    """slabs: list of (flat (N,L,Ci) f32, w_taps (kh*kw,Ci,Cout) bf16, shifts)."""
    n = slabs[0][0].shape[0]
    cout = slabs[0][1].shape[-1]

    m_need = ho * wrow
    tm = min(tm_max, _round_up(m_need, 8))
    n_tiles = pl.cdiv(m_need, tm)
    m_pad = n_tiles * tm
    max_shift = max(max(sh) for _, _, sh in slabs)
    l_need = _round_up(m_pad + max_shift, 8)

    xs, ws, shift_lists = [], [], []
    flops = 0
    bytes_accessed = 0
    for flat, w_taps, shifts in slabs:
        L = flat.shape[1]
        if L < l_need:
            flat = jnp.pad(flat, ((0, 0), (0, l_need - L), (0, 0)))
        elif L > l_need:
            flat = flat[:, :l_need, :]
        xs.append(flat)
        ws.append(w_taps)
        shift_lists.append(tuple(int(v) for v in shifts))
        ci = flat.shape[2]
        flops += 2 * n * m_pad * len(shifts) * ci * cout
        bytes_accessed += flat.size * 4 + w_taps.size * 2
    bias2d = bias.reshape(1, cout).astype(jnp.float32)
    bytes_accessed += bias2d.size * 4 + n * m_pad * cout * 4
    transcendentals = n * m_pad * cout if activation == "sigmoid" else 0

    in_specs = []
    for flat in xs:   # full flat slab per image, resident across M-tiles
        in_specs.append(pl.BlockSpec((1, flat.shape[1], flat.shape[2]),
                                     lambda b, m: (b, 0, 0)))
    for w_taps in ws:  # full weight slab, resident
        in_specs.append(pl.BlockSpec(w_taps.shape, lambda b, m: (0, 0, 0)))
    in_specs.append(pl.BlockSpec((1, cout), lambda b, m: (0, 0)))

    kernel = functools.partial(
        _conv_tap_kernel,
        shifts_per_slab=tuple(shift_lists),
        activation=activation,
        n_m_tiles=n_tiles,
    )

    out_flat = pl.pallas_call(
        kernel,
        out_shape=jax.ShapeDtypeStruct((n, m_pad, cout), jnp.float32),
        grid_spec=pltpu.PrefetchScalarGridSpec(
            num_scalar_prefetch=0,
            grid=(n, n_tiles),
            in_specs=in_specs,
            out_specs=pl.BlockSpec((1, tm, cout), lambda b, m: (b, m, 0)),
        ),
        compiler_params=pltpu.CompilerParams(
            dimension_semantics=("parallel", "parallel"),
            vmem_limit_bytes=32 * 1024 * 1024,
        ),
        cost_estimate=pl.CostEstimate(
            flops=int(flops),
            transcendentals=int(transcendentals),
            bytes_accessed=int(bytes_accessed),
        ),
    )(*xs, *ws, bias2d)

    # Drop the (small) over-computed columns of the flat grid and restore NHWC.
    out = out_flat[:, :ho * wrow, :].reshape(n, ho, wrow, cout)[:, :, :wo, :]
    return out


def conv2d_fused(xs_nhwc, w_hwio, bias, stride=1, padding=1, activation="none"):
    """Conv2D over the channel-concat of `xs_nhwc`; the concat is fused into the
    kernel as multiple accumulated weight slabs (no concatenated tensor in HBM)."""
    kh, kw, cin_total, cout = w_hwio.shape
    assert cin_total == sum(x.shape[-1] for x in xs_nhwc)
    slabs = []
    geom = None
    c0 = 0
    for x in xs_nhwc:
        ci = x.shape[-1]
        flat, shifts, g = _flatten_for_conv(x, kh, kw, stride, padding)
        if geom is None:
            geom = g
        else:
            assert g == geom, "concat operands must share spatial geometry"
        w_taps = (w_hwio[:, :, c0:c0 + ci, :]
                  .reshape(kh * kw, ci, cout)
                  .astype(jnp.bfloat16))
        slabs.append((flat, w_taps, shifts))
        c0 += ci
    ho, wo, wrow = geom
    return _conv_pallas(slabs, bias, activation, ho, wo, wrow)


def upsample2x(x_nhwc):
    # TODO(synk): nearest-neighbour 2x upsample is still materialized in plain
    # JAX; fusing it into the decoder conv's tap indexing (row//2, col//2) is
    # left for the real-resolution kernel.
    x = jnp.repeat(x_nhwc, 2, axis=1)
    x = jnp.repeat(x, 2, axis=2)
    return x


# ----------------------------------------------------------------------------
# Deterministic parameter init (He-style) for the synthetic U-Net.
# ----------------------------------------------------------------------------
def _conv_params(key, kh, kw, cin, cout):
    kw_key, _ = jax.random.split(key)
    fan_in = kh * kw * cin
    scale = jnp.sqrt(2.0 / fan_in)
    w = jax.random.normal(kw_key, (kh, kw, cin, cout), jnp.float32) * scale
    b = jnp.zeros((cout,), jnp.float32)
    return w, b


def init_unet_params(in_channels=3, out_channels=3, base=16, seed=0):
    root = jax.random.PRNGKey(seed)
    keys = [jax.random.fold_in(root, i) for i in range(6)]
    p = {}
    p["enc1"] = _conv_params(keys[0], 3, 3, in_channels, base)          # 16x16
    p["enc2"] = _conv_params(keys[1], 3, 3, base, base * 2)             # 8x8 (stride2)
    p["bott"] = _conv_params(keys[2], 3, 3, base * 2, base * 4)         # 4x4 (stride2)
    p["dec1"] = _conv_params(keys[3], 3, 3, base * 4 + base * 2, base * 2)
    p["dec2"] = _conv_params(keys[4], 3, 3, base * 2 + base, base)
    p["head"] = _conv_params(keys[5], 1, 1, base, out_channels)
    return p


# ----------------------------------------------------------------------------
# Forward pass: Unet(encoder -> decoder with fused skip-concats -> sigmoid head).
# ----------------------------------------------------------------------------
def matrix_forward(params, x_nchw):
    x = jnp.transpose(x_nchw, (0, 2, 3, 1))  # NCHW -> NHWC

    e1 = conv2d_fused([x], *params["enc1"], stride=1, padding=1, activation="relu")
    e2 = conv2d_fused([e1], *params["enc2"], stride=2, padding=1, activation="relu")
    bn = conv2d_fused([e2], *params["bott"], stride=2, padding=1, activation="relu")

    d1 = conv2d_fused([upsample2x(bn), e2], *params["dec1"],
                      stride=1, padding=1, activation="relu")
    d2 = conv2d_fused([upsample2x(d1), e1], *params["dec2"],
                      stride=1, padding=1, activation="relu")

    out = conv2d_fused([d2], *params["head"], stride=1, padding=0,
                       activation="sigmoid")
    return jnp.transpose(out, (0, 3, 1, 2))  # NHWC -> NCHW


# ----------------------------------------------------------------------------
# Pure-JAX reference (same synthetic weights, bf16-quantized like the kernel).
# ----------------------------------------------------------------------------
def _ref_conv(x, w, b, stride, padding, activation):
    wq = w.astype(jnp.bfloat16).astype(jnp.float32)
    y = jax.lax.conv_general_dilated(
        x, wq, window_strides=(stride, stride),
        padding=((padding, padding), (padding, padding)),
        dimension_numbers=("NHWC", "HWIO", "NHWC"))
    y = y + b.reshape(1, 1, 1, -1)
    if activation == "relu":
        y = jnp.maximum(y, 0.0)
    elif activation == "sigmoid":
        y = jax.nn.sigmoid(y)
    return y


def matrix_forward_ref(params, x_nchw):
    x = jnp.transpose(x_nchw, (0, 2, 3, 1))
    e1 = _ref_conv(x, *params["enc1"], 1, 1, "relu")
    e2 = _ref_conv(e1, *params["enc2"], 2, 1, "relu")
    bn = _ref_conv(e2, *params["bott"], 2, 1, "relu")
    d1 = _ref_conv(jnp.concatenate([upsample2x(bn), e2], -1), *params["dec1"], 1, 1, "relu")
    d2 = _ref_conv(jnp.concatenate([upsample2x(d1), e1], -1), *params["dec2"], 1, 1, "relu")
    out = _ref_conv(d2, *params["head"], 1, 0, "sigmoid")
    return jnp.transpose(out, (0, 3, 1, 2))


if __name__ == "__main__":
    key = jax.random.PRNGKey(0)
    x = jax.random.normal(key, (2, 3, 16, 16), jnp.float32)  # NCHW, like PyTorch

    params = init_unet_params(in_channels=3, out_channels=3, base=16, seed=0)

    fwd = jax.jit(matrix_forward)
    y = fwd(params, x)
    jax.block_until_ready(y)

    assert y.shape == (2, 3, 16, 16), y.shape
    assert bool(jnp.all((y >= 0.0) & (y <= 1.0))), "sigmoid output out of range"

    y_ref = jax.jit(matrix_forward_ref)(params, x)
    err = float(jnp.max(jnp.abs(y - y_ref)))
    assert err < 5e-2, f"mismatch vs pure-JAX reference: {err}"

    print("KERNEL_OK")
</pallas_src>

<mosaic_0001>
module attributes {stable_mosaic.version = 11 : i64} {
  func.func @_conv_tap_kernel(%arg0: i32, %arg1: i32, %arg2: memref<1x328x3xf32, #tpu.memory_space<vmem>>, %arg3: memref<9x3x16xbf16, #tpu.memory_space<vmem>>, %arg4: memref<1x16xf32, #tpu.memory_space<vmem>>, %arg5: memref<1x288x16xf32, #tpu.memory_space<vmem>>) attributes {dimension_semantics = [#tpu.dimension_semantics<parallel>, #tpu.dimension_semantics<parallel>], iteration_bounds = array<i64: 2, 1>, scalar_prefetch = 0 : i64, scratch_operands = 0 : i64, tpu.core_type = #tpu.core_type<tc>, window_params = [{transform_indices = @transform_0, window_bounds = array<i64: 1, 328, 3>}, {pipeline_mode = #tpu.pipeline_mode<synchronous>, transform_indices = @transform_1, window_bounds = array<i64: 9, 3, 16>}, {pipeline_mode = #tpu.pipeline_mode<synchronous>, transform_indices = @transform_2, window_bounds = array<i64: 1, 16>}, {transform_indices = @transform_3, window_bounds = array<i64: 1, 288, 16>}]} {
    %cst = arith.constant 0.000000e+00 : f32
    %0 = vector.broadcast %cst : f32 to vector<288x16xf32>
    %c0 = arith.constant 0 : index
    %c0_0 = arith.constant 0 : index
    %c0_1 = arith.constant 0 : index
    %1 = vector.load %arg2[%c0, %c0_0, %c0_1] : memref<1x328x3xf32, #tpu.memory_space<vmem>>, vector<1x288x3xf32>
    %2 = vector.shape_cast %1 : vector<1x288x3xf32> to vector<288x3xf32>
    %3 = arith.truncf %2 : vector<288x3xf32> to vector<288x3xbf16>
    %c0_2 = arith.constant 0 : index
    %c0_3 = arith.constant 0 : index
    %c0_4 = arith.constant 0 : index
    %4 = vector.load %arg3[%c0_2, %c0_3, %c0_4] : memref<9x3x16xbf16, #tpu.memory_space<vmem>>, vector<1x3x16xbf16>
    %5 = vector.shape_cast %4 : vector<1x3x16xbf16> to vector<3x16xbf16>
    %cst_5 = arith.constant dense<0.000000e+00> : vector<288x16xf32>
    %6 = tpu.matmul %3, %5, %cst_5 {dimension_numbers = #tpu.dot_dimension_numbers<[1], [0], [0], [1], [0, 0, 1, 1], [], []>} : vector<288x3xbf16>, vector<3x16xbf16>, vector<288x16xf32> -> vector<288x16xf32>
    %7 = arith.addf %0, %6 : vector<288x16xf32>
    %c0_6 = arith.constant 0 : index
    %c1 = arith.constant 1 : index
    %c0_7 = arith.constant 0 : index
    %8 = vector.load %arg2[%c0_6, %c1, %c0_7] : memref<1x328x3xf32, #tpu.memory_space<vmem>>, vector<1x288x3xf32>
    %9 = vector.shape_cast %8 : vector<1x288x3xf32> to vector<288x3xf32>
    %10 = arith.truncf %9 : vector<288x3xf32> to vector<288x3xbf16>
    %c1_8 = arith.constant 1 : index
    %c0_9 = arith.constant 0 : index
    %c0_10 = arith.constant 0 : index
    %11 = vector.load %arg3[%c1_8, %c0_9, %c0_10] : memref<9x3x16xbf16, #tpu.memory_space<vmem>>, vector<1x3x16xbf16>
    %12 = vector.shape_cast %11 : vector<1x3x16xbf16> to vector<3x16xbf16>
    %cst_11 = arith.constant dense<0.000000e+00> : vector<288x16xf32>
    %13 = tpu.matmul %10, %12, %cst_11 {dimension_numbers = #tpu.dot_dimension_numbers<[1], [0], [0], [1], [0, 0, 1, 1], [], []>} : vector<288x3xbf16>, vector<3x16xbf16>, vector<288x16xf32> -> vector<288x16xf32>
    %14 = arith.addf %7, %13 : vector<288x16xf32>
    %c0_12 = arith.constant 0 : index
    %c2 = arith.constant 2 : index
    %c0_13 = arith.constant 0 : index
    %15 = vector.load %arg2[%c0_12, %c2, %c0_13] : memref<1x328x3xf32, #tpu.memory_space<vmem>>, vector<1x288x3xf32>
    %16 = vector.shape_cast %15 : vector<1x288x3xf32> to vector<288x3xf32>
    %17 = arith.truncf %16 : vector<288x3xf32> to vector<288x3xbf16>
    %c2_14 = arith.constant 2 : index
    %c0_15 = arith.constant 0 : index
    %c0_16 = arith.constant 0 : index
    %18 = vector.load %arg3[%c2_14, %c0_15, %c0_16] : memref<9x3x16xbf16, #tpu.memory_space<vmem>>, vector<1x3x16xbf16>
    %19 = vector.shape_cast %18 : vector<1x3x16xbf16> to vector<3x16xbf16>
    %cst_17 = arith.constant dense<0.000000e+00> : vector<288x16xf32>
    %20 = tpu.matmul %17, %19, %cst_17 {dimension_numbers = #tpu.dot_dimension_numbers<[1], [0], [0], [1], [0, 0, 1, 1], [], []>} : vector<288x3xbf16>, vector<3x16xbf16>, vector<288x16xf32> -> vector<288x16xf32>
    %21 = arith.addf %14, %20 : vector<288x16xf32>
    %c0_18 = arith.constant 0 : index
    %c18 = arith.constant 18 : index
    %c0_19 = arith.constant 0 : index
    %22 = vector.load %arg2[%c0_18, %c18, %c0_19] : memref<1x328x3xf32, #tpu.memory_space<vmem>>, vector<1x288x3xf32>
    %23 = vector.shape_cast %22 : vector<1x288x3xf32> to vector<288x3xf32>
    %24 = arith.truncf %23 : vector<288x3xf32> to vector<288x3xbf16>
    %c3 = arith.constant 3 : index
    %c0_20 = arith.constant 0 : index
    %c0_21 = arith.constant 0 : index
    %25 = vector.load %arg3[%c3, %c0_20, %c0_21] : memref<9x3x16xbf16, #tpu.memory_space<vmem>>, vector<1x3x16xbf16>
    %26 = vector.shape_cast %25 : vector<1x3x16xbf16> to vector<3x16xbf16>
    %cst_22 = arith.constant dense<0.000000e+00> : vector<288x16xf32>
    %27 = tpu.matmul %24, %26, %cst_22 {dimension_numbers = #tpu.dot_dimension_numbers<[1], [0], [0], [1], [0, 0, 1, 1], [], []>} : vector<288x3xbf16>, vector<3x16xbf16>, vector<288x16xf32> -> vector<288x16xf32>
    %28 = arith.addf %21, %27 : vector<288x16xf32>
    %c0_23 = arith.constant 0 : index
    %c19 = arith.constant 19 : index
    %c0_24 = arith.constant 0 : index
    %29 = vector.load %arg2[%c0_23, %c19, %c0_24] : memref<1x328x3xf32, #tpu.memory_space<vmem>>, vector<1x288x3xf32>
    %30 = vector.shape_cast %29 : vector<1x288x3xf32> to vector<288x3xf32>
    %31 = arith.truncf %30 : vector<288x3xf32> to vector<288x3xbf16>
    %c4 = arith.constant 4 : index
    %c0_25 = arith.constant 0 : index
    %c0_26 = arith.constant 0 : index
    %32 = vector.load %arg3[%c4, %c0_25, %c0_26] : memref<9x3x16xbf16, #tpu.memory_space<vmem>>, vector<1x3x16xbf16>
    %33 = vector.shape_cast %32 : vector<1x3x16xbf16> to vector<3x16xbf16>
    %cst_27 = arith.constant dense<0.000000e+00> : vector<288x16xf32>
    %34 = tpu.matmul %31, %33, %cst_27 {dimension_numbers = #tpu.dot_dimension_numbers<[1], [0], [0], [1], [0, 0, 1, 1], [], []>} : vector<288x3xbf16>, vector<3x16xbf16>, vector<288x16xf32> -> vector<288x16xf32>
    %35 = arith.addf %28, %34 : vector<288x16xf32>
    %c0_28 = arith.constant 0 : index
    %c20 = arith.constant 20 : index
    %c0_29 = arith.constant 0 : index
    %36 = vector.load %arg2[%c0_28, %c20, %c0_29] : memref<1x328x3xf32, #tpu.memory_space<vmem>>, vector<1x288x3xf32>
    %37 = vector.shape_cast %36 : vector<1x288x3xf32> to vector<288x3xf32>
    %38 = arith.truncf %37 : vector<288x3xf32> to vector<288x3xbf16>
    %c5 = arith.constant 5 : index
    %c0_30 = arith.constant 0 : index
    %c0_31 = arith.constant 0 : index
    %39 = vector.load %arg3[%c5, %c0_30, %c0_31] : memref<9x3x16xbf16, #tpu.memory_space<vmem>>, vector<1x3x16xbf16>
    %40 = vector.shape_cast %39 : vector<1x3x16xbf16> to vector<3x16xbf16>
    %cst_32 = arith.constant dense<0.000000e+00> : vector<288x16xf32>
    %41 = tpu.matmul %38, %40, %cst_32 {dimension_numbers = #tpu.dot_dimension_numbers<[1], [0], [0], [1], [0, 0, 1, 1], [], []>} : vector<288x3xbf16>, vector<3x16xbf16>, vector<288x16xf32> -> vector<288x16xf32>
    %42 = arith.addf %35, %41 : vector<288x16xf32>
    %c0_33 = arith.constant 0 : index
    %c36 = arith.constant 36 : index
    %c0_34 = arith.constant 0 : index
    %43 = vector.load %arg2[%c0_33, %c36, %c0_34] : memref<1x328x3xf32, #tpu.memory_space<vmem>>, vector<1x288x3xf32>
    %44 = vector.shape_cast %43 : vector<1x288x3xf32> to vector<288x3xf32>
    %45 = arith.truncf %44 : vector<288x3xf32> to vector<288x3xbf16>
    %c6 = arith.constant 6 : index
    %c0_35 = arith.constant 0 : index
    %c0_36 = arith.constant 0 : index
    %46 = vector.load %arg3[%c6, %c0_35, %c0_36] : memref<9x3x16xbf16, #tpu.memory_space<vmem>>, vector<1x3x16xbf16>
    %47 = vector.shape_cast %46 : vector<1x3x16xbf16> to vector<3x16xbf16>
    %cst_37 = arith.constant dense<0.000000e+00> : vector<288x16xf32>
    %48 = tpu.matmul %45, %47, %cst_37 {dimension_numbers = #tpu.dot_dimension_numbers<[1], [0], [0], [1], [0, 0, 1, 1], [], []>} : vector<288x3xbf16>, vector<3x16xbf16>, vector<288x16xf32> -> vector<288x16xf32>
    %49 = arith.addf %42, %48 : vector<288x16xf32>
    %c0_38 = arith.constant 0 : index
    %c37 = arith.constant 37 : index
    %c0_39 = arith.constant 0 : index
    %50 = vector.load %arg2[%c0_38, %c37, %c0_39] : memref<1x328x3xf32, #tpu.memory_space<vmem>>, vector<1x288x3xf32>
    %51 = vector.shape_cast %50 : vector<1x288x3xf32> to vector<288x3xf32>
    %52 = arith.truncf %51 : vector<288x3xf32> to vector<288x3xbf16>
    %c7 = arith.constant 7 : index
    %c0_40 = arith.constant 0 : index
    %c0_41 = arith.constant 0 : index
    %53 = vector.load %arg3[%c7, %c0_40, %c0_41] : memref<9x3x16xbf16, #tpu.memory_space<vmem>>, vector<1x3x16xbf16>
    %54 = vector.shape_cast %53 : vector<1x3x16xbf16> to vector<3x16xbf16>
    %cst_42 = arith.constant dense<0.000000e+00> : vector<288x16xf32>
    %55 = tpu.matmul %52, %54, %cst_42 {dimension_numbers = #tpu.dot_dimension_numbers<[1], [0], [0], [1], [0, 0, 1, 1], [], []>} : vector<288x3xbf16>, vector<3x16xbf16>, vector<288x16xf32> -> vector<288x16xf32>
    %56 = arith.addf %49, %55 : vector<288x16xf32>
    %c0_43 = arith.constant 0 : index
    %c38 = arith.constant 38 : index
    %c0_44 = arith.constant 0 : index
    %57 = vector.load %arg2[%c0_43, %c38, %c0_44] : memref<1x328x3xf32, #tpu.memory_space<vmem>>, vector<1x288x3xf32>
    %58 = vector.shape_cast %57 : vector<1x288x3xf32> to vector<288x3xf32>
    %59 = arith.truncf %58 : vector<288x3xf32> to vector<288x3xbf16>
    %c8 = arith.constant 8 : index
    %c0_45 = arith.constant 0 : index
    %c0_46 = arith.constant 0 : index
    %60 = vector.load %arg3[%c8, %c0_45, %c0_46] : memref<9x3x16xbf16, #tpu.memory_space<vmem>>, vector<1x3x16xbf16>
    %61 = vector.shape_cast %60 : vector<1x3x16xbf16> to vector<3x16xbf16>
    %cst_47 = arith.constant dense<0.000000e+00> : vector<288x16xf32>
    %62 = tpu.matmul %59, %61, %cst_47 {dimension_numbers = #tpu.dot_dimension_numbers<[1], [0], [0], [1], [0, 0, 1, 1], [], []>} : vector<288x3xbf16>, vector<3x16xbf16>, vector<288x16xf32> -> vector<288x16xf32>
    %63 = arith.addf %56, %62 : vector<288x16xf32>
    %c0_48 = arith.constant 0 : index
    %c0_49 = arith.constant 0 : index
    %64 = vector.load %arg4[%c0_48, %c0_49] : memref<1x16xf32, #tpu.memory_space<vmem>>, vector<1x16xf32>
    %65 = vector.broadcast %64 : vector<1x16xf32> to vector<288x16xf32>
    %66 = arith.addf %63, %65 : vector<288x16xf32>
    %cst_50 = arith.constant 0.000000e+00 : f32
    %67 = vector.broadcast %cst_50 : f32 to vector<288x16xf32>
    %68 = arith.maximumf %66, %67 : vector<288x16xf32>
    %c0_51 = arith.constant 0 : index
    %c0_52 = arith.constant 0 : index
    %c0_53 = arith.constant 0 : index
    %69 = vector.load %arg5[%c0_51, %c0_52, %c0_53] : memref<1x288x16xf32, #tpu.memory_space<vmem>>, vector<1x288x16xf32>
    %70 = vector.shape_cast %69 : vector<1x288x16xf32> to vector<288x16xf32>
    %71 = vector.shape_cast %68 : vector<288x16xf32> to vector<1x288x16xf32>
    tpu.vector_store %arg5[%c0_51, %c0_52, %c0_53], %71 {strides = array<i32>} : memref<1x288x16xf32, #tpu.memory_space<vmem>>, vector<1x288x16xf32>,
    return
  }
  func.func @transform_0(%arg0: i32, %arg1: i32) -> (i32, i32, i32) {
    %c0_i32 = arith.constant 0 : i32
    %c0_i32_0 = arith.constant 0 : i32
    %c0_i32_1 = arith.constant 0 : i32
    return %arg0, %c0_i32, %c0_i32_0 : i32, i32, i32
  }
  func.func @transform_1(%arg0: i32, %arg1: i32) -> (i32, i32, i32) {
    %c0_i32 = arith.constant 0 : i32
    %c0_i32_0 = arith.constant 0 : i32
    %c0_i32_1 = arith.constant 0 : i32
    %c0_i32_2 = arith.constant 0 : i32
    return %c0_i32, %c0_i32_0, %c0_i32_1 : i32, i32, i32
  }
  func.func @transform_2(%arg0: i32, %arg1: i32) -> (i32, i32) {
    %c0_i32 = arith.constant 0 : i32
    %c0_i32_0 = arith.constant 0 : i32
    %c0_i32_1 = arith.constant 0 : i32
    return %c0_i32, %c0_i32_0 : i32, i32
  }
  func.func @transform_3(%arg0: i32, %arg1: i32) -> (i32, i32, i32) {
    %c0_i32 = arith.constant 0 : i32
    %c0_i32_0 = arith.constant 0 : i32
    return %arg0, %arg1, %c0_i32 : i32, i32, i32
  }
}

module attributes {stable_mosaic.version = 11 : i64} {
  func.func @_conv_tap_kernel(%arg0: i32, %arg1: i32, %arg2: memref<1x320x16xf32, #tpu.memory_space<vmem>>, %arg3: memref<9x16x32xbf16, #tpu.memory_space<vmem>>, %arg4: memref<1x32xf32, #tpu.memory_space<vmem>>, %arg5: memref<1x72x32xf32, #tpu.memory_space<vmem>>) attributes {dimension_semantics = [#tpu.dimension_semantics<parallel>, #tpu.dimension_semantics<parallel>], iteration_bounds = array<i64: 2, 1>, scalar_prefetch = 0 : i64, scratch_operands = 0 : i64, tpu.core_type = #tpu.core_type<tc>, window_params = [{transform_indices = @transform_0, window_bounds = array<i64: 1, 320, 16>}, {pipeline_mode = #tpu.pipeline_mode<synchronous>, transform_indices = @transform_1, window_bounds = array<i64: 9, 16, 32>}, {pipeline_mode = #tpu.pipeline_mode<synchronous>, transform_indices = @transform_2, window_bounds = array<i64: 1, 32>}, {transform_indices = @transform_3, window_bounds = array<i64: 1, 72, 32>}]} {
    %cst = arith.constant 0.000000e+00 : f32
    %0 = vector.broadcast %cst : f32 to vector<72x32xf32>
    %c0 = arith.constant 0 : index
    %c0_0 = arith.constant 0 : index
    %c0_1 = arith.constant 0 : index
    %1 = vector.load %arg2[%c0, %c0_0, %c0_1] : memref<1x320x16xf32, #tpu.memory_space<vmem>>, vector<1x72x16xf32>
    %2 = vector.shape_cast %1 : vector<1x72x16xf32> to vector<72x16xf32>
    %3 = arith.truncf %2 : vector<72x16xf32> to vector<72x16xbf16>
    %c0_2 = arith.constant 0 : index
    %c0_3 = arith.constant 0 : index
    %c0_4 = arith.constant 0 : index
    %4 = vector.load %arg3[%c0_2, %c0_3, %c0_4] : memref<9x16x32xbf16, #tpu.memory_space<vmem>>, vector<1x16x32xbf16>
    %5 = vector.shape_cast %4 : vector<1x16x32xbf16> to vector<16x32xbf16>
    %cst_5 = arith.constant dense<0.000000e+00> : vector<72x32xf32>
    %6 = tpu.matmul %3, %5, %cst_5 {dimension_numbers = #tpu.dot_dimension_numbers<[1], [0], [0], [1], [0, 0, 1, 1], [], []>} : vector<72x16xbf16>, vector<16x32xbf16>, vector<72x32xf32> -> vector<72x32xf32>
    %7 = arith.addf %0, %6 : vector<72x32xf32>
    %c0_6 = arith.constant 0 : index
    %c81 = arith.constant 81 : index
    %c0_7 = arith.constant 0 : index
    %8 = vector.load %arg2[%c0_6, %c81, %c0_7] : memref<1x320x16xf32, #tpu.memory_space<vmem>>, vector<1x72x16xf32>
    %9 = vector.shape_cast %8 : vector<1x72x16xf32> to vector<72x16xf32>
    %10 = arith.truncf %9 : vector<72x16xf32> to vector<72x16xbf16>
    %c1 = arith.constant 1 : index
    %c0_8 = arith.constant 0 : index
    %c0_9 = arith.constant 0 : index
    %11 = vector.load %arg3[%c1, %c0_8, %c0_9] : memref<9x16x32xbf16, #tpu.memory_space<vmem>>, vector<1x16x32xbf16>
    %12 = vector.shape_cast %11 : vector<1x16x32xbf16> to vector<16x32xbf16>
    %cst_10 = arith.constant dense<0.000000e+00> : vector<72x32xf32>
    %13 = tpu.matmul %10, %12, %cst_10 {dimension_numbers = #tpu.dot_dimension_numbers<[1], [0], [0], [1], [0, 0, 1, 1], [], []>} : vector<72x16xbf16>, vector<16x32xbf16>, vector<72x32xf32> -> vector<72x32xf32>
    %14 = arith.addf %7, %13 : vector<72x32xf32>
    %c0_11 = arith.constant 0 : index
    %c1_12 = arith.constant 1 : index
    %c0_13 = arith.constant 0 : index
    %15 = vector.load %arg2[%c0_11, %c1_12, %c0_13] : memref<1x320x16xf32, #tpu.memory_space<vmem>>, vector<1x72x16xf32>
    %16 = vector.shape_cast %15 : vector<1x72x16xf32> to vector<72x16xf32>
    %17 = arith.truncf %16 : vector<72x16xf32> to vector<72x16xbf16>
    %c2 = arith.constant 2 : index
    %c0_14 = arith.constant 0 : index
    %c0_15 = arith.constant 0 : index
    %18 = vector.load %arg3[%c2, %c0_14, %c0_15] : memref<9x16x32xbf16, #tpu.memory_space<vmem>>, vector<1x16x32xbf16>
    %19 = vector.shape_cast %18 : vector<1x16x32xbf16> to vector<16x32xbf16>
    %cst_16 = arith.constant dense<0.000000e+00> : vector<72x32xf32>
    %20 = tpu.matmul %17, %19, %cst_16 {dimension_numbers = #tpu.dot_dimension_numbers<[1], [0], [0], [1], [0, 0, 1, 1], [], []>} : vector<72x16xbf16>, vector<16x32xbf16>, vector<72x32xf32> -> vector<72x32xf32>
    %21 = arith.addf %14, %20 : vector<72x32xf32>
    %c0_17 = arith.constant 0 : index
    %c162 = arith.constant 162 : index
    %c0_18 = arith.constant 0 : index
    %22 = vector.load %arg2[%c0_17, %c162, %c0_18] : memref<1x320x16xf32, #tpu.memory_space<vmem>>, vector<1x72x16xf32>
    %23 = vector.shape_cast %22 : vector<1x72x16xf32> to vector<72x16xf32>
    %24 = arith.truncf %23 : vector<72x16xf32> to vector<72x16xbf16>
    %c3 = arith.constant 3 : index
    %c0_19 = arith.constant 0 : index
    %c0_20 = arith.constant 0 : index
    %25 = vector.load %arg3[%c3, %c0_19, %c0_20] : memref<9x16x32xbf16, #tpu.memory_space<vmem>>, vector<1x16x32xbf16>
    %26 = vector.shape_cast %25 : vector<1x16x32xbf16> to vector<16x32xbf16>
    %cst_21 = arith.constant dense<0.000000e+00> : vector<72x32xf32>
    %27 = tpu.matmul %24, %26, %cst_21 {dimension_numbers = #tpu.dot_dimension_numbers<[1], [0], [0], [1], [0, 0, 1, 1], [], []>} : vector<72x16xbf16>, vector<16x32xbf16>, vector<72x32xf32> -> vector<72x32xf32>
    %28 = arith.addf %21, %27 : vector<72x32xf32>
    %c0_22 = arith.constant 0 : index
    %c243 = arith.constant 243 : index
    %c0_23 = arith.constant 0 : index
    %29 = vector.load %arg2[%c0_22, %c243, %c0_23] : memref<1x320x16xf32, #tpu.memory_space<vmem>>, vector<1x72x16xf32>
    %30 = vector.shape_cast %29 : vector<1x72x16xf32> to vector<72x16xf32>
    %31 = arith.truncf %30 : vector<72x16xf32> to vector<72x16xbf16>
    %c4 = arith.constant 4 : index
    %c0_24 = arith.constant 0 : index
    %c0_25 = arith.constant 0 : index
    %32 = vector.load %arg3[%c4, %c0_24, %c0_25] : memref<9x16x32xbf16, #tpu.memory_space<vmem>>, vector<1x16x32xbf16>
    %33 = vector.shape_cast %32 : vector<1x16x32xbf16> to vector<16x32xbf16>
    %cst_26 = arith.constant dense<0.000000e+00> : vector<72x32xf32>
    %34 = tpu.matmul %31, %33, %cst_26 {dimension_numbers = #tpu.dot_dimension_numbers<[1], [0], [0], [1], [0, 0, 1, 1], [], []>} : vector<72x16xbf16>, vector<16x32xbf16>, vector<72x32xf32> -> vector<72x32xf32>
    %35 = arith.addf %28, %34 : vector<72x32xf32>
    %c0_27 = arith.constant 0 : index
    %c163 = arith.constant 163 : index
    %c0_28 = arith.constant 0 : index
    %36 = vector.load %arg2[%c0_27, %c163, %c0_28] : memref<1x320x16xf32, #tpu.memory_space<vmem>>, vector<1x72x16xf32>
    %37 = vector.shape_cast %36 : vector<1x72x16xf32> to vector<72x16xf32>
    %38 = arith.truncf %37 : vector<72x16xf32> to vector<72x16xbf16>
    %c5 = arith.constant 5 : index
    %c0_29 = arith.constant 0 : index
    %c0_30 = arith.constant 0 : index
    %39 = vector.load %arg3[%c5, %c0_29, %c0_30] : memref<9x16x32xbf16, #tpu.memory_space<vmem>>, vector<1x16x32xbf16>
    %40 = vector.shape_cast %39 : vector<1x16x32xbf16> to vector<16x32xbf16>
    %cst_31 = arith.constant dense<0.000000e+00> : vector<72x32xf32>
    %41 = tpu.matmul %38, %40, %cst_31 {dimension_numbers = #tpu.dot_dimension_numbers<[1], [0], [0], [1], [0, 0, 1, 1], [], []>} : vector<72x16xbf16>, vector<16x32xbf16>, vector<72x32xf32> -> vector<72x32xf32>
    %42 = arith.addf %35, %41 : vector<72x32xf32>
    %c0_32 = arith.constant 0 : index
    %c9 = arith.constant 9 : index
    %c0_33 = arith.constant 0 : index
    %43 = vector.load %arg2[%c0_32, %c9, %c0_33] : memref<1x320x16xf32, #tpu.memory_space<vmem>>, vector<1x72x16xf32>
    %44 = vector.shape_cast %43 : vector<1x72x16xf32> to vector<72x16xf32>
    %45 = arith.truncf %44 : vector<72x16xf32> to vector<72x16xbf16>
    %c6 = arith.constant 6 : index
    %c0_34 = arith.constant 0 : index
    %c0_35 = arith.constant 0 : index
    %46 = vector.load %arg3[%c6, %c0_34, %c0_35] : memref<9x16x32xbf16, #tpu.memory_space<vmem>>, vector<1x16x32xbf16>
    %47 = vector.shape_cast %46 : vector<1x16x32xbf16> to vector<16x32xbf16>
    %cst_36 = arith.constant dense<0.000000e+00> : vector<72x32xf32>
    %48 = tpu.matmul %45, %47, %cst_36 {dimension_numbers = #tpu.dot_dimension_numbers<[1], [0], [0], [1], [0, 0, 1, 1], [], []>} : vector<72x16xbf16>, vector<16x32xbf16>, vector<72x32xf32> -> vector<72x32xf32>
    %49 = arith.addf %42, %48 : vector<72x32xf32>
    %c0_37 = arith.constant 0 : index
    %c90 = arith.constant 90 : index
    %c0_38 = arith.constant 0 : index
    %50 = vector.load %arg2[%c0_37, %c90, %c0_38] : memref<1x320x16xf32, #tpu.memory_space<vmem>>, vector<1x72x16xf32>
    %51 = vector.shape_cast %50 : vector<1x72x16xf32> to vector<72x16xf32>
    %52 = arith.truncf %51 : vector<72x16xf32> to vector<72x16xbf16>
    %c7 = arith.constant 7 : index
    %c0_39 = arith.constant 0 : index
    %c0_40 = arith.constant 0 : index
    %53 = vector.load %arg3[%c7, %c0_39, %c0_40] : memref<9x16x32xbf16, #tpu.memory_space<vmem>>, vector<1x16x32xbf16>
    %54 = vector.shape_cast %53 : vector<1x16x32xbf16> to vector<16x32xbf16>
    %cst_41 = arith.constant dense<0.000000e+00> : vector<72x32xf32>
    %55 = tpu.matmul %52, %54, %cst_41 {dimension_numbers = #tpu.dot_dimension_numbers<[1], [0], [0], [1], [0, 0, 1, 1], [], []>} : vector<72x16xbf16>, vector<16x32xbf16>, vector<72x32xf32> -> vector<72x32xf32>
    %56 = arith.addf %49, %55 : vector<72x32xf32>
    %c0_42 = arith.constant 0 : index
    %c10 = arith.constant 10 : index
    %c0_43 = arith.constant 0 : index
    %57 = vector.load %arg2[%c0_42, %c10, %c0_43] : memref<1x320x16xf32, #tpu.memory_space<vmem>>, vector<1x72x16xf32>
    %58 = vector.shape_cast %57 : vector<1x72x16xf32> to vector<72x16xf32>
    %59 = arith.truncf %58 : vector<72x16xf32> to vector<72x16xbf16>
    %c8 = arith.constant 8 : index
    %c0_44 = arith.constant 0 : index
    %c0_45 = arith.constant 0 : index
    %60 = vector.load %arg3[%c8, %c0_44, %c0_45] : memref<9x16x32xbf16, #tpu.memory_space<vmem>>, vector<1x16x32xbf16>
    %61 = vector.shape_cast %60 : vector<1x16x32xbf16> to vector<16x32xbf16>
    %cst_46 = arith.constant dense<0.000000e+00> : vector<72x32xf32>
    %62 = tpu.matmul %59, %61, %cst_46 {dimension_numbers = #tpu.dot_dimension_numbers<[1], [0], [0], [1], [0, 0, 1, 1], [], []>} : vector<72x16xbf16>, vector<16x32xbf16>, vector<72x32xf32> -> vector<72x32xf32>
    %63 = arith.addf %56, %62 : vector<72x32xf32>
    %c0_47 = arith.constant 0 : index
    %c0_48 = arith.constant 0 : index
    %64 = vector.load %arg4[%c0_47, %c0_48] : memref<1x32xf32, #tpu.memory_space<vmem>>, vector<1x32xf32>
    %65 = vector.broadcast %64 : vector<1x32xf32> to vector<72x32xf32>
    %66 = arith.addf %63, %65 : vector<72x32xf32>
    %cst_49 = arith.constant 0.000000e+00 : f32
    %67 = vector.broadcast %cst_49 : f32 to vector<72x32xf32>
    %68 = arith.maximumf %66, %67 : vector<72x32xf32>
    %c0_50 = arith.constant 0 : index
    %c0_51 = arith.constant 0 : index
    %c0_52 = arith.constant 0 : index
    %69 = vector.load %arg5[%c0_50, %c0_51, %c0_52] : memref<1x72x32xf32, #tpu.memory_space<vmem>>, vector<1x72x32xf32>
    %70 = vector.shape_cast %69 : vector<1x72x32xf32> to vector<72x32xf32>
    %71 = vector.shape_cast %68 : vector<72x32xf32> to vector<1x72x32xf32>
    tpu.vector_store %arg5[%c0_50, %c0_51, %c0_52], %71 {strides = array<i32>} : memref<1x72x32xf32, #tpu.memory_space<vmem>>, vector<1x72x32xf32>,
    return
  }
  func.func @transform_0(%arg0: i32, %arg1: i32) -> (i32, i32, i32) {
    %c0_i32 = arith.constant 0 : i32
    %c0_i32_0 = arith.constant 0 : i32
    %c0_i32_1 = arith.constant 0 : i32
    return %arg0, %c0_i32, %c0_i32_0 : i32, i32, i32
  }
  func.func @transform_1(%arg0: i32, %arg1: i32) -> (i32, i32, i32) {
    %c0_i32 = arith.constant 0 : i32
    %c0_i32_0 = arith.constant 0 : i32
    %c0_i32_1 = arith.constant 0 : i32
    %c0_i32_2 = arith.constant 0 : i32
    return %c0_i32, %c0_i32_0, %c0_i32_1 : i32, i32, i32
  }
  func.func @transform_2(%arg0: i32, %arg1: i32) -> (i32, i32) {
    %c0_i32 = arith.constant 0 : i32
    %c0_i32_0 = arith.constant 0 : i32
    %c0_i32_1 = arith.constant 0 : i32
    return %c0_i32, %c0_i32_0 : i32, i32
  }
  func.func @transform_3(%arg0: i32, %arg1: i32) -> (i32, i32, i32) {
    %c0_i32 = arith.constant 0 : i32
    %c0_i32_0 = arith.constant 0 : i32
    return %arg0, %arg1, %c0_i32 : i32, i32, i32
  }
}

module attributes {stable_mosaic.version = 11 : i64} {
  func.func @_conv_tap_kernel(%arg0: i32, %arg1: i32, %arg2: memref<1x104x32xf32, #tpu.memory_space<vmem>>, %arg3: memref<9x32x64xbf16, #tpu.memory_space<vmem>>, %arg4: memref<1x64xf32, #tpu.memory_space<vmem>>, %arg5: memref<1x24x64xf32, #tpu.memory_space<vmem>>) attributes {dimension_semantics = [#tpu.dimension_semantics<parallel>, #tpu.dimension_semantics<parallel>], iteration_bounds = array<i64: 2, 1>, scalar_prefetch = 0 : i64, scratch_operands = 0 : i64, tpu.core_type = #tpu.core_type<tc>, window_params = [{transform_indices = @transform_0, window_bounds = array<i64: 1, 104, 32>}, {pipeline_mode = #tpu.pipeline_mode<synchronous>, transform_indices = @transform_1, window_bounds = array<i64: 9, 32, 64>}, {pipeline_mode = #tpu.pipeline_mode<synchronous>, transform_indices = @transform_2, window_bounds = array<i64: 1, 64>}, {transform_indices = @transform_3, window_bounds = array<i64: 1, 24, 64>}]} {
    %cst = arith.constant 0.000000e+00 : f32
    %0 = vector.broadcast %cst : f32 to vector<24x64xf32>
    %c0 = arith.constant 0 : index
    %c0_0 = arith.constant 0 : index
    %c0_1 = arith.constant 0 : index
    %1 = vector.load %arg2[%c0, %c0_0, %c0_1] : memref<1x104x32xf32, #tpu.memory_space<vmem>>, vector<1x24x32xf32>
    %2 = vector.shape_cast %1 : vector<1x24x32xf32> to vector<24x32xf32>
    %3 = arith.truncf %2 : vector<24x32xf32> to vector<24x32xbf16>
    %c0_2 = arith.constant 0 : index
    %c0_3 = arith.constant 0 : index
    %c0_4 = arith.constant 0 : index
    %4 = vector.load %arg3[%c0_2, %c0_3, %c0_4] : memref<9x32x64xbf16, #tpu.memory_space<vmem>>, vector<1x32x64xbf16>
    %5 = vector.shape_cast %4 : vector<1x32x64xbf16> to vector<32x64xbf16>
    %cst_5 = arith.constant dense<0.000000e+00> : vector<24x64xf32>
    %6 = tpu.matmul %3, %5, %cst_5 {dimension_numbers = #tpu.dot_dimension_numbers<[1], [0], [0], [1], [0, 0, 1, 1], [], []>} : vector<24x32xbf16>, vector<32x64xbf16>, vector<24x64xf32> -> vector<24x64xf32>
    %7 = arith.addf %0, %6 : vector<24x64xf32>
    %c0_6 = arith.constant 0 : index
    %c25 = arith.constant 25 : index
    %c0_7 = arith.constant 0 : index
    %8 = vector.load %arg2[%c0_6, %c25, %c0_7] : memref<1x104x32xf32, #tpu.memory_space<vmem>>, vector<1x24x32xf32>
    %9 = vector.shape_cast %8 : vector<1x24x32xf32> to vector<24x32xf32>
    %10 = arith.truncf %9 : vector<24x32xf32> to vector<24x32xbf16>
    %c1 = arith.constant 1 : index
    %c0_8 = arith.constant 0 : index
    %c0_9 = arith.constant 0 : index
    %11 = vector.load %arg3[%c1, %c0_8, %c0_9] : memref<9x32x64xbf16, #tpu.memory_space<vmem>>, vector<1x32x64xbf16>
    %12 = vector.shape_cast %11 : vector<1x32x64xbf16> to vector<32x64xbf16>
    %cst_10 = arith.constant dense<0.000000e+00> : vector<24x64xf32>
    %13 = tpu.matmul %10, %12, %cst_10 {dimension_numbers = #tpu.dot_dimension_numbers<[1], [0], [0], [1], [0, 0, 1, 1], [], []>} : vector<24x32xbf16>, vector<32x64xbf16>, vector<24x64xf32> -> vector<24x64xf32>
    %14 = arith.addf %7, %13 : vector<24x64xf32>
    %c0_11 = arith.constant 0 : index
    %c1_12 = arith.constant 1 : index
    %c0_13 = arith.constant 0 : index
    %15 = vector.load %arg2[%c0_11, %c1_12, %c0_13] : memref<1x104x32xf32, #tpu.memory_space<vmem>>, vector<1x24x32xf32>
    %16 = vector.shape_cast %15 : vector<1x24x32xf32> to vector<24x32xf32>
    %17 = arith.truncf %16 : vector<24x32xf32> to vector<24x32xbf16>
    %c2 = arith.constant 2 : index
    %c0_14 = arith.constant 0 : index
    %c0_15 = arith.constant 0 : index
    %18 = vector.load %arg3[%c2, %c0_14, %c0_15] : memref<9x32x64xbf16, #tpu.memory_space<vmem>>, vector<1x32x64xbf16>
    %19 = vector.shape_cast %18 : vector<1x32x64xbf16> to vector<32x64xbf16>
    %cst_16 = arith.constant dense<0.000000e+00> : vector<24x64xf32>
    %20 = tpu.matmul %17, %19, %cst_16 {dimension_numbers = #tpu.dot_dimension_numbers<[1], [0], [0], [1], [0, 0, 1, 1], [], []>} : vector<24x32xbf16>, vector<32x64xbf16>, vector<24x64xf32> -> vector<24x64xf32>
    %21 = arith.addf %14, %20 : vector<24x64xf32>
    %c0_17 = arith.constant 0 : index
    %c50 = arith.constant 50 : index
    %c0_18 = arith.constant 0 : index
    %22 = vector.load %arg2[%c0_17, %c50, %c0_18] : memref<1x104x32xf32, #tpu.memory_space<vmem>>, vector<1x24x32xf32>
    %23 = vector.shape_cast %22 : vector<1x24x32xf32> to vector<24x32xf32>
    %24 = arith.truncf %23 : vector<24x32xf32> to vector<24x32xbf16>
    %c3 = arith.constant 3 : index
    %c0_19 = arith.constant 0 : index
    %c0_20 = arith.constant 0 : index
    %25 = vector.load %arg3[%c3, %c0_19, %c0_20] : memref<9x32x64xbf16, #tpu.memory_space<vmem>>, vector<1x32x64xbf16>
    %26 = vector.shape_cast %25 : vector<1x32x64xbf16> to vector<32x64xbf16>
    %cst_21 = arith.constant dense<0.000000e+00> : vector<24x64xf32>
    %27 = tpu.matmul %24, %26, %cst_21 {dimension_numbers = #tpu.dot_dimension_numbers<[1], [0], [0], [1], [0, 0, 1, 1], [], []>} : vector<24x32xbf16>, vector<32x64xbf16>, vector<24x64xf32> -> vector<24x64xf32>
    %28 = arith.addf %21, %27 : vector<24x64xf32>
    %c0_22 = arith.constant 0 : index
    %c75 = arith.constant 75 : index
    %c0_23 = arith.constant 0 : index
    %29 = vector.load %arg2[%c0_22, %c75, %c0_23] : memref<1x104x32xf32, #tpu.memory_space<vmem>>, vector<1x24x32xf32>
    %30 = vector.shape_cast %29 : vector<1x24x32xf32> to vector<24x32xf32>
    %31 = arith.truncf %30 : vector<24x32xf32> to vector<24x32xbf16>
    %c4 = arith.constant 4 : index
    %c0_24 = arith.constant 0 : index
    %c0_25 = arith.constant 0 : index
    %32 = vector.load %arg3[%c4, %c0_24, %c0_25] : memref<9x32x64xbf16, #tpu.memory_space<vmem>>, vector<1x32x64xbf16>
    %33 = vector.shape_cast %32 : vector<1x32x64xbf16> to vector<32x64xbf16>
    %cst_26 = arith.constant dense<0.000000e+00> : vector<24x64xf32>
    %34 = tpu.matmul %31, %33, %cst_26 {dimension_numbers = #tpu.dot_dimension_numbers<[1], [0], [0], [1], [0, 0, 1, 1], [], []>} : vector<24x32xbf16>, vector<32x64xbf16>, vector<24x64xf32> -> vector<24x64xf32>
    %35 = arith.addf %28, %34 : vector<24x64xf32>
    %c0_27 = arith.constant 0 : index
    %c51 = arith.constant 51 : index
    %c0_28 = arith.constant 0 : index
    %36 = vector.load %arg2[%c0_27, %c51, %c0_28] : memref<1x104x32xf32, #tpu.memory_space<vmem>>, vector<1x24x32xf32>
    %37 = vector.shape_cast %36 : vector<1x24x32xf32> to vector<24x32xf32>
    %38 = arith.truncf %37 : vector<24x32xf32> to vector<24x32xbf16>
    %c5 = arith.constant 5 : index
    %c0_29 = arith.constant 0 : index
    %c0_30 = arith.constant 0 : index
    %39 = vector.load %arg3[%c5, %c0_29, %c0_30] : memref<9x32x64xbf16, #tpu.memory_space<vmem>>, vector<1x32x64xbf16>
    %40 = vector.shape_cast %39 : vector<1x32x64xbf16> to vector<32x64xbf16>
    %cst_31 = arith.constant dense<0.000000e+00> : vector<24x64xf32>
    %41 = tpu.matmul %38, %40, %cst_31 {dimension_numbers = #tpu.dot_dimension_numbers<[1], [0], [0], [1], [0, 0, 1, 1], [], []>} : vector<24x32xbf16>, vector<32x64xbf16>, vector<24x64xf32> -> vector<24x64xf32>
    %42 = arith.addf %35, %41 : vector<24x64xf32>
    %c0_32 = arith.constant 0 : index
    %c5_33 = arith.constant 5 : index
    %c0_34 = arith.constant 0 : index
    %43 = vector.load %arg2[%c0_32, %c5_33, %c0_34] : memref<1x104x32xf32, #tpu.memory_space<vmem>>, vector<1x24x32xf32>
    %44 = vector.shape_cast %43 : vector<1x24x32xf32> to vector<24x32xf32>
    %45 = arith.truncf %44 : vector<24x32xf32> to vector<24x32xbf16>
    %c6 = arith.constant 6 : index
    %c0_35 = arith.constant 0 : index
    %c0_36 = arith.constant 0 : index
    %46 = vector.load %arg3[%c6, %c0_35, %c0_36] : memref<9x32x64xbf16, #tpu.memory_space<vmem>>, vector<1x32x64xbf16>
    %47 = vector.shape_cast %46 : vector<1x32x64xbf16> to vector<32x64xbf16>
    %cst_37 = arith.constant dense<0.000000e+00> : vector<24x64xf32>
    %48 = tpu.matmul %45, %47, %cst_37 {dimension_numbers = #tpu.dot_dimension_numbers<[1], [0], [0], [1], [0, 0, 1, 1], [], []>} : vector<24x32xbf16>, vector<32x64xbf16>, vector<24x64xf32> -> vector<24x64xf32>
    %49 = arith.addf %42, %48 : vector<24x64xf32>
    %c0_38 = arith.constant 0 : index
    %c30 = arith.constant 30 : index
    %c0_39 = arith.constant 0 : index
    %50 = vector.load %arg2[%c0_38, %c30, %c0_39] : memref<1x104x32xf32, #tpu.memory_space<vmem>>, vector<1x24x32xf32>
    %51 = vector.shape_cast %50 : vector<1x24x32xf32> to vector<24x32xf32>
    %52 = arith.truncf %51 : vector<24x32xf32> to vector<24x32xbf16>
    %c7 = arith.constant 7 : index
    %c0_40 = arith.constant 0 : index
    %c0_41 = arith.constant 0 : index
    %53 = vector.load %arg3[%c7, %c0_40, %c0_41] : memref<9x32x64xbf16, #tpu.memory_space<vmem>>, vector<1x32x64xbf16>
    %54 = vector.shape_cast %53 : vector<1x32x64xbf16> to vector<32x64xbf16>
    %cst_42 = arith.constant dense<0.000000e+00> : vector<24x64xf32>
    %55 = tpu.matmul %52, %54, %cst_42 {dimension_numbers = #tpu.dot_dimension_numbers<[1], [0], [0], [1], [0, 0, 1, 1], [], []>} : vector<24x32xbf16>, vector<32x64xbf16>, vector<24x64xf32> -> vector<24x64xf32>
    %56 = arith.addf %49, %55 : vector<24x64xf32>
    %c0_43 = arith.constant 0 : index
    %c6_44 = arith.constant 6 : index
    %c0_45 = arith.constant 0 : index
    %57 = vector.load %arg2[%c0_43, %c6_44, %c0_45] : memref<1x104x32xf32, #tpu.memory_space<vmem>>, vector<1x24x32xf32>
    %58 = vector.shape_cast %57 : vector<1x24x32xf32> to vector<24x32xf32>
    %59 = arith.truncf %58 : vector<24x32xf32> to vector<24x32xbf16>
    %c8 = arith.constant 8 : index
    %c0_46 = arith.constant 0 : index
    %c0_47 = arith.constant 0 : index
    %60 = vector.load %arg3[%c8, %c0_46, %c0_47] : memref<9x32x64xbf16, #tpu.memory_space<vmem>>, vector<1x32x64xbf16>
    %61 = vector.shape_cast %60 : vector<1x32x64xbf16> to vector<32x64xbf16>
    %cst_48 = arith.constant dense<0.000000e+00> : vector<24x64xf32>
    %62 = tpu.matmul %59, %61, %cst_48 {dimension_numbers = #tpu.dot_dimension_numbers<[1], [0], [0], [1], [0, 0, 1, 1], [], []>} : vector<24x32xbf16>, vector<32x64xbf16>, vector<24x64xf32> -> vector<24x64xf32>
    %63 = arith.addf %56, %62 : vector<24x64xf32>
    %c0_49 = arith.constant 0 : index
    %c0_50 = arith.constant 0 : index
    %64 = vector.load %arg4[%c0_49, %c0_50] : memref<1x64xf32, #tpu.memory_space<vmem>>, vector<1x64xf32>
    %65 = vector.broadcast %64 : vector<1x64xf32> to vector<24x64xf32>
    %66 = arith.addf %63, %65 : vector<24x64xf32>
    %cst_51 = arith.constant 0.000000e+00 : f32
    %67 = vector.broadcast %cst_51 : f32 to vector<24x64xf32>
    %68 = arith.maximumf %66, %67 : vector<24x64xf32>
    %c0_52 = arith.constant 0 : index
    %c0_53 = arith.constant 0 : index
    %c0_54 = arith.constant 0 : index
    %69 = vector.load %arg5[%c0_52, %c0_53, %c0_54] : memref<1x24x64xf32, #tpu.memory_space<vmem>>, vector<1x24x64xf32>
    %70 = vector.shape_cast %69 : vector<1x24x64xf32> to vector<24x64xf32>
    %71 = vector.shape_cast %68 : vector<24x64xf32> to vector<1x24x64xf32>
    tpu.vector_store %arg5[%c0_52, %c0_53, %c0_54], %71 {strides = array<i32>} : memref<1x24x64xf32, #tpu.memory_space<vmem>>, vector<1x24x64xf32>,
    return
  }
  func.func @transform_0(%arg0: i32, %arg1: i32) -> (i32, i32, i32) {
    %c0_i32 = arith.constant 0 : i32
    %c0_i32_0 = arith.constant 0 : i32
    %c0_i32_1 = arith.constant 0 : i32
    return %arg0, %c0_i32, %c0_i32_0 : i32, i32, i32
  }
  func.func @transform_1(%arg0: i32, %arg1: i32) -> (i32, i32, i32) {
    %c0_i32 = arith.constant 0 : i32
    %c0_i32_0 = arith.constant 0 : i32
    %c0_i32_1 = arith.constant 0 : i32
    %c0_i32_2 = arith.constant 0 : i32
    return %c0_i32, %c0_i32_0, %c0_i32_1 : i32, i32, i32
  }
  func.func @transform_2(%arg0: i32, %arg1: i32) -> (i32, i32) {
    %c0_i32 = arith.constant 0 : i32
    %c0_i32_0 = arith.constant 0 : i32
    %c0_i32_1 = arith.constant 0 : i32
    return %c0_i32, %c0_i32_0 : i32, i32
  }
  func.func @transform_3(%arg0: i32, %arg1: i32) -> (i32, i32, i32) {
    %c0_i32 = arith.constant 0 : i32
    %c0_i32_0 = arith.constant 0 : i32
    return %arg0, %arg1, %c0_i32 : i32, i32, i32
  }
}

module attributes {stable_mosaic.version = 11 : i64} {
  func.func @_conv_tap_kernel(%arg0: i32, %arg1: i32, %arg2: memref<1x104x64xf32, #tpu.memory_space<vmem>>, %arg3: memref<1x104x32xf32, #tpu.memory_space<vmem>>, %arg4: memref<9x64x32xbf16, #tpu.memory_space<vmem>>, %arg5: memref<9x32x32xbf16, #tpu.memory_space<vmem>>, %arg6: memref<1x32xf32, #tpu.memory_space<vmem>>, %arg7: memref<1x80x32xf32, #tpu.memory_space<vmem>>) attributes {dimension_semantics = [#tpu.dimension_semantics<parallel>, #tpu.dimension_semantics<parallel>], iteration_bounds = array<i64: 2, 1>, scalar_prefetch = 0 : i64, scratch_operands = 0 : i64, tpu.core_type = #tpu.core_type<tc>, window_params = [{transform_indices = @transform_0, window_bounds = array<i64: 1, 104, 64>}, {transform_indices = @transform_1, window_bounds = array<i64: 1, 104, 32>}, {pipeline_mode = #tpu.pipeline_mode<synchronous>, transform_indices = @transform_2, window_bounds = array<i64: 9, 64, 32>}, {pipeline_mode = #tpu.pipeline_mode<synchronous>, transform_indices = @transform_3, window_bounds = array<i64: 9, 32, 32>}, {pipeline_mode = #tpu.pipeline_mode<synchronous>, transform_indices = @transform_4, window_bounds = array<i64: 1, 32>}, {transform_indices = @transform_5, window_bounds = array<i64: 1, 80, 32>}]} {
    %cst = arith.constant 0.000000e+00 : f32
    %0 = vector.broadcast %cst : f32 to vector<80x32xf32>
    %c0 = arith.constant 0 : index
    %c0_0 = arith.constant 0 : index
    %c0_1 = arith.constant 0 : index
    %1 = vector.load %arg2[%c0, %c0_0, %c0_1] : memref<1x104x64xf32, #tpu.memory_space<vmem>>, vector<1x80x64xf32>
    %2 = vector.shape_cast %1 : vector<1x80x64xf32> to vector<80x64xf32>
    %3 = arith.truncf %2 : vector<80x64xf32> to vector<80x64xbf16>
    %c0_2 = arith.constant 0 : index
    %c0_3 = arith.constant 0 : index
    %c0_4 = arith.constant 0 : index
    %4 = vector.load %arg4[%c0_2, %c0_3, %c0_4] : memref<9x64x32xbf16, #tpu.memory_space<vmem>>, vector<1x64x32xbf16>
    %5 = vector.shape_cast %4 : vector<1x64x32xbf16> to vector<64x32xbf16>
    %cst_5 = arith.constant dense<0.000000e+00> : vector<80x32xf32>
    %6 = tpu.matmul %3, %5, %cst_5 {dimension_numbers = #tpu.dot_dimension_numbers<[1], [0], [0], [1], [0, 0, 1, 1], [], []>} : vector<80x64xbf16>, vector<64x32xbf16>, vector<80x32xf32> -> vector<80x32xf32>
    %7 = arith.addf %0, %6 : vector<80x32xf32>
    %c0_6 = arith.constant 0 : index
    %c1 = arith.constant 1 : index
    %c0_7 = arith.constant 0 : index
    %8 = vector.load %arg2[%c0_6, %c1, %c0_7] : memref<1x104x64xf32, #tpu.memory_space<vmem>>, vector<1x80x64xf32>
    %9 = vector.shape_cast %8 : vector<1x80x64xf32> to vector<80x64xf32>
    %10 = arith.truncf %9 : vector<80x64xf32> to vector<80x64xbf16>
    %c1_8 = arith.constant 1 : index
    %c0_9 = arith.constant 0 : index
    %c0_10 = arith.constant 0 : index
    %11 = vector.load %arg4[%c1_8, %c0_9, %c0_10] : memref<9x64x32xbf16, #tpu.memory_space<vmem>>, vector<1x64x32xbf16>
    %12 = vector.shape_cast %11 : vector<1x64x32xbf16> to vector<64x32xbf16>
    %cst_11 = arith.constant dense<0.000000e+00> : vector<80x32xf32>
    %13 = tpu.matmul %10, %12, %cst_11 {dimension_numbers = #tpu.dot_dimension_numbers<[1], [0], [0], [1], [0, 0, 1, 1], [], []>} : vector<80x64xbf16>, vector<64x32xbf16>, vector<80x32xf32> -> vector<80x32xf32>
    %14 = arith.addf %7, %13 : vector<80x32xf32>
    %c0_12 = arith.constant 0 : index
    %c2 = arith.constant 2 : index
    %c0_13 = arith.constant 0 : index
    %15 = vector.load %arg2[%c0_12, %c2, %c0_13] : memref<1x104x64xf32, #tpu.memory_space<vmem>>, vector<1x80x64xf32>
    %16 = vector.shape_cast %15 : vector<1x80x64xf32> to vector<80x64xf32>
    %17 = arith.truncf %16 : vector<80x64xf32> to vector<80x64xbf16>
    %c2_14 = arith.constant 2 : index
    %c0_15 = arith.constant 0 : index
    %c0_16 = arith.constant 0 : index
    %18 = vector.load %arg4[%c2_14, %c0_15, %c0_16] : memref<9x64x32xbf16, #tpu.memory_space<vmem>>, vector<1x64x32xbf16>
    %19 = vector.shape_cast %18 : vector<1x64x32xbf16> to vector<64x32xbf16>
    %cst_17 = arith.constant dense<0.000000e+00> : vector<80x32xf32>
    %20 = tpu.matmul %17, %19, %cst_17 {dimension_numbers = #tpu.dot_dimension_numbers<[1], [0], [0], [1], [0, 0, 1, 1], [], []>} : vector<80x64xbf16>, vector<64x32xbf16>, vector<80x32xf32> -> vector<80x32xf32>
    %21 = arith.addf %14, %20 : vector<80x32xf32>
    %c0_18 = arith.constant 0 : index
    %c10 = arith.constant 10 : index
    %c0_19 = arith.constant 0 : index
    %22 = vector.load %arg2[%c0_18, %c10, %c0_19] : memref<1x104x64xf32, #tpu.memory_space<vmem>>, vector<1x80x64xf32>
    %23 = vector.shape_cast %22 : vector<1x80x64xf32> to vector<80x64xf32>
    %24 = arith.truncf %23 : vector<80x64xf32> to vector<80x64xbf16>
    %c3 = arith.constant 3 : index
    %c0_20 = arith.constant 0 : index
    %c0_21 = arith.constant 0 : index
    %25 = vector.load %arg4[%c3, %c0_20, %c0_21] : memref<9x64x32xbf16, #tpu.memory_space<vmem>>, vector<1x64x32xbf16>
    %26 = vector.shape_cast %25 : vector<1x64x32xbf16> to vector<64x32xbf16>
    %cst_22 = arith.constant dense<0.000000e+00> : vector<80x32xf32>
    %27 = tpu.matmul %24, %26, %cst_22 {dimension_numbers = #tpu.dot_dimension_numbers<[1], [0], [0], [1], [0, 0, 1, 1], [], []>} : vector<80x64xbf16>, vector<64x32xbf16>, vector<80x32xf32> -> vector<80x32xf32>
    %28 = arith.addf %21, %27 : vector<80x32xf32>
    %c0_23 = arith.constant 0 : index
    %c11 = arith.constant 11 : index
    %c0_24 = arith.constant 0 : index
    %29 = vector.load %arg2[%c0_23, %c11, %c0_24] : memref<1x104x64xf32, #tpu.memory_space<vmem>>, vector<1x80x64xf32>
    %30 = vector.shape_cast %29 : vector<1x80x64xf32> to vector<80x64xf32>
    %31 = arith.truncf %30 : vector<80x64xf32> to vector<80x64xbf16>
    %c4 = arith.constant 4 : index
    %c0_25 = arith.constant 0 : index
    %c0_26 = arith.constant 0 : index
    %32 = vector.load %arg4[%c4, %c0_25, %c0_26] : memref<9x64x32xbf16, #tpu.memory_space<vmem>>, vector<1x64x32xbf16>
    %33 = vector.shape_cast %32 : vector<1x64x32xbf16> to vector<64x32xbf16>
    %cst_27 = arith.constant dense<0.000000e+00> : vector<80x32xf32>
    %34 = tpu.matmul %31, %33, %cst_27 {dimension_numbers = #tpu.dot_dimension_numbers<[1], [0], [0], [1], [0, 0, 1, 1], [], []>} : vector<80x64xbf16>, vector<64x32xbf16>, vector<80x32xf32> -> vector<80x32xf32>
    %35 = arith.addf %28, %34 : vector<80x32xf32>
    %c0_28 = arith.constant 0 : index
    %c12 = arith.constant 12 : index
    %c0_29 = arith.constant 0 : index
    %36 = vector.load %arg2[%c0_28, %c12, %c0_29] : memref<1x104x64xf32, #tpu.memory_space<vmem>>, vector<1x80x64xf32>
    %37 = vector.shape_cast %36 : vector<1x80x64xf32> to vector<80x64xf32>
    %38 = arith.truncf %37 : vector<80x64xf32> to vector<80x64xbf16>
    %c5 = arith.constant 5 : index
    %c0_30 = arith.constant 0 : index
    %c0_31 = arith.constant 0 : index
    %39 = vector.load %arg4[%c5, %c0_30, %c0_31] : memref<9x64x32xbf16, #tpu.memory_space<vmem>>, vector<1x64x32xbf16>
    %40 = vector.shape_cast %39 : vector<1x64x32xbf16> to vector<64x32xbf16>
    %cst_32 = arith.constant dense<0.000000e+00> : vector<80x32xf32>
    %41 = tpu.matmul %38, %40, %cst_32 {dimension_numbers = #tpu.dot_dimension_numbers<[1], [0], [0], [1], [0, 0, 1, 1], [], []>} : vector<80x64xbf16>, vector<64x32xbf16>, vector<80x32xf32> -> vector<80x32xf32>
    %42 = arith.addf %35, %41 : vector<80x32xf32>
    %c0_33 = arith.constant 0 : index
    %c20 = arith.constant 20 : index
    %c0_34 = arith.constant 0 : index
    %43 = vector.load %arg2[%c0_33, %c20, %c0_34] : memref<1x104x64xf32, #tpu.memory_space<vmem>>, vector<1x80x64xf32>
    %44 = vector.shape_cast %43 : vector<1x80x64xf32> to vector<80x64xf32>
    %45 = arith.truncf %44 : vector<80x64xf32> to vector<80x64xbf16>
    %c6 = arith.constant 6 : index
    %c0_35 = arith.constant 0 : index
    %c0_36 = arith.constant 0 : index
    %46 = vector.load %arg4[%c6, %c0_35, %c0_36] : memref<9x64x32xbf16, #tpu.memory_space<vmem>>, vector<1x64x32xbf16>
    %47 = vector.shape_cast %46 : vector<1x64x32xbf16> to vector<64x32xbf16>
    %cst_37 = arith.constant dense<0.000000e+00> : vector<80x32xf32>
    %48 = tpu.matmul %45, %47, %cst_37 {dimension_numbers = #tpu.dot_dimension_numbers<[1], [0], [0], [1], [0, 0, 1, 1], [], []>} : vector<80x64xbf16>, vector<64x32xbf16>, vector<80x32xf32> -> vector<80x32xf32>
    %49 = arith.addf %42, %48 : vector<80x32xf32>
    %c0_38 = arith.constant 0 : index
    %c21 = arith.constant 21 : index
    %c0_39 = arith.constant 0 : index
    %50 = vector.load %arg2[%c0_38, %c21, %c0_39] : memref<1x104x64xf32, #tpu.memory_space<vmem>>, vector<1x80x64xf32>
    %51 = vector.shape_cast %50 : vector<1x80x64xf32> to vector<80x64xf32>
    %52 = arith.truncf %51 : vector<80x64xf32> to vector<80x64xbf16>
    %c7 = arith.constant 7 : index
    %c0_40 = arith.constant 0 : index
    %c0_41 = arith.constant 0 : index
    %53 = vector.load %arg4[%c7, %c0_40, %c0_41] : memref<9x64x32xbf16, #tpu.memory_space<vmem>>, vector<1x64x32xbf16>
    %54 = vector.shape_cast %53 : vector<1x64x32xbf16> to vector<64x32xbf16>
    %cst_42 = arith.constant dense<0.000000e+00> : vector<80x32xf32>
    %55 = tpu.matmul %52, %54, %cst_42 {dimension_numbers = #tpu.dot_dimension_numbers<[1], [0], [0], [1], [0, 0, 1, 1], [], []>} : vector<80x64xbf16>, vector<64x32xbf16>, vector<80x32xf32> -> vector<80x32xf32>
    %56 = arith.addf %49, %55 : vector<80x32xf32>
    %c0_43 = arith.constant 0 : index
    %c22 = arith.constant 22 : index
    %c0_44 = arith.constant 0 : index
    %57 = vector.load %arg2[%c0_43, %c22, %c0_44] : memref<1x104x64xf32, #tpu.memory_space<vmem>>, vector<1x80x64xf32>
    %58 = vector.shape_cast %57 : vector<1x80x64xf32> to vector<80x64xf32>
    %59 = arith.truncf %58 : vector<80x64xf32> to vector<80x64xbf16>
    %c8 = arith.constant 8 : index
    %c0_45 = arith.constant 0 : index
    %c0_46 = arith.constant 0 : index
    %60 = vector.load %arg4[%c8, %c0_45, %c0_46] : memref<9x64x32xbf16, #tpu.memory_space<vmem>>, vector<1x64x32xbf16>
    %61 = vector.shape_cast %60 : vector<1x64x32xbf16> to vector<64x32xbf16>
    %cst_47 = arith.constant dense<0.000000e+00> : vector<80x32xf32>
    %62 = tpu.matmul %59, %61, %cst_47 {dimension_numbers = #tpu.dot_dimension_numbers<[1], [0], [0], [1], [0, 0, 1, 1], [], []>} : vector<80x64xbf16>, vector<64x32xbf16>, vector<80x32xf32> -> vector<80x32xf32>
    %63 = arith.addf %56, %62 : vector<80x32xf32>
    %c0_48 = arith.constant 0 : index
    %c0_49 = arith.constant 0 : index
    %c0_50 = arith.constant 0 : index
    %64 = vector.load %arg3[%c0_48, %c0_49, %c0_50] : memref<1x104x32xf32, #tpu.memory_space<vmem>>, vector<1x80x32xf32>
    %65 = vector.shape_cast %64 : vector<1x80x32xf32> to vector<80x32xf32>
    %66 = arith.truncf %65 : vector<80x32xf32> to vector<80x32xbf16>
    %c0_51 = arith.constant 0 : index
    %c0_52 = arith.constant 0 : index
    %c0_53 = arith.constant 0 : index
    %67 = vector.load %arg5[%c0_51, %c0_52, %c0_53] : memref<9x32x32xbf16, #tpu.memory_space<vmem>>, vector<1x32x32xbf16>
    %68 = vector.shape_cast %67 : vector<1x32x32xbf16> to vector<32x32xbf16>
    %cst_54 = arith.constant dense<0.000000e+00> : vector<80x32xf32>
    %69 = tpu.matmul %66, %68, %cst_54 {dimension_numbers = #tpu.dot_dimension_numbers<[1], [0], [0], [1], [0, 0, 1, 1], [], []>} : vector<80x32xbf16>, vector<32x32xbf16>, vector<80x32xf32> -> vector<80x32xf32>
    %70 = arith.addf %63, %69 : vector<80x32xf32>
    %c0_55 = arith.constant 0 : index
    %c1_56 = arith.constant 1 : index
    %c0_57 = arith.constant 0 : index
    %71 = vector.load %arg3[%c0_55, %c1_56, %c0_57] : memref<1x104x32xf32, #tpu.memory_space<vmem>>, vector<1x80x32xf32>
    %72 = vector.shape_cast %71 : vector<1x80x32xf32> to vector<80x32xf32>
    %73 = arith.truncf %72 : vector<80x32xf32> to vector<80x32xbf16>
    %c1_58 = arith.constant 1 : index
    %c0_59 = arith.constant 0 : index
    %c0_60 = arith.constant 0 : index
    %74 = vector.load %arg5[%c1_58, %c0_59, %c0_60] : memref<9x32x32xbf16, #tpu.memory_space<vmem>>, vector<1x32x32xbf16>
    %75 = vector.shape_cast %74 : vector<1x32x32xbf16> to vector<32x32xbf16>
    %cst_61 = arith.constant dense<0.000000e+00> : vector<80x32xf32>
    %76 = tpu.matmul %73, %75, %cst_61 {dimension_numbers = #tpu.dot_dimension_numbers<[1], [0], [0], [1], [0, 0, 1, 1], [], []>} : vector<80x32xbf16>, vector<32x32xbf16>, vector<80x32xf32> -> vector<80x32xf32>
    %77 = arith.addf %70, %76 : vector<80x32xf32>
    %c0_62 = arith.constant 0 : index
    %c2_63 = arith.constant 2 : index
    %c0_64 = arith.constant 0 : index
    %78 = vector.load %arg3[%c0_62, %c2_63, %c0_64] : memref<1x104x32xf32, #tpu.memory_space<vmem>>, vector<1x80x32xf32>
    %79 = vector.shape_cast %78 : vector<1x80x32xf32> to vector<80x32xf32>
    %80 = arith.truncf %79 : vector<80x32xf32> to vector<80x32xbf16>
    %c2_65 = arith.constant 2 : index
    %c0_66 = arith.constant 0 : index
    %c0_67 = arith.constant 0 : index
    %81 = vector.load %arg5[%c2_65, %c0_66, %c0_67] : memref<9x32x32xbf16, #tpu.memory_space<vmem>>, vector<1x32x32xbf16>
    %82 = vector.shape_cast %81 : vector<1x32x32xbf16> to vector<32x32xbf16>
    %cst_68 = arith.constant dense<0.000000e+00> : vector<80x32xf32>
    %83 = tpu.matmul %80, %82, %cst_68 {dimension_numbers = #tpu.dot_dimension_numbers<[1], [0], [0], [1], [0, 0, 1, 1], [], []>} : vector<80x32xbf16>, vector<32x32xbf16>, vector<80x32xf32> -> vector<80x32xf32>
    %84 = arith.addf %77, %83 : vector<80x32xf32>
    %c0_69 = arith.constant 0 : index
    %c10_70 = arith.constant 10 : index
    %c0_71 = arith.constant 0 : index
    %85 = vector.load %arg3[%c0_69, %c10_70, %c0_71] : memref<1x104x32xf32, #tpu.memory_space<vmem>>, vector<1x80x32xf32>
    %86 = vector.shape_cast %85 : vector<1x80x32xf32> to vector<80x32xf32>
    %87 = arith.truncf %86 : vector<80x32xf32> to vector<80x32xbf16>
    %c3_72 = arith.constant 3 : index
    %c0_73 = arith.constant 0 : index
    %c0_74 = arith.constant 0 : index
    %88 = vector.load %arg5[%c3_72, %c0_73, %c0_74] : memref<9x32x32xbf16, #tpu.memory_space<vmem>>, vector<1x32x32xbf16>
    %89 = vector.shape_cast %88 : vector<1x32x32xbf16> to vector<32x32xbf16>
    %cst_75 = arith.constant dense<0.000000e+00> : vector<80x32xf32>
    %90 = tpu.matmul %87, %89, %cst_75 {dimension_numbers = #tpu.dot_dimension_numbers<[1], [0], [0], [1], [0, 0, 1, 1], [], []>} : vector<80x32xbf16>, vector<32x32xbf16>, vector<80x32xf32> -> vector<80x32xf32>
    %91 = arith.addf %84, %90 : vector<80x32xf32>
    %c0_76 = arith.constant 0 : index
    %c11_77 = arith.constant 11 : index
    %c0_78 = arith.constant 0 : index
    %92 = vector.load %arg3[%c0_76, %c11_77, %c0_78] : memref<1x104x32xf32, #tpu.memory_space<vmem>>, vector<1x80x32xf32>
    %93 = vector.shape_cast %92 : vector<1x80x32xf32> to vector<80x32xf32>
    %94 = arith.truncf %93 : vector<80x32xf32> to vector<80x32xbf16>
    %c4_79 = arith.constant 4 : index
    %c0_80 = arith.constant 0 : index
    %c0_81 = arith.constant 0 : index
    %95 = vector.load %arg5[%c4_79, %c0_80, %c0_81] : memref<9x32x32xbf16, #tpu.memory_space<vmem>>, vector<1x32x32xbf16>
    %96 = vector.shape_cast %95 : vector<1x32x32xbf16> to vector<32x32xbf16>
    %cst_82 = arith.constant dense<0.000000e+00> : vector<80x32xf32>
    %97 = tpu.matmul %94, %96, %cst_82 {dimension_numbers = #tpu.dot_dimension_numbers<[1], [0], [0], [1], [0, 0, 1, 1], [], []>} : vector<80x32xbf16>, vector<32x32xbf16>, vector<80x32xf32> -> vector<80x32xf32>
    %98 = arith.addf %91, %97 : vector<80x32xf32>
    %c0_83 = arith.constant 0 : index
    %c12_84 = arith.constant 12 : index
    %c0_85 = arith.constant 0 : index
    %99 = vector.load %arg3[%c0_83, %c12_84, %c0_85] : memref<1x104x32xf32, #tpu.memory_space<vmem>>, vector<1x80x32xf32>
    %100 = vector.shape_cast %99 : vector<1x80x32xf32> to vector<80x32xf32>
    %101 = arith.truncf %100 : vector<80x32xf32> to vector<80x32xbf16>
    %c5_86 = arith.constant 5 : index
    %c0_87 = arith.constant 0 : index
    %c0_88 = arith.constant 0 : index
    %102 = vector.load %arg5[%c5_86, %c0_87, %c0_88] : memref<9x32x32xbf16, #tpu.memory_space<vmem>>, vector<1x32x32xbf16>
    %103 = vector.shape_cast %102 : vector<1x32x32xbf16> to vector<32x32xbf16>
    %cst_89 = arith.constant dense<0.000000e+00> : vector<80x32xf32>
    %104 = tpu.matmul %101, %103, %cst_89 {dimension_numbers = #tpu.dot_dimension_numbers<[1], [0], [0], [1], [0, 0, 1, 1], [], []>} : vector<80x32xbf16>, vector<32x32xbf16>, vector<80x32xf32> -> vector<80x32xf32>
    %105 = arith.addf %98, %104 : vector<80x32xf32>
    %c0_90 = arith.constant 0 : index
    %c20_91 = arith.constant 20 : index
    %c0_92 = arith.constant 0 : index
    %106 = vector.load %arg3[%c0_90, %c20_91, %c0_92] : memref<1x104x32xf32, #tpu.memory_space<vmem>>, vector<1x80x32xf32>
    %107 = vector.shape_cast %106 : vector<1x80x32xf32> to vector<80x32xf32>
    %108 = arith.truncf %107 : vector<80x32xf32> to vector<80x32xbf16>
    %c6_93 = arith.constant 6 : index
    %c0_94 = arith.constant 0 : index
    %c0_95 = arith.constant 0 : index
    %109 = vector.load %arg5[%c6_93, %c0_94, %c0_95] : memref<9x32x32xbf16, #tpu.memory_space<vmem>>, vector<1x32x32xbf16>
    %110 = vector.shape_cast %109 : vector<1x32x32xbf16> to vector<32x32xbf16>
    %cst_96 = arith.constant dense<0.000000e+00> : vector<80x32xf32>
    %111 = tpu.matmul %108, %110, %cst_96 {dimension_numbers = #tpu.dot_dimension_numbers<[1], [0], [0], [1], [0, 0, 1, 1], [], []>} : vector<80x32xbf16>, vector<32x32xbf16>, vector<80x32xf32> -> vector<80x32xf32>
    %112 = arith.addf %105, %111 : vector<80x32xf32>
    %c0_97 = arith.constant 0 : index
    %c21_98 = arith.constant 21 : index
    %c0_99 = arith.constant 0 : index
    %113 = vector.load %arg3[%c0_97, %c21_98, %c0_99] : memref<1x104x32xf32, #tpu.memory_space<vmem>>, vector<1x80x32xf32>
    %114 = vector.shape_cast %113 : vector<1x80x32xf32> to vector<80x32xf32>
    %115 = arith.truncf %114 : vector<80x32xf32> to vector<80x32xbf16>
    %c7_100 = arith.constant 7 : index
    %c0_101 = arith.constant 0 : index
    %c0_102 = arith.constant 0 : index
    %116 = vector.load %arg5[%c7_100, %c0_101, %c0_102] : memref<9x32x32xbf16, #tpu.memory_space<vmem>>, vector<1x32x32xbf16>
    %117 = vector.shape_cast %116 : vector<1x32x32xbf16> to vector<32x32xbf16>
    %cst_103 = arith.constant dense<0.000000e+00> : vector<80x32xf32>
    %118 = tpu.matmul %115, %117, %cst_103 {dimension_numbers = #tpu.dot_dimension_numbers<[1], [0], [0], [1], [0, 0, 1, 1], [], []>} : vector<80x32xbf16>, vector<32x32xbf16>, vector<80x32xf32> -> vector<80x32xf32>
    %119 = arith.addf %112, %118 : vector<80x32xf32>
    %c0_104 = arith.constant 0 : index
    %c22_105 = arith.constant 22 : index
    %c0_106 = arith.constant 0 : index
    %120 = vector.load %arg3[%c0_104, %c22_105, %c0_106] : memref<1x104x32xf32, #tpu.memory_space<vmem>>, vector<1x80x32xf32>
    %121 = vector.shape_cast %120 : vector<1x80x32xf32> to vector<80x32xf32>
    %122 = arith.truncf %121 : vector<80x32xf32> to vector<80x32xbf16>
    %c8_107 = arith.constant 8 : index
    %c0_108 = arith.constant 0 : index
    %c0_109 = arith.constant 0 : index
    %123 = vector.load %arg5[%c8_107, %c0_108, %c0_109] : memref<9x32x32xbf16, #tpu.memory_space<vmem>>, vector<1x32x32xbf16>
    %124 = vector.shape_cast %123 : vector<1x32x32xbf16> to vector<32x32xbf16>
    %cst_110 = arith.constant dense<0.000000e+00> : vector<80x32xf32>
    %125 = tpu.matmul %122, %124, %cst_110 {dimension_numbers = #tpu.dot_dimension_numbers<[1], [0], [0], [1], [0, 0, 1, 1], [], []>} : vector<80x32xbf16>, vector<32x32xbf16>, vector<80x32xf32> -> vector<80x32xf32>
    %126 = arith.addf %119, %125 : vector<80x32xf32>
    %c0_111 = arith.constant 0 : index
    %c0_112 = arith.constant 0 : index
    %127 = vector.load %arg6[%c0_111, %c0_112] : memref<1x32xf32, #tpu.memory_space<vmem>>, vector<1x32xf32>
    %128 = vector.broadcast %127 : vector<1x32xf32> to vector<80x32xf32>
    %129 = arith.addf %126, %128 : vector<80x32xf32>
    %cst_113 = arith.constant 0.000000e+00 : f32
    %130 = vector.broadcast %cst_113 : f32 to vector<80x32xf32>
    %131 = arith.maximumf %129, %130 : vector<80x32xf32>
    %c0_114 = arith.constant 0 : index
    %c0_115 = arith.constant 0 : index
    %c0_116 = arith.constant 0 : index
    %132 = vector.load %arg7[%c0_114, %c0_115, %c0_116] : memref<1x80x32xf32, #tpu.memory_space<vmem>>, vector<1x80x32xf32>
    %133 = vector.shape_cast %132 : vector<1x80x32xf32> to vector<80x32xf32>
    %134 = vector.shape_cast %131 : vector<80x32xf32> to vector<1x80x32xf32>
    tpu.vector_store %arg7[%c0_114, %c0_115, %c0_116], %134 {strides = array<i32>} : memref<1x80x32xf32, #tpu.memory_space<vmem>>, vector<1x80x32xf32>,
    return
  }
  func.func @transform_0(%arg0: i32, %arg1: i32) -> (i32, i32, i32) {
    %c0_i32 = arith.constant 0 : i32
    %c0_i32_0 = arith.constant 0 : i32
    %c0_i32_1 = arith.constant 0 : i32
    return %arg0, %c0_i32, %c0_i32_0 : i32, i32, i32
  }
  func.func @transform_1(%arg0: i32, %arg1: i32) -> (i32, i32, i32) {
    %c0_i32 = arith.constant 0 : i32
    %c0_i32_0 = arith.constant 0 : i32
    %c0_i32_1 = arith.constant 0 : i32
    return %arg0, %c0_i32, %c0_i32_0 : i32, i32, i32
  }
  func.func @transform_2(%arg0: i32, %arg1: i32) -> (i32, i32, i32) {
    %c0_i32 = arith.constant 0 : i32
    %c0_i32_0 = arith.constant 0 : i32
    %c0_i32_1 = arith.constant 0 : i32
    %c0_i32_2 = arith.constant 0 : i32
    return %c0_i32, %c0_i32_0, %c0_i32_1 : i32, i32, i32
  }
  func.func @transform_3(%arg0: i32, %arg1: i32) -> (i32, i32, i32) {
    %c0_i32 = arith.constant 0 : i32
    %c0_i32_0 = arith.constant 0 : i32
    %c0_i32_1 = arith.constant 0 : i32
    %c0_i32_2 = arith.constant 0 : i32
    return %c0_i32, %c0_i32_0, %c0_i32_1 : i32, i32, i32
  }
  func.func @transform_4(%arg0: i32, %arg1: i32) -> (i32, i32) {
    %c0_i32 = arith.constant 0 : i32
    %c0_i32_0 = arith.constant 0 : i32
    %c0_i32_1 = arith.constant 0 : i32
    return %c0_i32, %c0_i32_0 : i32, i32
  }
  func.func @transform_5(%arg0: i32, %arg1: i32) -> (i32, i32, i32) {
    %c0_i32 = arith.constant 0 : i32
    %c0_i32_0 = arith.constant 0 : i32
    return %arg0, %arg1, %c0_i32 : i32, i32, i32
  }
}

module attributes {stable_mosaic.version = 11 : i64} {
  func.func @_conv_tap_kernel(%arg0: i32, %arg1: i32, %arg2: memref<1x328x32xf32, #tpu.memory_space<vmem>>, %arg3: memref<1x328x16xf32, #tpu.memory_space<vmem>>, %arg4: memref<9x32x16xbf16, #tpu.memory_space<vmem>>, %arg5: memref<9x16x16xbf16, #tpu.memory_space<vmem>>, %arg6: memref<1x16xf32, #tpu.memory_space<vmem>>, %arg7: memref<1x288x16xf32, #tpu.memory_space<vmem>>) attributes {dimension_semantics = [#tpu.dimension_semantics<parallel>, #tpu.dimension_semantics<parallel>], iteration_bounds = array<i64: 2, 1>, scalar_prefetch = 0 : i64, scratch_operands = 0 : i64, tpu.core_type = #tpu.core_type<tc>, window_params = [{transform_indices = @transform_0, window_bounds = array<i64: 1, 328, 32>}, {transform_indices = @transform_1, window_bounds = array<i64: 1, 328, 16>}, {pipeline_mode = #tpu.pipeline_mode<synchronous>, transform_indices = @transform_2, window_bounds = array<i64: 9, 32, 16>}, {pipeline_mode = #tpu.pipeline_mode<synchronous>, transform_indices = @transform_3, window_bounds = array<i64: 9, 16, 16>}, {pipeline_mode = #tpu.pipeline_mode<synchronous>, transform_indices = @transform_4, window_bounds = array<i64: 1, 16>}, {transform_indices = @transform_5, window_bounds = array<i64: 1, 288, 16>}]} {
    %cst = arith.constant 0.000000e+00 : f32
    %0 = vector.broadcast %cst : f32 to vector<288x16xf32>
    %c0 = arith.constant 0 : index
    %c0_0 = arith.constant 0 : index
    %c0_1 = arith.constant 0 : index
    %1 = vector.load %arg2[%c0, %c0_0, %c0_1] : memref<1x328x32xf32, #tpu.memory_space<vmem>>, vector<1x288x32xf32>
    %2 = vector.shape_cast %1 : vector<1x288x32xf32> to vector<288x32xf32>
    %3 = arith.truncf %2 : vector<288x32xf32> to vector<288x32xbf16>
    %c0_2 = arith.constant 0 : index
    %c0_3 = arith.constant 0 : index
    %c0_4 = arith.constant 0 : index
    %4 = vector.load %arg4[%c0_2, %c0_3, %c0_4] : memref<9x32x16xbf16, #tpu.memory_space<vmem>>, vector<1x32x16xbf16>
    %5 = vector.shape_cast %4 : vector<1x32x16xbf16> to vector<32x16xbf16>
    %cst_5 = arith.constant dense<0.000000e+00> : vector<288x16xf32>
    %6 = tpu.matmul %3, %5, %cst_5 {dimension_numbers = #tpu.dot_dimension_numbers<[1], [0], [0], [1], [0, 0, 1, 1], [], []>} : vector<288x32xbf16>, vector<32x16xbf16>, vector<288x16xf32> -> vector<288x16xf32>
    %7 = arith.addf %0, %6 : vector<288x16xf32>
    %c0_6 = arith.constant 0 : index
    %c1 = arith.constant 1 : index
    %c0_7 = arith.constant 0 : index
    %8 = vector.load %arg2[%c0_6, %c1, %c0_7] : memref<1x328x32xf32, #tpu.memory_space<vmem>>, vector<1x288x32xf32>
    %9 = vector.shape_cast %8 : vector<1x288x32xf32> to vector<288x32xf32>
    %10 = arith.truncf %9 : vector<288x32xf32> to vector<288x32xbf16>
    %c1_8 = arith.constant 1 : index
    %c0_9 = arith.constant 0 : index
    %c0_10 = arith.constant 0 : index
    %11 = vector.load %arg4[%c1_8, %c0_9, %c0_10] : memref<9x32x16xbf16, #tpu.memory_space<vmem>>, vector<1x32x16xbf16>
    %12 = vector.shape_cast %11 : vector<1x32x16xbf16> to vector<32x16xbf16>
    %cst_11 = arith.constant dense<0.000000e+00> : vector<288x16xf32>
    %13 = tpu.matmul %10, %12, %cst_11 {dimension_numbers = #tpu.dot_dimension_numbers<[1], [0], [0], [1], [0, 0, 1, 1], [], []>} : vector<288x32xbf16>, vector<32x16xbf16>, vector<288x16xf32> -> vector<288x16xf32>
    %14 = arith.addf %7, %13 : vector<288x16xf32>
    %c0_12 = arith.constant 0 : index
    %c2 = arith.constant 2 : index
    %c0_13 = arith.constant 0 : index
    %15 = vector.load %arg2[%c0_12, %c2, %c0_13] : memref<1x328x32xf32, #tpu.memory_space<vmem>>, vector<1x288x32xf32>
    %16 = vector.shape_cast %15 : vector<1x288x32xf32> to vector<288x32xf32>
    %17 = arith.truncf %16 : vector<288x32xf32> to vector<288x32xbf16>
    %c2_14 = arith.constant 2 : index
    %c0_15 = arith.constant 0 : index
    %c0_16 = arith.constant 0 : index
    %18 = vector.load %arg4[%c2_14, %c0_15, %c0_16] : memref<9x32x16xbf16, #tpu.memory_space<vmem>>, vector<1x32x16xbf16>
    %19 = vector.shape_cast %18 : vector<1x32x16xbf16> to vector<32x16xbf16>
    %cst_17 = arith.constant dense<0.000000e+00> : vector<288x16xf32>
    %20 = tpu.matmul %17, %19, %cst_17 {dimension_numbers = #tpu.dot_dimension_numbers<[1], [0], [0], [1], [0, 0, 1, 1], [], []>} : vector<288x32xbf16>, vector<32x16xbf16>, vector<288x16xf32> -> vector<288x16xf32>
    %21 = arith.addf %14, %20 : vector<288x16xf32>
    %c0_18 = arith.constant 0 : index
    %c18 = arith.constant 18 : index
    %c0_19 = arith.constant 0 : index
    %22 = vector.load %arg2[%c0_18, %c18, %c0_19] : memref<1x328x32xf32, #tpu.memory_space<vmem>>, vector<1x288x32xf32>
    %23 = vector.shape_cast %22 : vector<1x288x32xf32> to vector<288x32xf32>
    %24 = arith.truncf %23 : vector<288x32xf32> to vector<288x32xbf16>
    %c3 = arith.constant 3 : index
    %c0_20 = arith.constant 0 : index
    %c0_21 = arith.constant 0 : index
    %25 = vector.load %arg4[%c3, %c0_20, %c0_21] : memref<9x32x16xbf16, #tpu.memory_space<vmem>>, vector<1x32x16xbf16>
    %26 = vector.shape_cast %25 : vector<1x32x16xbf16> to vector<32x16xbf16>
    %cst_22 = arith.constant dense<0.000000e+00> : vector<288x16xf32>
    %27 = tpu.matmul %24, %26, %cst_22 {dimension_numbers = #tpu.dot_dimension_numbers<[1], [0], [0], [1], [0, 0, 1, 1], [], []>} : vector<288x32xbf16>, vector<32x16xbf16>, vector<288x16xf32> -> vector<288x16xf32>
    %28 = arith.addf %21, %27 : vector<288x16xf32>
    %c0_23 = arith.constant 0 : index
    %c19 = arith.constant 19 : index
    %c0_24 = arith.constant 0 : index
    %29 = vector.load %arg2[%c0_23, %c19, %c0_24] : memref<1x328x32xf32, #tpu.memory_space<vmem>>, vector<1x288x32xf32>
    %30 = vector.shape_cast %29 : vector<1x288x32xf32> to vector<288x32xf32>
    %31 = arith.truncf %30 : vector<288x32xf32> to vector<288x32xbf16>
    %c4 = arith.constant 4 : index
    %c0_25 = arith.constant 0 : index
    %c0_26 = arith.constant 0 : index
    %32 = vector.load %arg4[%c4, %c0_25, %c0_26] : memref<9x32x16xbf16, #tpu.memory_space<vmem>>, vector<1x32x16xbf16>
    %33 = vector.shape_cast %32 : vector<1x32x16xbf16> to vector<32x16xbf16>
    %cst_27 = arith.constant dense<0.000000e+00> : vector<288x16xf32>
    %34 = tpu.matmul %31, %33, %cst_27 {dimension_numbers = #tpu.dot_dimension_numbers<[1], [0], [0], [1], [0, 0, 1, 1], [], []>} : vector<288x32xbf16>, vector<32x16xbf16>, vector<288x16xf32> -> vector<288x16xf32>
    %35 = arith.addf %28, %34 : vector<288x16xf32>
    %c0_28 = arith.constant 0 : index
    %c20 = arith.constant 20 : index
    %c0_29 = arith.constant 0 : index
    %36 = vector.load %arg2[%c0_28, %c20, %c0_29] : memref<1x328x32xf32, #tpu.memory_space<vmem>>, vector<1x288x32xf32>
    %37 = vector.shape_cast %36 : vector<1x288x32xf32> to vector<288x32xf32>
    %38 = arith.truncf %37 : vector<288x32xf32> to vector<288x32xbf16>
    %c5 = arith.constant 5 : index
    %c0_30 = arith.constant 0 : index
    %c0_31 = arith.constant 0 : index
    %39 = vector.load %arg4[%c5, %c0_30, %c0_31] : memref<9x32x16xbf16, #tpu.memory_space<vmem>>, vector<1x32x16xbf16>
    %40 = vector.shape_cast %39 : vector<1x32x16xbf16> to vector<32x16xbf16>
    %cst_32 = arith.constant dense<0.000000e+00> : vector<288x16xf32>
    %41 = tpu.matmul %38, %40, %cst_32 {dimension_numbers = #tpu.dot_dimension_numbers<[1], [0], [0], [1], [0, 0, 1, 1], [], []>} : vector<288x32xbf16>, vector<32x16xbf16>, vector<288x16xf32> -> vector<288x16xf32>
    %42 = arith.addf %35, %41 : vector<288x16xf32>
    %c0_33 = arith.constant 0 : index
    %c36 = arith.constant 36 : index
    %c0_34 = arith.constant 0 : index
    %43 = vector.load %arg2[%c0_33, %c36, %c0_34] : memref<1x328x32xf32, #tpu.memory_space<vmem>>, vector<1x288x32xf32>
    %44 = vector.shape_cast %43 : vector<1x288x32xf32> to vector<288x32xf32>
    %45 = arith.truncf %44 : vector<288x32xf32> to vector<288x32xbf16>
    %c6 = arith.constant 6 : index
    %c0_35 = arith.constant 0 : index
    %c0_36 = arith.constant 0 : index
    %46 = vector.load %arg4[%c6, %c0_35, %c0_36] : memref<9x32x16xbf16, #tpu.memory_space<vmem>>, vector<1x32x16xbf16>
    %47 = vector.shape_cast %46 : vector<1x32x16xbf16> to vector<32x16xbf16>
    %cst_37 = arith.constant dense<0.000000e+00> : vector<288x16xf32>
    %48 = tpu.matmul %45, %47, %cst_37 {dimension_numbers = #tpu.dot_dimension_numbers<[1], [0], [0], [1], [0, 0, 1, 1], [], []>} : vector<288x32xbf16>, vector<32x16xbf16>, vector<288x16xf32> -> vector<288x16xf32>
    %49 = arith.addf %42, %48 : vector<288x16xf32>
    %c0_38 = arith.constant 0 : index
    %c37 = arith.constant 37 : index
    %c0_39 = arith.constant 0 : index
    %50 = vector.load %arg2[%c0_38, %c37, %c0_39] : memref<1x328x32xf32, #tpu.memory_space<vmem>>, vector<1x288x32xf32>
    %51 = vector.shape_cast %50 : vector<1x288x32xf32> to vector<288x32xf32>
    %52 = arith.truncf %51 : vector<288x32xf32> to vector<288x32xbf16>
    %c7 = arith.constant 7 : index
    %c0_40 = arith.constant 0 : index
    %c0_41 = arith.constant 0 : index
    %53 = vector.load %arg4[%c7, %c0_40, %c0_41] : memref<9x32x16xbf16, #tpu.memory_space<vmem>>, vector<1x32x16xbf16>
    %54 = vector.shape_cast %53 : vector<1x32x16xbf16> to vector<32x16xbf16>
    %cst_42 = arith.constant dense<0.000000e+00> : vector<288x16xf32>
    %55 = tpu.matmul %52, %54, %cst_42 {dimension_numbers = #tpu.dot_dimension_numbers<[1], [0], [0], [1], [0, 0, 1, 1], [], []>} : vector<288x32xbf16>, vector<32x16xbf16>, vector<288x16xf32> -> vector<288x16xf32>
    %56 = arith.addf %49, %55 : vector<288x16xf32>
    %c0_43 = arith.constant 0 : index
    %c38 = arith.constant 38 : index
    %c0_44 = arith.constant 0 : index
    %57 = vector.load %arg2[%c0_43, %c38, %c0_44] : memref<1x328x32xf32, #tpu.memory_space<vmem>>, vector<1x288x32xf32>
    %58 = vector.shape_cast %57 : vector<1x288x32xf32> to vector<288x32xf32>
    %59 = arith.truncf %58 : vector<288x32xf32> to vector<288x32xbf16>
    %c8 = arith.constant 8 : index
    %c0_45 = arith.constant 0 : index
    %c0_46 = arith.constant 0 : index
    %60 = vector.load %arg4[%c8, %c0_45, %c0_46] : memref<9x32x16xbf16, #tpu.memory_space<vmem>>, vector<1x32x16xbf16>
    %61 = vector.shape_cast %60 : vector<1x32x16xbf16> to vector<32x16xbf16>
    %cst_47 = arith.constant dense<0.000000e+00> : vector<288x16xf32>
    %62 = tpu.matmul %59, %61, %cst_47 {dimension_numbers = #tpu.dot_dimension_numbers<[1], [0], [0], [1], [0, 0, 1, 1], [], []>} : vector<288x32xbf16>, vector<32x16xbf16>, vector<288x16xf32> -> vector<288x16xf32>
    %63 = arith.addf %56, %62 : vector<288x16xf32>
    %c0_48 = arith.constant 0 : index
    %c0_49 = arith.constant 0 : index
    %c0_50 = arith.constant 0 : index
    %64 = vector.load %arg3[%c0_48, %c0_49, %c0_50] : memref<1x328x16xf32, #tpu.memory_space<vmem>>, vector<1x288x16xf32>
    %65 = vector.shape_cast %64 : vector<1x288x16xf32> to vector<288x16xf32>
    %66 = arith.truncf %65 : vector<288x16xf32> to vector<288x16xbf16>
    %c0_51 = arith.constant 0 : index
    %c0_52 = arith.constant 0 : index
    %c0_53 = arith.constant 0 : index
    %67 = vector.load %arg5[%c0_51, %c0_52, %c0_53] : memref<9x16x16xbf16, #tpu.memory_space<vmem>>, vector<1x16x16xbf16>
    %68 = vector.shape_cast %67 : vector<1x16x16xbf16> to vector<16x16xbf16>
    %cst_54 = arith.constant dense<0.000000e+00> : vector<288x16xf32>
    %69 = tpu.matmul %66, %68, %cst_54 {dimension_numbers = #tpu.dot_dimension_numbers<[1], [0], [0], [1], [0, 0, 1, 1], [], []>} : vector<288x16xbf16>, vector<16x16xbf16>, vector<288x16xf32> -> vector<288x16xf32>
    %70 = arith.addf %63, %69 : vector<288x16xf32>
    %c0_55 = arith.constant 0 : index
    %c1_56 = arith.constant 1 : index
    %c0_57 = arith.constant 0 : index
    %71 = vector.load %arg3[%c0_55, %c1_56, %c0_57] : memref<1x328x16xf32, #tpu.memory_space<vmem>>, vector<1x288x16xf32>
    %72 = vector.shape_cast %71 : vector<1x288x16xf32> to vector<288x16xf32>
    %73 = arith.truncf %72 : vector<288x16xf32> to vector<288x16xbf16>
    %c1_58 = arith.constant 1 : index
    %c0_59 = arith.constant 0 : index
    %c0_60 = arith.constant 0 : index
    %74 = vector.load %arg5[%c1_58, %c0_59, %c0_60] : memref<9x16x16xbf16, #tpu.memory_space<vmem>>, vector<1x16x16xbf16>
    %75 = vector.shape_cast %74 : vector<1x16x16xbf16> to vector<16x16xbf16>
    %cst_61 = arith.constant dense<0.000000e+00> : vector<288x16xf32>
    %76 = tpu.matmul %73, %75, %cst_61 {dimension_numbers = #tpu.dot_dimension_numbers<[1], [0], [0], [1], [0, 0, 1, 1], [], []>} : vector<288x16xbf16>, vector<16x16xbf16>, vector<288x16xf32> -> vector<288x16xf32>
    %77 = arith.addf %70, %76 : vector<288x16xf32>
    %c0_62 = arith.constant 0 : index
    %c2_63 = arith.constant 2 : index
    %c0_64 = arith.constant 0 : index
    %78 = vector.load %arg3[%c0_62, %c2_63, %c0_64] : memref<1x328x16xf32, #tpu.memory_space<vmem>>, vector<1x288x16xf32>
    %79 = vector.shape_cast %78 : vector<1x288x16xf32> to vector<288x16xf32>
    %80 = arith.truncf %79 : vector<288x16xf32> to vector<288x16xbf16>
    %c2_65 = arith.constant 2 : index
    %c0_66 = arith.constant 0 : index
    %c0_67 = arith.constant 0 : index
    %81 = vector.load %arg5[%c2_65, %c0_66, %c0_67] : memref<9x16x16xbf16, #tpu.memory_space<vmem>>, vector<1x16x16xbf16>
    %82 = vector.shape_cast %81 : vector<1x16x16xbf16> to vector<16x16xbf16>
    %cst_68 = arith.constant dense<0.000000e+00> : vector<288x16xf32>
    %83 = tpu.matmul %80, %82, %cst_68 {dimension_numbers = #tpu.dot_dimension_numbers<[1], [0], [0], [1], [0, 0, 1, 1], [], []>} : vector<288x16xbf16>, vector<16x16xbf16>, vector<288x16xf32> -> vector<288x16xf32>
    %84 = arith.addf %77, %83 : vector<288x16xf32>
    %c0_69 = arith.constant 0 : index
    %c18_70 = arith.constant 18 : index
    %c0_71 = arith.constant 0 : index
    %85 = vector.load %arg3[%c0_69, %c18_70, %c0_71] : memref<1x328x16xf32, #tpu.memory_space<vmem>>, vector<1x288x16xf32>
    %86 = vector.shape_cast %85 : vector<1x288x16xf32> to vector<288x16xf32>
    %87 = arith.truncf %86 : vector<288x16xf32> to vector<288x16xbf16>
    %c3_72 = arith.constant 3 : index
    %c0_73 = arith.constant 0 : index
    %c0_74 = arith.constant 0 : index
    %88 = vector.load %arg5[%c3_72, %c0_73, %c0_74] : memref<9x16x16xbf16, #tpu.memory_space<vmem>>, vector<1x16x16xbf16>
    %89 = vector.shape_cast %88 : vector<1x16x16xbf16> to vector<16x16xbf16>
    %cst_75 = arith.constant dense<0.000000e+00> : vector<288x16xf32>
    %90 = tpu.matmul %87, %89, %cst_75 {dimension_numbers = #tpu.dot_dimension_numbers<[1], [0], [0], [1], [0, 0, 1, 1], [], []>} : vector<288x16xbf16>, vector<16x16xbf16>, vector<288x16xf32> -> vector<288x16xf32>
    %91 = arith.addf %84, %90 : vector<288x16xf32>
    %c0_76 = arith.constant 0 : index
    %c19_77 = arith.constant 19 : index
    %c0_78 = arith.constant 0 : index
    %92 = vector.load %arg3[%c0_76, %c19_77, %c0_78] : memref<1x328x16xf32, #tpu.memory_space<vmem>>, vector<1x288x16xf32>
    %93 = vector.shape_cast %92 : vector<1x288x16xf32> to vector<288x16xf32>
    %94 = arith.truncf %93 : vector<288x16xf32> to vector<288x16xbf16>
    %c4_79 = arith.constant 4 : index
    %c0_80 = arith.constant 0 : index
    %c0_81 = arith.constant 0 : index
    %95 = vector.load %arg5[%c4_79, %c0_80, %c0_81] : memref<9x16x16xbf16, #tpu.memory_space<vmem>>, vector<1x16x16xbf16>
    %96 = vector.shape_cast %95 : vector<1x16x16xbf16> to vector<16x16xbf16>
    %cst_82 = arith.constant dense<0.000000e+00> : vector<288x16xf32>
    %97 = tpu.matmul %94, %96, %cst_82 {dimension_numbers = #tpu.dot_dimension_numbers<[1], [0], [0], [1], [0, 0, 1, 1], [], []>} : vector<288x16xbf16>, vector<16x16xbf16>, vector<288x16xf32> -> vector<288x16xf32>
    %98 = arith.addf %91, %97 : vector<288x16xf32>
    %c0_83 = arith.constant 0 : index
    %c20_84 = arith.constant 20 : index
    %c0_85 = arith.constant 0 : index
    %99 = vector.load %arg3[%c0_83, %c20_84, %c0_85] : memref<1x328x16xf32, #tpu.memory_space<vmem>>, vector<1x288x16xf32>
    %100 = vector.shape_cast %99 : vector<1x288x16xf32> to vector<288x16xf32>
    %101 = arith.truncf %100 : vector<288x16xf32> to vector<288x16xbf16>
    %c5_86 = arith.constant 5 : index
    %c0_87 = arith.constant 0 : index
    %c0_88 = arith.constant 0 : index
    %102 = vector.load %arg5[%c5_86, %c0_87, %c0_88] : memref<9x16x16xbf16, #tpu.memory_space<vmem>>, vector<1x16x16xbf16>
    %103 = vector.shape_cast %102 : vector<1x16x16xbf16> to vector<16x16xbf16>
    %cst_89 = arith.constant dense<0.000000e+00> : vector<288x16xf32>
    %104 = tpu.matmul %101, %103, %cst_89 {dimension_numbers = #tpu.dot_dimension_numbers<[1], [0], [0], [1], [0, 0, 1, 1], [], []>} : vector<288x16xbf16>, vector<16x16xbf16>, vector<288x16xf32> -> vector<288x16xf32>
    %105 = arith.addf %98, %104 : vector<288x16xf32>
    %c0_90 = arith.constant 0 : index
    %c36_91 = arith.constant 36 : index
    %c0_92 = arith.constant 0 : index
    %106 = vector.load %arg3[%c0_90, %c36_91, %c0_92] : memref<1x328x16xf32, #tpu.memory_space<vmem>>, vector<1x288x16xf32>
    %107 = vector.shape_cast %106 : vector<1x288x16xf32> to vector<288x16xf32>
    %108 = arith.truncf %107 : vector<288x16xf32> to vector<288x16xbf16>
    %c6_93 = arith.constant 6 : index
    %c0_94 = arith.constant 0 : index
    %c0_95 = arith.constant 0 : index
    %109 = vector.load %arg5[%c6_93, %c0_94, %c0_95] : memref<9x16x16xbf16, #tpu.memory_space<vmem>>, vector<1x16x16xbf16>
    %110 = vector.shape_cast %109 : vector<1x16x16xbf16> to vector<16x16xbf16>
    %cst_96 = arith.constant dense<0.000000e+00> : vector<288x16xf32>
    %111 = tpu.matmul %108, %110, %cst_96 {dimension_numbers = #tpu.dot_dimension_numbers<[1], [0], [0], [1], [0, 0, 1, 1], [], []>} : vector<288x16xbf16>, vector<16x16xbf16>, vector<288x16xf32> -> vector<288x16xf32>
    %112 = arith.addf %105, %111 : vector<288x16xf32>
    %c0_97 = arith.constant 0 : index
    %c37_98 = arith.constant 37 : index
    %c0_99 = arith.constant 0 : index
    %113 = vector.load %arg3[%c0_97, %c37_98, %c0_99] : memref<1x328x16xf32, #tpu.memory_space<vmem>>, vector<1x288x16xf32>
    %114 = vector.shape_cast %113 : vector<1x288x16xf32> to vector<288x16xf32>
    %115 = arith.truncf %114 : vector<288x16xf32> to vector<288x16xbf16>
    %c7_100 = arith.constant 7 : index
    %c0_101 = arith.constant 0 : index
    %c0_102 = arith.constant 0 : index
    %116 = vector.load %arg5[%c7_100, %c0_101, %c0_102] : memref<9x16x16xbf16, #tpu.memory_space<vmem>>, vector<1x16x16xbf16>
    %117 = vector.shape_cast %116 : vector<1x16x16xbf16> to vector<16x16xbf16>
    %cst_103 = arith.constant dense<0.000000e+00> : vector<288x16xf32>
    %118 = tpu.matmul %115, %117, %cst_103 {dimension_numbers = #tpu.dot_dimension_numbers<[1], [0], [0], [1], [0, 0, 1, 1], [], []>} : vector<288x16xbf16>, vector<16x16xbf16>, vector<288x16xf32> -> vector<288x16xf32>
    %119 = arith.addf %112, %118 : vector<288x16xf32>
    %c0_104 = arith.constant 0 : index
    %c38_105 = arith.constant 38 : index
    %c0_106 = arith.constant 0 : index
    %120 = vector.load %arg3[%c0_104, %c38_105, %c0_106] : memref<1x328x16xf32, #tpu.memory_space<vmem>>, vector<1x288x16xf32>
    %121 = vector.shape_cast %120 : vector<1x288x16xf32> to vector<288x16xf32>
    %122 = arith.truncf %121 : vector<288x16xf32> to vector<288x16xbf16>
    %c8_107 = arith.constant 8 : index
    %c0_108 = arith.constant 0 : index
    %c0_109 = arith.constant 0 : index
    %123 = vector.load %arg5[%c8_107, %c0_108, %c0_109] : memref<9x16x16xbf16, #tpu.memory_space<vmem>>, vector<1x16x16xbf16>
    %124 = vector.shape_cast %123 : vector<1x16x16xbf16> to vector<16x16xbf16>
    %cst_110 = arith.constant dense<0.000000e+00> : vector<288x16xf32>
    %125 = tpu.matmul %122, %124, %cst_110 {dimension_numbers = #tpu.dot_dimension_numbers<[1], [0], [0], [1], [0, 0, 1, 1], [], []>} : vector<288x16xbf16>, vector<16x16xbf16>, vector<288x16xf32> -> vector<288x16xf32>
    %126 = arith.addf %119, %125 : vector<288x16xf32>
    %c0_111 = arith.constant 0 : index
    %c0_112 = arith.constant 0 : index
    %127 = vector.load %arg6[%c0_111, %c0_112] : memref<1x16xf32, #tpu.memory_space<vmem>>, vector<1x16xf32>
    %128 = vector.broadcast %127 : vector<1x16xf32> to vector<288x16xf32>
    %129 = arith.addf %126, %128 : vector<288x16xf32>
    %cst_113 = arith.constant 0.000000e+00 : f32
    %130 = vector.broadcast %cst_113 : f32 to vector<288x16xf32>
    %131 = arith.maximumf %129, %130 : vector<288x16xf32>
    %c0_114 = arith.constant 0 : index
    %c0_115 = arith.constant 0 : index
    %c0_116 = arith.constant 0 : index
    %132 = vector.load %arg7[%c0_114, %c0_115, %c0_116] : memref<1x288x16xf32, #tpu.memory_space<vmem>>, vector<1x288x16xf32>
    %133 = vector.shape_cast %132 : vector<1x288x16xf32> to vector<288x16xf32>
    %134 = vector.shape_cast %131 : vector<288x16xf32> to vector<1x288x16xf32>
    tpu.vector_store %arg7[%c0_114, %c0_115, %c0_116], %134 {strides = array<i32>} : memref<1x288x16xf32, #tpu.memory_space<vmem>>, vector<1x288x16xf32>,
    return
  }
  func.func @transform_0(%arg0: i32, %arg1: i32) -> (i32, i32, i32) {
    %c0_i32 = arith.constant 0 : i32
    %c0_i32_0 = arith.constant 0 : i32
    %c0_i32_1 = arith.constant 0 : i32
    return %arg0, %c0_i32, %c0_i32_0 : i32, i32, i32
  }
  func.func @transform_1(%arg0: i32, %arg1: i32) -> (i32, i32, i32) {
    %c0_i32 = arith.constant 0 : i32
    %c0_i32_0 = arith.constant 0 : i32
    %c0_i32_1 = arith.constant 0 : i32
    return %arg0, %c0_i32, %c0_i32_0 : i32, i32, i32
  }
  func.func @transform_2(%arg0: i32, %arg1: i32) -> (i32, i32, i32) {
    %c0_i32 = arith.constant 0 : i32
    %c0_i32_0 = arith.constant 0 : i32
    %c0_i32_1 = arith.constant 0 : i32
    %c0_i32_2 = arith.constant 0 : i32
    return %c0_i32, %c0_i32_0, %c0_i32_1 : i32, i32, i32
  }
  func.func @transform_3(%arg0: i32, %arg1: i32) -> (i32, i32, i32) {
    %c0_i32 = arith.constant 0 : i32
    %c0_i32_0 = arith.constant 0 : i32
    %c0_i32_1 = arith.constant 0 : i32
    %c0_i32_2 = arith.constant 0 : i32
    return %c0_i32, %c0_i32_0, %c0_i32_1 : i32, i32, i32
  }
  func.func @transform_4(%arg0: i32, %arg1: i32) -> (i32, i32) {
    %c0_i32 = arith.constant 0 : i32
    %c0_i32_0 = arith.constant 0 : i32
    %c0_i32_1 = arith.constant 0 : i32
    return %c0_i32, %c0_i32_0 : i32, i32
  }
  func.func @transform_5(%arg0: i32, %arg1: i32) -> (i32, i32, i32) {
    %c0_i32 = arith.constant 0 : i32
    %c0_i32_0 = arith.constant 0 : i32
    return %arg0, %arg1, %c0_i32 : i32, i32, i32
  }
}

module attributes {stable_mosaic.version = 11 : i64} {
  func.func @_conv_tap_kernel(%arg0: i32, %arg1: i32, %arg2: memref<1x256x16xf32, #tpu.memory_space<vmem>>, %arg3: memref<1x16x3xbf16, #tpu.memory_space<vmem>>, %arg4: memref<1x3xf32, #tpu.memory_space<vmem>>, %arg5: memref<1x256x3xf32, #tpu.memory_space<vmem>>) attributes {dimension_semantics = [#tpu.dimension_semantics<parallel>, #tpu.dimension_semantics<parallel>], iteration_bounds = array<i64: 2, 1>, scalar_prefetch = 0 : i64, scratch_operands = 0 : i64, tpu.core_type = #tpu.core_type<tc>, window_params = [{transform_indices = @transform_0, window_bounds = array<i64: 1, 256, 16>}, {pipeline_mode = #tpu.pipeline_mode<synchronous>, transform_indices = @transform_1, window_bounds = array<i64: 1, 16, 3>}, {pipeline_mode = #tpu.pipeline_mode<synchronous>, transform_indices = @transform_2, window_bounds = array<i64: 1, 3>}, {transform_indices = @transform_3, window_bounds = array<i64: 1, 256, 3>}]} {
    %cst = arith.constant 0.000000e+00 : f32
    %0 = vector.broadcast %cst : f32 to vector<256x3xf32>
    %c0 = arith.constant 0 : index
    %c0_0 = arith.constant 0 : index
    %c0_1 = arith.constant 0 : index
    %1 = vector.load %arg2[%c0, %c0_0, %c0_1] : memref<1x256x16xf32, #tpu.memory_space<vmem>>, vector<1x256x16xf32>
    %2 = vector.shape_cast %1 : vector<1x256x16xf32> to vector<256x16xf32>
    %3 = arith.truncf %2 : vector<256x16xf32> to vector<256x16xbf16>
    %c0_2 = arith.constant 0 : index
    %c0_3 = arith.constant 0 : index
    %c0_4 = arith.constant 0 : index
    %4 = vector.load %arg3[%c0_2, %c0_3, %c0_4] : memref<1x16x3xbf16, #tpu.memory_space<vmem>>, vector<1x16x3xbf16>
    %5 = vector.shape_cast %4 : vector<1x16x3xbf16> to vector<16x3xbf16>
    %cst_5 = arith.constant dense<0.000000e+00> : vector<256x3xf32>
    %6 = tpu.matmul %3, %5, %cst_5 {dimension_numbers = #tpu.dot_dimension_numbers<[1], [0], [0], [1], [0, 0, 1, 1], [], []>} : vector<256x16xbf16>, vector<16x3xbf16>, vector<256x3xf32> -> vector<256x3xf32>
    %7 = arith.addf %0, %6 : vector<256x3xf32>
    %c0_6 = arith.constant 0 : index
    %c0_7 = arith.constant 0 : index
    %8 = vector.load %arg4[%c0_6, %c0_7] : memref<1x3xf32, #tpu.memory_space<vmem>>, vector<1x3xf32>
    %9 = vector.broadcast %8 : vector<1x3xf32> to vector<256x3xf32>
    %10 = arith.addf %7, %9 : vector<256x3xf32>
    %11 = arith.negf %10 : vector<256x3xf32>
    %12 = math.exp %11 : vector<256x3xf32>
    %cst_8 = arith.constant 1.000000e+00 : f32
    %13 = vector.broadcast %cst_8 : f32 to vector<256x3xf32>
    %14 = arith.addf %13, %12 : vector<256x3xf32>
    %15 = arith.divf %13, %14 : vector<256x3xf32>
    %c0_9 = arith.constant 0 : index
    %c0_10 = arith.constant 0 : index
    %c0_11 = arith.constant 0 : index
    %16 = vector.load %arg5[%c0_9, %c0_10, %c0_11] : memref<1x256x3xf32, #tpu.memory_space<vmem>>, vector<1x256x3xf32>
    %17 = vector.shape_cast %16 : vector<1x256x3xf32> to vector<256x3xf32>
    %18 = vector.shape_cast %15 : vector<256x3xf32> to vector<1x256x3xf32>
    tpu.vector_store %arg5[%c0_9, %c0_10, %c0_11], %18 {strides = array<i32>} : memref<1x256x3xf32, #tpu.memory_space<vmem>>, vector<1x256x3xf32>,
    return
  }
  func.func @transform_0(%arg0: i32, %arg1: i32) -> (i32, i32, i32) {
    %c0_i32 = arith.constant 0 : i32
    %c0_i32_0 = arith.constant 0 : i32
    %c0_i32_1 = arith.constant 0 : i32
    return %arg0, %c0_i32, %c0_i32_0 : i32, i32, i32
  }
  func.func @transform_1(%arg0: i32, %arg1: i32) -> (i32, i32, i32) {
    %c0_i32 = arith.constant 0 : i32
    %c0_i32_0 = arith.constant 0 : i32
    %c0_i32_1 = arith.constant 0 : i32
    %c0_i32_2 = arith.constant 0 : i32
    return %c0_i32, %c0_i32_0, %c0_i32_1 : i32, i32, i32
  }
  func.func @transform_2(%arg0: i32, %arg1: i32) -> (i32, i32) {
    %c0_i32 = arith.constant 0 : i32
    %c0_i32_0 = arith.constant 0 : i32
    %c0_i32_1 = arith.constant 0 : i32
    return %c0_i32, %c0_i32_0 : i32, i32
  }
  func.func @transform_3(%arg0: i32, %arg1: i32) -> (i32, i32, i32) {
    %c0_i32 = arith.constant 0 : i32
    %c0_i32_0 = arith.constant 0 : i32
    return %arg0, %arg1, %c0_i32 : i32, i32, i32
  }
}

</mosaic_0001>

<bundles_post_ra>
// kernel: matrix_forward.6
= control target key start
LH: loop header
LB: loop body
LE: loop exit
PB: predicated region body
PF: predicated region fallthrough
CT: control target
= control target key end

     0   :  { %s2808_s12 = smov 0   ;;  %s2810_s13 = smov 0   ;;  %s3733_s0 = inlined_call_operand.vmem [shape: f32[2,328,3], index: 0, kind: input, shape index: {}]   ;;  %s3734_s1 = inlined_call_operand.vmem [shape: bf16[9,3,16], index: 1, kind: input, shape index: {}]   ;;  %s3735_s2 = inlined_call_operand.vmem [shape: f32[1,16], index: 2, kind: input, shape index: {}]   ;;  %s3736_s3 = inlined_call_operand.vmem [shape: f32[2,288,16], index: 3, kind: output, shape index: {}]  }
   0x1   :  { %s2812_s14 = smov 0  }
   0x2 LB: > { %s25_s15 = sadd.s32 1, %s2781_s13  ;;  %p2557_p0 = scmp.ge.s32.totalorder %s2785_s14, 1  ;;  %s2785_s14 = sphi %s2812_s14, %s13_s14   ;;  %s2781_s13 = sphi %s2810_s13, %s3738_s13   ;;  %s2777_s12 = sphi %s2808_s12, %s3737_s12  }
   0x3   : > { %p27_p1 = scmp.ge.s32.totalorder %s25_s15, 2  ;;  %p151_p2 = scmp.lt.s32.totalorder %s2785_s14, 3 }
   0x5   : > { %s3740_s15 = smov (%p27_p1, %s25_s15), 0  ;;  %p152_p3 = pnand %p2557_p0, %p151_p2 }
   0x6   : > { %p179_p4 = scmp.lt.s32.totalorder (!%p152_p3), %s2777_s12, 1 }
   0x7   : > { %155 = sbr.rel (%p152_p3) target bundleno = 811 (0x32b), region = 32 }
   0xc   : > { %v2560_v0 = vld [vmem:[%s3734_s1 + $0x2] sm:$0x3]  ;;  %vm361_vm0 = vcmask 1040384   ;;  %vm362_vm1 = vcmask 1041408   ;;  %v2787_v1 = vmov 65535   ;;  %s3742_s12 = smov (!%p179_p4, %s2777_s12), 1 }
   0xd   : > { %v363_v2 = vsel %vm361_vm0, 4294967295, %v2787_v1  ;;  %v2597_v3 = vld [vmem:[%s3734_s1 + $0x4] sm:$0x3]  ;;  %v249_v4 = vld [vmem:[%s3734_s1] sm:$0x3]  ;;  %s2735_s24 = smul.u32 328, %s3742_s12 }
   0xe   : > { %v2835_v5 = vsel %vm362_vm1, %v363_v2, 0  ;;  %v2635_v6 = vld [vmem:[%s3734_s1 + $0x8] sm:$0x3]  ;;  %vm306_vm2 = vcmask 23552   ;;  %v2616_v23 = vld [vmem:[%s3734_s1 + $0x6] sm:$0x3] }
   0xf   : > { %v366_v7 = vand.u32 %v2560_v0, %v2835_v5  ;;  %v734_v8 = vand.u32 %v2597_v3, %v2835_v5  ;;  %v522_v9 = vand.u32 %v2835_v5, %v249_v4  ;;  %v1230_v10 = vand.u32 %v2635_v6, %v2835_v5  ;;  %s2850_s27 = scalar_lea.vmem %s3733_s0, %s2735_s24  ;;  %v2673_v61 = vld [vmem:[%s3734_s1 + $0xc] sm:$0x3]  ;;  %v2692_v62 = vld [vmem:[%s3734_s1 + $0xe] sm:$0x3]  ;;  %v2654_v63 = vld [vmem:[%s3734_s1 + $0xa] sm:$0x3] }
  0x10   : > { %v260_v11 = vld [vmem:[%s2850_s27 + $0x51] sm:$0xff]  ;;  %v261_v12 = vld [vmem:[%s2850_s27 + $0x59] sm:$0xff]  ;;  %v270_v13 = vld [vmem:[%s2850_s27 + $0xa1] sm:$0xff]  ;;  %v982_v24 = vand.u32 %v2616_v23, %v2835_v5  ;;  %v1726_v0 = vand.u32 %v2673_v61, %v2835_v5  ;;  %v1974_v1 = vand.u32 %v2692_v62, %v2835_v5  ;;  %v1478_v2 = vand.u32 %v2654_v63, %v2835_v5  ;;  %s2736_s17 = smul.u32 288, %s3742_s12 }
  0x11   : > { %2732 = vmatpush.bf16.msra.mxu1 %v366_v7  ;;  %2733 = vmatpush.bf16.msra.mxu2 %v366_v7  ;;  %v291_v14 = vpack.c.bf16 %v261_v12, %v260_v11  ;;  %v271_v15 = vld [vmem:[%s2850_s27 + $0xa9] sm:$0xff]  ;;  %v250_v16 = vld [vmem:[%s2850_s27 + $0x1] sm:$0xff]  ;;  %v280_v20 = vld [vmem:[%s2850_s27 + $0xf1] sm:$0xff]  ;;  %vm2435_vm3 = vcmask 130048  }
  0x12   : > { %375 = vmatpush.bf16.msra.mxu0 %v366_v7  ;;  %v251_v17 = vld [vmem:[%s2850_s27 + $0x9] sm:$0xff]  ;;  %2734 = vmatpush.bf16.msra.mxu3 %v366_v7  ;;  %v296_v18 = vpack.c.bf16 %v271_v15, %v270_v13  ;;  %v281_v21 = vld [vmem:[%s2850_s27 + $0xf9] sm:$0xff]  ;;  %v262_v25 = vld [vmem:[%s2850_s27 + $0x61] sm:$0xff]  ;;  %s3458_s20 = scalar_lea.vmem %s3736_s3, %s2736_s17 }
  0x13   : > { %v286_v19 = vpack.c.bf16 %v251_v17, %v250_v16  ;;  %v301_v22 = vpack.c.bf16 %v281_v21, %v280_v20  ;;  %v263_v26 = vld [vmem:[%s2850_s27 + $0x69] sm:$0xff]  ;;  %v272_v27 = vld [vmem:[%s2850_s27 + $0xb1] sm:$0xff]  ;;  %v273_v28 = vld [vmem:[%s2850_s27 + $0xb9] sm:$0xff] }
  0x14   : > { %2566 = vmatmul.msk.bf16.vlgmr.msra.gmra.mxu1 %vm306_vm2, %v291_v14  ;;  %2571 = vmatmul.msk.bf16.vlgmr.msra.gmra.mxu2 %vm306_vm2, %v296_v18  ;;  %v252_v29 = vld [vmem:[%s2850_s27 + $0x11] sm:$0xff]  ;;  %v253_v30 = vld [vmem:[%s2850_s27 + $0x19] sm:$0xff]  ;;  %v292_v31 = vpack.c.bf16 %v263_v26, %v262_v25  ;;  %v297_v32 = vpack.c.bf16 %v273_v28, %v272_v27  ;;  %v282_v34 = vld [vmem:[%s2850_s27 + $0x101] sm:$0xff] }
  0x15   : > { %743 = vmatpush.bf16.msrb.mxu2 %v734_v8  ;;  %531 = vmatpush.bf16.msrb.mxu1 %v522_v9  ;;  %v287_v33 = vpack.c.bf16 %v253_v30, %v252_v29  ;;  %v283_v35 = vld [vmem:[%s2850_s27 + $0x109] sm:$0xff]  ;;  %v264_v37 = vld [vmem:[%s2850_s27 + $0x71] sm:$0xff]  ;;  %v265_v38 = vld [vmem:[%s2850_s27 + $0x79] sm:$0xff] }
  0x16   : > { %1239 = vmatpush.bf16.msrb.mxu0 %v1230_v10  ;;  %2576 = vmatmul.msk.bf16.vlgmr.msra.gmra.mxu3 %vm306_vm2, %v301_v22  ;;  %v302_v36 = vpack.c.bf16 %v283_v35, %v282_v34  ;;  %v274_v39 = vld [vmem:[%s2850_s27 + $0xc1] sm:$0xff]  ;;  %v275_v40 = vld [vmem:[%s2850_s27 + $0xc9] sm:$0xff]  ;;  %v293_v43 = vpack.c.bf16 %v265_v38, %v264_v37  ;;  %v284_v46 = vld [vmem:[%s2850_s27 + $0x111] sm:$0xff] }
  0x17   : > { %2561 = vmatmul.msk.bf16.vlgmr.msra.gmra.mxu0 %vm306_vm2, %v286_v19  ;;  %991 = vmatpush.bf16.msrb.mxu3 %v982_v24  ;;  %v254_v41 = vld [vmem:[%s2850_s27 + $0x21] sm:$0xff]  ;;  %v255_v42 = vld [vmem:[%s2850_s27 + $0x29] sm:$0xff]  ;;  %v298_v44 = vpack.c.bf16 %v275_v40, %v274_v39  ;;  %v285_v47 = vld [vmem:[%s2850_s27 + $0x119] sm:$0xff] }
  0x18   : > { %v288_v45 = vpack.c.bf16 %v255_v42, %v254_v41  ;;  %v303_v48 = vpack.c.bf16 %v285_v47, %v284_v46  ;;  %v266_v49 = vld [vmem:[%s2850_s27 + $0x81] sm:$0xff]  ;;  %v267_v50 = vld [vmem:[%s2850_s27 + $0x89] sm:$0xff]  ;;  %v276_v51 = vld [vmem:[%s2850_s27 + $0xd1] sm:$0xff] }
  0x19   : > { %v277_v52 = vld [vmem:[%s2850_s27 + $0xd9] sm:$0xff]  ;;  %v256_v53 = vld [vmem:[%s2850_s27 + $0x31] sm:$0xff]  ;;  %v294_v55 = vpack.c.bf16 %v267_v50, %v266_v49  ;;  %1735 = vmatpush.bf16.msra.mxu2 %v1726_v0  ;;  %1487 = vmatpush.bf16.msra.mxu1 %v1478_v2  ;;  %v278_v8 = vld [vmem:[%s2850_s27 + $0xe1] sm:$0xff] }
  0x1a   : > { %v257_v54 = vld [vmem:[%s2850_s27 + $0x39] sm:$0xff]  ;;  %v299_v56 = vpack.c.bf16 %v277_v52, %v276_v51  ;;  %v2711_v3 = vld [vmem:[%s3734_s1 + $0x10] sm:$0x3]  ;;  %v258_v10 = vld [vmem:[%s2850_s27 + $0x41] sm:$0xff] }
  0x1b   : > { %v289_v57 = vpack.c.bf16 %v257_v54, %v256_v53  ;;  %v871_v58 = vld [vmem:[%s2850_s27 + $0x12] sm:$0xff]  ;;  %v872_v59 = vld [vmem:[%s2850_s27 + $0x1a] sm:$0xff]  ;;  %v2222_v4 = vand.u32 %v2711_v3, %v2835_v5  ;;  %1983 = vmatpush.bf16.msra.mxu3 %v1974_v1  ;;  %v279_v9 = vld [vmem:[%s2850_s27 + $0xe9] sm:$0xff] }
  0x1c   : > { %v907_v60 = vpack.c.bf16 %v872_v59, %v871_v58  ;;  %v268_v6 = vld [vmem:[%s2850_s27 + $0x91] sm:$0xff]  ;;  %v269_v7 = vld [vmem:[%s2850_s27 + $0x99] sm:$0xff]  ;;  %v259_v11 = vld [vmem:[%s2850_s27 + $0x49] sm:$0xff]  ;;  %v300_v12 = vpack.c.bf16 %v279_v9, %v278_v8 }
  0x1d   : > { %2231 = vmatpush.bf16.msra.mxu0 %v2222_v4  ;;  %v295_v5 = vpack.c.bf16 %v269_v7, %v268_v6  ;;  %v290_v13 = vpack.c.bf16 %v259_v11, %v258_v10  ;;  %v873_v14 = vld [vmem:[%s2850_s27 + $0x22] sm:$0xff]  ;;  %v874_v15 = vld [vmem:[%s2850_s27 + $0x2a] sm:$0xff]  ;;  %v1119_v21 = vld [vmem:[%s2850_s27 + $0x13] sm:$0xff] }
  0x1e   : > { %v908_v16 = vpack.c.bf16 %v874_v15, %v873_v14  ;;  %v195_v17 = vld [vmem:[%s2850_s27] sm:$0xff]  ;;  %v196_v18 = vld [vmem:[%s2850_s27 + $0x8] sm:$0xff]  ;;  %v875_v26 = vld [vmem:[%s2850_s27 + $0x32] sm:$0xff] }
  0x1f   : > { %v623_v19 = vld [vmem:[%s2850_s27 + $0x2] sm:$0xff]  ;;  %v624_v20 = vld [vmem:[%s2850_s27 + $0xa] sm:$0xff]  ;;  %v231_v23 = vpack.c.bf16 %v196_v18, %v195_v17  ;;  %v876_v27 = vld [vmem:[%s2850_s27 + $0x3a] sm:$0xff] }
  0x20   : > { %v1120_v22 = vld [vmem:[%s2850_s27 + $0x1b] sm:$0xff]  ;;  %v659_v24 = vpack.c.bf16 %v624_v20, %v623_v19  ;;  %v909_v28 = vpack.c.bf16 %v876_v27, %v875_v26  ;;  %v197_v29 = vld [vmem:[%s2850_s27 + $0x10] sm:$0xff]  ;;  %v200_v39 = vld [vmem:[%s2850_s27 + $0x28] sm:$0xff] }
  0x21   : > { %v1155_v25 = vpack.c.bf16 %v1120_v22, %v1119_v21  ;;  %v198_v30 = vld [vmem:[%s2850_s27 + $0x18] sm:$0xff]  ;;  %v877_v35 = vld [vmem:[%s2850_s27 + $0x42] sm:$0xff]  ;;  %v201_v47 = vld [vmem:[%s2850_s27 + $0x30] sm:$0xff] }
  0x22   : > { %v199_v38 = vld [vmem:[%s2850_s27 + $0x20] sm:$0xff]  ;;  %v1123_v40 = vld [vmem:[%s2850_s27 + $0x33] sm:$0xff]  ;;  %v1126_v50 = vld [vmem:[%s2850_s27 + $0x4b] sm:$0xff] }
  0x23   : > { %v1124_v41 = vld [vmem:[%s2850_s27 + $0x3b] sm:$0xff]  ;;  %v233_v42 = vpack.c.bf16 %v200_v39, %v199_v38  ;;  %v1125_v49 = vld [vmem:[%s2850_s27 + $0x43] sm:$0xff]  ;;  %v1127_v0 = vld [vmem:[%s2850_s27 + $0x53] sm:$0xff] }
  0x24   : > { %2567 = vmatmul.msk.bf16.gmra.mxu1 %vm306_vm2, %v292_v31  ;;  %2572 = vmatmul.msk.bf16.gmra.mxu2 %vm306_vm2, %v297_v32  ;;  %v1121_v31 = vld [vmem:[%s2850_s27 + $0x23] sm:$0xff]  ;;  %v1122_v32 = vld [vmem:[%s2850_s27 + $0x2b] sm:$0xff]  ;;  %v1158_v53 = vpack.c.bf16 %v1126_v50, %v1125_v49  ;;  %v1128_v1 = vld [vmem:[%s2850_s27 + $0x5b] sm:$0xff] }
  0x25   : > { %v1156_v34 = vpack.c.bf16 %v1122_v32, %v1121_v31  ;;  %v881_v54 = vld [vmem:[%s2850_s27 + $0x62] sm:$0xff]  ;;  %v1159_v6 = vpack.c.bf16 %v1128_v1, %v1127_v0  ;;  %v883_v7 = vld [vmem:[%s2850_s27 + $0x72] sm:$0xff]  ;;  %v884_v8 = vld [vmem:[%s2850_s27 + $0x7a] sm:$0xff] }
  0x26   : > { %2577 = vmatmul.msk.bf16.gmra.mxu3 %vm306_vm2, %v302_v36  ;;  %v878_v36 = vld [vmem:[%s2850_s27 + $0x4a] sm:$0xff]  ;;  %v203_v62 = vld [vmem:[%s2850_s27 + $0x40] sm:$0xff]  ;;  %v3004_v11 = vpack.c.bf16 %v884_v8, %v883_v7  ;;  %v210_v50 = vld [vmem:[%s2850_s27 + $0x78] sm:$0xff] }
  0x27   : > { %2562 = vmatmul.msk.bf16.gmra.mxu0 %vm306_vm2, %v287_v33  ;;  %v232_v33 = vpack.c.bf16 %v198_v30, %v197_v29  ;;  %v910_v37 = vpack.c.bf16 %v878_v36, %v877_v35  ;;  %v204_v63 = vld [vmem:[%s2850_s27 + $0x48] sm:$0xff]  ;;  %v205_v15 = vld [vmem:[%s2850_s27 + $0x50] sm:$0xff]  ;;  %v207_v32 = vld [vmem:[%s2850_s27 + $0x60] sm:$0xff] }
  0x28   : > { %v235_v3 = vpack.c.bf16 %v204_v63, %v203_v62  ;;  %v1129_v17 = vld [vmem:[%s2850_s27 + $0x63] sm:$0xff]  ;;  %v1130_v18 = vld [vmem:[%s2850_s27 + $0x6b] sm:$0xff]  ;;  %v1132_v35 = vld [vmem:[%s2850_s27 + $0x7b] sm:$0xff] }
  0x29   : > { %v1160_v22 = vpack.c.bf16 %v1130_v18, %v1129_v17  ;;  %v209_v49 = vld [vmem:[%s2850_s27 + $0x70] sm:$0xff]  ;;  %v889_v63 = vld [vmem:[%s2850_s27 + $0xa2] sm:$0xff] }
  0x2a   : > { %v890_v0 = vld [vmem:[%s2850_s27 + $0xaa] sm:$0xff]  ;;  %v211_v17 = vld [vmem:[%s2850_s27 + $0x80] sm:$0xff] }
  0x2b   : > { %v212_v18 = vld [vmem:[%s2850_s27 + $0x88] sm:$0xff] }
  0x34   : > { %2568 = vmatmul.msk.bf16.gmra.mxu1 %vm306_vm2, %v293_v43  ;;  %2573 = vmatmul.msk.bf16.gmra.mxu2 %vm306_vm2, %v298_v44  ;;  %v1157_v43 = vpack.c.bf16 %v1124_v41, %v1123_v40  ;;  %v879_v44 = vld [vmem:[%s2850_s27 + $0x52] sm:$0xff]  ;;  %v888_v41 = vld [vmem:[%s2850_s27 + $0x9a] sm:$0xff] }
  0x35   : > { %v887_v40 = vld [vmem:[%s2850_s27 + $0x92] sm:$0xff] }
  0x36   : > { %2578 = vmatmul.msk.bf16.gmra.mxu3 %vm306_vm2, %v303_v48  ;;  %v202_v48 = vld [vmem:[%s2850_s27 + $0x38] sm:$0xff] }
  0x37   : > { %2563 = vmatmul.msk.bf16.gmra.mxu0 %vm306_vm2, %v288_v45  ;;  %v880_v45 = vld [vmem:[%s2850_s27 + $0x5a] sm:$0xff]  ;;  %v234_v51 = vpack.c.bf16 %v202_v48, %v201_v47 }
  0x38   : > { %v911_v46 = vpack.c.bf16 %v880_v45, %v879_v44  ;;  %v3062_v44 = vpack.c.bf16 %v888_v41, %v887_v40 }
  0x44   : > { %2569 = vmatmul.msk.bf16.gmra.mxu1 %vm306_vm2, %v294_v55  ;;  %2574 = vmatmul.msk.bf16.gmra.mxu2 %vm306_vm2, %v299_v56  ;;  %v882_v55 = vld [vmem:[%s2850_s27 + $0x6a] sm:$0xff] }
  0x46   : > { %2617 = vmatmul.msk.bf16.vlgmr.msrb.gmra.mxu3 %vm306_vm2, %v907_v60 }
  0x47   : > { %2564 = vmatmul.msk.bf16.gmra.mxu0 %vm306_vm2, %v289_v57  ;;  %v2975_v57 = vpack.c.bf16 %v882_v55, %v881_v54  ;;  %v238_v55 = vpack.c.bf16 %v210_v50, %v209_v49 }
  0x54   : > { %2570 = vmatmul.msk.bf16.gmra.mxu1 %vm306_vm2, %v295_v5  ;;  %2575 = vmatmul.msk.bf16.gmra.mxu2 %vm306_vm2, %v300_v12 }
  0x56   : > { %2618 = vmatmul.msk.bf16.gmra.mxu3 %vm306_vm2, %v908_v16 }
  0x57   : > { %2565 = vmatmul.msk.bf16.gmra.mxu0 %vm306_vm2, %v290_v13 }
  0x64   : > { %2579 = vmatmul.msk.bf16.vlgmr.msrb.gmra.mxu1 %vm306_vm2, %v231_v23  ;;  %2598 = vmatmul.msk.bf16.vlgmr.msrb.gmra.mxu2 %vm306_vm2, %v659_v24  ;;  %v885_v23 = vld [vmem:[%s2850_s27 + $0x82] sm:$0xff]  ;;  %v886_v24 = vld [vmem:[%s2850_s27 + $0x8a] sm:$0xff] }
  0x65   : > { %v3033_v27 = vpack.c.bf16 %v886_v24, %v885_v23 }
  0x66   : > { %2619 = vmatmul.msk.bf16.gmra.mxu3 %vm306_vm2, %v909_v28 }
  0x67   : > { %2636 = vmatmul.msk.bf16.vlgmr.msrb.gmra.mxu0 %vm306_vm2, %v1155_v25 }
  0x74   : > { %2580 = vmatmul.msk.bf16.gmra.mxu1 %vm306_vm2, %v232_v33  ;;  %2599 = vmatmul.msk.bf16.gmra.mxu2 %vm306_vm2, %v907_v60  ;;  %v208_v33 = vld [vmem:[%s2850_s27 + $0x68] sm:$0xff] }
  0x76   : > { %2620 = vmatmul.msk.bf16.gmra.mxu3 %vm306_vm2, %v910_v37 }
  0x77   : > { %2637 = vmatmul.msk.bf16.gmra.mxu0 %vm306_vm2, %v1156_v34  ;;  %v1131_v34 = vld [vmem:[%s2850_s27 + $0x73] sm:$0xff] }
  0x78   : > { %v1161_v39 = vpack.c.bf16 %v1132_v35, %v1131_v34  ;;  %v892_v34 = vld [vmem:[%s2850_s27 + $0xba] sm:$0xff] }
  0x84   : > { %2581 = vmatmul.msk.bf16.gmra.mxu1 %vm306_vm2, %v233_v42  ;;  %2600 = vmatmul.msk.bf16.gmra.mxu2 %vm306_vm2, %v908_v16  ;;  %v206_v16 = vld [vmem:[%s2850_s27 + $0x58] sm:$0xff] }
  0x85   : > { %v236_v20 = vpack.c.bf16 %v206_v16, %v205_v15 }
  0x86   : > { %2621 = vmatmul.msk.bf16.gmra.mxu3 %vm306_vm2, %v911_v46 }
  0x87   : > { %2638 = vmatmul.msk.bf16.gmra.mxu0 %vm306_vm2, %v1157_v43 }
  0x91   : > { %v2968_v52 = vpop.f32.mrf.mxu1 }
  0x94   : > { %v2972_v56 = vpop.f32.mrf.mxu0  ;;  %2582 = vmatmul.msk.bf16.gmra.mxu1 %vm306_vm2, %v234_v51  ;;  %2601 = vmatmul.msk.bf16.gmra.mxu2 %vm306_vm2, %v909_v28  ;;  %v1133_v51 = vld [vmem:[%s2850_s27 + $0x83] sm:$0xff] }
  0x96   : > { %2622 = vmatmul.msk.bf16.gmra.mxu3 %vm306_vm2, %v2975_v57 }
  0x97   : > { %2639 = vmatmul.msk.bf16.gmra.mxu0 %vm306_vm2, %v1158_v53  ;;  %v2979_v58 = vpop.f32.mrf.mxu2  ;;  %v1134_v53 = vld [vmem:[%s2850_s27 + $0x8b] sm:$0xff] }
  0x98   : > { %v1162_v62 = vpack.c.bf16 %v1134_v53, %v1133_v51 }
  0x99   : > { %v2983_v59 = vpop.f32.mrf.mxu1  ;;  %v2987_v61 = vpop.f32.mrf.mxu3 }
  0x9c   : > { %v2985_v60 = vpop.f32.mrf.mxu0 }
  0x9f   : > { %v2993_v2 = vpop.f32.mrf.mxu2 }
  0xa1   : > { %v2995_v4 = vpop.f32.mrf.mxu1  ;;  %v3001_v10 = vpop.f32.mrf.mxu3 }
  0xa4   : > { %v2999_v9 = vpop.f32.mrf.mxu0  ;;  %2583 = vmatmul.msk.bf16.gmra.mxu1 %vm306_vm2, %v235_v3  ;;  %2602 = vmatmul.msk.bf16.gmra.mxu2 %vm306_vm2, %v910_v37  ;;  %v237_v37 = vpack.c.bf16 %v208_v33, %v207_v32  ;;  %v891_v33 = vld [vmem:[%s2850_s27 + $0xb2] sm:$0xff] }
  0xa6   : > { %2623 = vmatmul.msk.bf16.gmra.mxu3 %vm306_vm2, %v3004_v11 }
  0xa7   : > { %2640 = vmatmul.msk.bf16.gmra.mxu0 %vm306_vm2, %v1159_v6  ;;  %v3008_v5 = vpop.f32.mrf.mxu2  ;;  %v3088_v6 = vpack.c.bf16 %v890_v0, %v889_v63  ;;  %v214_v63 = vld [vmem:[%s2850_s27 + $0x98] sm:$0xff] }
  0xa9   : > { %v3012_v12 = vpop.f32.mrf.mxu1  ;;  %v3016_v14 = vpop.f32.mrf.mxu3 }
  0xac   : > { %v3014_v13 = vpop.f32.mrf.mxu0 }
  0xaf   : > { %v3022_v19 = vpop.f32.mrf.mxu2 }
  0xb1   : > { %v3024_v21 = vpop.f32.mrf.mxu1  ;;  %v3030_v26 = vpop.f32.mrf.mxu3 }
  0xb4   : > { %v3028_v25 = vpop.f32.mrf.mxu0  ;;  %2584 = vmatmul.msk.bf16.gmra.mxu1 %vm306_vm2, %v236_v20  ;;  %2603 = vmatmul.msk.bf16.gmra.mxu2 %vm306_vm2, %v911_v46  ;;  %v1135_v20 = vld [vmem:[%s2850_s27 + $0x93] sm:$0xff] }
  0xb6   : > { %2624 = vmatmul.msk.bf16.gmra.mxu3 %vm306_vm2, %v3033_v27 }
  0xb7   : > { %2641 = vmatmul.msk.bf16.gmra.mxu0 %vm306_vm2, %v1160_v22  ;;  %v3037_v28 = vpop.f32.mrf.mxu2  ;;  %v1136_v22 = vld [vmem:[%s2850_s27 + $0x9b] sm:$0xff] }
  0xb8   : > { %v1163_v32 = vpack.c.bf16 %v1136_v22, %v1135_v20 }
  0xb9   : > { %v3041_v29 = vpop.f32.mrf.mxu1  ;;  %v3045_v31 = vpop.f32.mrf.mxu3 }
  0xbc   : > { %v3043_v30 = vpop.f32.mrf.mxu0 }
  0xbf   : > { %v3051_v36 = vpop.f32.mrf.mxu2 }
  0xc1   : > { %v3053_v38 = vpop.f32.mrf.mxu1  ;;  %v3059_v43 = vpop.f32.mrf.mxu3 }
  0xc4   : > { %v3057_v42 = vpop.f32.mrf.mxu0  ;;  %2585 = vmatmul.msk.bf16.gmra.mxu1 %vm306_vm2, %v237_v37  ;;  %2604 = vmatmul.msk.bf16.gmra.mxu2 %vm306_vm2, %v2975_v57 }
  0xc6   : > { %2625 = vmatmul.msk.bf16.gmra.mxu3 %vm306_vm2, %v3062_v44 }
  0xc7   : > { %2642 = vmatmul.msk.bf16.gmra.mxu0 %vm306_vm2, %v1161_v39  ;;  %v3067_v45 = vpop.f32.mrf.mxu2  ;;  %v3110_v39 = vpack.c.bf16 %v892_v34, %v891_v33  ;;  %v894_v33 = vld [vmem:[%s2850_s27 + $0xca] sm:$0xff] }
  0xc9   : > { %v3071_v46 = vpop.f32.mrf.mxu1  ;;  %v993_v48 = vpop.f32.mrf.mxu3 }
  0xcc   : > { %v3073_v47 = vpop.f32.mrf.mxu0 }
  0xcf   : > { %v3079_v54 = vpop.f32.mrf.mxu2 }
  0xd1   : > { %v3081_v57 = vpop.f32.mrf.mxu1  ;;  %v995_v3 = vpop.f32.mrf.mxu3 }
  0xd4   : > { %v3085_v1 = vpop.f32.mrf.mxu0  ;;  %2586 = vmatmul.msk.bf16.gmra.mxu1 %vm306_vm2, %v238_v55  ;;  %2605 = vmatmul.msk.bf16.gmra.mxu2 %vm306_vm2, %v3004_v11  ;;  %v239_v11 = vpack.c.bf16 %v212_v18, %v211_v17  ;;  %v1138_v17 = vld [vmem:[%s2850_s27 + $0xab] sm:$0xff] }
  0xd6   : > { %2626 = vmatmul.msk.bf16.gmra.mxu3 %vm306_vm2, %v3088_v6 }
  0xd7   : > { %2643 = vmatmul.msk.bf16.gmra.mxu0 %vm306_vm2, %v1162_v62  ;;  %v3093_v7 = vpop.f32.mrf.mxu2  ;;  %v213_v62 = vld [vmem:[%s2850_s27 + $0x90] sm:$0xff] }
  0xd8   : > { %v240_v20 = vpack.c.bf16 %v214_v63, %v213_v62 }
  0xd9   : > { %v3097_v8 = vpop.f32.mrf.mxu1  ;;  %v998_v16 = vpop.f32.mrf.mxu3 }
  0xdc   : > { %v3099_v15 = vpop.f32.mrf.mxu0 }
  0xdf   : > { %v3105_v23 = vpop.f32.mrf.mxu2 }
  0xe1   : > { %v533_v24 = vpop.f32.mrf.mxu1  ;;  %v1000_v37 = vpop.f32.mrf.mxu3 }
  0xe2   : > { %v534_v40 = vadd.f32 %v533_v24, %v2972_v56 }
  0xe4   : > { %v1241_v35 = vpop.f32.mrf.mxu0  ;;  %2587 = vmatmul.msk.bf16.gmra.mxu1 %vm306_vm2, %v239_v11  ;;  %2606 = vmatmul.msk.bf16.gmra.mxu2 %vm306_vm2, %v3033_v27  ;;  %v1137_v27 = vld [vmem:[%s2850_s27 + $0xa3] sm:$0xff] }
  0xe5   : > { %v1164_v24 = vpack.c.bf16 %v1138_v17, %v1137_v27  ;;  %v215_v27 = vld [vmem:[%s2850_s27 + $0xa0] sm:$0xff]  ;;  %v216_v17 = vld [vmem:[%s2850_s27 + $0xa8] sm:$0xff] }
  0xe6   : > { %2627 = vmatmul.msk.bf16.gmra.mxu3 %vm306_vm2, %v3110_v39 }
  0xe7   : > { %2644 = vmatmul.msk.bf16.gmra.mxu0 %vm306_vm2, %v1163_v32  ;;  %v745_v41 = vpop.f32.mrf.mxu2  ;;  %v893_v32 = vld [vmem:[%s2850_s27 + $0xc2] sm:$0xff] }
  0xe8   : > { %v835_v49 = vadd.f32 %v745_v41, %v534_v40 }
  0xe9   : > { %v535_v50 = vpop.f32.mrf.mxu1  ;;  %v1003_v55 = vpop.f32.mrf.mxu3 }
  0xea   : > { %v1083_v53 = vadd.f32 %v993_v48, %v835_v49  ;;  %v536_v18 = vadd.f32 %v535_v50, %v2985_v60 }
  0xec   : > { %v1243_v51 = vpop.f32.mrf.mxu0  ;;  %v3120_v0 = vadd.f32 %v1241_v35, %v1083_v53  ;;  %v3128_v35 = vpack.c.bf16 %v894_v33, %v893_v32  ;;  %v895_v32 = vld [vmem:[%s2850_s27 + $0xd2] sm:$0xff]  ;;  %v896_v33 = vld [vmem:[%s2850_s27 + $0xda] sm:$0xff] }
  0xef   : > { %v747_v56 = vpop.f32.mrf.mxu2 }
  0xf0   : > { %v836_v22 = vadd.f32 %v747_v56, %v536_v18  ;;  %v1139_v18 = vld [vmem:[%s2850_s27 + $0xb3] sm:$0xff] }
  0xf1   : > { %v538_v11 = vpop.f32.mrf.mxu1  ;;  %v1005_v48 = vpop.f32.mrf.mxu3 }
  0xf2   : > { %v1084_v40 = vadd.f32 %v995_v3, %v836_v22  ;;  %v539_v41 = vadd.f32 %v538_v11, %v2999_v9 }
  0xf4   : > { %v1246_v34 = vpop.f32.mrf.mxu0  ;;  %2588 = vmatmul.msk.bf16.gmra.mxu1 %vm306_vm2, %v240_v20  ;;  %2607 = vmatmul.msk.bf16.gmra.mxu2 %vm306_vm2, %v3062_v44  ;;  %v3133_v60 = vadd.f32 %v1243_v51, %v1084_v40  ;;  %v1140_v51 = vld [vmem:[%s2850_s27 + $0xbb] sm:$0xff]  ;;  %v241_v20 = vpack.c.bf16 %v216_v17, %v215_v27 }
  0xf6   : > { %2628 = vmatmul.msk.bf16.gmra.mxu3 %vm306_vm2, %v3128_v35 }
  0xf7   : > { %2645 = vmatmul.msk.bf16.gmra.mxu0 %vm306_vm2, %v1164_v24  ;;  %v750_v49 = vpop.f32.mrf.mxu2  ;;  %v1165_v24 = vpack.c.bf16 %v1140_v51, %v1139_v18  ;;  %v217_v18 = vld [vmem:[%s2850_s27 + $0xb0] sm:$0xff]  ;;  %v218_v51 = vld [vmem:[%s2850_s27 + $0xb8] sm:$0xff] }
  0xf8   : > { %v837_v3 = vadd.f32 %v750_v49, %v539_v41 }
  0xf9   : > { %v540_v50 = vpop.f32.mrf.mxu1  ;;  %v1008_v63 = vpop.f32.mrf.mxu3 }
  0xfa   : > { %v1085_v62 = vadd.f32 %v998_v16, %v837_v3  ;;  %v541_v56 = vadd.f32 %v540_v50, %v3014_v13 }
  0xfc   : > { %v1248_v53 = vpop.f32.mrf.mxu0  ;;  %v3140_v44 = vadd.f32 %v1246_v34, %v1085_v62  ;;  %v3148_v34 = vpack.c.bf16 %v896_v33, %v895_v32  ;;  %v897_v32 = vld [vmem:[%s2850_s27 + $0xe2] sm:$0xff]  ;;  %v898_v33 = vld [vmem:[%s2850_s27 + $0xea] sm:$0xff] }
  0xff   : > { %v752_v9 = vpop.f32.mrf.mxu2 }
 0x100   : > { %v838_v22 = vadd.f32 %v752_v9, %v541_v56  ;;  %v1141_v56 = vld [vmem:[%s2850_s27 + $0xc3] sm:$0xff] }
 0x101   : > { %v543_v11 = vpop.f32.mrf.mxu1  ;;  %v1010_v16 = vpop.f32.mrf.mxu3 }
 0x102   : > { %v1086_v41 = vadd.f32 %v1000_v37, %v838_v22  ;;  %v544_v49 = vadd.f32 %v543_v11, %v3028_v25 }
 0x104   : > { %v1251_v40 = vpop.f32.mrf.mxu0  ;;  %2589 = vmatmul.msk.bf16.gmra.mxu1 %vm306_vm2, %v241_v20  ;;  %2608 = vmatmul.msk.bf16.gmra.mxu2 %vm306_vm2, %v3088_v6  ;;  %v3153_v13 = vadd.f32 %v1248_v53, %v1086_v41  ;;  %v1142_v53 = vld [vmem:[%s2850_s27 + $0xcb] sm:$0xff]  ;;  %v242_v20 = vpack.c.bf16 %v218_v51, %v217_v18 }
 0x106   : > { %2629 = vmatmul.msk.bf16.gmra.mxu3 %vm306_vm2, %v3148_v34 }
 0x107   : > { %2646 = vmatmul.msk.bf16.gmra.mxu0 %vm306_vm2, %v1165_v24  ;;  %v755_v3 = vpop.f32.mrf.mxu2  ;;  %v1166_v24 = vpack.c.bf16 %v1142_v53, %v1141_v56  ;;  %v219_v56 = vld [vmem:[%s2850_s27 + $0xc0] sm:$0xff]  ;;  %v220_v53 = vld [vmem:[%s2850_s27 + $0xc8] sm:$0xff] }
 0x108   : > { %v839_v37 = vadd.f32 %v755_v3, %v544_v49 }
 0x109   : > { %v545_v50 = vpop.f32.mrf.mxu1  ;;  %v1013_v17 = vpop.f32.mrf.mxu3 }
 0x10a   : > { %v1087_v27 = vadd.f32 %v1003_v55, %v839_v37  ;;  %v546_v9 = vadd.f32 %v545_v50, %v3043_v30 }
 0x10c   : > { %v1253_v62 = vpop.f32.mrf.mxu0  ;;  %v3160_v6 = vadd.f32 %v1251_v40, %v1087_v27  ;;  %v3168_v40 = vpack.c.bf16 %v898_v33, %v897_v32  ;;  %v899_v32 = vld [vmem:[%s2850_s27 + $0xf2] sm:$0xff]  ;;  %v900_v33 = vld [vmem:[%s2850_s27 + $0xfa] sm:$0xff] }
 0x10f   : > { %v757_v25 = vpop.f32.mrf.mxu2 }
 0x110   : > { %v840_v22 = vadd.f32 %v757_v25, %v546_v9  ;;  %v1143_v9 = vld [vmem:[%s2850_s27 + $0xd3] sm:$0xff] }
 0x111   : > { %v548_v11 = vpop.f32.mrf.mxu1  ;;  %v1015_v55 = vpop.f32.mrf.mxu3 }
 0x112   : > { %v1088_v49 = vadd.f32 %v1005_v48, %v840_v22  ;;  %v549_v3 = vadd.f32 %v548_v11, %v3057_v42 }
 0x114   : > { %v1256_v41 = vpop.f32.mrf.mxu0  ;;  %2590 = vmatmul.msk.bf16.gmra.mxu1 %vm306_vm2, %v242_v20  ;;  %2609 = vmatmul.msk.bf16.gmra.mxu2 %vm306_vm2, %v3110_v39  ;;  %v3173_v30 = vadd.f32 %v1253_v62, %v1088_v49  ;;  %v1144_v62 = vld [vmem:[%s2850_s27 + $0xdb] sm:$0xff]  ;;  %v243_v20 = vpack.c.bf16 %v220_v53, %v219_v56 }
 0x116   : > { %2630 = vmatmul.msk.bf16.gmra.mxu3 %vm306_vm2, %v3168_v40 }
 0x117   : > { %2647 = vmatmul.msk.bf16.gmra.mxu0 %vm306_vm2, %v1166_v24  ;;  %v760_v37 = vpop.f32.mrf.mxu2  ;;  %v1167_v24 = vpack.c.bf16 %v1144_v62, %v1143_v9  ;;  %v221_v9 = vld [vmem:[%s2850_s27 + $0xd0] sm:$0xff]  ;;  %v222_v62 = vld [vmem:[%s2850_s27 + $0xd8] sm:$0xff] }
 0x118   : > { %v841_v48 = vadd.f32 %v760_v37, %v549_v3 }
 0x119   : > { %v550_v50 = vpop.f32.mrf.mxu1  ;;  %v1018_v51 = vpop.f32.mrf.mxu3 }
 0x11a   : > { %v1089_v18 = vadd.f32 %v1008_v63, %v841_v48  ;;  %v551_v25 = vadd.f32 %v550_v50, %v3073_v47 }
 0x11c   : > { %v1258_v27 = vpop.f32.mrf.mxu0  ;;  %v3180_v39 = vadd.f32 %v1256_v41, %v1089_v18  ;;  %v3188_v41 = vpack.c.bf16 %v900_v33, %v899_v32  ;;  %v901_v32 = vld [vmem:[%s2850_s27 + $0x102] sm:$0xff]  ;;  %v902_v33 = vld [vmem:[%s2850_s27 + $0x10a] sm:$0xff] }
 0x11f   : > { %v762_v42 = vpop.f32.mrf.mxu2 }
 0x120   : > { %v842_v22 = vadd.f32 %v762_v42, %v551_v25  ;;  %v1145_v25 = vld [vmem:[%s2850_s27 + $0xe3] sm:$0xff] }
 0x121   : > { %v553_v11 = vpop.f32.mrf.mxu1  ;;  %v1020_v63 = vpop.f32.mrf.mxu3 }
 0x122   : > { %v1090_v3 = vadd.f32 %v1010_v16, %v842_v22  ;;  %v554_v37 = vadd.f32 %v553_v11, %v3085_v1 }
 0x124   : > { %v1261_v49 = vpop.f32.mrf.mxu0  ;;  %2591 = vmatmul.msk.bf16.gmra.mxu1 %vm306_vm2, %v243_v20  ;;  %2610 = vmatmul.msk.bf16.gmra.mxu2 %vm306_vm2, %v3128_v35  ;;  %v3193_v47 = vadd.f32 %v1258_v27, %v1090_v3  ;;  %v1146_v27 = vld [vmem:[%s2850_s27 + $0xeb] sm:$0xff]  ;;  %v244_v20 = vpack.c.bf16 %v222_v62, %v221_v9 }
 0x126   : > { %2631 = vmatmul.msk.bf16.gmra.mxu3 %vm306_vm2, %v3188_v41 }
 0x127   : > { %2648 = vmatmul.msk.bf16.gmra.mxu0 %vm306_vm2, %v1167_v24  ;;  %v765_v48 = vpop.f32.mrf.mxu2  ;;  %v1168_v24 = vpack.c.bf16 %v1146_v27, %v1145_v25  ;;  %v223_v25 = vld [vmem:[%s2850_s27 + $0xe0] sm:$0xff]  ;;  %v224_v27 = vld [vmem:[%s2850_s27 + $0xe8] sm:$0xff] }
 0x128   : > { %v843_v16 = vadd.f32 %v765_v48, %v554_v37 }
 0x129   : > { %v555_v50 = vpop.f32.mrf.mxu1  ;;  %v1023_v53 = vpop.f32.mrf.mxu3 }
 0x12a   : > { %v1091_v56 = vadd.f32 %v1013_v17, %v843_v16  ;;  %v556_v42 = vadd.f32 %v555_v50, %v3099_v15 }
 0x12c   : > { %v1263_v18 = vpop.f32.mrf.mxu0  ;;  %v3200_v35 = vadd.f32 %v1261_v49, %v1091_v56  ;;  %v3208_v49 = vpack.c.bf16 %v902_v33, %v901_v32  ;;  %v903_v32 = vld [vmem:[%s2850_s27 + $0x112] sm:$0xff]  ;;  %v904_v33 = vld [vmem:[%s2850_s27 + $0x11a] sm:$0xff] }
 0x12f   : > { %v767_v1 = vpop.f32.mrf.mxu2 }
 0x130   : > { %v844_v22 = vadd.f32 %v767_v1, %v556_v42  ;;  %v1147_v42 = vld [vmem:[%s2850_s27 + $0xf3] sm:$0xff] }
 0x131   : > { %v558_v11 = vpop.f32.mrf.mxu1  ;;  %v1025_v17 = vpop.f32.mrf.mxu3 }
 0x132   : > { %v1092_v37 = vadd.f32 %v1015_v55, %v844_v22  ;;  %v559_v48 = vadd.f32 %v558_v11, %v2968_v52 }
 0x134   : > { %v1266_v3 = vpop.f32.mrf.mxu0  ;;  %2592 = vmatmul.msk.bf16.gmra.mxu1 %vm306_vm2, %v244_v20  ;;  %2611 = vmatmul.msk.bf16.gmra.mxu2 %vm306_vm2, %v3148_v34  ;;  %v3213_v15 = vadd.f32 %v1263_v18, %v1092_v37  ;;  %v1148_v18 = vld [vmem:[%s2850_s27 + $0xfb] sm:$0xff]  ;;  %v245_v20 = vpack.c.bf16 %v224_v27, %v223_v25 }
 0x136   : > { %2632 = vmatmul.msk.bf16.gmra.mxu3 %vm306_vm2, %v3208_v49 }
 0x137   : > { %2649 = vmatmul.msk.bf16.gmra.mxu0 %vm306_vm2, %v1168_v24  ;;  %v770_v16 = vpop.f32.mrf.mxu2  ;;  %v1169_v24 = vpack.c.bf16 %v1148_v18, %v1147_v42  ;;  %v225_v42 = vld [vmem:[%s2850_s27 + $0xf0] sm:$0xff]  ;;  %v226_v18 = vld [vmem:[%s2850_s27 + $0xf8] sm:$0xff] }
 0x138   : > { %v845_v55 = vadd.f32 %v770_v16, %v559_v48 }
 0x139   : > { %v560_v50 = vpop.f32.mrf.mxu1  ;;  %v1028_v62 = vpop.f32.mrf.mxu3 }
 0x13a   : > { %v1093_v9 = vadd.f32 %v1018_v51, %v845_v55  ;;  %v561_v1 = vadd.f32 %v560_v50, %v2983_v59 }
 0x13c   : > { %v1268_v56 = vpop.f32.mrf.mxu0  ;;  %v3220_v34 = vadd.f32 %v1266_v3, %v1093_v9  ;;  %v3228_v3 = vpack.c.bf16 %v904_v33, %v903_v32  ;;  %v905_v32 = vld [vmem:[%s2850_s27 + $0x122] sm:$0xff]  ;;  %v906_v33 = vld [vmem:[%s2850_s27 + $0x12a] sm:$0xff] }
 0x13f   : > { %v772_v52 = vpop.f32.mrf.mxu2 }
 0x140   : > { %v846_v22 = vadd.f32 %v772_v52, %v561_v1  ;;  %v1149_v1 = vld [vmem:[%s2850_s27 + $0x103] sm:$0xff] }
 0x141   : > { %v563_v11 = vpop.f32.mrf.mxu1  ;;  %v1030_v51 = vpop.f32.mrf.mxu3 }
 0x142   : > { %v1094_v48 = vadd.f32 %v1020_v63, %v846_v22  ;;  %v564_v16 = vadd.f32 %v563_v11, %v2995_v4 }
 0x144   : > { %v1271_v37 = vpop.f32.mrf.mxu0  ;;  %2593 = vmatmul.msk.bf16.gmra.mxu1 %vm306_vm2, %v245_v20  ;;  %2612 = vmatmul.msk.bf16.gmra.mxu2 %vm306_vm2, %v3168_v40  ;;  %v3233_v59 = vadd.f32 %v1268_v56, %v1094_v48  ;;  %v1150_v56 = vld [vmem:[%s2850_s27 + $0x10b] sm:$0xff]  ;;  %v246_v20 = vpack.c.bf16 %v226_v18, %v225_v42 }
 0x146   : > { %2633 = vmatmul.msk.bf16.gmra.mxu3 %vm306_vm2, %v3228_v3 }
 0x147   : > { %2650 = vmatmul.msk.bf16.gmra.mxu0 %vm306_vm2, %v1169_v24  ;;  %v775_v55 = vpop.f32.mrf.mxu2  ;;  %v1170_v24 = vpack.c.bf16 %v1150_v56, %v1149_v1  ;;  %v227_v1 = vld [vmem:[%s2850_s27 + $0x100] sm:$0xff]  ;;  %v228_v56 = vld [vmem:[%s2850_s27 + $0x108] sm:$0xff] }
 0x148   : > { %v847_v63 = vadd.f32 %v775_v55, %v564_v16 }
 0x149   : > { %v565_v50 = vpop.f32.mrf.mxu1  ;;  %v1033_v27 = vpop.f32.mrf.mxu3 }
 0x14a   : > { %v1095_v25 = vadd.f32 %v1023_v53, %v847_v63  ;;  %v566_v52 = vadd.f32 %v565_v50, %v3012_v12 }
 0x14c   : > { %v1273_v9 = vpop.f32.mrf.mxu0  ;;  %v3240_v40 = vadd.f32 %v1271_v37, %v1095_v25  ;;  %v924_v37 = vpack.c.bf16 %v906_v33, %v905_v32  ;;  %v1863_v32 = vld [vmem:[%s2850_s27 + $0x25] sm:$0xff]  ;;  %v1864_v33 = vld [vmem:[%s2850_s27 + $0x2d] sm:$0xff] }
 0x14f   : > { %v777_v4 = vpop.f32.mrf.mxu2 }
 0x150   : > { %v848_v22 = vadd.f32 %v777_v4, %v566_v52  ;;  %v1152_v4 = vld [vmem:[%s2850_s27 + $0x11b] sm:$0xff] }
 0x151   : > { %v568_v11 = vpop.f32.mrf.mxu1  ;;  %v1035_v53 = vpop.f32.mrf.mxu3 }
 0x152   : > { %v1096_v16 = vadd.f32 %v1025_v17, %v848_v22  ;;  %v569_v55 = vadd.f32 %v568_v11, %v3024_v21  ;;  %v247_v21 = vpack.c.bf16 %v228_v56, %v227_v1  ;;  %v229_v56 = vld [vmem:[%s2850_s27 + $0x110] sm:$0xff] }
 0x154   : > { %v1276_v48 = vpop.f32.mrf.mxu0  ;;  %2594 = vmatmul.msk.bf16.gmra.mxu1 %vm306_vm2, %v246_v20  ;;  %2613 = vmatmul.msk.bf16.gmra.mxu2 %vm306_vm2, %v3188_v41  ;;  %v3251_v12 = vadd.f32 %v1273_v9, %v1096_v16  ;;  %v1151_v41 = vld [vmem:[%s2850_s27 + $0x113] sm:$0xff] }
 0x156   : > { %2634 = vmatmul.msk.bf16.gmra.mxu3 %vm306_vm2, %v924_v37 }
 0x157   : > { %2651 = vmatmul.msk.bf16.gmra.mxu0 %vm306_vm2, %v1170_v24  ;;  %v780_v63 = vpop.f32.mrf.mxu2  ;;  %v1171_v24 = vpack.c.bf16 %v1152_v4, %v1151_v41  ;;  %v230_v41 = vld [vmem:[%s2850_s27 + $0x118] sm:$0xff] }
 0x158   : > { %v849_v17 = vadd.f32 %v780_v63, %v569_v55 }
 0x159   : > { %v570_v50 = vpop.f32.mrf.mxu1  ;;  %v1038_v18 = vpop.f32.mrf.mxu3 }
 0x15a   : > { %v1097_v42 = vadd.f32 %v1028_v62, %v849_v17  ;;  %v571_v9 = vadd.f32 %v570_v50, %v3041_v29 }
 0x15c   : > { %v1278_v25 = vpop.f32.mrf.mxu0  ;;  %v3257_v52 = vadd.f32 %v1276_v48, %v1097_v42  ;;  %v1899_v48 = vpack.c.bf16 %v1864_v33, %v1863_v32  ;;  %v1866_v32 = vld [vmem:[%s2850_s27 + $0x3d] sm:$0xff] }
 0x15f   : > { %v782_v20 = vpop.f32.mrf.mxu2 }
 0x160   : > { %v850_v22 = vadd.f32 %v782_v20, %v571_v9  ;;  %v1154_v9 = vld [vmem:[%s2850_s27 + $0x12b] sm:$0xff] }
 0x161   : > { %v573_v11 = vpop.f32.mrf.mxu1  ;;  %v1040_v62 = vpop.f32.mrf.mxu3 }
 0x162   : > { %v1098_v37 = vadd.f32 %v1030_v51, %v850_v22  ;;  %v574_v55 = vadd.f32 %v573_v11, %v3053_v38  ;;  %v248_v38 = vpack.c.bf16 %v230_v41, %v229_v56  ;;  %v1367_v56 = vld [vmem:[%s2850_s27 + $0x14] sm:$0xff]  ;;  %v1615_v41 = vld [vmem:[%s2850_s27 + $0x24] sm:$0xff] }
 0x164   : > { %v1281_v16 = vpop.f32.mrf.mxu0  ;;  %2595 = vmatmul.msk.bf16.gmra.mxu1 %vm306_vm2, %v247_v21  ;;  %2614 = vmatmul.msk.bf16.gmra.mxu2 %vm306_vm2, %v3208_v49  ;;  %v3268_v29 = vadd.f32 %v1278_v25, %v1098_v37  ;;  %v1153_v49 = vld [vmem:[%s2850_s27 + $0x123] sm:$0xff] }
 0x165   : > { %v1172_v11 = vpack.c.bf16 %v1154_v9, %v1153_v49  ;;  %v1616_v9 = vld [vmem:[%s2850_s27 + $0x2c] sm:$0xff] }
 0x166   : > { %2693 = vmatmul.msk.bf16.vlgmr.msra.gmra.mxu3 %vm306_vm2, %v1899_v48 }
 0x167   : > { %2652 = vmatmul.msk.bf16.gmra.mxu0 %vm306_vm2, %v1171_v24  ;;  %v785_v63 = vpop.f32.mrf.mxu2  ;;  %v1865_v24 = vld [vmem:[%s2850_s27 + $0x35] sm:$0xff] }
 0x168   : > { %v851_v51 = vadd.f32 %v785_v63, %v574_v55 }
 0x169   : > { %v575_v17 = vpop.f32.mrf.mxu1  ;;  %v1043_v1 = vpop.f32.mrf.mxu3 }
 0x16a   : > { %v1099_v42 = vadd.f32 %v1033_v27, %v851_v51  ;;  %v576_v25 = vadd.f32 %v575_v17, %v3071_v46 }
 0x16c   : > { %v1283_v50 = vpop.f32.mrf.mxu0  ;;  %v3274_v4 = vadd.f32 %v1281_v16, %v1099_v42  ;;  %v1900_v16 = vpack.c.bf16 %v1866_v32, %v1865_v24  ;;  %v1868_v32 = vld [vmem:[%s2850_s27 + $0x4d] sm:$0xff] }
 0x16f   : > { %v787_v20 = vpop.f32.mrf.mxu2 }
 0x170   : > { %v852_v21 = vadd.f32 %v787_v20, %v576_v25  ;;  %v2112_v25 = vld [vmem:[%s2850_s27 + $0x2e] sm:$0xff] }
 0x171   : > { %v578_v22 = vpop.f32.mrf.mxu1  ;;  %v1045_v27 = vpop.f32.mrf.mxu3 }
 0x172   : > { %v1100_v37 = vadd.f32 %v1035_v53, %v852_v21  ;;  %v579_v48 = vadd.f32 %v578_v22, %v3081_v57 }
 0x174   : > { %v1286_v33 = vpop.f32.mrf.mxu0  ;;  %2596 = vmatmul.msk.bf16.gmra.mxu1 %vm306_vm2, %v248_v38  ;;  %2615 = vmatmul.msk.bf16.gmra.mxu2 %vm306_vm2, %v3228_v3  ;;  %v3285_v46 = vadd.f32 %v1283_v50, %v1100_v37  ;;  %v1368_v3 = vld [vmem:[%s2850_s27 + $0x1c] sm:$0xff]  ;;  %v2111_v50 = vld [vmem:[%s2850_s27 + $0x26] sm:$0xff] }
 0x175   : > { %v1403_v38 = vpack.c.bf16 %v1368_v3, %v1367_v56  ;;  %v2147_v24 = vpack.c.bf16 %v2112_v25, %v2111_v50  ;;  %v1618_v50 = vld [vmem:[%s2850_s27 + $0x3c] sm:$0xff] }
 0x176   : > { %2694 = vmatmul.msk.bf16.gmra.mxu3 %vm306_vm2, %v1900_v16  ;;  %v2113_v25 = vld [vmem:[%s2850_s27 + $0x36] sm:$0xff] }
 0x177   : > { %2653 = vmatmul.msk.bf16.gmra.mxu0 %vm306_vm2, %v1172_v11  ;;  %v790_v55 = vpop.f32.mrf.mxu2  ;;  %v1651_v11 = vpack.c.bf16 %v1616_v9, %v1615_v41  ;;  %v1617_v41 = vld [vmem:[%s2850_s27 + $0x34] sm:$0xff] }
 0x178   : > { %v853_v53 = vadd.f32 %v790_v55, %v579_v48 }
 0x179   : > { %v580_v63 = vpop.f32.mrf.mxu1  ;;  %v1048_v42 = vpop.f32.mrf.mxu3 }
 0x17a   : > { %v1101_v17 = vadd.f32 %v1038_v18, %v853_v53  ;;  %v581_v57 = vadd.f32 %v580_v63, %v3097_v8  ;;  %v1867_v18 = vld [vmem:[%s2850_s27 + $0x45] sm:$0xff] }
 0x17c   : > { %v1288_v51 = vpop.f32.mrf.mxu0  ;;  %v3292_v49 = vadd.f32 %v1286_v33, %v1101_v17  ;;  %v1901_v33 = vpack.c.bf16 %v1868_v32, %v1867_v18  ;;  %v1870_v18 = vld [vmem:[%s2850_s27 + $0x5d] sm:$0xff] }
 0x17f   : > { %v792_v20 = vpop.f32.mrf.mxu2 }
 0x180   : > { %v854_v21 = vadd.f32 %v792_v20, %v581_v57  ;;  %v2114_v57 = vld [vmem:[%s2850_s27 + $0x3e] sm:$0xff] }
 0x181   : > { %v583_v22 = vpop.f32.mrf.mxu1  ;;  %v1050_v48 = vpop.f32.mrf.mxu3 }
 0x182   : > { %v1102_v16 = vadd.f32 %v1040_v62, %v854_v21  ;;  %v584_v55 = vadd.f32 %v583_v22, %v2979_v58  ;;  %v1652_v21 = vpack.c.bf16 %v1618_v50, %v1617_v41  ;;  %v2148_v22 = vpack.c.bf16 %v2114_v57, %v2113_v25  ;;  %v1620_v50 = vld [vmem:[%s2850_s27 + $0x4c] sm:$0xff] }
 0x183   : > { %v2115_v25 = vld [vmem:[%s2850_s27 + $0x46] sm:$0xff]  ;;  %v2116_v57 = vld [vmem:[%s2850_s27 + $0x4e] sm:$0xff] }
 0x184   : > { %v1291_v37 = vpop.f32.mrf.mxu0  ;;  %2655 = vmatmul.msk.bf16.vlgmr.msra.gmra.mxu1 %vm306_vm2, %v1403_v38  ;;  %2674 = vmatmul.msk.bf16.vlgmr.msra.gmra.mxu2 %vm306_vm2, %v1651_v11  ;;  %v3303_v8 = vadd.f32 %v1288_v51, %v1102_v16 }
 0x186   : > { %2695 = vmatmul.msk.bf16.gmra.mxu3 %vm306_vm2, %v1901_v33 }
 0x187   : > { %2712 = vmatmul.msk.bf16.vlgmr.msra.gmra.mxu0 %vm306_vm2, %v2147_v24  ;;  %v795_v53 = vpop.f32.mrf.mxu2  ;;  %v1869_v24 = vld [vmem:[%s2850_s27 + $0x55] sm:$0xff] }
 0x188   : > { %v855_v63 = vadd.f32 %v795_v53, %v584_v55 }
 0x189   : > { %v585_v62 = vpop.f32.mrf.mxu1  ;;  %v1053_v3 = vpop.f32.mrf.mxu3 }
 0x18a   : > { %v1103_v56 = vadd.f32 %v1043_v1, %v855_v63  ;;  %v586_v51 = vadd.f32 %v585_v62, %v2993_v2 }
 0x18c   : > { %v1293_v17 = vpop.f32.mrf.mxu0  ;;  %v3308_v9 = vadd.f32 %v1291_v37, %v1103_v56  ;;  %v1902_v37 = vpack.c.bf16 %v1870_v18, %v1869_v24  ;;  %v1619_v56 = vld [vmem:[%s2850_s27 + $0x44] sm:$0xff]  ;;  %v1872_v24 = vld [vmem:[%s2850_s27 + $0x6d] sm:$0xff] }
 0x18f   : > { %v797_v20 = vpop.f32.mrf.mxu2 }
 0x190   : > { %v856_v58 = vadd.f32 %v797_v20, %v586_v51 }
 0x191   : > { %v588_v38 = vpop.f32.mrf.mxu1  ;;  %v1055_v1 = vpop.f32.mrf.mxu3 }
 0x192   : > { %v1104_v16 = vadd.f32 %v1045_v27, %v856_v58  ;;  %v589_v33 = vadd.f32 %v588_v38, %v3008_v5  ;;  %v1653_v58 = vpack.c.bf16 %v1620_v50, %v1619_v56  ;;  %v2149_v38 = vpack.c.bf16 %v2116_v57, %v2115_v25  ;;  %v1622_v50 = vld [vmem:[%s2850_s27 + $0x5c] sm:$0xff] }
 0x193   : > { %v2117_v25 = vld [vmem:[%s2850_s27 + $0x56] sm:$0xff]  ;;  %v2118_v57 = vld [vmem:[%s2850_s27 + $0x5e] sm:$0xff] }
 0x194   : > { %v1296_v32 = vpop.f32.mrf.mxu0  ;;  %2656 = vmatmul.msk.bf16.gmra.mxu1 %vm306_vm2, %v1651_v11  ;;  %2675 = vmatmul.msk.bf16.gmra.mxu2 %vm306_vm2, %v1652_v21  ;;  %v3319_v2 = vadd.f32 %v1293_v17, %v1104_v16 }
 0x196   : > { %2696 = vmatmul.msk.bf16.gmra.mxu3 %vm306_vm2, %v1902_v37 }
 0x197   : > { %2713 = vmatmul.msk.bf16.gmra.mxu0 %vm306_vm2, %v2148_v22  ;;  %v800_v55 = vpop.f32.mrf.mxu2  ;;  %v1871_v22 = vld [vmem:[%s2850_s27 + $0x65] sm:$0xff] }
 0x198   : > { %v857_v53 = vadd.f32 %v800_v55, %v589_v33 }
 0x199   : > { %v590_v27 = vpop.f32.mrf.mxu1  ;;  %v1058_v62 = vpop.f32.mrf.mxu3 }
 0x19a   : > { %v1105_v11 = vadd.f32 %v1048_v42, %v857_v53  ;;  %v591_v17 = vadd.f32 %v590_v27, %v3022_v19 }
 0x19c   : > { %v1298_v63 = vpop.f32.mrf.mxu0  ;;  %v3324_v41 = vadd.f32 %v1296_v32, %v1105_v11  ;;  %v1903_v32 = vpack.c.bf16 %v1872_v24, %v1871_v22  ;;  %v1621_v11 = vld [vmem:[%s2850_s27 + $0x54] sm:$0xff]  ;;  %v1874_v22 = vld [vmem:[%s2850_s27 + $0x7d] sm:$0xff] }
 0x19f   : > { %v802_v51 = vpop.f32.mrf.mxu2 }
 0x1a0   : > { %v858_v5 = vadd.f32 %v802_v51, %v591_v17 }
 0x1a1   : > { %v593_v20 = vpop.f32.mrf.mxu1  ;;  %v1060_v42 = vpop.f32.mrf.mxu3 }
 0x1a2   : > { %v1106_v16 = vadd.f32 %v1050_v48, %v858_v5  ;;  %v594_v37 = vadd.f32 %v593_v20, %v3037_v28  ;;  %v1654_v5 = vpack.c.bf16 %v1622_v50, %v1621_v11  ;;  %v2150_v20 = vpack.c.bf16 %v2118_v57, %v2117_v25  ;;  %v1624_v50 = vld [vmem:[%s2850_s27 + $0x6c] sm:$0xff] }
 0x1a3   : > { %v2119_v25 = vld [vmem:[%s2850_s27 + $0x66] sm:$0xff]  ;;  %v2120_v57 = vld [vmem:[%s2850_s27 + $0x6e] sm:$0xff] }
 0x1a4   : > { %v1301_v18 = vpop.f32.mrf.mxu0  ;;  %2657 = vmatmul.msk.bf16.gmra.mxu1 %vm306_vm2, %v1652_v21  ;;  %2676 = vmatmul.msk.bf16.gmra.mxu2 %vm306_vm2, %v1653_v58  ;;  %v3335_v19 = vadd.f32 %v1298_v63, %v1106_v16 }
 0x1a6   : > { %2697 = vmatmul.msk.bf16.gmra.mxu3 %vm306_vm2, %v1903_v32 }
 0x1a7   : > { %2714 = vmatmul.msk.bf16.gmra.mxu0 %vm306_vm2, %v2149_v38  ;;  %v805_v33 = vpop.f32.mrf.mxu2  ;;  %v1873_v38 = vld [vmem:[%s2850_s27 + $0x75] sm:$0xff] }
 0x1a8   : > { %v859_v55 = vadd.f32 %v805_v33, %v594_v37 }
 0x1a9   : > { %v595_v48 = vpop.f32.mrf.mxu1  ;;  %v1063_v27 = vpop.f32.mrf.mxu3 }
 0x1aa   : > { %v1107_v21 = vadd.f32 %v1053_v3, %v859_v55  ;;  %v596_v63 = vadd.f32 %v595_v48, %v3051_v36 }
 0x1ac   : > { %v1303_v53 = vpop.f32.mrf.mxu0  ;;  %v3340_v56 = vadd.f32 %v1301_v18, %v1107_v21  ;;  %v1904_v18 = vpack.c.bf16 %v1874_v22, %v1873_v38  ;;  %v1623_v21 = vld [vmem:[%s2850_s27 + $0x64] sm:$0xff]  ;;  %v1876_v38 = vld [vmem:[%s2850_s27 + $0x8d] sm:$0xff] }
 0x1af   : > { %v807_v17 = vpop.f32.mrf.mxu2 }
 0x1b0   : > { %v860_v28 = vadd.f32 %v807_v17, %v596_v63 }
 0x1b1   : > { %v598_v51 = vpop.f32.mrf.mxu1  ;;  %v1065_v3 = vpop.f32.mrf.mxu3 }
 0x1b2   : > { %v1108_v16 = vadd.f32 %v1055_v1, %v860_v28  ;;  %v599_v32 = vadd.f32 %v598_v51, %v3067_v45  ;;  %v1655_v28 = vpack.c.bf16 %v1624_v50, %v1623_v21  ;;  %v2151_v51 = vpack.c.bf16 %v2120_v57, %v2119_v25  ;;  %v1626_v50 = vld [vmem:[%s2850_s27 + $0x7c] sm:$0xff] }
 0x1b3   : > { %v2121_v25 = vld [vmem:[%s2850_s27 + $0x76] sm:$0xff]  ;;  %v2122_v57 = vld [vmem:[%s2850_s27 + $0x7e] sm:$0xff] }
 0x1b4   : > { %v1306_v24 = vpop.f32.mrf.mxu0  ;;  %2658 = vmatmul.msk.bf16.gmra.mxu1 %vm306_vm2, %v1653_v58  ;;  %2677 = vmatmul.msk.bf16.gmra.mxu2 %vm306_vm2, %v1654_v5  ;;  %v3351_v36 = vadd.f32 %v1303_v53, %v1108_v16 }
 0x1b6   : > { %2698 = vmatmul.msk.bf16.gmra.mxu3 %vm306_vm2, %v1904_v18 }
 0x1b7   : > { %2715 = vmatmul.msk.bf16.gmra.mxu0 %vm306_vm2, %v2150_v20  ;;  %v810_v37 = vpop.f32.mrf.mxu2  ;;  %v1875_v20 = vld [vmem:[%s2850_s27 + $0x85] sm:$0xff] }
 0x1b8   : > { %v861_v33 = vadd.f32 %v810_v37, %v599_v32 }
 0x1b9   : > { %v600_v1 = vpop.f32.mrf.mxu1  ;;  %v1068_v48 = vpop.f32.mrf.mxu3 }
 0x1ba   : > { %v1109_v58 = vadd.f32 %v1058_v62, %v861_v33  ;;  %v601_v53 = vadd.f32 %v600_v1, %v3079_v54 }
 0x1bc   : > { %v1308_v55 = vpop.f32.mrf.mxu0  ;;  %v3356_v11 = vadd.f32 %v1306_v24, %v1109_v58  ;;  %v1905_v24 = vpack.c.bf16 %v1876_v38, %v1875_v20  ;;  %v1625_v58 = vld [vmem:[%s2850_s27 + $0x74] sm:$0xff]  ;;  %v1878_v20 = vld [vmem:[%s2850_s27 + $0x9d] sm:$0xff] }
 0x1bf   : > { %v812_v63 = vpop.f32.mrf.mxu2 }
 0x1c0   : > { %v862_v45 = vadd.f32 %v812_v63, %v601_v53 }
 0x1c1   : > { %v603_v17 = vpop.f32.mrf.mxu1  ;;  %v1070_v62 = vpop.f32.mrf.mxu3 }
 0x1c2   : > { %v1110_v16 = vadd.f32 %v1060_v42, %v862_v45  ;;  %v604_v18 = vadd.f32 %v603_v17, %v3093_v7  ;;  %v1656_v45 = vpack.c.bf16 %v1626_v50, %v1625_v58  ;;  %v2152_v17 = vpack.c.bf16 %v2122_v57, %v2121_v25  ;;  %v1628_v50 = vld [vmem:[%s2850_s27 + $0x8c] sm:$0xff] }
 0x1c3   : > { %v2123_v25 = vld [vmem:[%s2850_s27 + $0x86] sm:$0xff]  ;;  %v2124_v57 = vld [vmem:[%s2850_s27 + $0x8e] sm:$0xff] }
 0x1c4   : > { %v1311_v22 = vpop.f32.mrf.mxu0  ;;  %2659 = vmatmul.msk.bf16.gmra.mxu1 %vm306_vm2, %v1654_v5  ;;  %2678 = vmatmul.msk.bf16.gmra.mxu2 %vm306_vm2, %v1655_v28  ;;  %v3367_v54 = vadd.f32 %v1308_v55, %v1110_v16 }
 0x1c6   : > { %2699 = vmatmul.msk.bf16.gmra.mxu3 %vm306_vm2, %v1905_v24 }
 0x1c7   : > { %2716 = vmatmul.msk.bf16.gmra.mxu0 %vm306_vm2, %v2151_v51  ;;  %v815_v32 = vpop.f32.mrf.mxu2  ;;  %v1877_v51 = vld [vmem:[%s2850_s27 + $0x95] sm:$0xff] }
 0x1c8   : > { %v863_v37 = vadd.f32 %v815_v32, %v604_v18 }
 0x1c9   : > { %v605_v42 = vpop.f32.mrf.mxu1  ;;  %v1073_v1 = vpop.f32.mrf.mxu3 }
 0x1ca   : > { %v1111_v5 = vadd.f32 %v1063_v27, %v863_v37  ;;  %v606_v55 = vadd.f32 %v605_v42, %v3105_v23 }
 0x1cc   : > { %v1313_v33 = vpop.f32.mrf.mxu0  ;;  %v3372_v21 = vadd.f32 %v1311_v22, %v1111_v5  ;;  %v1906_v22 = vpack.c.bf16 %v1878_v20, %v1877_v51  ;;  %v1627_v5 = vld [vmem:[%s2850_s27 + $0x84] sm:$0xff]  ;;  %v1880_v51 = vld [vmem:[%s2850_s27 + $0xad] sm:$0xff] }
 0x1cf   : > { %v817_v53 = vpop.f32.mrf.mxu2 }
 0x1d0   : > { %v864_v7 = vadd.f32 %v817_v53, %v606_v55 }
 0x1d1   : > { %v608_v63 = vpop.f32.mrf.mxu1  ;;  %v1075_v27 = vpop.f32.mrf.mxu3 }
 0x1d2   : > { %v1112_v16 = vadd.f32 %v1065_v3, %v864_v7  ;;  %v609_v24 = vadd.f32 %v608_v63, %v2987_v61  ;;  %v1657_v7 = vpack.c.bf16 %v1628_v50, %v1627_v5  ;;  %v2153_v63 = vpack.c.bf16 %v2124_v57, %v2123_v25  ;;  %v1630_v50 = vld [vmem:[%s2850_s27 + $0x9c] sm:$0xff] }
 0x1d3   : > { %v2125_v25 = vld [vmem:[%s2850_s27 + $0x96] sm:$0xff]  ;;  %v2126_v57 = vld [vmem:[%s2850_s27 + $0x9e] sm:$0xff] }
 0x1d4   : > { %v1316_v38 = vpop.f32.mrf.mxu0  ;;  %2660 = vmatmul.msk.bf16.gmra.mxu1 %vm306_vm2, %v1655_v28  ;;  %2679 = vmatmul.msk.bf16.gmra.mxu2 %vm306_vm2, %v1656_v45  ;;  %v3383_v23 = vadd.f32 %v1313_v33, %v1112_v16 }
 0x1d6   : > { %2700 = vmatmul.msk.bf16.gmra.mxu3 %vm306_vm2, %v1906_v22 }
 0x1d7   : > { %2717 = vmatmul.msk.bf16.gmra.mxu0 %vm306_vm2, %v2152_v17  ;;  %v820_v18 = vpop.f32.mrf.mxu2  ;;  %v1879_v17 = vld [vmem:[%s2850_s27 + $0xa5] sm:$0xff] }
 0x1d8   : > { %v865_v32 = vadd.f32 %v820_v18, %v609_v24 }
 0x1d9   : > { %v610_v3 = vpop.f32.mrf.mxu1  ;;  %v1078_v42 = vpop.f32.mrf.mxu3 }
 0x1da   : > { %v1113_v28 = vadd.f32 %v1068_v48, %v865_v32  ;;  %v611_v33 = vadd.f32 %v610_v3, %v3001_v10 }
 0x1dc   : > { %v1318_v37 = vpop.f32.mrf.mxu0  ;;  %v3388_v58 = vadd.f32 %v1316_v38, %v1113_v28  ;;  %v1907_v38 = vpack.c.bf16 %v1880_v51, %v1879_v17  ;;  %v1629_v28 = vld [vmem:[%s2850_s27 + $0x94] sm:$0xff]  ;;  %v1882_v17 = vld [vmem:[%s2850_s27 + $0xbd] sm:$0xff] }
 0x1df   : > { %v822_v55 = vpop.f32.mrf.mxu2 }
 0x1e0   : > { %v866_v61 = vadd.f32 %v822_v55, %v611_v33 }
 0x1e1   : > { %v613_v53 = vpop.f32.mrf.mxu1  ;;  %v1080_v48 = vpop.f32.mrf.mxu3 }
 0x1e2   : > { %v1114_v16 = vadd.f32 %v1070_v62, %v866_v61  ;;  %v614_v22 = vadd.f32 %v613_v53, %v3016_v14  ;;  %v1658_v61 = vpack.c.bf16 %v1630_v50, %v1629_v28  ;;  %v2154_v53 = vpack.c.bf16 %v2126_v57, %v2125_v25  ;;  %v1632_v50 = vld [vmem:[%s2850_s27 + $0xac] sm:$0xff] }
 0x1e3   : > { %v2127_v25 = vld [vmem:[%s2850_s27 + $0xa6] sm:$0xff] }
 0x1e4   : > { %v1321_v20 = vpop.f32.mrf.mxu0  ;;  %2661 = vmatmul.msk.bf16.gmra.mxu1 %vm306_vm2, %v1656_v45  ;;  %2680 = vmatmul.msk.bf16.gmra.mxu2 %vm306_vm2, %v1657_v7  ;;  %v3399_v10 = vadd.f32 %v1318_v37, %v1114_v16 }
 0x1e6   : > { %2701 = vmatmul.msk.bf16.gmra.mxu3 %vm306_vm2, %v1907_v38 }
 0x1e7   : > { %2718 = vmatmul.msk.bf16.gmra.mxu0 %vm306_vm2, %v2153_v63  ;;  %v825_v24 = vpop.f32.mrf.mxu2  ;;  %v1881_v63 = vld [vmem:[%s2850_s27 + $0xb5] sm:$0xff] }
 0x1e8   : > { %v867_v18 = vadd.f32 %v825_v24, %v614_v22 }
 0x1e9   : > { %v615_v62 = vpop.f32.mrf.mxu1  ;;  %v1985_v3 = vpop.f32.mrf.mxu3 }
 0x1ea   : > { %v1115_v45 = vadd.f32 %v1073_v1, %v867_v18  ;;  %v616_v37 = vadd.f32 %v615_v62, %v3030_v26 }
 0x1ec   : > { %v1323_v32 = vpop.f32.mrf.mxu0  ;;  %v3404_v5 = vadd.f32 %v1321_v20, %v1115_v45  ;;  %v1908_v20 = vpack.c.bf16 %v1882_v17, %v1881_v63  ;;  %v1631_v45 = vld [vmem:[%s2850_s27 + $0xa4] sm:$0xff]  ;;  %v1884_v63 = vld [vmem:[%s2850_s27 + $0xcd] sm:$0xff] }
 0x1ef   : > { %v827_v33 = vpop.f32.mrf.mxu2 }
 0x1f0   : > { %v868_v14 = vadd.f32 %v827_v33, %v616_v37 }
 0x1f1   : > { %v618_v55 = vpop.f32.mrf.mxu1  ;;  %v3412_v1 = vpop.f32.mrf.mxu3 }
 0x1f2   : > { %v1116_v16 = vadd.f32 %v1075_v27, %v868_v14  ;;  %v619_v38 = vadd.f32 %v618_v55, %v3045_v31  ;;  %v1659_v14 = vpack.c.bf16 %v1632_v50, %v1631_v45  ;;  %v1633_v45 = vld [vmem:[%s2850_s27 + $0xb4] sm:$0xff] }
 0x1f3   : > { %v2129_v50 = vld [vmem:[%s2850_s27 + $0xb6] sm:$0xff] }
 0x1f4   : > { %v1326_v51 = vpop.f32.mrf.mxu0  ;;  %2662 = vmatmul.msk.bf16.gmra.mxu1 %vm306_vm2, %v1657_v7  ;;  %2681 = vmatmul.msk.bf16.gmra.mxu2 %vm306_vm2, %v1658_v61  ;;  %v3417_v26 = vadd.f32 %v1323_v32, %v1116_v16  ;;  %v2128_v32 = vld [vmem:[%s2850_s27 + $0xae] sm:$0xff] }
 0x1f5   : > { %v2155_v55 = vpack.c.bf16 %v2128_v32, %v2127_v25  ;;  %v2130_v25 = vld [vmem:[%s2850_s27 + $0xbe] sm:$0xff] }
 0x1f6   : > { %2702 = vmatmul.msk.bf16.gmra.mxu3 %vm306_vm2, %v1908_v20 }
 0x1f7   : > { %2719 = vmatmul.msk.bf16.gmra.mxu0 %vm306_vm2, %v2154_v53  ;;  %v830_v22 = vpop.f32.mrf.mxu2  ;;  %v1883_v53 = vld [vmem:[%s2850_s27 + $0xc5] sm:$0xff] }
 0x1f8   : > { %v869_v27 = vadd.f32 %v830_v22, %v619_v38 }
 0x1f9   : > { %v620_v24 = vpop.f32.mrf.mxu1  ;;  %v3421_v62 = vpop.f32.mrf.mxu3 }
 0x1fa   : > { %v1117_v7 = vadd.f32 %v1078_v42, %v869_v27  ;;  %v621_v57 = vadd.f32 %v620_v24, %v3059_v43  ;;  %v3444_v24 = vld [vmem:[%s3735_s2] ss:$0 sm:$0xff] }
 0x1fc   : > { %v1328_v18 = vpop.f32.mrf.mxu0  ;;  %v3424_v28 = vadd.f32 %v1326_v51, %v1117_v7  ;;  %v1909_v51 = vpack.c.bf16 %v1884_v63, %v1883_v53  ;;  %v2156_v53 = vpack.c.bf16 %v2130_v25, %v2129_v50  ;;  %v1885_v63 = vld [vmem:[%s2850_s27 + $0xd5] sm:$0xff]  ;;  %v1635_v25 = vld [vmem:[%s2850_s27 + $0xc4] sm:$0xff] }
 0x1ff   : > { %v832_v31 = vpop.f32.mrf.mxu2 }
 0x200   : > { %v870_v37 = vadd.f32 %v832_v31, %v621_v57 }
 0x201   : > { %v1489_v33 = vpop.f32.mrf.mxu1  ;;  %v3432_v42 = vpop.f32.mrf.mxu3 }
 0x202   : > { %v1118_v16 = vadd.f32 %v1080_v48, %v870_v37  ;;  %v1579_v20 = vadd.f32 %v1489_v33, %v3120_v0  ;;  %v1634_v0 = vld [vmem:[%s2850_s27 + $0xbc] sm:$0xff] }
 0x204   : > { %v2233_v17 = vpop.f32.mrf.mxu0  ;;  %2663 = vmatmul.msk.bf16.gmra.mxu1 %vm306_vm2, %v1658_v61  ;;  %2682 = vmatmul.msk.bf16.gmra.mxu2 %vm306_vm2, %v1659_v14  ;;  %v3437_v43 = vadd.f32 %v1328_v18, %v1118_v16 }
 0x206   : > { %2703 = vmatmul.msk.bf16.gmra.mxu3 %vm306_vm2, %v1909_v51 }
 0x207   : > { %2720 = vmatmul.msk.bf16.gmra.mxu0 %vm306_vm2, %v2155_v55  ;;  %v1737_v38 = vpop.f32.mrf.mxu2  ;;  %v1660_v55 = vpack.c.bf16 %v1634_v0, %v1633_v45 }
 0x208   : > { %v1827_v48 = vadd.f32 %v1737_v38, %v1579_v20 }
 0x209   : > { %v1491_v22 = vpop.f32.mrf.mxu1  ;;  %v3446_v7 = vpop.f32.mrf.mxu3 }
 0x20a   : > { %v2075_v61 = vadd.f32 %v1985_v3, %v1827_v48  ;;  %v1580_v57 = vadd.f32 %v1491_v22, %v3133_v60 }
 0x20c   : > { %v2235_v27 = vpop.f32.mrf.mxu0  ;;  %v2323_v18 = vadd.f32 %v2233_v17, %v2075_v61  ;;  %v1886_v17 = vld [vmem:[%s2850_s27 + $0xdd] sm:$0xff] }
 0x20d   : > { %v1910_v20 = vpack.c.bf16 %v1886_v17, %v1885_v63 }
 0x20e   : > { %v2363_v32 = vadd.f32 %v3444_v24, %v2323_v18 }
 0x20f   : > { %v1739_v3 = vpop.f32.mrf.mxu2 }
 0x210   : > { %v2399_v31 = vmax.f32 %v2363_v32, 0.0  ;;  %v1828_v37 = vadd.f32 %v1739_v3, %v1580_v57  ;;  %v1636_v32 = vld [vmem:[%s2850_s27 + $0xcc] sm:$0xff] }
 0x211   : > { %v1494_v33 = vpop.f32.mrf.mxu1  ;;  %v3465_v51 = vpop.f32.mrf.mxu3  ;;  %v2132_v57 = vld [vmem:[%s2850_s27 + $0xce] sm:$0xff]  ;;  %v1661_v17 = vpack.c.bf16 %v1636_v32, %v1635_v25 }
 0x212   : > { %2436 = vst.msk [vmem:[%s3458_s20] sm:$0xff] %vm2435_vm3, %v2399_v31  ;;  %v2076_v60 = vadd.f32 %v3412_v1, %v1828_v37  ;;  %v1581_v22 = vadd.f32 %v1494_v33, %v3140_v44  ;;  %v2131_v44 = vld [vmem:[%s2850_s27 + $0xc6] sm:$0xff]  ;;  %v1637_v32 = vld [vmem:[%s2850_s27 + $0xd4] sm:$0xff] }
 0x214   : > { %v2238_v16 = vpop.f32.mrf.mxu0  ;;  %2664 = vmatmul.msk.bf16.gmra.mxu1 %vm306_vm2, %v1659_v14  ;;  %v2324_v38 = vadd.f32 %v2235_v27, %v2076_v60  ;;  %2683 = vmatmul.msk.bf16.gmra.mxu2 %vm306_vm2, %v1660_v55  ;;  %v2157_v60 = vpack.c.bf16 %v2132_v57, %v2131_v44  ;;  %v1638_v44 = vld [vmem:[%s2850_s27 + $0xdc] sm:$0xff] }
 0x215   : > { %v2134_v57 = vld [vmem:[%s2850_s27 + $0xde] sm:$0xff] }
 0x216   : > { %v2364_v48 = vadd.f32 %v3444_v24, %v2324_v38  ;;  %2704 = vmatmul.msk.bf16.gmra.mxu3 %vm306_vm2, %v1910_v20  ;;  %v1888_v20 = vld [vmem:[%s2850_s27 + $0xed] sm:$0xff] }
 0x217   : > { %2721 = vmatmul.msk.bf16.gmra.mxu0 %vm306_vm2, %v2156_v53  ;;  %v1742_v61 = vpop.f32.mrf.mxu2 }
 0x218   : > { %v2400_v1 = vmax.f32 %v2364_v48, 0.0  ;;  %v1829_v18 = vadd.f32 %v1742_v61, %v1581_v22 }
 0x219   : > { %v1496_v14 = vpop.f32.mrf.mxu1  ;;  %v3476_v0 = vpop.f32.mrf.mxu3 }
 0x21a   : > { %2437 = vst.msk [vmem:[%s3458_s20 + $0x8] sm:$0xff] %vm2435_vm3, %v2400_v1  ;;  %v2077_v27 = vadd.f32 %v3421_v62, %v1829_v18  ;;  %v1582_v31 = vadd.f32 %v1496_v14, %v3153_v13  ;;  %v1887_v62 = vld [vmem:[%s2850_s27 + $0xe5] sm:$0xff] }
 0x21b   : > { %v1911_v22 = vpack.c.bf16 %v1888_v20, %v1887_v62  ;;  %v1890_v20 = vld [vmem:[%s2850_s27 + $0xfd] sm:$0xff] }
 0x21c   : > { %v2240_v45 = vpop.f32.mrf.mxu0  ;;  %v2325_v50 = vadd.f32 %v2238_v16, %v2077_v27 }
 0x21e   : > { %v2365_v3 = vadd.f32 %v3444_v24, %v2325_v50 }
 0x21f   : > { %v1744_v37 = vpop.f32.mrf.mxu2 }
 0x220   : > { %v2401_v33 = vmax.f32 %v2365_v3, 0.0  ;;  %v1830_v53 = vadd.f32 %v1744_v37, %v1582_v31 }
 0x221   : > { %v1499_v63 = vpop.f32.mrf.mxu1  ;;  %v3489_v48 = vpop.f32.mrf.mxu3 }
 0x222   : > { %2438 = vst.msk [vmem:[%s3458_s20 + $0x10] sm:$0xff] %vm2435_vm3, %v2401_v33  ;;  %v2078_v16 = vadd.f32 %v3432_v42, %v1830_v53  ;;  %v1583_v1 = vadd.f32 %v1499_v63, %v3160_v6  ;;  %v2133_v6 = vld [vmem:[%s2850_s27 + $0xd6] sm:$0xff] }
 0x223   : > { %v2158_v62 = vpack.c.bf16 %v2134_v57, %v2133_v6 }
 0x224   : > { %v2243_v38 = vpop.f32.mrf.mxu0  ;;  %2665 = vmatmul.msk.bf16.gmra.mxu1 %vm306_vm2, %v1660_v55  ;;  %v2326_v13 = vadd.f32 %v2240_v45, %v2078_v16  ;;  %2684 = vmatmul.msk.bf16.gmra.mxu2 %vm306_vm2, %v1661_v17 }
 0x226   : > { %v2366_v61 = vadd.f32 %v3444_v24, %v2326_v13  ;;  %2705 = vmatmul.msk.bf16.gmra.mxu3 %vm306_vm2, %v1911_v22 }
 0x227   : > { %2722 = vmatmul.msk.bf16.gmra.mxu0 %vm306_vm2, %v2157_v60  ;;  %v1747_v18 = vpop.f32.mrf.mxu2  ;;  %v1662_v60 = vpack.c.bf16 %v1638_v44, %v1637_v32  ;;  %v1640_v32 = vld [vmem:[%s2850_s27 + $0xec] sm:$0xff] }
 0x228   : > { %v2402_v42 = vmax.f32 %v2366_v61, 0.0  ;;  %v1831_v14 = vadd.f32 %v1747_v18, %v1583_v1  ;;  %v2136_v44 = vld [vmem:[%s2850_s27 + $0xee] sm:$0xff] }
 0x229   : > { %v1501_v55 = vpop.f32.mrf.mxu1  ;;  %v3500_v50 = vpop.f32.mrf.mxu3 }
 0x22a   : > { %2439 = vst.msk [vmem:[%s3458_s20 + $0x18] sm:$0xff] %vm2435_vm3, %v2402_v42  ;;  %v2079_v45 = vadd.f32 %v3446_v7, %v1831_v14  ;;  %v1584_v31 = vadd.f32 %v1501_v55, %v3173_v30  ;;  %v1889_v7 = vld [vmem:[%s2850_s27 + $0xf5] sm:$0xff] }
 0x22b   : > { %v1912_v13 = vpack.c.bf16 %v1890_v20, %v1889_v7 }
 0x22c   : > { %v2245_v27 = vpop.f32.mrf.mxu0  ;;  %v2327_v25 = vadd.f32 %v2243_v38, %v2079_v45 }
 0x22e   : > { %v2367_v3 = vadd.f32 %v3444_v24, %v2327_v25  ;;  %v1639_v25 = vld [vmem:[%s2850_s27 + $0xe4] sm:$0xff] }
 0x22f   : > { %v1749_v37 = vpop.f32.mrf.mxu2 }
 0x230   : > { %v2403_v33 = vmax.f32 %v2367_v3, 0.0  ;;  %v1832_v53 = vadd.f32 %v1749_v37, %v1584_v31 }
 0x231   : > { %v1504_v63 = vpop.f32.mrf.mxu1  ;;  %v3513_v22 = vpop.f32.mrf.mxu3 }
 0x232   : > { %2440 = vst.msk [vmem:[%s3458_s20 + $0x20] sm:$0xff] %vm2435_vm3, %v2403_v33  ;;  %v2080_v38 = vadd.f32 %v3465_v51, %v1832_v53  ;;  %v1585_v1 = vadd.f32 %v1504_v63, %v3180_v39  ;;  %v2135_v39 = vld [vmem:[%s2850_s27 + $0xe6] sm:$0xff]  ;;  %v1663_v53 = vpack.c.bf16 %v1640_v32, %v1639_v25 }
 0x233   : > { %v2159_v63 = vpack.c.bf16 %v2136_v44, %v2135_v39 }
 0x234   : > { %v2248_v16 = vpop.f32.mrf.mxu0  ;;  %2666 = vmatmul.msk.bf16.gmra.mxu1 %vm306_vm2, %v1661_v17  ;;  %v2328_v30 = vadd.f32 %v2245_v27, %v2080_v38  ;;  %2685 = vmatmul.msk.bf16.gmra.mxu2 %vm306_vm2, %v1662_v60 }
 0x236   : > { %v2368_v61 = vadd.f32 %v3444_v24, %v2328_v30  ;;  %2706 = vmatmul.msk.bf16.gmra.mxu3 %vm306_vm2, %v1912_v13 }
 0x237   : > { %2723 = vmatmul.msk.bf16.gmra.mxu0 %vm306_vm2, %v2158_v62  ;;  %v1752_v18 = vpop.f32.mrf.mxu2  ;;  %v1892_v62 = vld [vmem:[%s2850_s27 + $0x10d] sm:$0xff] }
 0x238   : > { %v2404_v51 = vmax.f32 %v2368_v61, 0.0  ;;  %v1833_v42 = vadd.f32 %v1752_v18, %v1585_v1 }
 0x239   : > { %v1506_v17 = vpop.f32.mrf.mxu1  ;;  %v3524_v27 = vpop.f32.mrf.mxu3 }
 0x23a   : > { %2441 = vst.msk [vmem:[%s3458_s20 + $0x28] sm:$0xff] %vm2435_vm3, %v2404_v51  ;;  %v2081_v55 = vadd.f32 %v3476_v0, %v1833_v42  ;;  %v1586_v57 = vadd.f32 %v1506_v17, %v3193_v47  ;;  %v1891_v0 = vld [vmem:[%s2850_s27 + $0x105] sm:$0xff] }
 0x23b   : > { %v1913_v38 = vpack.c.bf16 %v1892_v62, %v1891_v0 }
 0x23c   : > { %v2250_v14 = vpop.f32.mrf.mxu0  ;;  %v2329_v45 = vadd.f32 %v2248_v16, %v2081_v55  ;;  %v1642_v55 = vld [vmem:[%s2850_s27 + $0xfc] sm:$0xff] }
 0x23e   : > { %v2369_v6 = vadd.f32 %v3444_v24, %v2329_v45  ;;  %v2138_v45 = vld [vmem:[%s2850_s27 + $0xfe] sm:$0xff] }
 0x23f   : > { %v1754_v3 = vpop.f32.mrf.mxu2 }
 0x240   : > { %v2405_v31 = vmax.f32 %v2369_v6, 0.0  ;;  %v1834_v37 = vadd.f32 %v1754_v3, %v1586_v57 }
 0x241   : > { %v1509_v33 = vpop.f32.mrf.mxu1  ;;  %v3537_v16 = vpop.f32.mrf.mxu3 }
 0x242   : > { %2442 = vst.msk [vmem:[%s3458_s20 + $0x30] sm:$0xff] %vm2435_vm3, %v2405_v31  ;;  %v2082_v20 = vadd.f32 %v3489_v48, %v1834_v37  ;;  %v1587_v30 = vadd.f32 %v1509_v33, %v3200_v35  ;;  %v2137_v35 = vld [vmem:[%s2850_s27 + $0xf6] sm:$0xff] }
 0x243   : > { %v2160_v31 = vpack.c.bf16 %v2138_v45, %v2137_v35  ;;  %v1894_v37 = vld [vmem:[%s2850_s27 + $0x11d] sm:$0xff] }
 0x244   : > { %v2253_v7 = vpop.f32.mrf.mxu0  ;;  %2667 = vmatmul.msk.bf16.gmra.mxu1 %vm306_vm2, %v1662_v60  ;;  %v2330_v47 = vadd.f32 %v2250_v14, %v2082_v20  ;;  %2686 = vmatmul.msk.bf16.gmra.mxu2 %vm306_vm2, %v1663_v53  ;;  %v1641_v14 = vld [vmem:[%s2850_s27 + $0xf4] sm:$0xff] }
 0x245   : > { %v1664_v3 = vpack.c.bf16 %v1642_v55, %v1641_v14 }
 0x246   : > { %v2370_v13 = vadd.f32 %v3444_v24, %v2330_v47  ;;  %2707 = vmatmul.msk.bf16.gmra.mxu3 %vm306_vm2, %v1913_v38 }
 0x247   : > { %2724 = vmatmul.msk.bf16.gmra.mxu0 %vm306_vm2, %v2159_v63  ;;  %v1757_v61 = vpop.f32.mrf.mxu2 }
 0x248   : > { %v2406_v48 = vmax.f32 %v2370_v13, 0.0  ;;  %v1835_v1 = vadd.f32 %v1757_v61, %v1587_v30 }
 0x249   : > { %v1511_v60 = vpop.f32.mrf.mxu1  ;;  %v3548_v42 = vpop.f32.mrf.mxu3 }
 0x24a   : > { %2443 = vst.msk [vmem:[%s3458_s20 + $0x38] sm:$0xff] %vm2435_vm3, %v2406_v48  ;;  %v2083_v51 = vadd.f32 %v3500_v50, %v1835_v1  ;;  %v1588_v32 = vadd.f32 %v1511_v60, %v3213_v15  ;;  %v1893_v50 = vld [vmem:[%s2850_s27 + $0x115] sm:$0xff]  ;;  %v1643_v1 = vld [vmem:[%s2850_s27 + $0x104] sm:$0xff]  ;;  %v1644_v60 = vld [vmem:[%s2850_s27 + $0x10c] sm:$0xff] }
 0x24b   : > { %v1914_v62 = vpack.c.bf16 %v1894_v37, %v1893_v50 }
 0x24c   : > { %v2255_v18 = vpop.f32.mrf.mxu0  ;;  %v2331_v17 = vadd.f32 %v2253_v7, %v2083_v51 }
 0x24e   : > { %v2371_v25 = vadd.f32 %v3444_v24, %v2331_v17 }
 0x24f   : > { %v1759_v39 = vpop.f32.mrf.mxu2 }
 0x250   : > { %v2407_v44 = vmax.f32 %v2371_v25, 0.0  ;;  %v1836_v6 = vadd.f32 %v1759_v39, %v1588_v32  ;;  %v1665_v25 = vpack.c.bf16 %v1644_v60, %v1643_v1  ;;  %v1896_v39 = vld [vmem:[%s2850_s27 + $0x12d] sm:$0xff] }
 0x251   : > { %v1514_v57 = vpop.f32.mrf.mxu1  ;;  %v3561_v0 = vpop.f32.mrf.mxu3 }
 0x252   : > { %2444 = vst.msk [vmem:[%s3458_s20 + $0x40] sm:$0xff] %vm2435_vm3, %v2407_v44  ;;  %v2084_v63 = vadd.f32 %v3513_v22, %v1836_v6  ;;  %v1589_v20 = vadd.f32 %v1514_v57, %v3220_v34  ;;  %v2139_v34 = vld [vmem:[%s2850_s27 + $0x106] sm:$0xff] }
 0x254   : > { %v2258_v33 = vpop.f32.mrf.mxu0  ;;  %2668 = vmatmul.msk.bf16.gmra.mxu1 %vm306_vm2, %v1663_v53  ;;  %v2332_v15 = vadd.f32 %v2255_v18, %v2084_v63  ;;  %2687 = vmatmul.msk.bf16.gmra.mxu2 %vm306_vm2, %v1664_v3  ;;  %v2140_v18 = vld [vmem:[%s2850_s27 + $0x10e] sm:$0xff] }
 0x255   : > { %v2161_v32 = vpack.c.bf16 %v2140_v18, %v2139_v34 }
 0x256   : > { %v2372_v7 = vadd.f32 %v3444_v24, %v2332_v15  ;;  %2708 = vmatmul.msk.bf16.gmra.mxu3 %vm306_vm2, %v1914_v62 }
 0x257   : > { %2725 = vmatmul.msk.bf16.gmra.mxu0 %vm306_vm2, %v2160_v31  ;;  %v1762_v38 = vpop.f32.mrf.mxu2 }
 0x258   : > { %v2408_v22 = vmax.f32 %v2372_v7, 0.0  ;;  %v1837_v47 = vadd.f32 %v1762_v38, %v1589_v20  ;;  %v1645_v38 = vld [vmem:[%s2850_s27 + $0x114] sm:$0xff] }
 0x259   : > { %v1516_v53 = vpop.f32.mrf.mxu1  ;;  %v3572_v61 = vpop.f32.mrf.mxu3 }
 0x25a   : > { %2445 = vst.msk [vmem:[%s3458_s20 + $0x48] sm:$0xff] %vm2435_vm3, %v2408_v22  ;;  %v2085_v30 = vadd.f32 %v3524_v27, %v1837_v47  ;;  %v1590_v17 = vadd.f32 %v1516_v53, %v3233_v59  ;;  %v1895_v27 = vld [vmem:[%s2850_s27 + $0x125] sm:$0xff]  ;;  %v1646_v22 = vld [vmem:[%s2850_s27 + $0x11c] sm:$0xff] }
 0x25b   : > { %v1915_v31 = vpack.c.bf16 %v1896_v39, %v1895_v27  ;;  %v2142_v47 = vld [vmem:[%s2850_s27 + $0x11e] sm:$0xff]  ;;  %v1666_v34 = vpack.c.bf16 %v1646_v22, %v1645_v38 }
 0x25c   : > { %v2260_v13 = vpop.f32.mrf.mxu0  ;;  %v2333_v48 = vadd.f32 %v2258_v33, %v2085_v30 }
 0x25e   : > { %v2373_v51 = vadd.f32 %v3444_v24, %v2333_v48 }
 0x25f   : > { %v1764_v14 = vpop.f32.mrf.mxu2 }
 0x260   : > { %v2409_v55 = vmax.f32 %v2373_v51, 0.0  ;;  %v1838_v35 = vadd.f32 %v1764_v14, %v1590_v17  ;;  %v1898_v51 = vld [vmem:[%s2850_s27 + $0x13d] sm:$0xff] }
 0x261   : > { %v1519_v45 = vpop.f32.mrf.mxu1  ;;  %v3585_v57 = vpop.f32.mrf.mxu3 }
 0x262   : > { %2446 = vst.msk [vmem:[%s3458_s20 + $0x50] sm:$0xff] %vm2435_vm3, %v2409_v55  ;;  %v2086_v6 = vadd.f32 %v3537_v16, %v1838_v35  ;;  %v1591_v37 = vadd.f32 %v1519_v45, %v3240_v40  ;;  %v2141_v40 = vld [vmem:[%s2850_s27 + $0x116] sm:$0xff] }
 0x263   : > { %v2162_v18 = vpack.c.bf16 %v2142_v47, %v2141_v40 }
 0x264   : > { %v2263_v44 = vpop.f32.mrf.mxu0  ;;  %2669 = vmatmul.msk.bf16.gmra.mxu1 %vm306_vm2, %v1664_v3  ;;  %v2334_v59 = vadd.f32 %v2260_v13, %v2086_v6  ;;  %2688 = vmatmul.msk.bf16.gmra.mxu2 %vm306_vm2, %v1665_v25 }
 0x266   : > { %v2374_v50 = vadd.f32 %v3444_v24, %v2334_v59  ;;  %2709 = vmatmul.msk.bf16.gmra.mxu3 %vm306_vm2, %v1915_v31 }
 0x267   : > { %2726 = vmatmul.msk.bf16.gmra.mxu0 %vm306_vm2, %v2161_v32  ;;  %v1767_v33 = vpop.f32.mrf.mxu2 }
 0x268   : > { %v2410_v16 = vmax.f32 %v2374_v50, 0.0  ;;  %v1839_v63 = vadd.f32 %v1767_v33, %v1591_v37  ;;  %v1647_v50 = vld [vmem:[%s2850_s27 + $0x124] sm:$0xff]  ;;  %v1648_v37 = vld [vmem:[%s2850_s27 + $0x12c] sm:$0xff] }
 0x269   : > { %v1521_v3 = vpop.f32.mrf.mxu1  ;;  %v3596_v7 = vpop.f32.mrf.mxu3  ;;  %v2143_v33 = vld [vmem:[%s2850_s27 + $0x126] sm:$0xff]  ;;  %v1667_v38 = vpack.c.bf16 %v1648_v37, %v1647_v50 }
 0x26a   : > { %2447 = vst.msk [vmem:[%s3458_s20 + $0x58] sm:$0xff] %vm2435_vm3, %v2410_v16  ;;  %v2087_v15 = vadd.f32 %v3548_v42, %v1839_v63  ;;  %v1592_v13 = vadd.f32 %v1521_v3, %v3251_v12  ;;  %v1897_v42 = vld [vmem:[%s2850_s27 + $0x135] sm:$0xff] }
 0x26b   : > { %v1916_v35 = vpack.c.bf16 %v1898_v51, %v1897_v42  ;;  %v2144_v16 = vld [vmem:[%s2850_s27 + $0x12e] sm:$0xff] }
 0x26c   : > { %v2265_v62 = vpop.f32.mrf.mxu0  ;;  %v2335_v20 = vadd.f32 %v2263_v44, %v2087_v15  ;;  %v2163_v22 = vpack.c.bf16 %v2144_v16, %v2143_v33  ;;  %v1649_v51 = vld [vmem:[%s2850_s27 + $0x134] sm:$0xff] }
 0x26e   : > { %v2375_v53 = vadd.f32 %v3444_v24, %v2335_v20 }
 0x26f   : > { %v1769_v30 = vpop.f32.mrf.mxu2 }
 0x270   : > { %v2411_v48 = vmax.f32 %v2375_v53, 0.0  ;;  %v1840_v1 = vadd.f32 %v1769_v30, %v1592_v13 }
 0x271   : > { %v1524_v60 = vpop.f32.mrf.mxu1  ;;  %v3609_v55 = vpop.f32.mrf.mxu3 }
 0x272   : > { %2448 = vst.msk [vmem:[%s3458_s20 + $0x60] sm:$0xff] %vm2435_vm3, %v2411_v48  ;;  %v2088_v14 = vadd.f32 %v3561_v0, %v1840_v1  ;;  %v1593_v32 = vadd.f32 %v1524_v60, %v3257_v52 }
 0x274   : > { %v2268_v17 = vpop.f32.mrf.mxu0  ;;  %2670 = vmatmul.msk.bf16.gmra.mxu1 %vm306_vm2, %v1665_v25  ;;  %v2336_v12 = vadd.f32 %v2265_v62, %v2088_v14  ;;  %2689 = vmatmul.msk.bf16.gmra.mxu2 %vm306_vm2, %v1666_v34  ;;  %v2145_v14 = vld [vmem:[%s2850_s27 + $0x136] sm:$0xff] }
 0x276   : > { %v2376_v45 = vadd.f32 %v3444_v24, %v2336_v12  ;;  %2710 = vmatmul.msk.bf16.gmra.mxu3 %vm306_vm2, %v1916_v35  ;;  %v2146_v35 = vld [vmem:[%s2850_s27 + $0x13e] sm:$0xff] }
 0x277   : > { %2727 = vmatmul.msk.bf16.gmra.mxu0 %vm306_vm2, %v2162_v18  ;;  %v1772_v27 = vpop.f32.mrf.mxu2 }
 0x278   : > { %v2412_v0 = vmax.f32 %v2376_v45, 0.0  ;;  %v1841_v39 = vadd.f32 %v1772_v27, %v1593_v32 }
 0x279   : > { %v1526_v25 = vpop.f32.mrf.mxu1  ;;  %v2030_v31 = vpop.f32.mrf.mxu3 }
 0x27a   : > { %2449 = vst.msk [vmem:[%s3458_s20 + $0x68] sm:$0xff] %vm2435_vm3, %v2412_v0  ;;  %v2089_v6 = vadd.f32 %v3572_v61, %v1841_v39  ;;  %v1594_v63 = vadd.f32 %v1526_v25, %v3268_v29  ;;  %v2164_v25 = vpack.c.bf16 %v2146_v35, %v2145_v14 }
 0x27c   : > { %v2270_v44 = vpop.f32.mrf.mxu0  ;;  %v2337_v59 = vadd.f32 %v2268_v17, %v2089_v6  ;;  %v1650_v17 = vld [vmem:[%s2850_s27 + $0x13c] sm:$0xff] }
 0x27d   : > { %v1668_v39 = vpack.c.bf16 %v1650_v17, %v1649_v51 }
 0x27e   : > { %v2377_v52 = vadd.f32 %v3444_v24, %v2337_v59 }
 0x27f   : > { %v1774_v3 = vpop.f32.mrf.mxu2 }
 0x280   : > { %v2413_v62 = vmax.f32 %v2377_v52, 0.0  ;;  %v1842_v15 = vadd.f32 %v1774_v3, %v1594_v63 }
 0x281   : > { %v1529_v20 = vpop.f32.mrf.mxu1  ;;  %v2032_v47 = vpop.f32.mrf.mxu3 }
 0x282   : > { %2450 = vst.msk [vmem:[%s3458_s20 + $0x70] sm:$0xff] %vm2435_vm3, %v2413_v62  ;;  %v2090_v61 = vadd.f32 %v3585_v57, %v1842_v15  ;;  %v1595_v13 = vadd.f32 %v1529_v20, %v3274_v4 }
 0x284   : > { %v2273_v40 = vpop.f32.mrf.mxu0  ;;  %2671 = vmatmul.msk.bf16.gmra.mxu1 %vm306_vm2, %v1666_v34  ;;  %v2338_v53 = vadd.f32 %v2270_v44, %v2090_v61  ;;  %2690 = vmatmul.msk.bf16.gmra.mxu2 %vm306_vm2, %v1667_v38 }
 0x286   : > { %v2378_v29 = vadd.f32 %v3444_v24, %v2338_v53 }
 0x287   : > { %2728 = vmatmul.msk.bf16.gmra.mxu0 %vm306_vm2, %v2163_v22  ;;  %v1777_v30 = vpop.f32.mrf.mxu2 }
 0x288   : > { %v2414_v48 = vmax.f32 %v2378_v29, 0.0  ;;  %v1843_v1 = vadd.f32 %v1777_v30, %v1595_v13 }
 0x289   : > { %v1531_v57 = vpop.f32.mrf.mxu1  ;;  %v2035_v18 = vpop.f32.mrf.mxu3 }
 0x28a   : > { %2451 = vst.msk [vmem:[%s3458_s20 + $0x78] sm:$0xff] %vm2435_vm3, %v2414_v48  ;;  %v2091_v34 = vadd.f32 %v3596_v7, %v1843_v1  ;;  %v1596_v4 = vadd.f32 %v1531_v57, %v3285_v46 }
 0x28c   : > { %v2275_v60 = vpop.f32.mrf.mxu0  ;;  %v2339_v42 = vadd.f32 %v2273_v40, %v2091_v34 }
 0x28e   : > { %v2379_v12 = vadd.f32 %v3444_v24, %v2339_v42 }
 0x28f   : > { %v1779_v45 = vpop.f32.mrf.mxu2 }
 0x290   : > { %v2415_v32 = vmax.f32 %v2379_v12, 0.0  ;;  %v1844_v27 = vadd.f32 %v1779_v45, %v1596_v4 }
 0x291   : > { %v1534_v0 = vpop.f32.mrf.mxu1  ;;  %v2037_v46 = vpop.f32.mrf.mxu3 }
 0x292   : > { %2452 = vst.msk [vmem:[%s3458_s20 + $0x80] sm:$0xff] %vm2435_vm3, %v2415_v32  ;;  %v2092_v7 = vadd.f32 %v3609_v55, %v1844_v27  ;;  %v1597_v50 = vadd.f32 %v1534_v0, %v3292_v49 }
 0x294   : > { %v2278_v44 = vpop.f32.mrf.mxu0  ;;  %2672 = vmatmul.msk.bf16.gmra.mxu1 %vm306_vm2, %v1667_v38  ;;  %v2340_v6 = vadd.f32 %v2275_v60, %v2092_v7  ;;  %2691 = vmatmul.msk.bf16.gmra.mxu2 %vm306_vm2, %v1668_v39 }
 0x296   : > { %v2380_v59 = vadd.f32 %v3444_v24, %v2340_v6 }
 0x297   : > { %2729 = vmatmul.msk.bf16.gmra.mxu0 %vm306_vm2, %v2164_v25  ;;  %v1782_v37 = vpop.f32.mrf.mxu2 }
 0x298   : > { %v2416_v33 = vmax.f32 %v2380_v59, 0.0  ;;  %v1845_v16 = vadd.f32 %v1782_v37, %v1597_v50 }
 0x299   : > { %v1536_v52 = vpop.f32.mrf.mxu1  ;;  %v2040_v38 = vpop.f32.mrf.mxu3 }
 0x29a   : > { %2453 = vst.msk [vmem:[%s3458_s20 + $0x88] sm:$0xff] %vm2435_vm3, %v2416_v33  ;;  %v2093_v55 = vadd.f32 %v2030_v31, %v1845_v16  ;;  %v1598_v15 = vadd.f32 %v1536_v52, %v3303_v8 }
 0x29c   : > { %v2280_v63 = vpop.f32.mrf.mxu0  ;;  %v2341_v3 = vadd.f32 %v2278_v44, %v2093_v55 }
 0x29e   : > { %v2381_v62 = vadd.f32 %v3444_v24, %v2341_v3 }
 0x29f   : > { %v1784_v20 = vpop.f32.mrf.mxu2 }
 0x2a0   : > { %v2417_v22 = vmax.f32 %v2381_v62, 0.0  ;;  %v1846_v40 = vadd.f32 %v1784_v20, %v1598_v15 }
 0x2a1   : > { %v1539_v49 = vpop.f32.mrf.mxu1  ;;  %v2042_v60 = vpop.f32.mrf.mxu3 }
 0x2a2   : > { %2454 = vst.msk [vmem:[%s3458_s20 + $0x90] sm:$0xff] %vm2435_vm3, %v2417_v22  ;;  %v2094_v53 = vadd.f32 %v2032_v47, %v1846_v40  ;;  %v1599_v31 = vadd.f32 %v1539_v49, %v3308_v9 }
 0x2a4   : > { %v2283_v61 = vpop.f32.mrf.mxu0  ;;  %v2342_v29 = vadd.f32 %v2280_v63, %v2094_v53 }
 0x2a6   : > { %v2382_v13 = vadd.f32 %v3444_v24, %v2342_v29 }
 0x2a7   : > { %v1787_v30 = vpop.f32.mrf.mxu2 }
 0x2a8   : > { %v2418_v48 = vmax.f32 %v2382_v13, 0.0  ;;  %v1847_v1 = vadd.f32 %v1787_v30, %v1599_v31 }
 0x2a9   : > { %v1541_v8 = vpop.f32.mrf.mxu1  ;;  %v2045_v45 = vpop.f32.mrf.mxu3 }
 0x2aa   : > { %2455 = vst.msk [vmem:[%s3458_s20 + $0x98] sm:$0xff] %vm2435_vm3, %v2418_v48  ;;  %v2095_v34 = vadd.f32 %v2035_v18, %v1847_v1  ;;  %v1600_v47 = vadd.f32 %v1541_v8, %v3319_v2 }
 0x2ac   : > { %v2285_v57 = vpop.f32.mrf.mxu0  ;;  %v2343_v42 = vadd.f32 %v2283_v61, %v2095_v34 }
 0x2ae   : > { %v2383_v51 = vadd.f32 %v3444_v24, %v2343_v42 }
 0x2af   : > { %v1789_v17 = vpop.f32.mrf.mxu2 }
 0x2b0   : > { %v2419_v14 = vmax.f32 %v2383_v51, 0.0  ;;  %v1848_v35 = vadd.f32 %v1789_v17, %v1600_v47 }
 0x2b1   : > { %v1544_v9 = vpop.f32.mrf.mxu1  ;;  %v2047_v59 = vpop.f32.mrf.mxu3 }
 0x2b2   : > { %2456 = vst.msk [vmem:[%s3458_s20 + $0xa0] sm:$0xff] %vm2435_vm3, %v2419_v14  ;;  %v2096_v4 = vadd.f32 %v2037_v46, %v1848_v35  ;;  %v1601_v18 = vadd.f32 %v1544_v9, %v3324_v41 }
 0x2b4   : > { %v2288_v12 = vpop.f32.mrf.mxu0  ;;  %v2344_v32 = vadd.f32 %v2285_v57, %v2096_v4 }
 0x2b6   : > { %v2384_v27 = vadd.f32 %v3444_v24, %v2344_v32 }
 0x2b7   : > { %v1792_v0 = vpop.f32.mrf.mxu2 }
 0x2b8   : > { %v2420_v39 = vmax.f32 %v2384_v27, 0.0  ;;  %v1849_v25 = vadd.f32 %v1792_v0, %v1601_v18 }
 0x2b9   : > { %v1546_v2 = vpop.f32.mrf.mxu1  ;;  %v2050_v20 = vpop.f32.mrf.mxu3 }
 0x2ba   : > { %2457 = vst.msk [vmem:[%s3458_s20 + $0xa8] sm:$0xff] %vm2435_vm3, %v2420_v39  ;;  %v2097_v7 = vadd.f32 %v2040_v38, %v1849_v25  ;;  %v1602_v46 = vadd.f32 %v1546_v2, %v3335_v19 }
 0x2bc   : > { %v2290_v44 = vpop.f32.mrf.mxu0  ;;  %v2345_v6 = vadd.f32 %v2288_v12, %v2097_v7 }
 0x2be   : > { %v2385_v50 = vadd.f32 %v3444_v24, %v2345_v6 }
 0x2bf   : > { %v1794_v37 = vpop.f32.mrf.mxu2 }
 0x2c0   : > { %v2421_v33 = vmax.f32 %v2385_v50, 0.0  ;;  %v1850_v16 = vadd.f32 %v1794_v37, %v1602_v46 }
 0x2c1   : > { %v1549_v41 = vpop.f32.mrf.mxu1  ;;  %v2052_v1 = vpop.f32.mrf.mxu3 }
 0x2c2   : > { %2458 = vst.msk [vmem:[%s3458_s20 + $0xb0] sm:$0xff] %vm2435_vm3, %v2421_v33  ;;  %v2098_v63 = vadd.f32 %v2042_v60, %v1850_v16  ;;  %v1603_v62 = vadd.f32 %v1549_v41, %v3340_v56 }
 0x2c4   : > { %v2293_v52 = vpop.f32.mrf.mxu0  ;;  %v2346_v55 = vadd.f32 %v2290_v44, %v2098_v63 }
 0x2c6   : > { %v2386_v3 = vadd.f32 %v3444_v24, %v2346_v55 }
 0x2c7   : > { %v1797_v15 = vpop.f32.mrf.mxu2 }
 0x2c8   : > { %v2422_v38 = vmax.f32 %v2386_v3, 0.0  ;;  %v1851_v22 = vadd.f32 %v1797_v15, %v1603_v62 }
 0x2c9   : > { %v1551_v19 = vpop.f32.mrf.mxu1  ;;  %v2055_v35 = vpop.f32.mrf.mxu3 }
 0x2ca   : > { %2459 = vst.msk [vmem:[%s3458_s20 + $0xb8] sm:$0xff] %vm2435_vm3, %v2422_v38  ;;  %v2099_v49 = vadd.f32 %v2045_v45, %v1851_v22  ;;  %v1604_v29 = vadd.f32 %v1551_v19, %v3351_v36 }
 0x2cc   : > { %v2295_v40 = vpop.f32.mrf.mxu0  ;;  %v2347_v61 = vadd.f32 %v2293_v52, %v2099_v49 }
 0x2ce   : > { %v2387_v53 = vadd.f32 %v3444_v24, %v2347_v61 }
 0x2cf   : > { %v1799_v13 = vpop.f32.mrf.mxu2 }
 0x2d0   : > { %v2423_v31 = vmax.f32 %v2387_v53, 0.0  ;;  %v1852_v30 = vadd.f32 %v1799_v13, %v1604_v29 }
 0x2d1   : > { %v1554_v56 = vpop.f32.mrf.mxu1  ;;  %v2057_v25 = vpop.f32.mrf.mxu3 }
 0x2d2   : > { %2460 = vst.msk [vmem:[%s3458_s20 + $0xc0] sm:$0xff] %vm2435_vm3, %v2423_v31  ;;  %v2100_v8 = vadd.f32 %v2047_v59, %v1852_v30  ;;  %v1605_v34 = vadd.f32 %v1554_v56, %v3356_v11 }
 0x2d4   : > { %v2298_v48 = vpop.f32.mrf.mxu0  ;;  %v2348_v57 = vadd.f32 %v2295_v40, %v2100_v8 }
 0x2d6   : > { %v2388_v60 = vadd.f32 %v3444_v24, %v2348_v57 }
 0x2d7   : > { %v1802_v42 = vpop.f32.mrf.mxu2 }
 0x2d8   : > { %v2424_v51 = vmax.f32 %v2388_v60, 0.0  ;;  %v1853_v47 = vadd.f32 %v1802_v42, %v1605_v34 }
 0x2d9   : > { %v1556_v36 = vpop.f32.mrf.mxu1  ;;  %v2060_v52 = vpop.f32.mrf.mxu3 }
 0x2da   : > { %2461 = vst.msk [vmem:[%s3458_s20 + $0xc8] sm:$0xff] %vm2435_vm3, %v2424_v51  ;;  %v2101_v14 = vadd.f32 %v2050_v20, %v1853_v47  ;;  %v1606_v4 = vadd.f32 %v1556_v36, %v3367_v54 }
 0x2dc   : > { %v2300_v17 = vpop.f32.mrf.mxu0  ;;  %v2349_v9 = vadd.f32 %v2298_v48, %v2101_v14 }
 0x2de   : > { %v2389_v12 = vadd.f32 %v3444_v24, %v2349_v9 }
 0x2df   : > { %v1804_v45 = vpop.f32.mrf.mxu2 }
 0x2e0   : > { %v2425_v32 = vmax.f32 %v2389_v12, 0.0  ;;  %v1854_v27 = vadd.f32 %v1804_v45, %v1606_v4 }
 0x2e1   : > { %v1559_v11 = vpop.f32.mrf.mxu1  ;;  %v2062_v49 = vpop.f32.mrf.mxu3 }
 0x2e2   : > { %2462 = vst.msk [vmem:[%s3458_s20 + $0xd0] sm:$0xff] %vm2435_vm3, %v2425_v32  ;;  %v2102_v0 = vadd.f32 %v2052_v1, %v1854_v27  ;;  %v1607_v44 = vadd.f32 %v1559_v11, %v3372_v21 }
 0x2e4   : > { %v2303_v18 = vpop.f32.mrf.mxu0  ;;  %v2350_v39 = vadd.f32 %v2300_v17, %v2102_v0 }
 0x2e6   : > { %v2390_v2 = vadd.f32 %v3444_v24, %v2350_v39 }
 0x2e7   : > { %v1807_v7 = vpop.f32.mrf.mxu2 }
 0x2e8   : > { %v2426_v6 = vmax.f32 %v2390_v2, 0.0  ;;  %v1855_v59 = vadd.f32 %v1807_v7, %v1607_v44 }
 0x2e9   : > { %v1561_v54 = vpop.f32.mrf.mxu1  ;;  %v2065_v8 = vpop.f32.mrf.mxu3 }
 0x2ea   : > { %2463 = vst.msk [vmem:[%s3458_s20 + $0xd8] sm:$0xff] %vm2435_vm3, %v2426_v6  ;;  %v2103_v46 = vadd.f32 %v2055_v35, %v1855_v59  ;;  %v1608_v16 = vadd.f32 %v1561_v54, %v3383_v23 }
 0x2ec   : > { %v2305_v50 = vpop.f32.mrf.mxu0  ;;  %v2351_v37 = vadd.f32 %v2303_v18, %v2103_v46 }
 0x2ee   : > { %v2391_v33 = vadd.f32 %v3444_v24, %v2351_v37 }
 0x2ef   : > { %v1809_v41 = vpop.f32.mrf.mxu2 }
 0x2f0   : > { %v2427_v63 = vmax.f32 %v2391_v33, 0.0  ;;  %v1856_v55 = vadd.f32 %v1809_v41, %v1608_v16 }
 0x2f1   : > { %v1564_v21 = vpop.f32.mrf.mxu1  ;;  %v2067_v35 = vpop.f32.mrf.mxu3 }
 0x2f2   : > { %2464 = vst.msk [vmem:[%s3458_s20 + $0xe0] sm:$0xff] %vm2435_vm3, %v2427_v63  ;;  %v2104_v62 = vadd.f32 %v2057_v25, %v1856_v55  ;;  %v1609_v38 = vadd.f32 %v1564_v21, %v3388_v58 }
 0x2f4   : > { %v2308_v3 = vpop.f32.mrf.mxu0  ;;  %v2352_v15 = vadd.f32 %v2305_v50, %v2104_v62 }
 0x2f6   : > { %v2392_v20 = vadd.f32 %v3444_v24, %v2352_v15 }
 0x2f7   : > { %v1812_v22 = vpop.f32.mrf.mxu2 }
 0x2f8   : > { %v2428_v19 = vmax.f32 %v2392_v20, 0.0  ;;  %v1857_v40 = vadd.f32 %v1812_v22, %v1609_v38 }
 0x2f9   : > { %v1566_v23 = vpop.f32.mrf.mxu1  ;;  %v2070_v25 = vpop.f32.mrf.mxu3 }
 0x2fa   : > { %2465 = vst.msk [vmem:[%s3458_s20 + $0xe8] sm:$0xff] %vm2435_vm3, %v2428_v19  ;;  %v2105_v61 = vadd.f32 %v2060_v52, %v1857_v40  ;;  %v1610_v31 = vadd.f32 %v1566_v23, %v3399_v10 }
 0x2fc   : > { %v2310_v53 = vpop.f32.mrf.mxu0  ;;  %v2353_v29 = vadd.f32 %v2308_v3, %v2105_v61 }
 0x2fe   : > { %v2393_v13 = vadd.f32 %v3444_v24, %v2353_v29 }
 0x2ff   : > { %v1814_v30 = vpop.f32.mrf.mxu2 }
 0x300   : > { %v2429_v56 = vmax.f32 %v2393_v13, 0.0  ;;  %v1858_v48 = vadd.f32 %v1814_v30, %v1610_v31 }
 0x301   : > { %v1569_v58 = vpop.f32.mrf.mxu1 }
 0x302   : > { %2466 = vst.msk [vmem:[%s3458_s20 + $0xf0] sm:$0xff] %vm2435_vm3, %v2429_v56  ;;  %v2106_v1 = vadd.f32 %v2062_v49, %v1858_v48  ;;  %v1611_v42 = vadd.f32 %v1569_v58, %v3404_v5 }
 0x304   : > { %v2354_v57 = vadd.f32 %v2310_v53, %v2106_v1  ;;  %v2313_v60 = vpop.f32.mrf.mxu0 }
 0x306   : > { %v2394_v34 = vadd.f32 %v3444_v24, %v2354_v57 }
 0x307   : > { %v1817_v51 = vpop.f32.mrf.mxu2 }
 0x308   : > { %v2430_v47 = vmax.f32 %v2394_v34, 0.0  ;;  %v1859_v36 = vadd.f32 %v1817_v51, %v1611_v42 }
 0x309   : > { %v1571_v10 = vpop.f32.mrf.mxu1 }
 0x30a   : > { %2467 = vst.msk [vmem:[%s3458_s20 + $0xf8] sm:$0xff] %vm2435_vm3, %v2430_v47  ;;  %v2107_v17 = vadd.f32 %v2065_v8, %v1859_v36  ;;  %v1612_v12 = vadd.f32 %v1571_v10, %v3417_v26 }
 0x30c   : > { %v2355_v14 = vadd.f32 %v2313_v60, %v2107_v17  ;;  %v2315_v4 = vpop.f32.mrf.mxu0 }
 0x30e   : > { %v2395_v9 = vadd.f32 %v3444_v24, %v2355_v14 }
 0x30f   : > { %v1819_v45 = vpop.f32.mrf.mxu2 }
 0x310   : > { %v2431_v32 = vmax.f32 %v2395_v9, 0.0  ;;  %v1860_v27 = vadd.f32 %v1819_v45, %v1612_v12 }
 0x311   : > { %v1574_v5 = vpop.f32.mrf.mxu1 }
 0x312   : > { %2468 = vst.msk [vmem:[%s3458_s20 + $0x100] sm:$0xff] %vm2435_vm3, %v2431_v32  ;;  %v2108_v11 = vadd.f32 %v2067_v35, %v1860_v27  ;;  %v1613_v39 = vadd.f32 %v1574_v5, %v3424_v28  ;;  %v2072_v28 = vpop.f32.mrf.mxu3 }
 0x314   : > { %v2356_v18 = vadd.f32 %v2315_v4, %v2108_v11  ;;  %v2318_v26 = vpop.f32.mrf.mxu0 }
 0x316   : > { %v2396_v0 = vadd.f32 %v3444_v24, %v2356_v18 }
 0x317   : > { %v1822_v2 = vpop.f32.mrf.mxu2 }
 0x318   : > { %v2432_v44 = vmax.f32 %v2396_v0, 0.0  ;;  %v1861_v7 = vadd.f32 %v1822_v2, %v1613_v39 }
 0x319   : > { %v1576_v59 = vpop.f32.mrf.mxu1 }
 0x31a   : > { %2469 = vst.msk [vmem:[%s3458_s20 + $0x108] sm:$0xff] %vm2435_vm3, %v2432_v44  ;;  %v2109_v6 = vadd.f32 %v2070_v25, %v1861_v7  ;;  %v1614_v46 = vadd.f32 %v1576_v59, %v3437_v43 }
 0x31c   : > { %v2357_v54 = vadd.f32 %v2318_v26, %v2109_v6  ;;  %v2320_v52 = vpop.f32.mrf.mxu0 }
 0x31e   : > { %v2397_v50 = vadd.f32 %v3444_v24, %v2357_v54 }
 0x31f   : > { %v1824_v37 = vpop.f32.mrf.mxu2 }
 0x320   : > { %v2433_v33 = vmax.f32 %v2397_v50, 0.0  ;;  %v1862_v16 = vadd.f32 %v1824_v37, %v1614_v46 }
 0x322   : > { %2470 = vst.msk [vmem:[%s3458_s20 + $0x110] sm:$0xff] %vm2435_vm3, %v2433_v33  ;;  %v2110_v41 = vadd.f32 %v2072_v28, %v1862_v16 }
 0x324   : > { %v2358_v63 = vadd.f32 %v2320_v52, %v2110_v41 }
 0x326   : > { %v2398_v55 = vadd.f32 %v3444_v24, %v2358_v63 }
 0x328   : > { %v2434_v21 = vmax.f32 %v2398_v55, 0.0 }
 0x32a   : > { %2471 = vst.msk [vmem:[%s3458_s20 + $0x118] sm:$0xff] %vm2435_vm3, %v2434_v21 }
 0x32b PF: > { %s13_s14 = sadd.s32 1, %s2785_s14   ;;  %s3737_s12 = smov %s2781_s13 }
 0x32c   : > { %p10_p5 = scmp.ge.s32.totalorder %s13_s14, 4   ;;  %s3738_s13 = smov %s3740_s15 }
 0x32e   :  { %12 = sbr.rel (!%p10_p5) target bundleno = 2 (0x2), region = 70 }

// kernel: matrix_forward.7
= control target key start
LH: loop header
LB: loop body
LE: loop exit
PB: predicated region body
PF: predicated region fallthrough
CT: control target
= control target key end

     0   :  { %s1199_s12 = smov 0   ;;  %s1201_s13 = smov 0   ;;  %s1480_s0 = inlined_call_operand.vmem [shape: f32[2,320,16], index: 0, kind: input, shape index: {}]   ;;  %s1481_s1 = inlined_call_operand.vmem [shape: bf16[9,16,32], index: 1, kind: input, shape index: {}]   ;;  %s1482_s2 = inlined_call_operand.vmem [shape: f32[1,32], index: 2, kind: input, shape index: {}]   ;;  %s1483_s3 = inlined_call_operand.vmem [shape: f32[2,72,32], index: 3, kind: output, shape index: {}]  }
   0x1   :  { %s1203_s14 = smov 0  }
   0x2 LB: > { %s25_s15 = sadd.s32 1, %s1173_s13  ;;  %p1014_p0 = scmp.ge.s32.totalorder %s1177_s14, 1  ;;  %s1177_s14 = sphi %s1203_s14, %s13_s14   ;;  %s1173_s13 = sphi %s1201_s13, %s1485_s13   ;;  %s1169_s12 = sphi %s1199_s12, %s1484_s12  }
   0x3   : > { %p27_p1 = scmp.ge.s32.totalorder %s25_s15, 2  ;;  %p151_p2 = scmp.lt.s32.totalorder %s1177_s14, 3 }
   0x5   : > { %s1487_s15 = smov (%p27_p1, %s25_s15), 0  ;;  %p152_p3 = pnand %p1014_p0, %p151_p2 }
   0x6   : > { %p179_p4 = scmp.lt.s32.totalorder (!%p152_p3), %s1169_s12, 1 }
   0x7   : > { %155 = sbr.rel (%p152_p3) target bundleno = 339 (0x153), region = 32 }
   0xc   : > { %v1117_v0 = vld [vmem:[%s1481_s1 + $0x8] sm:$0xff]  ;;  %v1118_v1 = vld [vmem:[%s1481_s1 + $0x10] sm:$0xff]  ;;  %v1116_v2 = vld [vmem:[%s1481_s1] sm:$0xff]  ;;  %s1489_s12 = smov (!%p179_p4, %s1169_s12), 1  ;;  %vm234_vm0 = vcmask 130048   ;;  %vm919_vm1 = vcmask 261120  }
   0xd   : > { %v1119_v3 = vld [vmem:[%s1481_s1 + $0x18] sm:$0xff]  ;;  %v1120_v4 = vld [vmem:[%s1481_s1 + $0x20] sm:$0xff]  ;;  %1125 = vmatpush.bf16.msra.mxu1 %v1117_v0  ;;  %1126 = vmatpush.bf16.msra.mxu2 %v1117_v0  ;;  %s1128_s26 = smul.u32 320, %s1489_s12  ;;  %v1122_v16 = vld [vmem:[%s1481_s1 + $0x30] sm:$0xff] }
   0xe   : > { %1127 = vmatpush.bf16.msra.mxu3 %v1117_v0  ;;  %257 = vmatpush.bf16.msra.mxu0 %v1117_v0  ;;  %v1123_v17 = vld [vmem:[%s1481_s1 + $0x38] sm:$0xff]  ;;  %v1121_v18 = vld [vmem:[%s1481_s1 + $0x28] sm:$0xff]  ;;  %v1124_v19 = vld [vmem:[%s1481_s1 + $0x40] sm:$0xff]  ;;  %s1129_s17 = smul.u32 72, %s1489_s12 }
   0xf   : > { %s1238_s29 = scalar_lea.vmem %s1480_s0, %s1128_s26 }
  0x10   : > { %v213_v5 = vld [vmem:[%s1238_s29 + $0x61] sm:$0xff]  ;;  %v214_v6 = vld [vmem:[%s1238_s29 + $0x69] sm:$0xff]  ;;  %v215_v7 = vld [vmem:[%s1238_s29 + $0x71] sm:$0xff]  ;;  %s1436_s20 = scalar_lea.vmem %s1483_s3, %s1129_s17 }
  0x11   : > { %382 = vmatpush.bf16.msrb.mxu2 %v1118_v1  ;;  %311 = vmatpush.bf16.msrb.mxu1 %v1116_v2  ;;  %v221_v8 = vpack.c.bf16 %v214_v6, %v213_v5  ;;  %v216_v9 = vld [vmem:[%s1238_s29 + $0x79] sm:$0xff]  ;;  %v219_v10 = vld [vmem:[%s1238_s29 + $0x91] sm:$0xff]  ;;  %v217_v20 = vld [vmem:[%s1238_s29 + $0x81] sm:$0xff] }
  0x12   : > { %462 = vmatpush.bf16.msrb.mxu3 %v1119_v3  ;;  %542 = vmatpush.bf16.msrb.mxu0 %v1120_v4  ;;  %v222_v11 = vpack.c.bf16 %v216_v9, %v215_v7  ;;  %v224_v12 = vpack.c.bf16 %v219_v10, %v219_v10  ;;  %v211_v13 = vld [vmem:[%s1238_s29 + $0x51] sm:$0xff]  ;;  %v212_v14 = vld [vmem:[%s1238_s29 + $0x59] sm:$0xff]  ;;  %v196_v22 = vld [vmem:[%s1238_s29 + $0x8] sm:$0xff] }
  0x13   : > { %1024 = vmatmul.msk.bf16.vlgmr.msra.gmra.mxu1 %vm234_vm0, %v221_v8  ;;  %v220_v15 = vpack.c.bf16 %v212_v14, %v211_v13  ;;  %v195_v21 = vld [vmem:[%s1238_s29] sm:$0xff]  ;;  %v218_v23 = vld [vmem:[%s1238_s29 + $0x89] sm:$0xff]  ;;  %v497_v27 = vld [vmem:[%s1238_s29 + $0xf3] sm:$0xff] }
  0x14   : > { %1025 = vmatmul.msk.bf16.vlgmr.msra.gmra.mxu2 %vm234_vm0, %v222_v11  ;;  %1027 = vmatmul.msk.bf16.vlgmr.msra.gmra.mxu3 %vm234_vm0, %v224_v12  ;;  %v417_v24 = vld [vmem:[%s1238_s29 + $0xa2] sm:$0xff]  ;;  %v418_v25 = vld [vmem:[%s1238_s29 + $0xaa] sm:$0xff]  ;;  %v204_v26 = vpack.c.bf16 %v196_v22, %v195_v21  ;;  %v223_v29 = vpack.c.bf16 %v218_v23, %v217_v20  ;;  %v198_v33 = vld [vmem:[%s1238_s29 + $0x18] sm:$0xff] }
  0x15   : > { %1023 = vmatmul.msk.bf16.vlgmr.msra.gmra.mxu0 %vm234_vm0, %v220_v15  ;;  %702 = vmatpush.bf16.msra.mxu2 %v1122_v16  ;;  %v498_v28 = vld [vmem:[%s1238_s29 + $0xfb] sm:$0xff]  ;;  %v426_v30 = vpack.c.bf16 %v418_v25, %v417_v24  ;;  %v197_v32 = vld [vmem:[%s1238_s29 + $0x10] sm:$0xff]  ;;  %v499_v39 = vld [vmem:[%s1238_s29 + $0x103] sm:$0xff] }
  0x16   : > { %782 = vmatpush.bf16.msra.mxu3 %v1123_v17  ;;  %622 = vmatpush.bf16.msra.mxu1 %v1121_v18  ;;  %v506_v31 = vpack.c.bf16 %v498_v28, %v497_v27  ;;  %v337_v34 = vld [vmem:[%s1238_s29 + $0x1] sm:$0xff]  ;;  %v1279_v35 = vld [vmem:[%s1238_s29 + $0x9] sm:$0xff]  ;;  %v419_v36 = vld [vmem:[%s1238_s29 + $0xb2] sm:$0xff]  ;;  %v205_v38 = vpack.c.bf16 %v198_v33, %v197_v32 }
  0x17   : > { %862 = vmatpush.bf16.msra.mxu0 %v1124_v19  ;;  %v420_v37 = vld [vmem:[%s1238_s29 + $0xba] sm:$0xff]  ;;  %v500_v40 = vld [vmem:[%s1238_s29 + $0x10b] sm:$0xff]  ;;  %v346_v41 = vpack.c.bf16 %v1279_v35, %v337_v34  ;;  %v421_v48 = vld [vmem:[%s1238_s29 + $0xc2] sm:$0xff] }
  0x18   : > { %v427_v42 = vpack.c.bf16 %v420_v37, %v419_v36  ;;  %v507_v43 = vpack.c.bf16 %v500_v40, %v499_v39  ;;  %v199_v44 = vld [vmem:[%s1238_s29 + $0x20] sm:$0xff]  ;;  %v200_v45 = vld [vmem:[%s1238_s29 + $0x28] sm:$0xff]  ;;  %v1293_v46 = vld [vmem:[%s1238_s29 + $0x11] sm:$0xff] }
  0x19   : > { %v1296_v47 = vld [vmem:[%s1238_s29 + $0x19] sm:$0xff]  ;;  %v422_v49 = vld [vmem:[%s1238_s29 + $0xca] sm:$0xff]  ;;  %v206_v50 = vpack.c.bf16 %v200_v45, %v199_v44  ;;  %v1311_v58 = vld [vmem:[%s1238_s29 + $0x21] sm:$0xff] }
  0x1a   : > { %v501_v51 = vld [vmem:[%s1238_s29 + $0x113] sm:$0xff]  ;;  %v502_v52 = vld [vmem:[%s1238_s29 + $0x11b] sm:$0xff]  ;;  %v347_v53 = vpack.c.bf16 %v1296_v47, %v1293_v46  ;;  %v428_v54 = vpack.c.bf16 %v422_v49, %v421_v48  ;;  %v1314_v59 = vld [vmem:[%s1238_s29 + $0x29] sm:$0xff] }
  0x1b   : > { %v508_v55 = vpack.c.bf16 %v502_v52, %v501_v51  ;;  %v201_v56 = vld [vmem:[%s1238_s29 + $0x30] sm:$0xff]  ;;  %v202_v57 = vld [vmem:[%s1238_s29 + $0x38] sm:$0xff]  ;;  %v503_v63 = vld [vmem:[%s1238_s29 + $0x123] sm:$0xff]  ;;  %v348_v1 = vpack.c.bf16 %v1314_v59, %v1311_v58 }
  0x1c   : > { %v423_v60 = vld [vmem:[%s1238_s29 + $0xd2] sm:$0xff]  ;;  %v424_v61 = vld [vmem:[%s1238_s29 + $0xda] sm:$0xff]  ;;  %v207_v62 = vpack.c.bf16 %v202_v57, %v201_v56  ;;  %v425_v7 = vld [vmem:[%s1238_s29 + $0xe2] sm:$0xff] }
  0x1d   : > { %v504_v0 = vld [vmem:[%s1238_s29 + $0x12b] sm:$0xff]  ;;  %v429_v2 = vpack.c.bf16 %v424_v61, %v423_v60  ;;  %v203_v4 = vld [vmem:[%s1238_s29 + $0x40] sm:$0xff]  ;;  %v505_v9 = vld [vmem:[%s1238_s29 + $0x133] sm:$0xff]  ;;  %v430_v11 = vpack.c.bf16 %v425_v7, %v425_v7 }
  0x1e   : > { %v509_v3 = vpack.c.bf16 %v504_v0, %v503_v63  ;;  %v1328_v5 = vld [vmem:[%s1238_s29 + $0x31] sm:$0xff]  ;;  %v1331_v6 = vld [vmem:[%s1238_s29 + $0x39] sm:$0xff]  ;;  %v208_v8 = vpack.c.bf16 %v203_v4, %v203_v4  ;;  %v510_v12 = vpack.c.bf16 %v505_v9, %v505_v9  ;;  %v577_v13 = vld [vmem:[%s1238_s29 + $0xa3] sm:$0xff] }
  0x1f   : > { %v349_v10 = vpack.c.bf16 %v1331_v6, %v1328_v5  ;;  %v578_v14 = vld [vmem:[%s1238_s29 + $0xab] sm:$0xff]  ;;  %v1344_v15 = vld [vmem:[%s1238_s29 + $0x41] sm:$0xff]  ;;  %v579_v24 = vld [vmem:[%s1238_s29 + $0xb3] sm:$0xff]  ;;  %v668_v61 = vpack.c.bf16 %v1328_v5, %v1314_v59 }
  0x20   : > { %v737_v16 = vld [vmem:[%s1238_s29 + $0x5a] sm:$0xff]  ;;  %v738_v17 = vld [vmem:[%s1238_s29 + $0x62] sm:$0xff]  ;;  %v586_v18 = vpack.c.bf16 %v578_v14, %v577_v13  ;;  %v817_v19 = vld [vmem:[%s1238_s29 + $0xa] sm:$0xff]  ;;  %v350_v21 = vpack.c.bf16 %v1344_v15, %v1344_v15  ;;  %v669_v14 = vpack.c.bf16 %v1344_v15, %v1331_v6 }
  0x21   : > { %v818_v20 = vld [vmem:[%s1238_s29 + $0x12] sm:$0xff]  ;;  %v746_v22 = vpack.c.bf16 %v738_v17, %v737_v16  ;;  %v580_v25 = vld [vmem:[%s1238_s29 + $0xbb] sm:$0xff]  ;;  %v581_v34 = vld [vmem:[%s1238_s29 + $0xc3] sm:$0xff] }
  0x22   : > { %v826_v23 = vpack.c.bf16 %v818_v20, %v817_v19  ;;  %v740_v27 = vld [vmem:[%s1238_s29 + $0x72] sm:$0xff]  ;;  %v587_v28 = vpack.c.bf16 %v580_v25, %v579_v24  ;;  %v741_v37 = vld [vmem:[%s1238_s29 + $0x7a] sm:$0xff]  ;;  %v821_v40 = vld [vmem:[%s1238_s29 + $0x2a] sm:$0xff] }
  0x23   : > { %1032 = vmatmul.msk.bf16.vlgmr.msrb.gmra.mxu1 %vm234_vm0, %v204_v26  ;;  %v739_v26 = vld [vmem:[%s1238_s29 + $0x6a] sm:$0xff]  ;;  %v583_v51 = vld [vmem:[%s1238_s29 + $0xd3] sm:$0xff] }
  0x24   : > { %1026 = vmatmul.msk.bf16.gmra.mxu2 %vm234_vm0, %v223_v29  ;;  %1054 = vmatmul.msk.bf16.vlgmr.msrb.gmra.mxu3 %vm234_vm0, %v426_v30  ;;  %v819_v29 = vld [vmem:[%s1238_s29 + $0x1a] sm:$0xff]  ;;  %v820_v30 = vld [vmem:[%s1238_s29 + $0x22] sm:$0xff]  ;;  %v747_v32 = vpack.c.bf16 %v740_v27, %v739_v26  ;;  %v582_v36 = vld [vmem:[%s1238_s29 + $0xcb] sm:$0xff] }
  0x25   : > { %1065 = vmatmul.msk.bf16.vlgmr.msrb.gmra.mxu0 %vm234_vm0, %v506_v31  ;;  %v666_v31 = vpack.c.bf16 %v1293_v46, %v1279_v35  ;;  %v827_v33 = vpack.c.bf16 %v820_v30, %v819_v29  ;;  %v588_v39 = vpack.c.bf16 %v582_v36, %v581_v34  ;;  %v743_v52 = vld [vmem:[%s1238_s29 + $0x8a] sm:$0xff]  ;;  %v823_v57 = vld [vmem:[%s1238_s29 + $0x3a] sm:$0xff] }
  0x26   : > { %v585_v9 = vld [vmem:[%s1238_s29 + $0xe3] sm:$0xff]  ;;  %v745_v59 = vld [vmem:[%s1238_s29 + $0x9a] sm:$0xff] }
  0x27   : > { %v750_v16 = vpack.c.bf16 %v745_v59, %v745_v59  ;;  %v665_v26 = vld [vmem:[%s1238_s29 + $0x49] sm:$0xff] }
  0x33   : > { %1033 = vmatmul.msk.bf16.gmra.mxu1 %vm234_vm0, %v205_v38  ;;  %v742_v38 = vld [vmem:[%s1238_s29 + $0x82] sm:$0xff] }
  0x34   : > { %1043 = vmatmul.msk.bf16.vlgmr.msrb.gmra.mxu2 %vm234_vm0, %v346_v41  ;;  %1055 = vmatmul.msk.bf16.gmra.mxu3 %vm234_vm0, %v427_v42  ;;  %v822_v41 = vld [vmem:[%s1238_s29 + $0x32] sm:$0xff]  ;;  %v667_v42 = vpack.c.bf16 %v1311_v58, %v1296_v47  ;;  %v584_v47 = vld [vmem:[%s1238_s29 + $0xdb] sm:$0xff] }
  0x35   : > { %1066 = vmatmul.msk.bf16.gmra.mxu0 %vm234_vm0, %v507_v43  ;;  %v748_v43 = vpack.c.bf16 %v742_v38, %v741_v37  ;;  %v828_v44 = vpack.c.bf16 %v822_v41, %v821_v40  ;;  %v824_v58 = vld [vmem:[%s1238_s29 + $0x42] sm:$0xff] }
  0x36   : > { %v829_v0 = vpack.c.bf16 %v824_v58, %v823_v57 }
  0x43   : > { %1034 = vmatmul.msk.bf16.gmra.mxu1 %vm234_vm0, %v206_v50 }
  0x44   : > { %1044 = vmatmul.msk.bf16.gmra.mxu2 %vm234_vm0, %v347_v53  ;;  %1056 = vmatmul.msk.bf16.gmra.mxu3 %vm234_vm0, %v428_v54  ;;  %v744_v53 = vld [vmem:[%s1238_s29 + $0x92] sm:$0xff] }
  0x45   : > { %1067 = vmatmul.msk.bf16.gmra.mxu0 %vm234_vm0, %v508_v55  ;;  %v589_v55 = vpack.c.bf16 %v584_v47, %v583_v51 }
  0x53   : > { %1035 = vmatmul.msk.bf16.gmra.mxu1 %vm234_vm0, %v207_v62  ;;  %v749_v62 = vpack.c.bf16 %v744_v53, %v743_v52 }
  0x54   : > { %1045 = vmatmul.msk.bf16.gmra.mxu2 %vm234_vm0, %v348_v1  ;;  %1057 = vmatmul.msk.bf16.gmra.mxu3 %vm234_vm0, %v429_v2 }
  0x55   : > { %1068 = vmatmul.msk.bf16.gmra.mxu0 %vm234_vm0, %v509_v3 }
  0x63   : > { %1036 = vmatmul.msk.bf16.gmra.mxu1 %vm234_vm0, %v208_v8 }
  0x64   : > { %1046 = vmatmul.msk.bf16.gmra.mxu2 %vm234_vm0, %v349_v10  ;;  %1058 = vmatmul.msk.bf16.gmra.mxu3 %vm234_vm0, %v430_v11  ;;  %v590_v10 = vpack.c.bf16 %v585_v9, %v585_v9 }
  0x65   : > { %1069 = vmatmul.msk.bf16.gmra.mxu0 %vm234_vm0, %v510_v12  ;;  %v825_v12 = vld [vmem:[%s1238_s29 + $0x4a] sm:$0xff] }
  0x73   : > { %1076 = vmatmul.msk.bf16.vlgmr.msra.gmra.mxu1 %vm234_vm0, %v586_v18  ;;  %v830_v18 = vpack.c.bf16 %v825_v12, %v825_v12 }
  0x74   : > { %1047 = vmatmul.msk.bf16.gmra.mxu2 %vm234_vm0, %v350_v21  ;;  %1098 = vmatmul.msk.bf16.vlgmr.msra.gmra.mxu3 %vm234_vm0, %v746_v22 }
  0x75   : > { %1109 = vmatmul.msk.bf16.vlgmr.msra.gmra.mxu0 %vm234_vm0, %v826_v23 }
  0x83   : > { %1077 = vmatmul.msk.bf16.gmra.mxu1 %vm234_vm0, %v587_v28 }
  0x84   : > { %1087 = vmatmul.msk.bf16.vlgmr.msra.gmra.mxu2 %vm234_vm0, %v666_v31  ;;  %1099 = vmatmul.msk.bf16.gmra.mxu3 %vm234_vm0, %v747_v32  ;;  %v670_v31 = vpack.c.bf16 %v665_v26, %v665_v26 }
  0x85   : > { %1110 = vmatmul.msk.bf16.gmra.mxu0 %vm234_vm0, %v827_v33 }
  0x90   : > { %v264_v35 = vpop.f32.mrf.mxu1 }
  0x92   : > { %v259_v45 = vpop.f32.mrf.mxu0 }
  0x93   : > { %1078 = vmatmul.msk.bf16.gmra.mxu1 %vm234_vm0, %v588_v39 }
  0x94   : > { %1088 = vmatmul.msk.bf16.gmra.mxu2 %vm234_vm0, %v667_v42  ;;  %1100 = vmatmul.msk.bf16.gmra.mxu3 %vm234_vm0, %v748_v43 }
  0x95   : > { %1111 = vmatmul.msk.bf16.gmra.mxu0 %vm234_vm0, %v828_v44 }
  0x97   : > { %v269_v46 = vpop.f32.mrf.mxu2  ;;  %v1380_v48 = vpop.f32.mrf.mxu3 }
  0x98   : > { %v266_v49 = vpop.f32.mrf.mxu1 }
  0x9a   : > { %v261_v50 = vpop.f32.mrf.mxu0 }
  0x9f   : > { %v271_v54 = vpop.f32.mrf.mxu2  ;;  %v281_v56 = vpop.f32.mrf.mxu3 }
  0xa0   : > { %v313_v60 = vpop.f32.mrf.mxu1 }
  0xa1   : > { %v314_v63 = vadd.f32 %v313_v60, %v259_v45 }
  0xa2   : > { %v544_v1 = vpop.f32.mrf.mxu0 }
  0xa3   : > { %1079 = vmatmul.msk.bf16.gmra.mxu1 %vm234_vm0, %v589_v55 }
  0xa4   : > { %1089 = vmatmul.msk.bf16.gmra.mxu2 %vm234_vm0, %v668_v61  ;;  %1101 = vmatmul.msk.bf16.gmra.mxu3 %vm234_vm0, %v749_v62 }
  0xa5   : > { %1112 = vmatmul.msk.bf16.gmra.mxu0 %vm234_vm0, %v829_v0 }
  0xa7   : > { %v274_v2 = vpop.f32.mrf.mxu2  ;;  %v464_v3 = vpop.f32.mrf.mxu3 }
  0xa8   : > { %v315_v4 = vpop.f32.mrf.mxu1 }
  0xa9   : > { %v316_v7 = vadd.f32 %v315_v4, %v261_v50 }
  0xaa   : > { %v546_v8 = vpop.f32.mrf.mxu0 }
  0xaf   : > { %v276_v5 = vpop.f32.mrf.mxu2  ;;  %v466_v11 = vpop.f32.mrf.mxu3 }
  0xb0   : > { %v318_v13 = vpop.f32.mrf.mxu1 }
  0xb1   : > { %v319_v17 = vadd.f32 %v318_v13, %v264_v35 }
  0xb2   : > { %v549_v19 = vpop.f32.mrf.mxu0 }
  0xb3   : > { %1080 = vmatmul.msk.bf16.gmra.mxu1 %vm234_vm0, %v590_v10 }
  0xb4   : > { %1090 = vmatmul.msk.bf16.gmra.mxu2 %vm234_vm0, %v669_v14  ;;  %1102 = vmatmul.msk.bf16.gmra.mxu3 %vm234_vm0, %v750_v16 }
  0xb5   : > { %1113 = vmatmul.msk.bf16.gmra.mxu0 %vm234_vm0, %v830_v18 }
  0xb7   : > { %v384_v20 = vpop.f32.mrf.mxu2  ;;  %v469_v21 = vpop.f32.mrf.mxu3 }
  0xb8   : > { %v408_v22 = vadd.f32 %v384_v20, %v314_v63  ;;  %v320_v23 = vpop.f32.mrf.mxu1 }
  0xb9   : > { %v321_v24 = vadd.f32 %v320_v23, %v266_v49 }
  0xba   : > { %v488_v25 = vadd.f32 %v464_v3, %v408_v22  ;;  %v551_v6 = vpop.f32.mrf.mxu0 }
  0xbc   : > { %v1403_v15 = vadd.f32 %v544_v1, %v488_v25 }
  0xbf   : > { %v386_v27 = vpop.f32.mrf.mxu2  ;;  %v471_v28 = vpop.f32.mrf.mxu3 }
  0xc0   : > { %v409_v29 = vadd.f32 %v386_v27, %v316_v7  ;;  %v323_v30 = vpop.f32.mrf.mxu1 }
  0xc1   : > { %v324_v32 = vadd.f32 %v323_v30, %v269_v46 }
  0xc2   : > { %v489_v33 = vadd.f32 %v466_v11, %v409_v29  ;;  %v554_v34 = vpop.f32.mrf.mxu0 }
  0xc4   : > { %1091 = vmatmul.msk.bf16.gmra.mxu2 %vm234_vm0, %v670_v31  ;;  %v1407_v36 = vadd.f32 %v546_v8, %v489_v33 }
  0xc7   : > { %v389_v37 = vpop.f32.mrf.mxu2  ;;  %v474_v38 = vpop.f32.mrf.mxu3 }
  0xc8   : > { %v410_v39 = vadd.f32 %v389_v37, %v319_v17  ;;  %v325_v40 = vpop.f32.mrf.mxu1 }
  0xc9   : > { %v326_v41 = vadd.f32 %v325_v40, %v271_v54 }
  0xca   : > { %v490_v35 = vadd.f32 %v469_v21, %v410_v39  ;;  %v556_v42 = vpop.f32.mrf.mxu0 }
  0xcc   : > { %v1409_v43 = vadd.f32 %v549_v19, %v490_v35 }
  0xcf   : > { %v391_v44 = vpop.f32.mrf.mxu2  ;;  %v476_v45 = vpop.f32.mrf.mxu3 }
  0xd0   : > { %v411_v49 = vadd.f32 %v391_v44, %v321_v24  ;;  %v328_v50 = vpop.f32.mrf.mxu1 }
  0xd1   : > { %v329_v46 = vadd.f32 %v328_v50, %v274_v2 }
  0xd2   : > { %v491_v51 = vadd.f32 %v471_v28, %v411_v49  ;;  %v559_v47 = vpop.f32.mrf.mxu0 }
  0xd4   : > { %v1411_v52 = vadd.f32 %v551_v6, %v491_v51 }
  0xd7   : > { %v394_v53 = vpop.f32.mrf.mxu2  ;;  %v479_v55 = vpop.f32.mrf.mxu3 }
  0xd8   : > { %v412_v56 = vadd.f32 %v394_v53, %v324_v32  ;;  %v330_v57 = vpop.f32.mrf.mxu1 }
  0xd9   : > { %v331_v58 = vadd.f32 %v330_v57, %v276_v5 }
  0xda   : > { %v492_v60 = vadd.f32 %v474_v38, %v412_v56  ;;  %v561_v54 = vpop.f32.mrf.mxu0  ;;  %v1428_v38 = vld [vmem:[%s1482_s2] ss:$0 sm:$0xff] }
  0xdc   : > { %v1413_v61 = vadd.f32 %v554_v34, %v492_v60 }
  0xdf   : > { %v396_v62 = vpop.f32.mrf.mxu2  ;;  %v481_v63 = vpop.f32.mrf.mxu3 }
  0xe0   : > { %v413_v0 = vadd.f32 %v396_v62, %v326_v41  ;;  %v333_v1 = vpop.f32.mrf.mxu1 }
  0xe1   : > { %v334_v20 = vadd.f32 %v333_v1, %v1380_v48 }
  0xe2   : > { %v493_v3 = vadd.f32 %v476_v45, %v413_v0  ;;  %v564_v4 = vpop.f32.mrf.mxu0 }
  0xe4   : > { %v1415_v2 = vadd.f32 %v556_v42, %v493_v3 }
  0xe7   : > { %v399_v7 = vpop.f32.mrf.mxu2  ;;  %v484_v8 = vpop.f32.mrf.mxu3 }
  0xe8   : > { %v414_v9 = vadd.f32 %v399_v7, %v329_v46  ;;  %v335_v59 = vpop.f32.mrf.mxu1 }
  0xea   : > { %v494_v10 = vadd.f32 %v479_v55, %v414_v9  ;;  %v566_v11 = vpop.f32.mrf.mxu0 }
  0xec   : > { %v1417_v12 = vadd.f32 %v559_v47, %v494_v10 }
  0xef   : > { %v401_v5 = vpop.f32.mrf.mxu2  ;;  %v486_v13 = vpop.f32.mrf.mxu3 }
  0xf0   : > { %v415_v14 = vadd.f32 %v401_v5, %v331_v58  ;;  %v624_v16 = vpop.f32.mrf.mxu1 }
  0xf1   : > { %v648_v31 = vadd.f32 %v624_v16, %v1403_v15 }
  0xf2   : > { %v495_v17 = vadd.f32 %v481_v63, %v415_v14  ;;  %v864_v18 = vpop.f32.mrf.mxu0 }
  0xf4   : > { %v1419_v19 = vadd.f32 %v561_v54, %v495_v17 }
  0xf7   : > { %v404_v21 = vpop.f32.mrf.mxu2  ;;  %v784_v22 = vpop.f32.mrf.mxu3 }
  0xf8   : > { %v416_v23 = vadd.f32 %v404_v21, %v334_v20  ;;  %v626_v24 = vpop.f32.mrf.mxu1 }
  0xf9   : > { %v649_v41 = vadd.f32 %v626_v24, %v1407_v36 }
  0xfa   : > { %v496_v25 = vadd.f32 %v484_v8, %v416_v23  ;;  %v866_v6 = vpop.f32.mrf.mxu0 }
  0xfc   : > { %v1422_v26 = vadd.f32 %v564_v4, %v496_v25 }
  0xff   : > { %v406_v27 = vpop.f32.mrf.mxu2  ;;  %v786_v28 = vpop.f32.mrf.mxu3 }
 0x100   : > { %v629_v29 = vpop.f32.mrf.mxu1 }
 0x101   : > { %v650_v51 = vadd.f32 %v629_v29, %v1409_v43 }
 0x102   : > { %v869_v30 = vpop.f32.mrf.mxu0 }
 0x107   : > { %v704_v32 = vpop.f32.mrf.mxu2  ;;  %v789_v33 = vpop.f32.mrf.mxu3 }
 0x108   : > { %v728_v34 = vadd.f32 %v704_v32, %v648_v31  ;;  %v631_v37 = vpop.f32.mrf.mxu1 }
 0x109   : > { %v651_v63 = vadd.f32 %v631_v37, %v1411_v52 }
 0x10a   : > { %v808_v48 = vadd.f32 %v784_v22, %v728_v34  ;;  %v871_v39 = vpop.f32.mrf.mxu0 }
 0x10c   : > { %v888_v40 = vadd.f32 %v864_v18, %v808_v48 }
 0x10e   : > { %v901_v35 = vadd.f32 %v1428_v38, %v888_v40 }
 0x10f   : > { %v706_v15 = vpop.f32.mrf.mxu2  ;;  %v791_v42 = vpop.f32.mrf.mxu3 }
 0x110   : > { %v910_v44 = vmax.f32 %v901_v35, 0.0  ;;  %v729_v45 = vadd.f32 %v706_v15, %v649_v41  ;;  %v634_v49 = vpop.f32.mrf.mxu1 }
 0x111   : > { %v652_v10 = vadd.f32 %v634_v49, %v1413_v61 }
 0x112   : > { %920 = vst.msk [vmem:[%s1436_s20] sm:$0xff] %vm919_vm1, %v910_v44  ;;  %v809_v50 = vadd.f32 %v786_v28, %v729_v45  ;;  %v874_v46 = vpop.f32.mrf.mxu0 }
 0x114   : > { %v889_v36 = vadd.f32 %v866_v6, %v809_v50 }
 0x116   : > { %v902_v47 = vadd.f32 %v1428_v38, %v889_v36 }
 0x117   : > { %v709_v53 = vpop.f32.mrf.mxu2  ;;  %v794_v55 = vpop.f32.mrf.mxu3 }
 0x118   : > { %v911_v56 = vmax.f32 %v902_v47, 0.0  ;;  %v730_v57 = vadd.f32 %v709_v53, %v650_v51  ;;  %v636_v58 = vpop.f32.mrf.mxu1 }
 0x119   : > { %v653_v21 = vadd.f32 %v636_v58, %v1415_v2 }
 0x11a   : > { %921 = vst.msk [vmem:[%s1436_s20 + $0x8] sm:$0xff] %vm919_vm1, %v911_v56  ;;  %v810_v60 = vadd.f32 %v789_v33, %v730_v57  ;;  %v876_v54 = vpop.f32.mrf.mxu0 }
 0x11c   : > { %v890_v62 = vadd.f32 %v869_v30, %v810_v60 }
 0x11e   : > { %v903_v0 = vadd.f32 %v1428_v38, %v890_v62 }
 0x11f   : > { %v711_v1 = vpop.f32.mrf.mxu2  ;;  %v796_v43 = vpop.f32.mrf.mxu3 }
 0x120   : > { %v912_v3 = vmax.f32 %v903_v0, 0.0  ;;  %v731_v4 = vadd.f32 %v711_v1, %v651_v63  ;;  %v639_v7 = vpop.f32.mrf.mxu1 }
 0x121   : > { %v654_v30 = vadd.f32 %v639_v7, %v1417_v12 }
 0x122   : > { %922 = vst.msk [vmem:[%s1436_s20 + $0x10] sm:$0xff] %vm919_vm1, %v912_v3  ;;  %v811_v8 = vadd.f32 %v791_v42, %v731_v4  ;;  %v879_v9 = vpop.f32.mrf.mxu0 }
 0x124   : > { %v891_v59 = vadd.f32 %v871_v39, %v811_v8 }
 0x126   : > { %v904_v11 = vadd.f32 %v1428_v38, %v891_v59 }
 0x127   : > { %v714_v5 = vpop.f32.mrf.mxu2  ;;  %v799_v52 = vpop.f32.mrf.mxu3 }
 0x128   : > { %v913_v13 = vmax.f32 %v904_v11, 0.0  ;;  %v732_v14 = vadd.f32 %v714_v5, %v652_v10  ;;  %v641_v16 = vpop.f32.mrf.mxu1 }
 0x129   : > { %v655_v41 = vadd.f32 %v641_v16, %v1419_v19 }
 0x12a   : > { %923 = vst.msk [vmem:[%s1436_s20 + $0x18] sm:$0xff] %vm919_vm1, %v913_v13  ;;  %v812_v17 = vadd.f32 %v794_v55, %v732_v14  ;;  %v881_v18 = vpop.f32.mrf.mxu0 }
 0x12c   : > { %v892_v20 = vadd.f32 %v874_v46, %v812_v17 }
 0x12e   : > { %v905_v22 = vadd.f32 %v1428_v38, %v892_v20 }
 0x12f   : > { %v716_v23 = vpop.f32.mrf.mxu2  ;;  %v801_v61 = vpop.f32.mrf.mxu3 }
 0x130   : > { %v914_v24 = vmax.f32 %v905_v22, 0.0  ;;  %v733_v25 = vadd.f32 %v716_v23, %v653_v21  ;;  %v644_v6 = vpop.f32.mrf.mxu1 }
 0x131   : > { %v656_v50 = vadd.f32 %v644_v6, %v1422_v26 }
 0x132   : > { %924 = vst.msk [vmem:[%s1436_s20 + $0x20] sm:$0xff] %vm919_vm1, %v914_v24  ;;  %v813_v27 = vadd.f32 %v796_v43, %v733_v25  ;;  %v884_v28 = vpop.f32.mrf.mxu0 }
 0x134   : > { %v893_v29 = vadd.f32 %v876_v54, %v813_v27 }
 0x136   : > { %v906_v31 = vadd.f32 %v1428_v38, %v893_v29 }
 0x137   : > { %v719_v32 = vpop.f32.mrf.mxu2  ;;  %v804_v2 = vpop.f32.mrf.mxu3 }
 0x138   : > { %v915_v33 = vmax.f32 %v906_v31, 0.0  ;;  %v734_v34 = vadd.f32 %v719_v32, %v654_v30  ;;  %v646_v37 = vpop.f32.mrf.mxu1 }
 0x13a   : > { %925 = vst.msk [vmem:[%s1436_s20 + $0x28] sm:$0xff] %vm919_vm1, %v915_v33  ;;  %v814_v48 = vadd.f32 %v799_v52, %v734_v34  ;;  %v886_v39 = vpop.f32.mrf.mxu0 }
 0x13c   : > { %v894_v40 = vadd.f32 %v879_v9, %v814_v48 }
 0x13e   : > { %v907_v35 = vadd.f32 %v1428_v38, %v894_v40 }
 0x13f   : > { %v721_v15 = vpop.f32.mrf.mxu2  ;;  %v806_v12 = vpop.f32.mrf.mxu3 }
 0x140   : > { %v916_v42 = vmax.f32 %v907_v35, 0.0  ;;  %v735_v44 = vadd.f32 %v721_v15, %v655_v41 }
 0x142   : > { %926 = vst.msk [vmem:[%s1436_s20 + $0x30] sm:$0xff] %vm919_vm1, %v916_v42  ;;  %v815_v45 = vadd.f32 %v801_v61, %v735_v44 }
 0x144   : > { %v895_v49 = vadd.f32 %v881_v18, %v815_v45 }
 0x146   : > { %v908_v46 = vadd.f32 %v1428_v38, %v895_v49 }
 0x147   : > { %v724_v36 = vpop.f32.mrf.mxu2 }
 0x148   : > { %v917_v51 = vmax.f32 %v908_v46, 0.0  ;;  %v736_v47 = vadd.f32 %v724_v36, %v656_v50 }
 0x14a   : > { %927 = vst.msk [vmem:[%s1436_s20 + $0x38] sm:$0xff] %vm919_vm1, %v917_v51  ;;  %v816_v19 = vadd.f32 %v804_v2, %v736_v47 }
 0x14c   : > { %v896_v53 = vadd.f32 %v884_v28, %v816_v19 }
 0x14e   : > { %v909_v55 = vadd.f32 %v1428_v38, %v896_v53 }
 0x14f   : > { %v726_v56 = vpop.f32.mrf.mxu2 }
 0x150   : > { %v918_v57 = vmax.f32 %v909_v55, 0.0 }
 0x152   : > { %928 = vst.msk [vmem:[%s1436_s20 + $0x40] sm:$0xff] %vm919_vm1, %v918_v57 }
 0x153 PF: > { %s13_s14 = sadd.s32 1, %s1177_s14   ;;  %s1484_s12 = smov %s1173_s13 }
 0x154   : > { %p10_p5 = scmp.ge.s32.totalorder %s13_s14, 4   ;;  %s1485_s13 = smov %s1487_s15 }
 0x156   :  { %12 = sbr.rel (!%p10_p5) target bundleno = 2 (0x2), region = 70 }

// kernel: matrix_forward.8
= control target key start
LH: loop header
LB: loop body
LE: loop exit
PB: predicated region body
PF: predicated region fallthrough
CT: control target
= control target key end

     0   :  { %s947_s12 = smov 0   ;;  %s949_s13 = smov 0   ;;  %s1091_s0 = inlined_call_operand.vmem [shape: f32[2,104,32], index: 0, kind: input, shape index: {}]   ;;  %s1092_s1 = inlined_call_operand.vmem [shape: bf16[9,32,64], index: 1, kind: input, shape index: {}]   ;;  %s1093_s2 = inlined_call_operand.vmem [shape: f32[1,64], index: 2, kind: input, shape index: {}]   ;;  %s1094_s3 = inlined_call_operand.vmem [shape: f32[2,24,64], index: 3, kind: output, shape index: {}]  }
   0x1   :  { %s951_s14 = smov 0  }
   0x2 LB: > { %s25_s15 = sadd.s32 1, %s921_s13  ;;  %p729_p0 = scmp.ge.s32.totalorder %s925_s14, 1  ;;  %s925_s14 = sphi %s951_s14, %s13_s14   ;;  %s921_s13 = sphi %s949_s13, %s1096_s13   ;;  %s917_s12 = sphi %s947_s12, %s1095_s12  }
   0x3   : > { %p27_p1 = scmp.ge.s32.totalorder %s25_s15, 2  ;;  %p151_p2 = scmp.lt.s32.totalorder %s925_s14, 3 }
   0x5   : > { %s1098_s15 = smov (%p27_p1, %s25_s15), 0  ;;  %p152_p3 = pnand %p729_p0, %p151_p2 }
   0x6   : > { %p179_p4 = scmp.lt.s32.totalorder (!%p152_p3), %s917_s12, 1 }
   0x7   : > { %155 = sbr.rel (%p152_p3) target bundleno = 223 (0xdf), region = 32 }
   0xc   : > { %v859_v0 = vld [vmem:[%s1092_s1 + $0x18] sm:$0xff]  ;;  %v861_v1 = vld [vmem:[%s1092_s1 + $0x28] sm:$0xff]  ;;  %v858_v3 = vld [vmem:[%s1092_s1 + $0x10] sm:$0xff]  ;;  %s1100_s12 = smov (!%p179_p4, %s917_s12), 1  ;;  %vm226_vm0 = vcmask 261120   ;;  %vm640_vm1 = vcmask 523264  }
   0xd   : > { %v863_v2 = vld [vmem:[%s1092_s1 + $0x38] sm:$0xff]  ;;  %239 = vmatpush.bf16.msra.mxu0 %v859_v0  ;;  %874 = vmatpush.bf16.msra.mxu1 %v859_v0  ;;  %v857_v4 = vld [vmem:[%s1092_s1 + $0x8] sm:$0xff]  ;;  %v860_v5 = vld [vmem:[%s1092_s1 + $0x20] sm:$0xff]  ;;  %s876_s28 = smul.u32 104, %s1100_s12 }
   0xe   : > { %321 = vmatpush.bf16.msra.mxu2 %v861_v1  ;;  %370 = vmatpush.bf16.msra.mxu3 %v863_v2  ;;  %v862_v6 = vld [vmem:[%s1092_s1 + $0x30] sm:$0xff]  ;;  %v865_v7 = vld [vmem:[%s1092_s1 + $0x48] sm:$0xff]  ;;  %v871_v9 = vld [vmem:[%s1092_s1 + $0x78] sm:$0xff]  ;;  %s877_s8 = smul.u32 24, %s1100_s12 }
   0xf   : > { %v869_v8 = vld [vmem:[%s1092_s1 + $0x68] sm:$0xff]  ;;  %s1001_s16 = scalar_lea.vmem %s1091_s0, %s876_s28  ;;  %v856_v10 = vld [vmem:[%s1092_s1] sm:$0xff]  ;;  %v867_v22 = vld [vmem:[%s1092_s1 + $0x58] sm:$0xff] }
  0x10   : > { %v864_v11 = vld [vmem:[%s1092_s1 + $0x40] sm:$0xff]  ;;  %v206_v14 = vld [vmem:[%s1001_s16 + $0x29] sm:$0xff]  ;;  %v336_v19 = vld [vmem:[%s1001_s16 + $0x32] sm:$0xff]  ;;  %s192_s11 = scalar_lea.vmem %s1094_s3, %s877_s8 }
  0x11   : > { %240 = vmatpush.bf16.msra.mxu0 %v858_v3  ;;  %875 = vmatpush.bf16.msra.mxu1 %v858_v3  ;;  %v204_v12 = vld [vmem:[%s1001_s16 + $0x19] sm:$0xff]  ;;  %v205_v13 = vld [vmem:[%s1001_s16 + $0x21] sm:$0xff]  ;;  %v208_v16 = vpack.c.bf16 %v206_v14, %v206_v14  ;;  %v288_v18 = vld [vmem:[%s1001_s16 + $0x9] sm:$0xff] }
  0x12   : > { %322 = vmatpush.bf16.msra.mxu2 %v860_v5  ;;  %v207_v15 = vpack.c.bf16 %v205_v13, %v204_v12  ;;  %371 = vmatpush.bf16.msra.mxu3 %v862_v6  ;;  %v287_v17 = vld [vmem:[%s1001_s16 + $0x1] sm:$0xff]  ;;  %v870_v26 = vld [vmem:[%s1092_s1 + $0x70] sm:$0xff] }
  0x13   : > { %v290_v20 = vpack.c.bf16 %v288_v18, %v287_v17  ;;  %v337_v21 = vld [vmem:[%s1001_s16 + $0x3a] sm:$0xff]  ;;  %v873_v23 = vld [vmem:[%s1092_s1 + $0x88] sm:$0xff]  ;;  %v866_v27 = vld [vmem:[%s1092_s1 + $0x50] sm:$0xff] }
  0x14   : > { %744 = vmatmul.msk.bf16.vlgmr.msra.gmra.mxu0 %vm226_vm0, %v207_v15  ;;  %745 = vmatmul.msk.bf16.vlgmr.msra.gmra.mxu1 %vm226_vm0, %v208_v16  ;;  %v339_v24 = vpack.c.bf16 %v337_v21, %v336_v19  ;;  %v868_v25 = vld [vmem:[%s1092_s1 + $0x60] sm:$0xff]  ;;  %v196_v30 = vld [vmem:[%s1001_s16 + $0x8] sm:$0xff]  ;;  %v386_v32 = vld [vmem:[%s1001_s16 + $0x53] sm:$0xff] }
  0x15   : > { %275 = vmatpush.bf16.msrb.mxu1 %v857_v4  ;;  %419 = vmatpush.bf16.msrb.mxu0 %v865_v7  ;;  %v872_v28 = vld [vmem:[%s1092_s1 + $0x80] sm:$0xff]  ;;  %v385_v31 = vld [vmem:[%s1001_s16 + $0x4b] sm:$0xff]  ;;  %v434_v49 = vld [vmem:[%s1001_s16 + $0x33] sm:$0xff] }
  0x16   : > { %517 = vmatpush.bf16.msrb.mxu2 %v869_v8  ;;  %566 = vmatpush.bf16.msrb.mxu3 %v871_v9  ;;  %v195_v29 = vld [vmem:[%s1001_s16] sm:$0xff]  ;;  %v289_v33 = vld [vmem:[%s1001_s16 + $0x11] sm:$0xff]  ;;  %v388_v36 = vpack.c.bf16 %v386_v32, %v385_v31 }
  0x17   : > { %768 = vmatmul.msk.bf16.vlgmr.msra.gmra.mxu2 %vm226_vm0, %v290_v20  ;;  %782 = vmatmul.msk.bf16.vlgmr.msra.gmra.mxu3 %vm226_vm0, %v339_v24  ;;  %v338_v34 = vld [vmem:[%s1001_s16 + $0x42] sm:$0xff]  ;;  %v198_v35 = vpack.c.bf16 %v196_v30, %v195_v29  ;;  %v291_v37 = vpack.c.bf16 %v289_v33, %v289_v33  ;;  %v197_v39 = vld [vmem:[%s1001_s16 + $0x10] sm:$0xff] }
  0x18   : > { %v340_v38 = vpack.c.bf16 %v338_v34, %v338_v34  ;;  %v387_v40 = vld [vmem:[%s1001_s16 + $0x5b] sm:$0xff]  ;;  %v483_v41 = vld [vmem:[%s1001_s16 + $0x5] sm:$0xff]  ;;  %v484_v42 = vld [vmem:[%s1001_s16 + $0xd] sm:$0xff]  ;;  %v199_v45 = vpack.c.bf16 %v197_v39, %v197_v39 }
  0x19   : > { %276 = vmatpush.bf16.msrb.mxu1 %v856_v10  ;;  %420 = vmatpush.bf16.msrb.mxu0 %v864_v11  ;;  %v532_v43 = vld [vmem:[%s1001_s16 + $0x1e] sm:$0xff]  ;;  %v533_v44 = vld [vmem:[%s1001_s16 + $0x26] sm:$0xff]  ;;  %v389_v46 = vpack.c.bf16 %v387_v40, %v387_v40  ;;  %v486_v47 = vpack.c.bf16 %v484_v42, %v483_v41  ;;  %v582_v52 = vld [vmem:[%s1001_s16 + $0xe] sm:$0xff] }
  0x1a   : > { %518 = vmatpush.bf16.msrb.mxu2 %v868_v25  ;;  %567 = vmatpush.bf16.msrb.mxu3 %v870_v26  ;;  %v535_v48 = vpack.c.bf16 %v533_v44, %v532_v43  ;;  %v435_v50 = vld [vmem:[%s1001_s16 + $0x3b] sm:$0xff]  ;;  %v581_v51 = vld [vmem:[%s1001_s16 + $0x6] sm:$0xff]  ;;  %v534_v54 = vld [vmem:[%s1001_s16 + $0x2e] sm:$0xff] }
  0x1b   : > { %v485_v53 = vld [vmem:[%s1001_s16 + $0x15] sm:$0xff]  ;;  %v437_v55 = vpack.c.bf16 %v435_v50, %v434_v49  ;;  %v584_v56 = vpack.c.bf16 %v582_v52, %v581_v51  ;;  %v536_v58 = vpack.c.bf16 %v534_v54, %v534_v54  ;;  %v436_v59 = vld [vmem:[%s1001_s16 + $0x43] sm:$0xff] }
  0x1c   : > { %v487_v57 = vpack.c.bf16 %v485_v53, %v485_v53  ;;  %v583_v60 = vld [vmem:[%s1001_s16 + $0x16] sm:$0xff]  ;;  %v438_v61 = vpack.c.bf16 %v436_v59, %v436_v59 }
  0x1d   : > { %468 = vmatpush.bf16.msra.mxu1 %v867_v22  ;;  %615 = vmatpush.bf16.msra.mxu0 %v873_v23  ;;  %v585_v62 = vpack.c.bf16 %v583_v60, %v583_v60 }
  0x21   : > { %469 = vmatpush.bf16.msra.mxu1 %v866_v27  ;;  %616 = vmatpush.bf16.msra.mxu0 %v872_v28 }
  0x24   : > { %754 = vmatmul.msk.bf16.vlgmr.msrb.gmra.mxu1 %vm226_vm0, %v198_v35  ;;  %796 = vmatmul.msk.bf16.vlgmr.msrb.gmra.mxu0 %vm226_vm0, %v388_v36  ;;  %v902_v36 = vld [vmem:[%s1093_s2] ss:$0 sm:$0xff] }
  0x27   : > { %769 = vmatmul.msk.bf16.gmra.mxu2 %vm226_vm0, %v291_v37  ;;  %783 = vmatmul.msk.bf16.gmra.mxu3 %vm226_vm0, %v340_v38 }
  0x34   : > { %755 = vmatmul.msk.bf16.gmra.mxu1 %vm226_vm0, %v199_v45  ;;  %797 = vmatmul.msk.bf16.gmra.mxu0 %vm226_vm0, %v389_v46 }
  0x37   : > { %824 = vmatmul.msk.bf16.vlgmr.msrb.gmra.mxu2 %vm226_vm0, %v486_v47  ;;  %838 = vmatmul.msk.bf16.vlgmr.msrb.gmra.mxu3 %vm226_vm0, %v535_v48 }
  0x44   : > { %810 = vmatmul.msk.bf16.vlgmr.msra.gmra.mxu1 %vm226_vm0, %v437_v55  ;;  %852 = vmatmul.msk.bf16.vlgmr.msra.gmra.mxu0 %vm226_vm0, %v584_v56 }
  0x47   : > { %825 = vmatmul.msk.bf16.gmra.mxu2 %vm226_vm0, %v487_v57  ;;  %839 = vmatmul.msk.bf16.gmra.mxu3 %vm226_vm0, %v536_v58 }
  0x54   : > { %811 = vmatmul.msk.bf16.gmra.mxu1 %vm226_vm0, %v438_v61  ;;  %853 = vmatmul.msk.bf16.gmra.mxu0 %vm226_vm0, %v585_v62 }
  0x91   : > { %v242_v63 = vpop.f32.mrf.mxu0  ;;  %v247_v0 = vpop.f32.mrf.mxu1 }
  0x99   : > { %v244_v2 = vpop.f32.mrf.mxu0  ;;  %v249_v3 = vpop.f32.mrf.mxu1 }
  0x9a   : > { %v324_v1 = vpop.f32.mrf.mxu2  ;;  %v373_v4 = vpop.f32.mrf.mxu3 }
  0xa1   : > { %v278_v6 = vpop.f32.mrf.mxu1  ;;  %v422_v7 = vpop.f32.mrf.mxu0 }
  0xa2   : > { %v326_v5 = vpop.f32.mrf.mxu2  ;;  %v375_v8 = vpop.f32.mrf.mxu3  ;;  %v279_v17 = vadd.f32 %v278_v6, %v242_v63 }
  0xa4   : > { %v333_v18 = vadd.f32 %v324_v1, %v279_v17 }
  0xa6   : > { %v382_v23 = vadd.f32 %v373_v4, %v333_v18 }
  0xa8   : > { %v431_v25 = vadd.f32 %v422_v7, %v382_v23 }
  0xa9   : > { %v280_v10 = vpop.f32.mrf.mxu1  ;;  %v424_v11 = vpop.f32.mrf.mxu0 }
  0xaa   : > { %v329_v9 = vpop.f32.mrf.mxu2  ;;  %v378_v12 = vpop.f32.mrf.mxu3  ;;  %v281_v24 = vadd.f32 %v280_v10, %v244_v2 }
  0xac   : > { %v334_v26 = vadd.f32 %v326_v5, %v281_v24 }
  0xae   : > { %v383_v32 = vadd.f32 %v375_v8, %v334_v26 }
  0xb0   : > { %v432_v37 = vadd.f32 %v424_v11, %v383_v32 }
  0xb1   : > { %v283_v14 = vpop.f32.mrf.mxu1  ;;  %v427_v15 = vpop.f32.mrf.mxu0 }
  0xb2   : > { %v331_v13 = vpop.f32.mrf.mxu2  ;;  %v380_v16 = vpop.f32.mrf.mxu3  ;;  %v284_v33 = vadd.f32 %v283_v14, %v247_v0 }
  0xb4   : > { %v335_v38 = vadd.f32 %v329_v9, %v284_v33 }
  0xb6   : > { %v384_v46 = vadd.f32 %v378_v12, %v335_v38 }
  0xb8   : > { %v433_v50 = vadd.f32 %v427_v15, %v384_v46 }
  0xb9   : > { %v285_v20 = vpop.f32.mrf.mxu1  ;;  %v429_v21 = vpop.f32.mrf.mxu0 }
  0xba   : > { %v520_v19 = vpop.f32.mrf.mxu2  ;;  %v569_v22 = vpop.f32.mrf.mxu3 }
  0xc1   : > { %v471_v28 = vpop.f32.mrf.mxu1  ;;  %v618_v29 = vpop.f32.mrf.mxu0 }
  0xc2   : > { %v522_v27 = vpop.f32.mrf.mxu2  ;;  %v480_v30 = vadd.f32 %v471_v28, %v431_v25  ;;  %v571_v31 = vpop.f32.mrf.mxu3 }
  0xc4   : > { %v529_v34 = vadd.f32 %v520_v19, %v480_v30 }
  0xc6   : > { %v578_v35 = vadd.f32 %v569_v22, %v529_v34 }
  0xc8   : > { %v627_v39 = vadd.f32 %v618_v29, %v578_v35 }
  0xc9   : > { %v473_v41 = vpop.f32.mrf.mxu1  ;;  %v620_v42 = vpop.f32.mrf.mxu0 }
  0xca   : > { %v525_v40 = vpop.f32.mrf.mxu2  ;;  %v634_v43 = vadd.f32 %v902_v36, %v627_v39  ;;  %v481_v44 = vadd.f32 %v473_v41, %v432_v37  ;;  %v574_v45 = vpop.f32.mrf.mxu3 }
  0xcc   : > { %v637_v47 = vmax.f32 %v634_v43, 0.0  ;;  %v530_v48 = vadd.f32 %v522_v27, %v481_v44 }
  0xce   : > { %641 = vst.msk [vmem:[%s192_s11] sm:$0xff] %vm640_vm1, %v637_v47  ;;  %v579_v49 = vadd.f32 %v571_v31, %v530_v48 }
  0xd0   : > { %v628_v51 = vadd.f32 %v620_v42, %v579_v49 }
  0xd1   : > { %v476_v53 = vpop.f32.mrf.mxu1  ;;  %v623_v54 = vpop.f32.mrf.mxu0 }
  0xd2   : > { %v527_v52 = vpop.f32.mrf.mxu2  ;;  %v635_v55 = vadd.f32 %v902_v36, %v628_v51  ;;  %v482_v56 = vadd.f32 %v476_v53, %v433_v50  ;;  %v576_v57 = vpop.f32.mrf.mxu3 }
  0xd4   : > { %v638_v58 = vmax.f32 %v635_v55, 0.0  ;;  %v531_v59 = vadd.f32 %v525_v40, %v482_v56 }
  0xd6   : > { %642 = vst.msk [vmem:[%s192_s11 + $0x8] sm:$0xff] %vm640_vm1, %v638_v58  ;;  %v580_v60 = vadd.f32 %v574_v45, %v531_v59 }
  0xd8   : > { %v629_v61 = vadd.f32 %v623_v54, %v580_v60 }
  0xd9   : > { %v478_v62 = vpop.f32.mrf.mxu1  ;;  %v625_v63 = vpop.f32.mrf.mxu0 }
  0xda   : > { %v636_v0 = vadd.f32 %v902_v36, %v629_v61 }
  0xdc   : > { %v639_v1 = vmax.f32 %v636_v0, 0.0 }
  0xde   : > { %643 = vst.msk [vmem:[%s192_s11 + $0x10] sm:$0xff] %vm640_vm1, %v639_v1 }
  0xdf PF: > { %s13_s14 = sadd.s32 1, %s925_s14   ;;  %s1095_s12 = smov %s921_s13 }
  0xe0   : > { %p10_p5 = scmp.ge.s32.totalorder %s13_s14, 4   ;;  %s1096_s13 = smov %s1098_s15 }
  0xe2   :  { %12 = sbr.rel (!%p10_p5) target bundleno = 2 (0x2), region = 70 }

// kernel: matrix_forward.9
= control target key start
LH: loop header
LB: loop body
LE: loop exit
PB: predicated region body
PF: predicated region fallthrough
CT: control target
= control target key end

     0   :  { %s2713_s18 = smov 0   ;;  %s2715_s19 = smov 0   ;;  %s3350_s0 = inlined_call_operand.vmem [shape: f32[2,104,64], index: 0, kind: input, shape index: {}]   ;;  %s3351_s1 = inlined_call_operand.vmem [shape: f32[2,104,32], index: 1, kind: input, shape index: {}]   ;;  %s3352_s2 = inlined_call_operand.vmem [shape: bf16[9,64,32], index: 2, kind: input, shape index: {}]   ;;  %s3353_s3 = inlined_call_operand.vmem [shape: bf16[9,32,32], index: 3, kind: input, shape index: {}]   ;;  %s3354_s4 = inlined_call_operand.vmem [shape: f32[1,32], index: 4, kind: input, shape index: {}]   ;;  %s3355_s5 = inlined_call_operand.vmem [shape: f32[2,80,32], index: 5, kind: output, shape index: {}]  }
   0x1   :  { %s2717_s20 = smov 0  }
   0x2 LB: > { %s27_s21 = sadd.s32 1, %s2677_s19  ;;  %p2162_p0 = scmp.ge.s32.totalorder %s2681_s20, 1  ;;  %s2681_s20 = sphi %s2717_s20, %s15_s20   ;;  %s2677_s19 = sphi %s2715_s19, %s3357_s19   ;;  %s2673_s18 = sphi %s2713_s18, %s3356_s18  }
   0x3   : > { %p29_p1 = scmp.ge.s32.totalorder %s27_s21, 2  ;;  %p211_p2 = scmp.lt.s32.totalorder %s2681_s20, 3 }
   0x5   : > { %s3359_s21 = smov (%p29_p1, %s27_s21), 0  ;;  %p212_p3 = pnand %p2162_p0, %p211_p2 }
   0x6   : > { %p248_p4 = scmp.lt.s32.totalorder (!%p212_p3), %s2673_s18, 1 }
   0x7   : > { %215 = sbr.rel (%p212_p3) target bundleno = 523 (0x20b), region = 40 }
   0xc   : > { %v2577_v0 = vld [vmem:[%s3352_s2 + $0x38] sm:$0xff]  ;;  %v2576_v2 = vld [vmem:[%s3352_s2 + $0x30] sm:$0xff]  ;;  %s3361_s18 = smov (!%p248_p4, %s2673_s18), 1  ;;  %v2575_v4 = vld [vmem:[%s3352_s2 + $0x28] sm:$0xff]  ;;  %vm340_vm0 = vcmask 523264   ;;  %vm1243_vm1 = vcmask 261120  }
   0xd   : > { %v2573_v1 = vld [vmem:[%s3352_s2 + $0x18] sm:$0xff]  ;;  %360 = vmatpush.bf16.msra.mxu0 %v2577_v0  ;;  %2624 = vmatpush.bf16.msra.mxu2 %v2577_v0  ;;  %v2572_v3 = vld [vmem:[%s3352_s2 + $0x10] sm:$0xff]  ;;  %s2632_s30 = smul.u32 104, %s3361_s18  ;;  %v2571_v5 = vld [vmem:[%s3352_s2 + $0x8] sm:$0xff] }
   0xe   : > { %433 = vmatpush.bf16.msra.mxu1 %v2573_v1  ;;  %2628 = vmatpush.bf16.msra.mxu3 %v2573_v1  ;;  %v2574_v6 = vld [vmem:[%s3352_s2 + $0x20] sm:$0xff]  ;;  %v2589_v16 = vld [vmem:[%s3352_s2 + $0x98] sm:$0xff]  ;;  %v2588_v24 = vld [vmem:[%s3352_s2 + $0x90] sm:$0xff]  ;;  %s2633_s16 = smul.u32 80, %s3361_s18 }
   0xf   : > { %s2754_s10 = scalar_lea.vmem %s3350_s0, %s2632_s30  ;;  %v2570_v7 = vld [vmem:[%s3352_s2] sm:$0xff]  ;;  %v2593_v17 = vld [vmem:[%s3352_s2 + $0xb8] sm:$0xff]  ;;  %v2592_v25 = vld [vmem:[%s3352_s2 + $0xb0] sm:$0xff]  ;;  %s2986_s11 = scalar_lea.vmem %s3351_s1, %s2632_s30 }
  0x10   : > { %v292_v8 = vld [vmem:[%s2754_s10 + $0x1] sm:$0xff]  ;;  %v293_v9 = vld [vmem:[%s2754_s10 + $0x9] sm:$0xff]  ;;  %v298_v10 = vld [vmem:[%s2754_s10 + $0x31] sm:$0xff]  ;;  %s3302_s23 = scalar_lea.vmem %s3355_s5, %s2633_s16 }
  0x11   : > { %361 = vmatpush.bf16.msra.mxu0 %v2576_v2  ;;  %2625 = vmatpush.bf16.msra.mxu2 %v2576_v2  ;;  %v299_v11 = vld [vmem:[%s2754_s10 + $0x39] sm:$0xff]  ;;  %v270_v13 = vld [vmem:[%s2754_s10 + $0x8] sm:$0xff]  ;;  %v275_v14 = vld [vmem:[%s2754_s10 + $0x30] sm:$0xff]  ;;  %v302_v18 = vpack.c.bf16 %v293_v9, %v292_v8 }
  0x12   : > { %434 = vmatpush.bf16.msra.mxu1 %v2572_v3  ;;  %2629 = vmatpush.bf16.msra.mxu3 %v2572_v3  ;;  %v269_v12 = vld [vmem:[%s2754_s10] sm:$0xff]  ;;  %v276_v15 = vld [vmem:[%s2754_s10 + $0x38] sm:$0xff]  ;;  %v305_v19 = vpack.c.bf16 %v299_v11, %v298_v10  ;;  %v2580_v26 = vld [vmem:[%s3352_s2 + $0x50] sm:$0xff] }
  0x13   : > { %v279_v20 = vpack.c.bf16 %v270_v13, %v269_v12  ;;  %v282_v21 = vpack.c.bf16 %v276_v15, %v275_v14  ;;  %v2581_v22 = vld [vmem:[%s3352_s2 + $0x58] sm:$0xff]  ;;  %v2584_v27 = vld [vmem:[%s3352_s2 + $0x70] sm:$0xff]  ;;  %v2587_v28 = vld [vmem:[%s3352_s2 + $0x88] sm:$0xff] }
  0x14   : > { %v2585_v23 = vld [vmem:[%s3352_s2 + $0x78] sm:$0xff]  ;;  %v2591_v29 = vld [vmem:[%s3352_s2 + $0xa8] sm:$0xff]  ;;  %v2586_v32 = vld [vmem:[%s3352_s2 + $0x80] sm:$0xff] }
  0x15   : > { %362 = vmatpush.bf16.msra.mxu0 %v2575_v4  ;;  %2626 = vmatpush.bf16.msra.mxu2 %v2575_v4  ;;  %v2579_v30 = vld [vmem:[%s3352_s2 + $0x48] sm:$0xff]  ;;  %v2590_v33 = vld [vmem:[%s3352_s2 + $0xa0] sm:$0xff]  ;;  %v294_v34 = vld [vmem:[%s2754_s10 + $0x11] sm:$0xff] }
  0x16   : > { %435 = vmatpush.bf16.msra.mxu1 %v2571_v5  ;;  %2630 = vmatpush.bf16.msra.mxu3 %v2571_v5  ;;  %v2583_v31 = vld [vmem:[%s3352_s2 + $0x68] sm:$0xff]  ;;  %v295_v35 = vld [vmem:[%s2754_s10 + $0x19] sm:$0xff]  ;;  %v271_v39 = vld [vmem:[%s2754_s10 + $0x10] sm:$0xff] }
  0x17   : > { %v300_v36 = vld [vmem:[%s2754_s10 + $0x41] sm:$0xff]  ;;  %v301_v38 = vld [vmem:[%s2754_s10 + $0x49] sm:$0xff]  ;;  %v272_v40 = vld [vmem:[%s2754_s10 + $0x18] sm:$0xff]  ;;  %v303_v46 = vpack.c.bf16 %v295_v35, %v294_v34 }
  0x18   : > { %v2578_v37 = vld [vmem:[%s3352_s2 + $0x40] sm:$0xff]  ;;  %v278_v42 = vld [vmem:[%s2754_s10 + $0x48] sm:$0xff]  ;;  %v2597_v44 = vld [vmem:[%s3352_s2 + $0xd8] sm:$0xff]  ;;  %v306_v47 = vpack.c.bf16 %v301_v38, %v300_v36  ;;  %v280_v48 = vpack.c.bf16 %v272_v40, %v271_v39 }
  0x19   : > { %363 = vmatpush.bf16.msra.mxu0 %v2574_v6  ;;  %2627 = vmatpush.bf16.msra.mxu2 %v2574_v6  ;;  %v277_v41 = vld [vmem:[%s2754_s10 + $0x40] sm:$0xff]  ;;  %v2601_v45 = vld [vmem:[%s3352_s2 + $0xf8] sm:$0xff]  ;;  %v2607_v51 = vld [vmem:[%s3353_s3 + $0x8] sm:$0xff] }
  0x1a   : > { %436 = vmatpush.bf16.msra.mxu1 %v2570_v7  ;;  %2631 = vmatpush.bf16.msra.mxu3 %v2570_v7  ;;  %v2582_v43 = vld [vmem:[%s3352_s2 + $0x60] sm:$0xff]  ;;  %v283_v49 = vpack.c.bf16 %v278_v42, %v277_v41  ;;  %v2605_v50 = vld [vmem:[%s3352_s2 + $0x118] sm:$0xff]  ;;  %v2596_v52 = vld [vmem:[%s3352_s2 + $0xd0] sm:$0xff] }
  0x1b   : > { %v2600_v53 = vld [vmem:[%s3352_s2 + $0xf0] sm:$0xff]  ;;  %v296_v54 = vld [vmem:[%s2754_s10 + $0x21] sm:$0xff]  ;;  %v2609_v39 = vld [vmem:[%s3353_s3 + $0x18] sm:$0xff] }
  0x1c   : > { %2190 = vmatmul.msk.bf16.vlgmr.msra.gmra.mxu0 %vm340_vm0, %v302_v18  ;;  %2193 = vmatmul.msk.bf16.vlgmr.msra.gmra.mxu2 %vm340_vm0, %v305_v19  ;;  %v297_v55 = vld [vmem:[%s2754_s10 + $0x29] sm:$0xff]  ;;  %v273_v58 = vld [vmem:[%s2754_s10 + $0x20] sm:$0xff]  ;;  %v571_v60 = vld [vmem:[%s2754_s10 + $0x12] sm:$0xff] }
  0x1d   : > { %744 = vmatpush.bf16.msrb.mxu0 %v2589_v16  ;;  %2211 = vmatmul.msk.bf16.vlgmr.msra.gmra.mxu1 %vm340_vm0, %v279_v20  ;;  %v463_v56 = vld [vmem:[%s2754_s10 + $0x2] sm:$0xff]  ;;  %v464_v57 = vld [vmem:[%s2754_s10 + $0xa] sm:$0xff]  ;;  %v304_v61 = vpack.c.bf16 %v297_v55, %v296_v54  ;;  %v466_v3 = vld [vmem:[%s2754_s10 + $0x1a] sm:$0xff] }
  0x1e   : > { %851 = vmatpush.bf16.msrb.mxu1 %v2593_v17  ;;  %2214 = vmatmul.msk.bf16.vlgmr.msra.gmra.mxu3 %vm340_vm0, %v282_v21  ;;  %v274_v59 = vld [vmem:[%s2754_s10 + $0x28] sm:$0xff]  ;;  %v473_v62 = vpack.c.bf16 %v464_v57, %v463_v56  ;;  %v580_v0 = vpack.c.bf16 %v571_v60, %v464_v57  ;;  %v2604_v1 = vld [vmem:[%s3352_s2 + $0x110] sm:$0xff]  ;;  %v474_v9 = vpack.c.bf16 %v466_v3, %v571_v60  ;;  %v2606_v15 = vld [vmem:[%s3353_s3] sm:$0xff] }
  0x1f   : > { %530 = vmatpush.bf16.msrb.mxu2 %v2581_v22  ;;  %637 = vmatpush.bf16.msrb.mxu3 %v2585_v23  ;;  %v281_v63 = vpack.c.bf16 %v274_v59, %v273_v58  ;;  %v2595_v2 = vld [vmem:[%s3352_s2 + $0xc8] sm:$0xff]  ;;  %v678_v5 = vld [vmem:[%s2754_s10 + $0x13] sm:$0xff]  ;;  %v679_v17 = vld [vmem:[%s2754_s10 + $0x1b] sm:$0xff] }
  0x20   : > { %v677_v4 = vld [vmem:[%s2754_s10 + $0xb] sm:$0xff]  ;;  %v573_v6 = vld [vmem:[%s2754_s10 + $0x22] sm:$0xff]  ;;  %v2878_v8 = vld [vmem:[%s2754_s10 + $0x14] sm:$0xff] }
  0x21   : > { %745 = vmatpush.bf16.msrb.mxu0 %v2588_v24  ;;  %v784_v7 = vld [vmem:[%s2754_s10 + $0xc] sm:$0xff]  ;;  %v687_v10 = vpack.c.bf16 %v678_v5, %v677_v4  ;;  %v581_v11 = vpack.c.bf16 %v573_v6, %v466_v3  ;;  %v680_v18 = vld [vmem:[%s2754_s10 + $0x23] sm:$0xff]  ;;  %v2927_v34 = vld [vmem:[%s2754_s10 + $0x34] sm:$0xff] }
  0x22   : > { %852 = vmatpush.bf16.msrb.mxu1 %v2592_v25  ;;  %v794_v12 = vpack.c.bf16 %v2878_v8, %v784_v7  ;;  %v2599_v13 = vld [vmem:[%s3352_s2 + $0xe8] sm:$0xff]  ;;  %v575_v19 = vld [vmem:[%s2754_s10 + $0x32] sm:$0xff]  ;;  %v2899_v20 = vld [vmem:[%s2754_s10 + $0x1c] sm:$0xff]  ;;  %v688_v23 = vpack.c.bf16 %v680_v18, %v679_v17 }
  0x23   : > { %531 = vmatpush.bf16.msrb.mxu2 %v2580_v26  ;;  %638 = vmatpush.bf16.msrb.mxu3 %v2584_v27  ;;  %v2603_v14 = vld [vmem:[%s3352_s2 + $0x108] sm:$0xff]  ;;  %v2594_v26 = vld [vmem:[%s3352_s2 + $0xc0] sm:$0xff]  ;;  %v686_v54 = vld [vmem:[%s2754_s10 + $0x53] sm:$0xff]  ;;  %v901_v60 = vpack.c.bf16 %v2899_v20, %v2878_v8 }
  0x24   : > { %v468_v16 = vld [vmem:[%s2754_s10 + $0x2a] sm:$0xff]  ;;  %v2598_v27 = vld [vmem:[%s3352_s2 + $0xe0] sm:$0xff]  ;;  %v2969_v56 = vld [vmem:[%s2754_s10 + $0x54] sm:$0xff] }
  0x25   : > { %746 = vmatpush.bf16.msrb.mxu0 %v2587_v28  ;;  %v2902_v21 = vld [vmem:[%s2754_s10 + $0x24] sm:$0xff]  ;;  %v475_v22 = vpack.c.bf16 %v468_v16, %v573_v6  ;;  %v582_v24 = vpack.c.bf16 %v575_v19, %v468_v16  ;;  %v683_v42 = vld [vmem:[%s2754_s10 + $0x3b] sm:$0xff]  ;;  %v2966_v55 = vld [vmem:[%s2754_s10 + $0x4c] sm:$0xff] }
  0x26   : > { %853 = vmatpush.bf16.msrb.mxu1 %v2591_v29  ;;  %v795_v25 = vpack.c.bf16 %v2902_v21, %v2899_v20  ;;  %v2602_v28 = vld [vmem:[%s3352_s2 + $0x100] sm:$0xff]  ;;  %v2611_v40 = vld [vmem:[%s3353_s3 + $0x28] sm:$0xff]  ;;  %v998_v57 = vld [vmem:[%s2754_s10 + $0x15] sm:$0xff] }
  0x27   : > { %532 = vmatpush.bf16.msrb.mxu2 %v2579_v30  ;;  %639 = vmatpush.bf16.msrb.mxu3 %v2583_v31  ;;  %v470_v29 = vld [vmem:[%s2754_s10 + $0x3a] sm:$0xff]  ;;  %v681_v30 = vld [vmem:[%s2754_s10 + $0x2b] sm:$0xff] }
  0x28   : > { %v682_v31 = vld [vmem:[%s2754_s10 + $0x33] sm:$0xff]  ;;  %v476_v35 = vpack.c.bf16 %v470_v29, %v575_v19  ;;  %v472_v41 = vld [vmem:[%s2754_s10 + $0x4a] sm:$0xff]  ;;  %v999_v58 = vld [vmem:[%s2754_s10 + $0x1d] sm:$0xff] }
  0x29   : > { %747 = vmatpush.bf16.msrb.mxu0 %v2586_v32  ;;  %v577_v32 = vld [vmem:[%s2754_s10 + $0x42] sm:$0xff]  ;;  %v689_v36 = vpack.c.bf16 %v682_v31, %v681_v30  ;;  %v2612_v20 = vld [vmem:[%s3353_s3 + $0x30] sm:$0xff] }
  0x2a   : > { %854 = vmatpush.bf16.msrb.mxu1 %v2590_v33  ;;  %v2924_v33 = vld [vmem:[%s2754_s10 + $0x2c] sm:$0xff]  ;;  %v1212_v3 = vld [vmem:[%s2986_s11] sm:$0xff] }
  0x2b   : > { %533 = vmatpush.bf16.msrb.mxu2 %v2578_v37  ;;  %640 = vmatpush.bf16.msrb.mxu3 %v2582_v43  ;;  %v583_v37 = vpack.c.bf16 %v577_v32, %v470_v29  ;;  %v796_v38 = vpack.c.bf16 %v2927_v34, %v2924_v33  ;;  %v684_v43 = vld [vmem:[%s2754_s10 + $0x43] sm:$0xff]  ;;  %v902_v5 = vpack.c.bf16 %v2924_v33, %v2902_v21 }
  0x2c   : > { %2191 = vmatmul.msk.bf16.gmra.mxu0 %vm340_vm0, %v303_v46  ;;  %2194 = vmatmul.msk.bf16.gmra.mxu2 %vm340_vm0, %v306_v47  ;;  %v2949_v46 = vld [vmem:[%s2754_s10 + $0x44] sm:$0xff]  ;;  %v477_v47 = vpack.c.bf16 %v472_v41, %v577_v32 }
  0x2d   : > { %2212 = vmatmul.msk.bf16.gmra.mxu1 %vm340_vm0, %v280_v48  ;;  %1172 = vmatpush.bf16.msra.mxu0 %v2605_v50  ;;  %v690_v48 = vpack.c.bf16 %v684_v43, %v683_v42  ;;  %v1213_v4 = vld [vmem:[%s2986_s11 + $0x8] sm:$0xff]  ;;  %v2614_v21 = vld [vmem:[%s3353_s3 + $0x40] sm:$0xff] }
  0x2e   : > { %2215 = vmatmul.msk.bf16.gmra.mxu3 %vm340_vm0, %v283_v49  ;;  %1265 = vmatpush.bf16.msra.mxu1 %v2607_v51  ;;  %v2613_v51 = vld [vmem:[%s3353_s3 + $0x38] sm:$0xff] }
  0x2f   : > { %958 = vmatpush.bf16.msra.mxu2 %v2597_v44  ;;  %1065 = vmatpush.bf16.msra.mxu3 %v2601_v45  ;;  %v579_v44 = vld [vmem:[%s2754_s10 + $0x52] sm:$0xff]  ;;  %v2946_v45 = vld [vmem:[%s2754_s10 + $0x3c] sm:$0xff] }
  0x30   : > { %v584_v49 = vpack.c.bf16 %v579_v44, %v472_v41  ;;  %v797_v50 = vpack.c.bf16 %v2949_v46, %v2946_v45  ;;  %v903_v30 = vpack.c.bf16 %v2946_v45, %v2927_v34  ;;  %v1004_v44 = vld [vmem:[%s2754_s10 + $0x45] sm:$0xff]  ;;  %v1109_v45 = vld [vmem:[%s2754_s10 + $0x36] sm:$0xff] }
  0x31   : > { %1173 = vmatpush.bf16.msra.mxu0 %v2604_v1  ;;  %v1106_v1 = vld [vmem:[%s2754_s10 + $0x1e] sm:$0xff] }
  0x32   : > { %1266 = vmatpush.bf16.msra.mxu1 %v2606_v15 }
  0x33   : > { %959 = vmatpush.bf16.msra.mxu2 %v2596_v52  ;;  %1066 = vmatpush.bf16.msra.mxu3 %v2600_v53  ;;  %v2615_v52 = vld [vmem:[%s3353_s3 + $0x48] sm:$0xff] }
  0x34   : > { %v685_v53 = vld [vmem:[%s2754_s10 + $0x4b] sm:$0xff] }
  0x35   : > { %1174 = vmatpush.bf16.msra.mxu0 %v2603_v14  ;;  %v691_v59 = vpack.c.bf16 %v686_v54, %v685_v53  ;;  %v904_v53 = vpack.c.bf16 %v2966_v55, %v2949_v46 }
  0x37   : > { %960 = vmatpush.bf16.msra.mxu2 %v2595_v2  ;;  %1067 = vmatpush.bf16.msra.mxu3 %v2599_v13  ;;  %v1001_v2 = vld [vmem:[%s2754_s10 + $0x2d] sm:$0xff]  ;;  %v2610_v13 = vld [vmem:[%s3353_s3 + $0x20] sm:$0xff] }
  0x39   : > { %1175 = vmatpush.bf16.msra.mxu0 %v2602_v28 }
  0x3b   : > { %961 = vmatpush.bf16.msra.mxu2 %v2594_v26  ;;  %1068 = vmatpush.bf16.msra.mxu3 %v2598_v27  ;;  %v1214_v26 = vld [vmem:[%s2986_s11 + $0x10] sm:$0xff]  ;;  %v1215_v27 = vld [vmem:[%s2986_s11 + $0x18] sm:$0xff] }
  0x3c   : > { %2192 = vmatmul.msk.bf16.gmra.mxu0 %vm340_vm0, %v304_v61  ;;  %2240 = vmatmul.msk.bf16.vlgmr.msrb.gmra.mxu2 %vm340_vm0, %v473_v62  ;;  %v798_v61 = vpack.c.bf16 %v2969_v56, %v2966_v55  ;;  %v1008_v62 = vpack.c.bf16 %v999_v58, %v998_v57 }
  0x3d   : > { %2213 = vmatmul.msk.bf16.gmra.mxu1 %vm340_vm0, %v281_v63  ;;  %v1000_v63 = vld [vmem:[%s2754_s10 + $0x25] sm:$0xff] }
  0x3e   : > { %2269 = vmatmul.msk.bf16.vlgmr.msrb.gmra.mxu3 %vm340_vm0, %v580_v0  ;;  %v1105_v0 = vld [vmem:[%s2754_s10 + $0x16] sm:$0xff]  ;;  %v1009_v8 = vpack.c.bf16 %v1001_v2, %v1000_v63 }
  0x3f   : > { %1356 = vmatpush.bf16.msrb.mxu2 %v2609_v39  ;;  %1447 = vmatpush.bf16.msrb.mxu3 %v2611_v40  ;;  %v1115_v6 = vpack.c.bf16 %v1106_v1, %v1105_v0 }
  0x43   : > { %1448 = vmatpush.bf16.msrb.mxu3 %v2610_v13 }
  0x4c   : > { %2241 = vmatmul.msk.bf16.gmra.mxu2 %vm340_vm0, %v474_v9  ;;  %2298 = vmatmul.msk.bf16.vlgmr.msrb.gmra.mxu0 %vm340_vm0, %v687_v10  ;;  %v1222_v9 = vpack.c.bf16 %v1213_v4, %v1212_v3  ;;  %v900_v4 = vld [vmem:[%s2754_s10 + $0x5c] sm:$0xff] }
  0x4d   : > { %2327 = vmatmul.msk.bf16.vlgmr.msrb.gmra.mxu1 %vm340_vm0, %v794_v12  ;;  %1538 = vmatpush.bf16.msrb.mxu0 %v2613_v51  ;;  %v2608_v12 = vld [vmem:[%s3353_s3 + $0x10] sm:$0xff] }
  0x4e   : > { %2270 = vmatmul.msk.bf16.gmra.mxu3 %vm340_vm0, %v581_v11  ;;  %1629 = vmatpush.bf16.msrb.mxu1 %v2615_v52 }
  0x4f   : > { %1357 = vmatpush.bf16.msrb.mxu2 %v2608_v12  ;;  %v1219_v12 = vld [vmem:[%s2986_s11 + $0x38] sm:$0xff] }
  0x51   : > { %1539 = vmatpush.bf16.msrb.mxu0 %v2612_v20 }
  0x52   : > { %1630 = vmatpush.bf16.msrb.mxu1 %v2614_v21 }
  0x5c   : > { %2242 = vmatmul.msk.bf16.gmra.mxu2 %vm340_vm0, %v475_v22  ;;  %2299 = vmatmul.msk.bf16.gmra.mxu0 %vm340_vm0, %v688_v23  ;;  %v1002_v22 = vld [vmem:[%s2754_s10 + $0x35] sm:$0xff]  ;;  %v1107_v23 = vld [vmem:[%s2754_s10 + $0x26] sm:$0xff] }
  0x5d   : > { %2328 = vmatmul.msk.bf16.gmra.mxu1 %vm340_vm0, %v795_v25  ;;  %v1003_v25 = vld [vmem:[%s2754_s10 + $0x3d] sm:$0xff] }
  0x5e   : > { %2271 = vmatmul.msk.bf16.gmra.mxu3 %vm340_vm0, %v582_v24  ;;  %v1108_v24 = vld [vmem:[%s2754_s10 + $0x2e] sm:$0xff] }
  0x5f   : > { %v1116_v31 = vpack.c.bf16 %v1108_v24, %v1107_v23 }
  0x6c   : > { %2243 = vmatmul.msk.bf16.gmra.mxu2 %vm340_vm0, %v476_v35  ;;  %2300 = vmatmul.msk.bf16.gmra.mxu0 %vm340_vm0, %v689_v36  ;;  %v1010_v35 = vpack.c.bf16 %v1003_v25, %v1002_v22  ;;  %v1223_v36 = vpack.c.bf16 %v1215_v27, %v1214_v26 }
  0x6d   : > { %2329 = vmatmul.msk.bf16.gmra.mxu1 %vm340_vm0, %v796_v38 }
  0x6e   : > { %2272 = vmatmul.msk.bf16.gmra.mxu3 %vm340_vm0, %v583_v37 }
  0x7c   : > { %2244 = vmatmul.msk.bf16.gmra.mxu2 %vm340_vm0, %v477_v47  ;;  %2301 = vmatmul.msk.bf16.gmra.mxu0 %vm340_vm0, %v690_v48  ;;  %v1110_v47 = vld [vmem:[%s2754_s10 + $0x3e] sm:$0xff]  ;;  %v1005_v48 = vld [vmem:[%s2754_s10 + $0x4d] sm:$0xff] }
  0x7d   : > { %2330 = vmatmul.msk.bf16.gmra.mxu1 %vm340_vm0, %v797_v50  ;;  %v1217_v50 = vld [vmem:[%s2986_s11 + $0x28] sm:$0xff]  ;;  %v1117_v54 = vpack.c.bf16 %v1110_v47, %v1109_v45 }
  0x7e   : > { %2273 = vmatmul.msk.bf16.gmra.mxu3 %vm340_vm0, %v584_v49  ;;  %v1216_v49 = vld [vmem:[%s2986_s11 + $0x20] sm:$0xff]  ;;  %v1395_v47 = vld [vmem:[%s2986_s11 + $0xa] sm:$0xff] }
  0x7f   : > { %v1394_v45 = vld [vmem:[%s2986_s11 + $0x2] sm:$0xff] }
  0x8c   : > { %2302 = vmatmul.msk.bf16.gmra.mxu0 %vm340_vm0, %v691_v59  ;;  %2356 = vmatmul.msk.bf16.vlgmr.msra.gmra.mxu2 %vm340_vm0, %v901_v60  ;;  %v1011_v59 = vpack.c.bf16 %v1005_v48, %v1004_v44  ;;  %v1224_v60 = vpack.c.bf16 %v1217_v50, %v1216_v49  ;;  %v1221_v44 = vld [vmem:[%s2986_s11 + $0x48] sm:$0xff] }
  0x8d   : > { %2331 = vmatmul.msk.bf16.gmra.mxu1 %vm340_vm0, %v798_v61 }
  0x8e   : > { %2385 = vmatmul.msk.bf16.vlgmr.msra.gmra.mxu3 %vm340_vm0, %v1008_v62 }
  0x99   : > { %v365_v7 = vpop.f32.mrf.mxu0 }
  0x9a   : > { %v438_v10 = vpop.f32.mrf.mxu1 }
  0x9b   : > { %v2996_v11 = vadd.f32 %v438_v10, %v365_v7  ;;  %v1006_v7 = vld [vmem:[%s2754_s10 + $0x55] sm:$0xff]  ;;  %v1007_v10 = vld [vmem:[%s2754_s10 + $0x5d] sm:$0xff] }
  0x9c   : > { %2357 = vmatmul.msk.bf16.gmra.mxu2 %vm340_vm0, %v902_v5  ;;  %2414 = vmatmul.msk.bf16.vlgmr.msra.gmra.mxu0 %vm340_vm0, %v1115_v6  ;;  %v2617_v5 = vld [vmem:[%s3353_s3 + $0x58] sm:$0xff]  ;;  %v2619_v6 = vld [vmem:[%s3353_s3 + $0x68] sm:$0xff]  ;;  %v1012_v21 = vpack.c.bf16 %v1007_v10, %v1006_v7 }
  0x9d   : > { %2427 = vmatmul.msk.bf16.vlgmr.msra.gmra.mxu1 %vm1243_vm1, %v1222_v9  ;;  %v1112_v9 = vld [vmem:[%s2754_s10 + $0x4e] sm:$0xff]  ;;  %1720 = vmatpush.bf16.msra.mxu2 %v2617_v5 }
  0x9e   : > { %2386 = vmatmul.msk.bf16.gmra.mxu3 %vm340_vm0, %v1009_v8  ;;  %v1111_v8 = vld [vmem:[%s2754_s10 + $0x46] sm:$0xff]  ;;  %v1305_v5 = vld [vmem:[%s2986_s11 + $0x11] sm:$0xff] }
  0x9f   : > { %v380_v14 = vpop.f32.mrf.mxu2  ;;  %1811 = vmatpush.bf16.msra.mxu3 %v2619_v6  ;;  %v1306_v6 = vld [vmem:[%s2986_s11 + $0x19] sm:$0xff] }
  0xa0   : > { %v1396_v7 = vld [vmem:[%s2986_s11 + $0x12] sm:$0xff] }
  0xa1   : > { %v453_v15 = vpop.f32.mrf.mxu3  ;;  %v367_v17 = vpop.f32.mrf.mxu0  ;;  %v1577_v10 = vld [vmem:[%s2986_s11 + $0x13] sm:$0xff] }
  0xa2   : > { %v3008_v16 = vadd.f32 %v453_v15, %v380_v14  ;;  %v440_v18 = vpop.f32.mrf.mxu1 }
  0xa3   : > { %v3010_v19 = vadd.f32 %v440_v18, %v367_v17  ;;  %v905_v17 = vpack.c.bf16 %v900_v4, %v2969_v56  ;;  %v1118_v18 = vpack.c.bf16 %v1112_v9, %v1111_v8  ;;  %v2621_v56 = vld [vmem:[%s3353_s3 + $0x78] sm:$0xff]  ;;  %v1576_v9 = vld [vmem:[%s2986_s11 + $0xb] sm:$0xff] }
  0xa4   : > { %1902 = vmatpush.bf16.msra.mxu0 %v2621_v56  ;;  %v1397_v8 = vld [vmem:[%s2986_s11 + $0x1a] sm:$0xff] }
  0xa7   : > { %v382_v28 = vpop.f32.mrf.mxu2 }
  0xa9   : > { %v455_v29 = vpop.f32.mrf.mxu3  ;;  %v370_v33 = vpop.f32.mrf.mxu0 }
  0xaa   : > { %v3026_v32 = vadd.f32 %v455_v29, %v382_v28  ;;  %v443_v37 = vpop.f32.mrf.mxu1 }
  0xab   : > { %v3028_v38 = vadd.f32 %v443_v37, %v370_v33  ;;  %v1113_v37 = vld [vmem:[%s2754_s10 + $0x56] sm:$0xff] }
  0xac   : > { %2358 = vmatmul.msk.bf16.gmra.mxu2 %vm340_vm0, %v903_v30  ;;  %2415 = vmatmul.msk.bf16.gmra.mxu0 %vm340_vm0, %v1116_v31 }
  0xad   : > { %2428 = vmatmul.msk.bf16.gmra.mxu1 %vm1243_vm1, %v1223_v36 }
  0xae   : > { %2387 = vmatmul.msk.bf16.gmra.mxu3 %vm340_vm0, %v1010_v35 }
  0xaf   : > { %v385_v34 = vpop.f32.mrf.mxu2 }
  0xb1   : > { %v458_v39 = vpop.f32.mrf.mxu3  ;;  %v372_v41 = vpop.f32.mrf.mxu0 }
  0xb2   : > { %v3034_v40 = vadd.f32 %v458_v39, %v385_v34  ;;  %v445_v42 = vpop.f32.mrf.mxu1  ;;  %v1114_v34 = vld [vmem:[%s2754_s10 + $0x5e] sm:$0xff] }
  0xb3   : > { %v3036_v43 = vadd.f32 %v445_v42, %v372_v41  ;;  %v1220_v39 = vld [vmem:[%s2986_s11 + $0x40] sm:$0xff]  ;;  %v1304_v42 = vld [vmem:[%s2986_s11 + $0x9] sm:$0xff] }
  0xb4   : > { %v1303_v41 = vld [vmem:[%s2986_s11 + $0x1] sm:$0xff] }
  0xb7   : > { %v387_v51 = vpop.f32.mrf.mxu2 }
  0xb9   : > { %v460_v52 = vpop.f32.mrf.mxu3  ;;  %v375_v58 = vpop.f32.mrf.mxu0 }
  0xba   : > { %v3046_v57 = vadd.f32 %v460_v52, %v387_v51  ;;  %v448_v61 = vpop.f32.mrf.mxu1  ;;  %v1313_v51 = vpack.c.bf16 %v1304_v42, %v1303_v41  ;;  %v1399_v41 = vld [vmem:[%s2986_s11 + $0x2a] sm:$0xff] }
  0xbb   : > { %v3048_v62 = vadd.f32 %v448_v61, %v375_v58  ;;  %v1579_v42 = vld [vmem:[%s2986_s11 + $0x23] sm:$0xff] }
  0xbc   : > { %2359 = vmatmul.msk.bf16.gmra.mxu2 %vm340_vm0, %v904_v53  ;;  %2416 = vmatmul.msk.bf16.gmra.mxu0 %vm340_vm0, %v1117_v54  ;;  %v1226_v53 = vpack.c.bf16 %v1221_v44, %v1220_v39  ;;  %v1404_v54 = vpack.c.bf16 %v1395_v47, %v1394_v45  ;;  %v1398_v39 = vld [vmem:[%s2986_s11 + $0x22] sm:$0xff] }
  0xbd   : > { %2429 = vmatmul.msk.bf16.gmra.mxu1 %vm1243_vm1, %v1224_v60 }
  0xbe   : > { %2388 = vmatmul.msk.bf16.gmra.mxu3 %vm340_vm0, %v1011_v59 }
  0xbf   : > { %v535_v46 = vpop.f32.mrf.mxu2 }
  0xc0   : > { %v560_v55 = vadd.f32 %v535_v46, %v2996_v11  ;;  %v1218_v11 = vld [vmem:[%s2986_s11 + $0x30] sm:$0xff] }
  0xc1   : > { %v642_v63 = vpop.f32.mrf.mxu3  ;;  %v377_v0 = vpop.f32.mrf.mxu0  ;;  %v1225_v22 = vpack.c.bf16 %v1219_v12, %v1218_v11 }
  0xc2   : > { %v667_v1 = vadd.f32 %v642_v63, %v560_v55  ;;  %v450_v2 = vpop.f32.mrf.mxu1 }
  0xc3   : > { %v3055_v3 = vadd.f32 %v450_v2, %v377_v0 }
  0xc7   : > { %v537_v13 = vpop.f32.mrf.mxu2 }
  0xc8   : > { %v561_v14 = vadd.f32 %v537_v13, %v3010_v19  ;;  %v2623_v19 = vld [vmem:[%s3353_s3 + $0x88] sm:$0xff] }
  0xc9   : > { %v644_v15 = vpop.f32.mrf.mxu3  ;;  %v749_v20 = vpop.f32.mrf.mxu0  ;;  %1993 = vmatpush.bf16.msra.mxu1 %v2623_v19 }
  0xca   : > { %v668_v23 = vadd.f32 %v644_v15, %v561_v14  ;;  %v774_v24 = vadd.f32 %v749_v20, %v667_v1  ;;  %v856_v25 = vpop.f32.mrf.mxu1  ;;  %v1314_v14 = vpack.c.bf16 %v1306_v6, %v1305_v5  ;;  %v1495_v15 = vpack.c.bf16 %v1396_v7, %v1395_v47  ;;  %v1400_v5 = vld [vmem:[%s2986_s11 + $0x32] sm:$0xff]  ;;  %v1401_v6 = vld [vmem:[%s2986_s11 + $0x3a] sm:$0xff] }
  0xcc   : > { %v3072_v26 = vadd.f32 %v856_v25, %v774_v24  ;;  %2360 = vmatmul.msk.bf16.gmra.mxu2 %vm340_vm0, %v905_v17  ;;  %2417 = vmatmul.msk.bf16.gmra.mxu0 %vm340_vm0, %v1118_v18  ;;  %v1405_v17 = vpack.c.bf16 %v1397_v8, %v1396_v7  ;;  %v1586_v18 = vpack.c.bf16 %v1577_v10, %v1576_v9  ;;  %v2616_v24 = vld [vmem:[%s3353_s3 + $0x50] sm:$0xff] }
  0xcd   : > { %2430 = vmatmul.msk.bf16.gmra.mxu1 %vm1243_vm1, %v1225_v22  ;;  %1721 = vmatpush.bf16.msra.mxu2 %v2616_v24  ;;  %v1580_v7 = vld [vmem:[%s2986_s11 + $0x2b] sm:$0xff] }
  0xce   : > { %2389 = vmatmul.msk.bf16.gmra.mxu3 %vm340_vm0, %v1012_v21 }
  0xcf   : > { %v540_v27 = vpop.f32.mrf.mxu2 }
  0xd0   : > { %v562_v28 = vadd.f32 %v540_v27, %v3028_v38  ;;  %v1119_v38 = vpack.c.bf16 %v1114_v34, %v1113_v37  ;;  %v1307_v37 = vld [vmem:[%s2986_s11 + $0x21] sm:$0xff]  ;;  %v1308_v34 = vld [vmem:[%s2986_s11 + $0x29] sm:$0xff] }
  0xd1   : > { %v647_v29 = vpop.f32.mrf.mxu3  ;;  %v751_v30 = vpop.f32.mrf.mxu0 }
  0xd2   : > { %v669_v31 = vadd.f32 %v647_v29, %v562_v28  ;;  %v775_v33 = vadd.f32 %v751_v30, %v668_v23  ;;  %v858_v35 = vpop.f32.mrf.mxu1 }
  0xd4   : > { %v3085_v36 = vadd.f32 %v858_v35, %v775_v33  ;;  %v2620_v33 = vld [vmem:[%s3353_s3 + $0x70] sm:$0xff]  ;;  %v2622_v35 = vld [vmem:[%s3353_s3 + $0x80] sm:$0xff] }
  0xd5   : > { %1903 = vmatpush.bf16.msra.mxu0 %v2620_v33  ;;  %1994 = vmatpush.bf16.msra.mxu1 %v2622_v35  ;;  %v1582_v33 = vld [vmem:[%s2986_s11 + $0x3b] sm:$0xff]  ;;  %v1583_v35 = vld [vmem:[%s2986_s11 + $0x43] sm:$0xff] }
  0xd7   : > { %v542_v48 = vpop.f32.mrf.mxu2 }
  0xd8   : > { %v563_v49 = vadd.f32 %v542_v48, %v3036_v43  ;;  %v1315_v48 = vpack.c.bf16 %v1308_v34, %v1307_v37 }
  0xd9   : > { %v649_v50 = vpop.f32.mrf.mxu3  ;;  %v754_v52 = vpop.f32.mrf.mxu0 }
  0xda   : > { %v670_v58 = vadd.f32 %v649_v50, %v563_v49  ;;  %v776_v59 = vadd.f32 %v754_v52, %v669_v31  ;;  %v861_v60 = vpop.f32.mrf.mxu1  ;;  %v1496_v49 = vpack.c.bf16 %v1398_v39, %v1397_v8  ;;  %v1581_v8 = vld [vmem:[%s2986_s11 + $0x33] sm:$0xff] }
  0xdc   : > { %v3096_v61 = vadd.f32 %v861_v60, %v776_v59  ;;  %2418 = vmatmul.msk.bf16.gmra.mxu0 %vm340_vm0, %v1119_v38  ;;  %2444 = vmatmul.msk.bf16.vlgmr.msrb.gmra.mxu2 %vm1243_vm1, %v1313_v51  ;;  %v1406_v38 = vpack.c.bf16 %v1399_v41, %v1398_v39 }
  0xdd   : > { %2431 = vmatmul.msk.bf16.gmra.mxu1 %vm1243_vm1, %v1226_v53 }
  0xde   : > { %2461 = vmatmul.msk.bf16.vlgmr.msrb.gmra.mxu3 %vm1243_vm1, %v1404_v54 }
  0xdf   : > { %v545_v43 = vpop.f32.mrf.mxu2 }
  0xe0   : > { %v564_v46 = vadd.f32 %v545_v43, %v3048_v62 }
  0xe1   : > { %v652_v55 = vpop.f32.mrf.mxu3  ;;  %v756_v63 = vpop.f32.mrf.mxu0 }
  0xe2   : > { %v671_v0 = vadd.f32 %v652_v55, %v564_v46  ;;  %v777_v1 = vadd.f32 %v756_v63, %v670_v58  ;;  %v863_v2 = vpop.f32.mrf.mxu1 }
  0xe4   : > { %v3103_v4 = vadd.f32 %v863_v2, %v777_v1  ;;  %v1309_v1 = vld [vmem:[%s2986_s11 + $0x31] sm:$0xff]  ;;  %v1310_v2 = vld [vmem:[%s2986_s11 + $0x39] sm:$0xff] }
  0xe7   : > { %v547_v11 = vpop.f32.mrf.mxu2 }
  0xe8   : > { %v565_v12 = vadd.f32 %v547_v11, %v3055_v3  ;;  %v2618_v3 = vld [vmem:[%s3353_s3 + $0x60] sm:$0xff] }
  0xe9   : > { %v654_v13 = vpop.f32.mrf.mxu3  ;;  %v759_v62 = vpop.f32.mrf.mxu0  ;;  %1812 = vmatpush.bf16.msra.mxu3 %v2618_v3 }
  0xea   : > { %v672_v20 = vadd.f32 %v654_v13, %v565_v12  ;;  %v778_v21 = vadd.f32 %v759_v62, %v671_v0  ;;  %v866_v22 = vpop.f32.mrf.mxu1  ;;  %v1316_v12 = vpack.c.bf16 %v1310_v2, %v1309_v1  ;;  %v1497_v13 = vpack.c.bf16 %v1400_v5, %v1399_v41 }
  0xec   : > { %v3112_v23 = vadd.f32 %v866_v22, %v778_v21  ;;  %2445 = vmatmul.msk.bf16.gmra.mxu2 %vm1243_vm1, %v1314_v14  ;;  %2478 = vmatmul.msk.bf16.vlgmr.msrb.gmra.mxu0 %vm1243_vm1, %v1495_v15  ;;  %v1407_v14 = vpack.c.bf16 %v1401_v6, %v1400_v5  ;;  %v1588_v15 = vpack.c.bf16 %v1581_v8, %v1580_v7 }
  0xed   : > { %2495 = vmatmul.msk.bf16.vlgmr.msrb.gmra.mxu1 %vm1243_vm1, %v1586_v18 }
  0xee   : > { %2462 = vmatmul.msk.bf16.gmra.mxu3 %vm1243_vm1, %v1405_v17 }
  0xef   : > { %v550_v25 = vpop.f32.mrf.mxu2 }
  0xf0   : > { %v566_v56 = vadd.f32 %v550_v25, %v3008_v16  ;;  %v1578_v16 = vld [vmem:[%s2986_s11 + $0x1b] sm:$0xff] }
  0xf1   : > { %v657_v19 = vpop.f32.mrf.mxu3  ;;  %v761_v27 = vpop.f32.mrf.mxu0  ;;  %v1587_v51 = vpack.c.bf16 %v1579_v42, %v1578_v16 }
  0xf2   : > { %v673_v28 = vadd.f32 %v657_v19, %v566_v56  ;;  %v779_v29 = vadd.f32 %v761_v27, %v672_v20  ;;  %v868_v30 = vpop.f32.mrf.mxu1  ;;  %v1311_v27 = vld [vmem:[%s2986_s11 + $0x41] sm:$0xff] }
  0xf4   : > { %v3125_v31 = vadd.f32 %v868_v30, %v779_v29  ;;  %v1402_v29 = vld [vmem:[%s2986_s11 + $0x42] sm:$0xff]  ;;  %v1403_v30 = vld [vmem:[%s2986_s11 + $0x4a] sm:$0xff] }
  0xf5   : > { %v1498_v16 = vpack.c.bf16 %v1402_v29, %v1401_v6  ;;  %v1408_v42 = vpack.c.bf16 %v1403_v30, %v1402_v29 }
  0xf7   : > { %v552_v44 = vpop.f32.mrf.mxu2 }
  0xf8   : > { %v567_v45 = vadd.f32 %v552_v44, %v3026_v32  ;;  %v1589_v44 = vpack.c.bf16 %v1583_v35, %v1582_v33 }
  0xf9   : > { %v659_v47 = vpop.f32.mrf.mxu3  ;;  %v764_v50 = vpop.f32.mrf.mxu0 }
  0xfa   : > { %v674_v52 = vadd.f32 %v659_v47, %v567_v45  ;;  %v780_v53 = vadd.f32 %v764_v50, %v673_v28  ;;  %v871_v54 = vpop.f32.mrf.mxu1  ;;  %v1312_v28 = vld [vmem:[%s2986_s11 + $0x49] sm:$0xff] }
  0xfb   : > { %v1317_v41 = vpack.c.bf16 %v1312_v28, %v1311_v27 }
  0xfc   : > { %v3140_v58 = vadd.f32 %v871_v54, %v780_v53  ;;  %2446 = vmatmul.msk.bf16.gmra.mxu2 %vm1243_vm1, %v1315_v48  ;;  %2479 = vmatmul.msk.bf16.gmra.mxu0 %vm1243_vm1, %v1496_v49 }
  0xfd   : > { %2496 = vmatmul.msk.bf16.gmra.mxu1 %vm1243_vm1, %v1587_v51 }
  0xfe   : > { %2463 = vmatmul.msk.bf16.gmra.mxu3 %vm1243_vm1, %v1406_v38 }
  0xff   : > { %v555_v32 = vpop.f32.mrf.mxu2 }
 0x100   : > { %v568_v59 = vadd.f32 %v555_v32, %v3034_v40 }
 0x101   : > { %v662_v60 = vpop.f32.mrf.mxu3  ;;  %v766_v43 = vpop.f32.mrf.mxu0 }
 0x102   : > { %v675_v46 = vadd.f32 %v662_v60, %v568_v59  ;;  %v781_v55 = vadd.f32 %v766_v43, %v674_v52  ;;  %v873_v63 = vpop.f32.mrf.mxu1  ;;  %v1494_v59 = vld [vmem:[%s2986_s11 + $0x52] sm:$0xff] }
 0x103   : > { %v1667_v60 = vld [vmem:[%s2986_s11 + $0xc] sm:$0xff]  ;;  %v1668_v43 = vld [vmem:[%s2986_s11 + $0x14] sm:$0xff]  ;;  %v1499_v6 = vpack.c.bf16 %v1494_v59, %v1403_v30 }
 0x104   : > { %v3147_v0 = vadd.f32 %v873_v63, %v781_v55  ;;  %v1585_v55 = vld [vmem:[%s2986_s11 + $0x53] sm:$0xff]  ;;  %v1759_v63 = vld [vmem:[%s2986_s11 + $0x1c] sm:$0xff]  ;;  %v1677_v7 = vpack.c.bf16 %v1668_v43, %v1667_v60 }
 0x107   : > { %v557_v9 = vpop.f32.mrf.mxu2 }
 0x108   : > { %v569_v10 = vadd.f32 %v557_v9, %v3046_v57  ;;  %v1768_v9 = vpack.c.bf16 %v1759_v63, %v1668_v43 }
 0x109   : > { %v664_v11 = vpop.f32.mrf.mxu3  ;;  %v769_v40 = vpop.f32.mrf.mxu0 }
 0x10a   : > { %v676_v62 = vadd.f32 %v664_v11, %v569_v10  ;;  %v782_v17 = vadd.f32 %v769_v40, %v675_v46  ;;  %v876_v18 = vpop.f32.mrf.mxu1  ;;  %v1584_v46 = vld [vmem:[%s2986_s11 + $0x4b] sm:$0xff] }
 0x10b   : > { %v1590_v8 = vpack.c.bf16 %v1585_v55, %v1584_v46 }
 0x10c   : > { %v3156_v20 = vadd.f32 %v876_v18, %v782_v17  ;;  %2447 = vmatmul.msk.bf16.gmra.mxu2 %vm1243_vm1, %v1316_v12  ;;  %2480 = vmatmul.msk.bf16.gmra.mxu0 %vm1243_vm1, %v1497_v13 }
 0x10d   : > { %2497 = vmatmul.msk.bf16.gmra.mxu1 %vm1243_vm1, %v1588_v15 }
 0x10e   : > { %2464 = vmatmul.msk.bf16.gmra.mxu3 %vm1243_vm1, %v1407_v14 }
 0x10f   : > { %v963_v57 = vpop.f32.mrf.mxu2 }
 0x110   : > { %v988_v21 = vadd.f32 %v963_v57, %v3072_v26 }
 0x111   : > { %v1070_v22 = vpop.f32.mrf.mxu3  ;;  %v771_v24 = vpop.f32.mrf.mxu0 }
 0x112   : > { %v1095_v3 = vadd.f32 %v1070_v22, %v988_v21  ;;  %v783_v25 = vadd.f32 %v771_v24, %v676_v62  ;;  %v878_v56 = vpop.f32.mrf.mxu1  ;;  %v1670_v21 = vld [vmem:[%s2986_s11 + $0x24] sm:$0xff]  ;;  %v1849_v22 = vld [vmem:[%s2986_s11 + $0x15] sm:$0xff] }
 0x113   : > { %v1850_v24 = vld [vmem:[%s2986_s11 + $0x1d] sm:$0xff]  ;;  %v1678_v30 = vpack.c.bf16 %v1670_v21, %v1759_v63 }
 0x114   : > { %v3163_v19 = vadd.f32 %v878_v56, %v783_v25  ;;  %v1940_v25 = vld [vmem:[%s2986_s11 + $0x16] sm:$0xff]  ;;  %v1941_v56 = vld [vmem:[%s2986_s11 + $0x1e] sm:$0xff]  ;;  %v1859_v33 = vpack.c.bf16 %v1850_v24, %v1849_v22 }
 0x117   : > { %v965_v37 = vpop.f32.mrf.mxu2 }
 0x118   : > { %v989_v34 = vadd.f32 %v965_v37, %v3085_v36  ;;  %v1950_v37 = vpack.c.bf16 %v1941_v56, %v1940_v25 }
 0x119   : > { %v1072_v39 = vpop.f32.mrf.mxu3  ;;  %v1177_v26 = vpop.f32.mrf.mxu0 }
 0x11a   : > { %v1096_v45 = vadd.f32 %v1072_v39, %v989_v34  ;;  %v1202_v47 = vadd.f32 %v1177_v26, %v1095_v3  ;;  %v1268_v48 = vpop.f32.mrf.mxu1  ;;  %v1761_v3 = vld [vmem:[%s2986_s11 + $0x2c] sm:$0xff] }
 0x11b   : > { %v1769_v35 = vpack.c.bf16 %v1761_v3, %v1670_v21 }
 0x11c   : > { %v3172_v49 = vadd.f32 %v1268_v48, %v1202_v47  ;;  %2448 = vmatmul.msk.bf16.gmra.mxu2 %vm1243_vm1, %v1317_v41  ;;  %2481 = vmatmul.msk.bf16.gmra.mxu0 %vm1243_vm1, %v1498_v16 }
 0x11d   : > { %2498 = vmatmul.msk.bf16.gmra.mxu1 %vm1243_vm1, %v1589_v44 }
 0x11e   : > { %2465 = vmatmul.msk.bf16.gmra.mxu3 %vm1243_vm1, %v1408_v42 }
 0x11f   : > { %v968_v36 = vpop.f32.mrf.mxu2 }
 0x120   : > { %v990_v50 = vadd.f32 %v968_v36, %v3096_v61 }
 0x121   : > { %v1075_v38 = vpop.f32.mrf.mxu3  ;;  %v1179_v51 = vpop.f32.mrf.mxu0 }
 0x122   : > { %v1097_v52 = vadd.f32 %v1075_v38, %v990_v50  ;;  %v1203_v53 = vadd.f32 %v1179_v51, %v1096_v45  ;;  %v1270_v54 = vpop.f32.mrf.mxu1  ;;  %v1672_v50 = vld [vmem:[%s2986_s11 + $0x34] sm:$0xff]  ;;  %v1851_v38 = vld [vmem:[%s2986_s11 + $0x25] sm:$0xff] }
 0x123   : > { %v1852_v51 = vld [vmem:[%s2986_s11 + $0x2d] sm:$0xff]  ;;  %v1679_v46 = vpack.c.bf16 %v1672_v50, %v1761_v3 }
 0x124   : > { %v3179_v32 = vadd.f32 %v1270_v54, %v1203_v53  ;;  %v1942_v53 = vld [vmem:[%s2986_s11 + $0x26] sm:$0xff]  ;;  %v1943_v54 = vld [vmem:[%s2986_s11 + $0x2e] sm:$0xff]  ;;  %v1860_v55 = vpack.c.bf16 %v1852_v51, %v1851_v38 }
 0x127   : > { %v970_v1 = vpop.f32.mrf.mxu2 }
 0x128   : > { %v991_v2 = vadd.f32 %v970_v1, %v3103_v4  ;;  %v1951_v1 = vpack.c.bf16 %v1943_v54, %v1942_v53 }
 0x129   : > { %v1077_v5 = vpop.f32.mrf.mxu3  ;;  %v1182_v61 = vpop.f32.mrf.mxu0 }
 0x12a   : > { %v1098_v10 = vadd.f32 %v1077_v5, %v991_v2  ;;  %v1204_v11 = vadd.f32 %v1182_v61, %v1097_v52  ;;  %v1273_v12 = vpop.f32.mrf.mxu1  ;;  %v1763_v52 = vld [vmem:[%s2986_s11 + $0x3c] sm:$0xff] }
 0x12b   : > { %v1770_v63 = vpack.c.bf16 %v1763_v52, %v1672_v50 }
 0x12c   : > { %v3188_v13 = vadd.f32 %v1273_v12, %v1204_v11  ;;  %2482 = vmatmul.msk.bf16.gmra.mxu0 %vm1243_vm1, %v1499_v6  ;;  %2512 = vmatmul.msk.bf16.vlgmr.msra.gmra.mxu2 %vm1243_vm1, %v1677_v7 }
 0x12d   : > { %2499 = vmatmul.msk.bf16.gmra.mxu1 %vm1243_vm1, %v1590_v8 }
 0x12e   : > { %2529 = vmatmul.msk.bf16.vlgmr.msra.gmra.mxu3 %vm1243_vm1, %v1768_v9 }
 0x12f   : > { %v973_v4 = vpop.f32.mrf.mxu2 }
 0x130   : > { %v992_v40 = vadd.f32 %v973_v4, %v3112_v23 }
 0x131   : > { %v1080_v14 = vpop.f32.mrf.mxu3  ;;  %v1184_v15 = vpop.f32.mrf.mxu0 }
 0x132   : > { %v1099_v62 = vadd.f32 %v1080_v14, %v992_v40  ;;  %v1205_v17 = vadd.f32 %v1184_v15, %v1098_v10  ;;  %v1275_v18 = vpop.f32.mrf.mxu1  ;;  %v1674_v40 = vld [vmem:[%s2986_s11 + $0x44] sm:$0xff]  ;;  %v1853_v14 = vld [vmem:[%s2986_s11 + $0x35] sm:$0xff] }
 0x133   : > { %v1854_v15 = vld [vmem:[%s2986_s11 + $0x3d] sm:$0xff]  ;;  %v1680_v3 = vpack.c.bf16 %v1674_v40, %v1763_v52 }
 0x134   : > { %v3195_v57 = vadd.f32 %v1275_v18, %v1205_v17  ;;  %v1944_v17 = vld [vmem:[%s2986_s11 + $0x36] sm:$0xff]  ;;  %v1945_v18 = vld [vmem:[%s2986_s11 + $0x3e] sm:$0xff]  ;;  %v1861_v25 = vpack.c.bf16 %v1854_v15, %v1853_v14 }
 0x137   : > { %v975_v27 = vpop.f32.mrf.mxu2 }
 0x138   : > { %v993_v28 = vadd.f32 %v975_v27, %v3125_v31  ;;  %v1952_v27 = vpack.c.bf16 %v1945_v18, %v1944_v17 }
 0x139   : > { %v1082_v29 = vpop.f32.mrf.mxu3  ;;  %v1187_v23 = vpop.f32.mrf.mxu0 }
 0x13a   : > { %v1100_v34 = vadd.f32 %v1082_v29, %v993_v28  ;;  %v1206_v39 = vadd.f32 %v1187_v23, %v1099_v62  ;;  %v1278_v41 = vpop.f32.mrf.mxu1  ;;  %v1765_v62 = vld [vmem:[%s2986_s11 + $0x4c] sm:$0xff] }
 0x13b   : > { %v1771_v56 = vpack.c.bf16 %v1765_v62, %v1674_v40 }
 0x13c   : > { %v3204_v16 = vadd.f32 %v1278_v41, %v1206_v39  ;;  %2513 = vmatmul.msk.bf16.gmra.mxu2 %vm1243_vm1, %v1678_v30  ;;  %2546 = vmatmul.msk.bf16.vlgmr.msra.gmra.mxu0 %vm1243_vm1, %v1859_v33 }
 0x13d   : > { %2563 = vmatmul.msk.bf16.vlgmr.msra.gmra.mxu1 %vm1243_vm1, %v1950_v37 }
 0x13e   : > { %2530 = vmatmul.msk.bf16.gmra.mxu3 %vm1243_vm1, %v1769_v35 }
 0x13f   : > { %v978_v31 = vpop.f32.mrf.mxu2 }
 0x140   : > { %v994_v26 = vadd.f32 %v978_v31, %v3140_v58 }
 0x141   : > { %v1085_v42 = vpop.f32.mrf.mxu3  ;;  %v1189_v44 = vpop.f32.mrf.mxu0 }
 0x142   : > { %v1101_v45 = vadd.f32 %v1085_v42, %v994_v26  ;;  %v1207_v47 = vadd.f32 %v1189_v44, %v1100_v34  ;;  %v1280_v48 = vpop.f32.mrf.mxu1  ;;  %v1676_v26 = vld [vmem:[%s2986_s11 + $0x54] sm:$0xff]  ;;  %v1855_v42 = vld [vmem:[%s2986_s11 + $0x45] sm:$0xff] }
 0x143   : > { %v1856_v44 = vld [vmem:[%s2986_s11 + $0x4d] sm:$0xff]  ;;  %v1681_v52 = vpack.c.bf16 %v1676_v26, %v1765_v62 }
 0x144   : > { %v3211_v36 = vadd.f32 %v1280_v48, %v1207_v47  ;;  %v1946_v47 = vld [vmem:[%s2986_s11 + $0x46] sm:$0xff]  ;;  %v1947_v48 = vld [vmem:[%s2986_s11 + $0x4e] sm:$0xff]  ;;  %v1862_v53 = vpack.c.bf16 %v1856_v44, %v1855_v42 }
 0x147   : > { %v980_v59 = vpop.f32.mrf.mxu2 }
 0x148   : > { %v995_v60 = vadd.f32 %v980_v59, %v3147_v0  ;;  %v1953_v59 = vpack.c.bf16 %v1947_v48, %v1946_v47 }
 0x149   : > { %v1087_v43 = vpop.f32.mrf.mxu3  ;;  %v1192_v58 = vpop.f32.mrf.mxu0 }
 0x14a   : > { %v1102_v2 = vadd.f32 %v1087_v43, %v995_v60  ;;  %v1208_v5 = vadd.f32 %v1192_v58, %v1101_v45  ;;  %v1283_v6 = vpop.f32.mrf.mxu1  ;;  %v1767_v45 = vld [vmem:[%s2986_s11 + $0x5c] sm:$0xff] }
 0x14b   : > { %v1772_v54 = vpack.c.bf16 %v1767_v45, %v1676_v26 }
 0x14c   : > { %v3220_v7 = vadd.f32 %v1283_v6, %v1208_v5  ;;  %2514 = vmatmul.msk.bf16.gmra.mxu2 %vm1243_vm1, %v1679_v46  ;;  %2547 = vmatmul.msk.bf16.gmra.mxu0 %vm1243_vm1, %v1860_v55 }
 0x14d   : > { %2564 = vmatmul.msk.bf16.gmra.mxu1 %vm1243_vm1, %v1951_v1 }
 0x14e   : > { %2531 = vmatmul.msk.bf16.gmra.mxu3 %vm1243_vm1, %v1770_v63 }
 0x14f   : > { %v983_v0 = vpop.f32.mrf.mxu2 }
 0x150   : > { %v996_v61 = vadd.f32 %v983_v0, %v3156_v20 }
 0x151   : > { %v1090_v8 = vpop.f32.mrf.mxu3  ;;  %v1194_v9 = vpop.f32.mrf.mxu0 }
 0x152   : > { %v1103_v10 = vadd.f32 %v1090_v8, %v996_v61  ;;  %v1209_v11 = vadd.f32 %v1194_v9, %v1102_v2  ;;  %v1285_v12 = vpop.f32.mrf.mxu1  ;;  %v1857_v61 = vld [vmem:[%s2986_s11 + $0x55] sm:$0xff]  ;;  %v1858_v8 = vld [vmem:[%s2986_s11 + $0x5d] sm:$0xff] }
 0x153   : > { %v1948_v9 = vld [vmem:[%s2986_s11 + $0x56] sm:$0xff]  ;;  %v1863_v14 = vpack.c.bf16 %v1858_v8, %v1857_v61 }
 0x154   : > { %v3227_v4 = vadd.f32 %v1285_v12, %v1209_v11 }
 0x157   : > { %v985_v21 = vpop.f32.mrf.mxu2 }
 0x158   : > { %v997_v22 = vadd.f32 %v985_v21, %v3163_v19 }
 0x159   : > { %v1092_v24 = vpop.f32.mrf.mxu3  ;;  %v1197_v20 = vpop.f32.mrf.mxu0 }
 0x15a   : > { %v1104_v28 = vadd.f32 %v1092_v24, %v997_v22  ;;  %v1210_v29 = vadd.f32 %v1197_v20, %v1103_v10  ;;  %v1288_v30 = vpop.f32.mrf.mxu1  ;;  %v1949_v10 = vld [vmem:[%s2986_s11 + $0x5e] sm:$0xff] }
 0x15b   : > { %v1954_v62 = vpack.c.bf16 %v1949_v10, %v1948_v9 }
 0x15c   : > { %v3236_v33 = vadd.f32 %v1288_v30, %v1210_v29  ;;  %2515 = vmatmul.msk.bf16.gmra.mxu2 %vm1243_vm1, %v1680_v3  ;;  %2548 = vmatmul.msk.bf16.gmra.mxu0 %vm1243_vm1, %v1861_v25 }
 0x15d   : > { %2565 = vmatmul.msk.bf16.gmra.mxu1 %vm1243_vm1, %v1952_v27 }
 0x15e   : > { %2532 = vmatmul.msk.bf16.gmra.mxu3 %vm1243_vm1, %v1771_v56 }
 0x15f   : > { %v1359_v19 = vpop.f32.mrf.mxu2 }
 0x160   : > { %v1384_v23 = vadd.f32 %v1359_v19, %v3172_v49 }
 0x161   : > { %v1450_v35 = vpop.f32.mrf.mxu3  ;;  %v1199_v37 = vpop.f32.mrf.mxu0 }
 0x162   : > { %v1475_v34 = vadd.f32 %v1450_v35, %v1384_v23  ;;  %v1211_v39 = vadd.f32 %v1199_v37, %v1104_v28  ;;  %v1290_v41 = vpop.f32.mrf.mxu1 }
 0x164   : > { %v3243_v31 = vadd.f32 %v1290_v41, %v1211_v39 }
 0x167   : > { %v1361_v50 = vpop.f32.mrf.mxu2 }
 0x168   : > { %v1385_v38 = vadd.f32 %v1361_v50, %v3179_v32 }
 0x169   : > { %v1452_v51 = vpop.f32.mrf.mxu3  ;;  %v1541_v49 = vpop.f32.mrf.mxu0 }
 0x16a   : > { %v1476_v60 = vadd.f32 %v1452_v51, %v1385_v38  ;;  %v1566_v43 = vadd.f32 %v1541_v49, %v1475_v34  ;;  %v1632_v46 = vpop.f32.mrf.mxu1 }
 0x16c   : > { %v3252_v55 = vadd.f32 %v1632_v46, %v1566_v43  ;;  %2516 = vmatmul.msk.bf16.gmra.mxu2 %vm1243_vm1, %v1681_v52  ;;  %2549 = vmatmul.msk.bf16.gmra.mxu0 %vm1243_vm1, %v1862_v53 }
 0x16d   : > { %2566 = vmatmul.msk.bf16.gmra.mxu1 %vm1243_vm1, %v1953_v59 }
 0x16e   : > { %2533 = vmatmul.msk.bf16.gmra.mxu3 %vm1243_vm1, %v1772_v54 }
 0x16f   : > { %v1364_v32 = vpop.f32.mrf.mxu2 }
 0x170   : > { %v1386_v58 = vadd.f32 %v1364_v32, %v3188_v13 }
 0x171   : > { %v1455_v63 = vpop.f32.mrf.mxu3  ;;  %v1543_v1 = vpop.f32.mrf.mxu0 }
 0x172   : > { %v1477_v2 = vadd.f32 %v1455_v63, %v1386_v58  ;;  %v1567_v5 = vadd.f32 %v1543_v1, %v1476_v60  ;;  %v1634_v6 = vpop.f32.mrf.mxu1 }
 0x174   : > { %v3259_v0 = vadd.f32 %v1634_v6, %v1567_v5 }
 0x177   : > { %v1366_v11 = vpop.f32.mrf.mxu2 }
 0x178   : > { %v1387_v12 = vadd.f32 %v1366_v11, %v3195_v57 }
 0x179   : > { %v1457_v40 = vpop.f32.mrf.mxu3  ;;  %v1546_v15 = vpop.f32.mrf.mxu0 }
 0x17a   : > { %v1478_v17 = vadd.f32 %v1457_v40, %v1387_v12  ;;  %v1568_v13 = vadd.f32 %v1546_v15, %v1477_v2  ;;  %v1637_v18 = vpop.f32.mrf.mxu1 }
 0x17c   : > { %v3266_v21 = vadd.f32 %v1637_v18, %v1568_v13  ;;  %2550 = vmatmul.msk.bf16.gmra.mxu0 %vm1243_vm1, %v1863_v14 }
 0x17d   : > { %2567 = vmatmul.msk.bf16.gmra.mxu1 %vm1243_vm1, %v1954_v62 }
 0x17f   : > { %v1369_v22 = vpop.f32.mrf.mxu2 }
 0x180   : > { %v1388_v24 = vadd.f32 %v1369_v22, %v3204_v16  ;;  %v3294_v22 = vld [vmem:[%s3354_s4] ss:$0 sm:$0xff] }
 0x181   : > { %v1460_v3 = vpop.f32.mrf.mxu3  ;;  %v1548_v25 = vpop.f32.mrf.mxu0 }
 0x182   : > { %v1479_v20 = vadd.f32 %v1460_v3, %v1388_v24  ;;  %v1569_v57 = vadd.f32 %v1548_v25, %v1478_v17  ;;  %v1639_v56 = vpop.f32.mrf.mxu1 }
 0x184   : > { %v3271_v27 = vadd.f32 %v1639_v56, %v1569_v57 }
 0x187   : > { %v1371_v28 = vpop.f32.mrf.mxu2 }
 0x188   : > { %v1389_v29 = vadd.f32 %v1371_v28, %v3211_v36 }
 0x189   : > { %v1462_v30 = vpop.f32.mrf.mxu3  ;;  %v1551_v19 = vpop.f32.mrf.mxu0 }
 0x18a   : > { %v1480_v23 = vadd.f32 %v1462_v30, %v1389_v29  ;;  %v1570_v35 = vadd.f32 %v1551_v19, %v1479_v20  ;;  %v1642_v37 = vpop.f32.mrf.mxu1 }
 0x18c   : > { %v3274_v34 = vadd.f32 %v1642_v37, %v1570_v35 }
 0x18f   : > { %v1374_v39 = vpop.f32.mrf.mxu2 }
 0x190   : > { %v1390_v16 = vadd.f32 %v1374_v39, %v3220_v7 }
 0x191   : > { %v1465_v41 = vpop.f32.mrf.mxu3  ;;  %v1553_v26 = vpop.f32.mrf.mxu0 }
 0x192   : > { %v1481_v42 = vadd.f32 %v1465_v41, %v1390_v16  ;;  %v1571_v44 = vadd.f32 %v1553_v26, %v1480_v23  ;;  %v1644_v45 = vpop.f32.mrf.mxu1 }
 0x194   : > { %v3277_v47 = vadd.f32 %v1644_v45, %v1571_v44 }
 0x197   : > { %v1376_v48 = vpop.f32.mrf.mxu2 }
 0x198   : > { %v1391_v36 = vadd.f32 %v1376_v48, %v3227_v4 }
 0x199   : > { %v1467_v50 = vpop.f32.mrf.mxu3  ;;  %v1556_v38 = vpop.f32.mrf.mxu0 }
 0x19a   : > { %v1482_v51 = vadd.f32 %v1467_v50, %v1391_v36  ;;  %v1572_v52 = vadd.f32 %v1556_v38, %v1481_v42  ;;  %v1647_v53 = vpop.f32.mrf.mxu1 }
 0x19c   : > { %v3280_v49 = vadd.f32 %v1647_v53, %v1572_v52 }
 0x19f   : > { %v1379_v54 = vpop.f32.mrf.mxu2 }
 0x1a0   : > { %v1392_v7 = vadd.f32 %v1379_v54, %v3236_v33 }
 0x1a1   : > { %v1470_v59 = vpop.f32.mrf.mxu3  ;;  %v1558_v60 = vpop.f32.mrf.mxu0 }
 0x1a2   : > { %v1483_v43 = vadd.f32 %v1470_v59, %v1392_v7  ;;  %v1573_v46 = vadd.f32 %v1558_v60, %v1482_v51  ;;  %v1649_v32 = vpop.f32.mrf.mxu1 }
 0x1a4   : > { %v3283_v58 = vadd.f32 %v1649_v32, %v1573_v46 }
 0x1a7   : > { %v1381_v63 = vpop.f32.mrf.mxu2 }
 0x1a8   : > { %v1393_v4 = vadd.f32 %v1381_v63, %v3243_v31 }
 0x1a9   : > { %v1472_v1 = vpop.f32.mrf.mxu3  ;;  %v1561_v2 = vpop.f32.mrf.mxu0 }
 0x1aa   : > { %v1484_v5 = vadd.f32 %v1472_v1, %v1393_v4  ;;  %v1574_v6 = vadd.f32 %v1561_v2, %v1483_v43  ;;  %v1652_v61 = vpop.f32.mrf.mxu1 }
 0x1ac   : > { %v3286_v8 = vadd.f32 %v1652_v61, %v1574_v6 }
 0x1af   : > { %v1723_v9 = vpop.f32.mrf.mxu2 }
 0x1b0   : > { %v1748_v40 = vadd.f32 %v1723_v9, %v3252_v55 }
 0x1b1   : > { %v1814_v33 = vpop.f32.mrf.mxu3  ;;  %v1563_v10 = vpop.f32.mrf.mxu0 }
 0x1b2   : > { %v1575_v11 = vadd.f32 %v1563_v10, %v1484_v5  ;;  %v1654_v12 = vpop.f32.mrf.mxu1  ;;  %v1839_v62 = vadd.f32 %v1814_v33, %v1748_v40 }
 0x1b4   : > { %v3289_v14 = vadd.f32 %v1654_v12, %v1575_v11 }
 0x1b7   : > { %v1725_v15 = vpop.f32.mrf.mxu2 }
 0x1b8   : > { %v1749_v24 = vadd.f32 %v1725_v15, %v3259_v0 }
 0x1b9   : > { %v1816_v31 = vpop.f32.mrf.mxu3  ;;  %v1905_v17 = vpop.f32.mrf.mxu0 }
 0x1ba   : > { %v1930_v13 = vadd.f32 %v1905_v17, %v1839_v62  ;;  %v1996_v18 = vpop.f32.mrf.mxu1  ;;  %v1840_v20 = vadd.f32 %v1816_v31, %v1749_v24 }
 0x1bc   : > { %v2021_v3 = vadd.f32 %v1996_v18, %v1930_v13 }
 0x1be   : > { %v2035_v25 = vadd.f32 %v3294_v22, %v2021_v3 }
 0x1bf   : > { %v1728_v55 = vpop.f32.mrf.mxu2 }
 0x1c0   : > { %v2045_v57 = vmax.f32 %v2035_v25, 0.0  ;;  %v1750_v0 = vadd.f32 %v1728_v55, %v3266_v21 }
 0x1c1   : > { %v1819_v56 = vpop.f32.mrf.mxu3  ;;  %v1907_v28 = vpop.f32.mrf.mxu0 }
 0x1c2   : > { %2055 = vst.msk [vmem:[%s3302_s23] sm:$0xff] %vm1243_vm1, %v2045_v57  ;;  %v1931_v29 = vadd.f32 %v1907_v28, %v1840_v20  ;;  %v1998_v30 = vpop.f32.mrf.mxu1  ;;  %v1841_v37 = vadd.f32 %v1819_v56, %v1750_v0 }
 0x1c4   : > { %v2022_v19 = vadd.f32 %v1998_v30, %v1931_v29 }
 0x1c6   : > { %v2036_v23 = vadd.f32 %v3294_v22, %v2022_v19 }
 0x1c7   : > { %v1730_v35 = vpop.f32.mrf.mxu2 }
 0x1c8   : > { %v2046_v39 = vmax.f32 %v2036_v23, 0.0  ;;  %v1751_v44 = vadd.f32 %v1730_v35, %v3271_v27 }
 0x1c9   : > { %v1821_v16 = vpop.f32.mrf.mxu3  ;;  %v1910_v41 = vpop.f32.mrf.mxu0 }
 0x1ca   : > { %2056 = vst.msk [vmem:[%s3302_s23 + $0x8] sm:$0xff] %vm1243_vm1, %v2046_v39  ;;  %v1932_v26 = vadd.f32 %v1910_v41, %v1841_v37  ;;  %v2001_v42 = vpop.f32.mrf.mxu1  ;;  %v1842_v21 = vadd.f32 %v1821_v16, %v1751_v44 }
 0x1cc   : > { %v2023_v45 = vadd.f32 %v2001_v42, %v1932_v26 }
 0x1ce   : > { %v2037_v48 = vadd.f32 %v3294_v22, %v2023_v45 }
 0x1cf   : > { %v1733_v36 = vpop.f32.mrf.mxu2 }
 0x1d0   : > { %v2047_v50 = vmax.f32 %v2037_v48, 0.0  ;;  %v1752_v54 = vadd.f32 %v1733_v36, %v3274_v34 }
 0x1d1   : > { %v1824_v38 = vpop.f32.mrf.mxu3  ;;  %v1912_v51 = vpop.f32.mrf.mxu0 }
 0x1d2   : > { %2057 = vst.msk [vmem:[%s3302_s23 + $0x10] sm:$0xff] %vm1243_vm1, %v2047_v50  ;;  %v1933_v52 = vadd.f32 %v1912_v51, %v1842_v21  ;;  %v2003_v53 = vpop.f32.mrf.mxu1  ;;  %v1843_v27 = vadd.f32 %v1824_v38, %v1752_v54 }
 0x1d4   : > { %v2024_v7 = vadd.f32 %v2003_v53, %v1933_v52 }
 0x1d6   : > { %v2038_v59 = vadd.f32 %v3294_v22, %v2024_v7 }
 0x1d7   : > { %v1735_v60 = vpop.f32.mrf.mxu2 }
 0x1d8   : > { %v2048_v43 = vmax.f32 %v2038_v59, 0.0  ;;  %v1753_v1 = vadd.f32 %v1735_v60, %v3277_v47 }
 0x1d9   : > { %v1826_v46 = vpop.f32.mrf.mxu3  ;;  %v1915_v32 = vpop.f32.mrf.mxu0 }
 0x1da   : > { %2058 = vst.msk [vmem:[%s3302_s23 + $0x18] sm:$0xff] %vm1243_vm1, %v2048_v43  ;;  %v1934_v63 = vadd.f32 %v1915_v32, %v1843_v27  ;;  %v2006_v4 = vpop.f32.mrf.mxu1  ;;  %v1844_v6 = vadd.f32 %v1826_v46, %v1753_v1 }
 0x1dc   : > { %v2025_v2 = vadd.f32 %v2006_v4, %v1934_v63 }
 0x1de   : > { %v2039_v5 = vadd.f32 %v3294_v22, %v2025_v2 }
 0x1df   : > { %v1738_v34 = vpop.f32.mrf.mxu2 }
 0x1e0   : > { %v2049_v61 = vmax.f32 %v2039_v5, 0.0  ;;  %v1754_v12 = vadd.f32 %v1738_v34, %v3280_v49 }
 0x1e1   : > { %v1829_v9 = vpop.f32.mrf.mxu3  ;;  %v1917_v33 = vpop.f32.mrf.mxu0 }
 0x1e2   : > { %2059 = vst.msk [vmem:[%s3302_s23 + $0x20] sm:$0xff] %vm1243_vm1, %v2049_v61  ;;  %v1935_v10 = vadd.f32 %v1917_v33, %v1844_v6  ;;  %v2008_v11 = vpop.f32.mrf.mxu1  ;;  %v1845_v62 = vadd.f32 %v1829_v9, %v1754_v12 }
 0x1e4   : > { %v2026_v40 = vadd.f32 %v2008_v11, %v1935_v10 }
 0x1e6   : > { %v2040_v15 = vadd.f32 %v3294_v22, %v2026_v40 }
 0x1e7   : > { %v1740_v47 = vpop.f32.mrf.mxu2 }
 0x1e8   : > { %v2050_v31 = vmax.f32 %v2040_v15, 0.0  ;;  %v1755_v3 = vadd.f32 %v1740_v47, %v3283_v58 }
 0x1e9   : > { %v1920_v17 = vpop.f32.mrf.mxu0  ;;  %v1831_v24 = vpop.f32.mrf.mxu3 }
 0x1ea   : > { %2060 = vst.msk [vmem:[%s3302_s23 + $0x28] sm:$0xff] %vm1243_vm1, %v2050_v31  ;;  %v1936_v13 = vadd.f32 %v1920_v17, %v1845_v62  ;;  %v2011_v18 = vpop.f32.mrf.mxu1  ;;  %v1846_v20 = vadd.f32 %v1831_v24, %v1755_v3 }
 0x1ec   : > { %v2027_v25 = vadd.f32 %v2011_v18, %v1936_v13 }
 0x1ee   : > { %v2041_v55 = vadd.f32 %v3294_v22, %v2027_v25 }
 0x1ef   : > { %v1743_v49 = vpop.f32.mrf.mxu2 }
 0x1f0   : > { %v2051_v57 = vmax.f32 %v2041_v55, 0.0  ;;  %v1756_v30 = vadd.f32 %v1743_v49, %v3286_v8 }
 0x1f1   : > { %v1922_v56 = vpop.f32.mrf.mxu0  ;;  %v1834_v19 = vpop.f32.mrf.mxu3 }
 0x1f2   : > { %2061 = vst.msk [vmem:[%s3302_s23 + $0x30] sm:$0xff] %vm1243_vm1, %v2051_v57  ;;  %v1937_v28 = vadd.f32 %v1922_v56, %v1846_v20  ;;  %v2013_v29 = vpop.f32.mrf.mxu1  ;;  %v1847_v58 = vadd.f32 %v1834_v19, %v1756_v30 }
 0x1f4   : > { %v2028_v0 = vadd.f32 %v2013_v29, %v1937_v28 }
 0x1f6   : > { %v2042_v23 = vadd.f32 %v3294_v22, %v2028_v0 }
 0x1f7   : > { %v1745_v37 = vpop.f32.mrf.mxu2 }
 0x1f8   : > { %v2052_v35 = vmax.f32 %v2042_v23, 0.0  ;;  %v1757_v26 = vadd.f32 %v1745_v37, %v3289_v14 }
 0x1f9   : > { %v1925_v39 = vpop.f32.mrf.mxu0  ;;  %v1836_v8 = vpop.f32.mrf.mxu3 }
 0x1fa   : > { %2062 = vst.msk [vmem:[%s3302_s23 + $0x38] sm:$0xff] %vm1243_vm1, %v2052_v35  ;;  %v1938_v16 = vadd.f32 %v1925_v39, %v1847_v58  ;;  %v2016_v41 = vpop.f32.mrf.mxu1  ;;  %v1848_v45 = vadd.f32 %v1836_v8, %v1757_v26 }
 0x1fc   : > { %v2029_v42 = vadd.f32 %v2016_v41, %v1938_v16 }
 0x1fe   : > { %v2043_v44 = vadd.f32 %v3294_v22, %v2029_v42 }
 0x200   : > { %v2053_v48 = vmax.f32 %v2043_v44, 0.0 }
 0x201   : > { %v1927_v36 = vpop.f32.mrf.mxu0 }
 0x202   : > { %2063 = vst.msk [vmem:[%s3302_s23 + $0x40] sm:$0xff] %vm1243_vm1, %v2053_v48  ;;  %v1939_v21 = vadd.f32 %v1927_v36, %v1848_v45  ;;  %v2018_v50 = vpop.f32.mrf.mxu1 }
 0x204   : > { %v2030_v38 = vadd.f32 %v2018_v50, %v1939_v21 }
 0x206   : > { %v2044_v51 = vadd.f32 %v3294_v22, %v2030_v38 }
 0x208   : > { %v2054_v52 = vmax.f32 %v2044_v51, 0.0 }
 0x20a   : > { %2064 = vst.msk [vmem:[%s3302_s23 + $0x48] sm:$0xff] %vm1243_vm1, %v2054_v52 }
 0x20b PF: > { %s15_s20 = sadd.s32 1, %s2681_s20   ;;  %s3356_s18 = smov %s2677_s19 }
 0x20c   : > { %p12_p5 = scmp.ge.s32.totalorder %s15_s20, 4   ;;  %s3357_s19 = smov %s3359_s21 }
 0x20e   :  { %14 = sbr.rel (!%p12_p5) target bundleno = 2 (0x2), region = 89 }

// kernel: matrix_forward.11
= control target key start
LH: loop header
LB: loop body
LE: loop exit
PB: predicated region body
PF: predicated region fallthrough
CT: control target
= control target key end

     0   :  { %s1382_s12 = smov 0   ;;  %s1384_s13 = smov 0   ;;  %s2006_s0 = inlined_call_operand.vmem [shape: f32[2,256,16], index: 0, kind: input, shape index: {}]   ;;  %s2007_s1 = inlined_call_operand.vmem [shape: bf16[1,16,3], index: 1, kind: input, shape index: {}]   ;;  %s2008_s2 = inlined_call_operand.vmem [shape: f32[1,3], index: 2, kind: input, shape index: {}]   ;;  %s2009_s3 = inlined_call_operand.vmem [shape: f32[2,256,3], index: 3, kind: output, shape index: {}]  }
   0x1   :  { %s1386_s14 = smov 0  }
   0x2 LB: > { %s25_s15 = sadd.s32 1, %s1356_s13  ;;  %p1119_p0 = scmp.ge.s32.totalorder %s1360_s14, 1  ;;  %s1360_s14 = sphi %s1386_s14, %s13_s14   ;;  %s1356_s13 = sphi %s1384_s13, %s2057_s13   ;;  %s1352_s12 = sphi %s1382_s12, %s2056_s12  }
   0x3   : > { %p27_p1 = scmp.ge.s32.totalorder %s25_s15, 2  ;;  %p151_p2 = scmp.lt.s32.totalorder %s1360_s14, 3 }
   0x5   : > { %s2059_s15 = smov (%p27_p1, %s25_s15), 0  ;;  %p152_p3 = pnand %p1119_p0, %p151_p2 }
   0x6   : > { %p179_p4 = scmp.lt.s32.totalorder (!%p152_p3), %s1352_s12, 1 }
   0x7   : > { %155 = sbr.rel (%p152_p3) target bundleno = 299 (0x12b), region = 32 }
   0xc   : > { %v1180_v0 = vld [vmem:[%s2007_s1] sm:$0xff]  ;;  %s2061_s12 = smov (!%p179_p4, %s1352_s12), 1  ;;  %vm255_vm0 = vcmask 130048   ;;  %vm1001_vm2 = vcmask 23552  }
   0xd   : > { %311 = vmatpush.bf16.msra.mxu0 %v1180_v0  ;;  %1181 = vmatpush.bf16.msra.mxu1 %v1180_v0  ;;  %s1178_s18 = sshll.u32 %s2061_s12, 8  ;;  %v1464_v49 = vld [vmem:[%s2008_s2] ss:$0 sm:$0xff] }
   0xe   : > { %1182 = vmatpush.bf16.msra.mxu2 %v1180_v0  ;;  %1183 = vmatpush.bf16.msra.mxu3 %v1180_v0  ;;  %s1411_s21 = scalar_lea.vmem %s2006_s0, %s1178_s18  ;;  %s1520_s26 = scalar_lea.vmem %s2009_s3, %s1178_s18 }
   0xf   : > { %v195_v1 = vld [vmem:[%s1411_s21] sm:$0xff]  ;;  %v196_v2 = vld [vmem:[%s1411_s21 + $0x8] sm:$0xff]  ;;  %v197_v13 = vld [vmem:[%s1411_s21 + $0x10] sm:$0xff] }
  0x10   : > { %v203_v3 = vld [vmem:[%s1411_s21 + $0x40] sm:$0xff]  ;;  %v227_v4 = vpack.c.bf16 %v196_v2, %v195_v1  ;;  %v204_v5 = vld [vmem:[%s1411_s21 + $0x48] sm:$0xff]  ;;  %v198_v14 = vld [vmem:[%s1411_s21 + $0x18] sm:$0xff] }
  0x11   : > { %v211_v6 = vld [vmem:[%s1411_s21 + $0x80] sm:$0xff]  ;;  %v212_v7 = vld [vmem:[%s1411_s21 + $0x88] sm:$0xff]  ;;  %v231_v8 = vpack.c.bf16 %v204_v5, %v203_v3  ;;  %v205_v15 = vld [vmem:[%s1411_s21 + $0x50] sm:$0xff]  ;;  %v228_v21 = vpack.c.bf16 %v198_v14, %v197_v13 }
  0x12   : > { %v235_v9 = vpack.c.bf16 %v212_v7, %v211_v6  ;;  %v219_v10 = vld [vmem:[%s1411_s21 + $0xc0] sm:$0xff]  ;;  %v220_v11 = vld [vmem:[%s1411_s21 + $0xc8] sm:$0xff]  ;;  %1128 = vmatmul.msk.bf16.vlgmr.msra.gmra.mxu0 %vm255_vm0, %v227_v4  ;;  %v206_v16 = vld [vmem:[%s1411_s21 + $0x58] sm:$0xff] }
  0x13   : > { %v239_v12 = vpack.c.bf16 %v220_v11, %v219_v10  ;;  %1132 = vmatmul.msk.bf16.vlgmr.msra.gmra.mxu1 %vm255_vm0, %v231_v8  ;;  %v213_v17 = vld [vmem:[%s1411_s21 + $0x90] sm:$0xff]  ;;  %v214_v18 = vld [vmem:[%s1411_s21 + $0x98] sm:$0xff]  ;;  %v232_v22 = vpack.c.bf16 %v206_v16, %v205_v15  ;;  %v199_v25 = vld [vmem:[%s1411_s21 + $0x20] sm:$0xff] }
  0x14   : > { %1136 = vmatmul.msk.bf16.vlgmr.msra.gmra.mxu2 %vm255_vm0, %v235_v9  ;;  %v221_v19 = vld [vmem:[%s1411_s21 + $0xd0] sm:$0xff]  ;;  %v222_v20 = vld [vmem:[%s1411_s21 + $0xd8] sm:$0xff]  ;;  %v236_v23 = vpack.c.bf16 %v214_v18, %v213_v17  ;;  %v200_v26 = vld [vmem:[%s1411_s21 + $0x28] sm:$0xff] }
  0x15   : > { %1140 = vmatmul.msk.bf16.vlgmr.msra.gmra.mxu3 %vm255_vm0, %v239_v12  ;;  %v240_v24 = vpack.c.bf16 %v222_v20, %v221_v19  ;;  %v207_v27 = vld [vmem:[%s1411_s21 + $0x60] sm:$0xff]  ;;  %v208_v28 = vld [vmem:[%s1411_s21 + $0x68] sm:$0xff]  ;;  %v229_v33 = vpack.c.bf16 %v200_v26, %v199_v25  ;;  %v201_v37 = vld [vmem:[%s1411_s21 + $0x30] sm:$0xff] }
  0x16   : > { %v215_v29 = vld [vmem:[%s1411_s21 + $0xa0] sm:$0xff]  ;;  %v216_v30 = vld [vmem:[%s1411_s21 + $0xa8] sm:$0xff]  ;;  %v233_v34 = vpack.c.bf16 %v208_v28, %v207_v27  ;;  %v202_v38 = vld [vmem:[%s1411_s21 + $0x38] sm:$0xff] }
  0x17   : > { %v223_v31 = vld [vmem:[%s1411_s21 + $0xe0] sm:$0xff]  ;;  %v224_v32 = vld [vmem:[%s1411_s21 + $0xe8] sm:$0xff]  ;;  %v237_v35 = vpack.c.bf16 %v216_v30, %v215_v29  ;;  %v209_v39 = vld [vmem:[%s1411_s21 + $0x70] sm:$0xff]  ;;  %v230_v45 = vpack.c.bf16 %v202_v38, %v201_v37 }
  0x18   : > { %v241_v36 = vpack.c.bf16 %v224_v32, %v223_v31  ;;  %v210_v40 = vld [vmem:[%s1411_s21 + $0x78] sm:$0xff]  ;;  %v217_v41 = vld [vmem:[%s1411_s21 + $0xb0] sm:$0xff] }
  0x19   : > { %v218_v42 = vld [vmem:[%s1411_s21 + $0xb8] sm:$0xff]  ;;  %v225_v43 = vld [vmem:[%s1411_s21 + $0xf0] sm:$0xff]  ;;  %v234_v46 = vpack.c.bf16 %v210_v40, %v209_v39 }
  0x1a   : > { %v226_v44 = vld [vmem:[%s1411_s21 + $0xf8] sm:$0xff]  ;;  %v238_v47 = vpack.c.bf16 %v218_v42, %v217_v41 }
  0x1b   : > { %v242_v48 = vpack.c.bf16 %v226_v44, %v225_v43 }
  0x22   : > { %1129 = vmatmul.msk.bf16.gmra.mxu0 %vm255_vm0, %v228_v21 }
  0x23   : > { %1133 = vmatmul.msk.bf16.gmra.mxu1 %vm255_vm0, %v232_v22 }
  0x24   : > { %1137 = vmatmul.msk.bf16.gmra.mxu2 %vm255_vm0, %v236_v23 }
  0x25   : > { %1141 = vmatmul.msk.bf16.gmra.mxu3 %vm255_vm0, %v240_v24 }
  0x32   : > { %1130 = vmatmul.msk.bf16.gmra.mxu0 %vm255_vm0, %v229_v33 }
  0x33   : > { %1134 = vmatmul.msk.bf16.gmra.mxu1 %vm255_vm0, %v233_v34 }
  0x34   : > { %1138 = vmatmul.msk.bf16.gmra.mxu2 %vm255_vm0, %v237_v35 }
  0x35   : > { %1142 = vmatmul.msk.bf16.gmra.mxu3 %vm255_vm0, %v241_v36 }
  0x42   : > { %1131 = vmatmul.msk.bf16.gmra.mxu0 %vm255_vm0, %v230_v45 }
  0x43   : > { %1135 = vmatmul.msk.bf16.gmra.mxu1 %vm255_vm0, %v234_v46 }
  0x44   : > { %1139 = vmatmul.msk.bf16.gmra.mxu2 %vm255_vm0, %v238_v47 }
  0x45   : > { %1143 = vmatmul.msk.bf16.gmra.mxu3 %vm255_vm0, %v242_v48 }
  0x8f   : > { %v313_v50 = vpop.f32.mrf.mxu0 }
  0x90   : > { %v314_v51 = vadd.f32 %v1464_v49, %v313_v50  ;;  %v333_v52 = vpop.f32.mrf.mxu1 }
  0x91   : > { %v334_v53 = vadd.f32 %v1464_v49, %v333_v52 }
  0x92   : > { %v1144_v54 = vmul.f32 -1.442695, %v314_v51 }
  0x93   : > { %v1152_v55 = vmul.f32 -1.442695, %v334_v53 }
  0x94   : > { %1209 = vpow2.f32 %v1144_v54 }
  0x95   : > { %1211 = vpow2.f32 %v1152_v55 }
  0x97   : > { %v353_v56 = vpop.f32.mrf.mxu2  ;;  %v315_v59 = vpop.f32.mrf.mxu0 }
  0x98   : > { %v354_v57 = vadd.f32 %v1464_v49, %v353_v56  ;;  %v373_v58 = vpop.f32.mrf.mxu3  ;;  %v316_v61 = vadd.f32 %v1464_v49, %v315_v59  ;;  %v335_v62 = vpop.f32.mrf.mxu1 }
  0x99   : > { %v374_v60 = vadd.f32 %v1464_v49, %v373_v58  ;;  %v336_v0 = vadd.f32 %v1464_v49, %v335_v62 }
  0x9a   : > { %v1160_v63 = vmul.f32 -1.442695, %v354_v57  ;;  %v1210_v1 = vpop.eup %1209  ;;  %v1145_v5 = vmul.f32 -1.442695, %v316_v61 }
  0x9b   : > { %v1168_v2 = vmul.f32 -1.442695, %v374_v60  ;;  %v1212_v3 = vpop.eup %1211  ;;  %v1472_v4 = vadd.f32 1.0, %v1210_v1  ;;  %v1153_v7 = vmul.f32 -1.442695, %v336_v0 }
  0x9c   : > { %1213 = vpow2.f32 %v1160_v63  ;;  %v1474_v6 = vadd.f32 1.0, %v1212_v3 }
  0x9d   : > { %1215 = vpow2.f32 %v1168_v2  ;;  %v530_v11 = vand.u32 2147483647, %v1472_v4  ;;  %v532_v12 = vand.u32 2147483648, %v1472_v4  ;;  %vm526_vm1 = vweird.f32 %v1472_v4 }
  0x9e   : > { %1217 = vrcp.f32 %v1472_v4  ;;  %v650_v15 = vand.u32 2147483647, %v1474_v6  ;;  %v652_v19 = vand.u32 2147483648, %v1474_v6  ;;  %vm646_vm3 = vweird.f32 %v1474_v6 }
  0x9f   : > { %1219 = vrcp.f32 %v1474_v6  ;;  %v355_v8 = vpop.f32.mrf.mxu2  ;;  %v318_v13 = vpop.f32.mrf.mxu0  ;;  %vm1492_vm4 = vcmp.eq.f32.partialorder %v530_v11, 8.507059e+37  ;;  %v533_v28 = vor.u32 1.1754944e-38, %v532_v12 }
  0xa0   : > { %1221 = vpow2.f32 %v1145_v5  ;;  %v356_v9 = vadd.f32 %v1464_v49, %v355_v8  ;;  %v375_v10 = vpop.f32.mrf.mxu3  ;;  %v319_v23 = vadd.f32 %v1464_v49, %v318_v13  ;;  %v338_v24 = vpop.f32.mrf.mxu1  ;;  %vm1498_vm5 = vcmp.eq.f32.partialorder %v650_v15, 8.507059e+37 }
  0xa1   : > { %1223 = vpow2.f32 %v1153_v7  ;;  %v376_v17 = vadd.f32 %v1464_v49, %v375_v10  ;;  %v653_v35 = vor.u32 1.1754944e-38, %v652_v19  ;;  %v339_v36 = vadd.f32 %v1464_v49, %v338_v24 }
  0xa2   : > { %v1214_v14 = vpop.eup %1213  ;;  %v1161_v16 = vmul.f32 -1.442695, %v356_v9  ;;  %v1146_v39 = vmul.f32 -1.442695, %v319_v23 }
  0xa3   : > { %v1216_v18 = vpop.eup %1215  ;;  %v1484_v20 = vadd.f32 1.0, %v1214_v14  ;;  %v1169_v32 = vmul.f32 -1.442695, %v376_v17  ;;  %v1513_v50 = vmul.f32 -1.442695, %v339_v36 }
  0xa4   : > { %v1218_v21 = vpop.eup %1217  ;;  %v1488_v22 = vadd.f32 1.0, %v1216_v18 }
  0xa5   : > { %v1220_v25 = vpop.eup %1219  ;;  %v522_v26 = vmul.f32 %v1218_v21, %v1472_v4  ;;  %1225 = vrcp.f32 %v1484_v20  ;;  %vm527_vm6 = vweird.f32 %v1218_v21  ;;  %v770_v38 = vand.u32 2147483647, %v1484_v20 }
  0xa6   : > { %v1222_v29 = vpop.eup %1221  ;;  %v642_v30 = vmul.f32 %v1220_v25, %v1474_v6  ;;  %1227 = vpow2.f32 %v1161_v16  ;;  %v772_v41 = vand.u32 2147483648, %v1484_v20  ;;  %vm647_vm7 = vweird.f32 %v1220_v25  ;;  %vm528_vm8 = vmor %vm526_vm1, %vm527_vm6 }
  0xa7   : > { %v1224_v33 = vpop.eup %1223  ;;  %v523_v34 = vsub.f32 1.0, %v522_v26  ;;  %1229 = vrcp.f32 %v1488_v22  ;;  %v1506_v42 = vadd.f32 1.0, %v1222_v29  ;;  %v890_v45 = vand.u32 2147483647, %v1488_v22  ;;  %v358_v54 = vpop.f32.mrf.mxu2  ;;  %vm648_vm11 = vmor %vm646_vm3, %vm647_vm7 }
  0xa8   : > { %v643_v37 = vsub.f32 1.0, %v642_v30  ;;  %v1508_v43 = vadd.f32 1.0, %v1224_v33  ;;  %1231 = vpow2.f32 %v1169_v32  ;;  %v892_v48 = vand.u32 2147483648, %v1488_v22  ;;  %v378_v17 = vpop.f32.mrf.mxu3  ;;  %v320_v36 = vpop.f32.mrf.mxu0 }
  0xa9   : > { %v524_v40 = vmul.f32 %v1218_v21, %v523_v34  ;;  %1233 = vrcp.f32 %v1506_v42  ;;  %vm766_vm9 = vweird.f32 %v1484_v20  ;;  %vm886_vm10 = vweird.f32 %v1488_v22 }
  0xaa   : > { %v644_v44 = vmul.f32 %v1220_v25, %v643_v37  ;;  %vm1531_vm12 = vcmp.eq.f32.partialorder %v770_v38, 8.507059e+37  ;;  %v773_v58 = vor.u32 1.1754944e-38, %v772_v41  ;;  %1235 = vrcp.f32 %v1508_v43 }
  0xab   : > { %v1226_v46 = vpop.eup %1225  ;;  %v525_v47 = vadd.f32 %v1218_v21, %v524_v40  ;;  %vm1539_vm13 = vcmp.eq.f32.partialorder %v890_v45, 8.507059e+37  ;;  %v893_v1 = vor.u32 1.1754944e-38, %v892_v48  ;;  %v545_v2 = vand.u32 2147483647, %v1506_v42 }
  0xac   : > { %v1228_v51 = vpop.eup %1227  ;;  %v645_v52 = vadd.f32 %v1220_v25, %v644_v44  ;;  %v762_v53 = vmul.f32 %v1226_v46, %v1484_v20  ;;  %v359_v3 = vadd.f32 %v1464_v49, %v358_v54  ;;  %vm767_vm14 = vweird.f32 %v1226_v46  ;;  %v340_v54 = vpop.f32.mrf.mxu1 }
  0xad   : > { %v1230_v55 = vpop.eup %1229  ;;  %v529_v56 = vsel %vm528_vm8, %v1218_v21, %v525_v47  ;;  %v1551_v7 = vadd.f32 1.0, %v1228_v51  ;;  %vm541_vm0 = vweird.f32 %v1506_v42  ;;  %v547_v9 = vand.u32 2147483648, %v1506_v42  ;;  %vm768_vm1 = vmor %vm766_vm9, %vm767_vm14 }
  0xae   : > { %v534_v59 = vsel %vm1492_vm4, %v533_v28, %v529_v56  ;;  %v649_v60 = vsel %vm648_vm11, %v1220_v25, %v645_v52  ;;  %v763_v61 = vsub.f32 1.0, %v762_v53  ;;  %v882_v62 = vmul.f32 %v1230_v55, %v1488_v22  ;;  %v1232_v4 = vpop.eup %1231 }
  0xaf   : > { %1002 = vst.msk [vmem:[%s1520_s26] sm:$0xff] %vm1001_vm2, %v534_v59  ;;  %v654_v0 = vsel %vm1498_vm5, %v653_v35, %v649_v60  ;;  %v1234_v8 = vpop.eup %1233  ;;  %vm887_vm15 = vweird.f32 %v1230_v55  ;;  %1237 = vpow2.f32 %v1146_v39  ;;  %v1556_v13 = vadd.f32 1.0, %v1232_v4 }
  0xb0   : > { %1010 = vst.msk [vmem:[%s1520_s26 + $0x40] sm:$0xff] %vm1001_vm2, %v654_v0  ;;  %v764_v5 = vmul.f32 %v1226_v46, %v763_v61  ;;  %v883_v6 = vsub.f32 1.0, %v882_v62  ;;  %v537_v12 = vmul.f32 %v1234_v8, %v1506_v42  ;;  %v1236_v14 = vpop.eup %1235  ;;  %vm1560_vm3 = vcmp.eq.f32.partialorder %v545_v2, 8.507059e+37  ;;  %vm888_vm5 = vmor %vm886_vm10, %vm887_vm15 }
  0xb1   : > { %vm661_vm4 = vweird.f32 %v1508_v43  ;;  %v665_v16 = vand.u32 2147483647, %v1508_v43  ;;  %1239 = vrcp.f32 %v1551_v7  ;;  %v657_v23 = vmul.f32 %v1236_v14, %v1508_v43 }
  0xb2   : > { %v765_v10 = vadd.f32 %v1226_v46, %v764_v5  ;;  %v884_v11 = vmul.f32 %v1230_v55, %v883_v6  ;;  %v538_v21 = vsub.f32 1.0, %v537_v12  ;;  %vm542_vm6 = vweird.f32 %v1234_v8 }
  0xb3   : > { %v667_v24 = vand.u32 2147483648, %v1508_v43  ;;  %v785_v25 = vand.u32 2147483647, %v1551_v7  ;;  %v658_v28 = vsub.f32 1.0, %v657_v23  ;;  %1241 = vrcp.f32 %v1556_v13  ;;  %vm543_vm9 = vmor %vm541_vm0, %vm542_vm6 }
  0xb4   : > { %v769_v18 = vsel %vm768_vm1, %v1226_v46, %v765_v10  ;;  %v885_v19 = vadd.f32 %v1230_v55, %v884_v11  ;;  %v539_v27 = vmul.f32 %v1234_v8, %v538_v21  ;;  %v548_v31 = vor.u32 1.1754944e-38, %v547_v9 }
  0xb5   : > { %v774_v20 = vsel %vm1531_vm12, %v773_v58, %v769_v18  ;;  %v1238_v29 = vpop.eup %1237  ;;  %vm1580_vm7 = vcmp.eq.f32.partialorder %v665_v16, 8.507059e+37  ;;  %v787_v32 = vand.u32 2147483648, %v1551_v7  ;;  %v659_v34 = vmul.f32 %v1236_v14, %v658_v28  ;;  %v380_v58 = vpop.f32.mrf.mxu3 }
  0xb6   : > { %1018 = vst.msk [vmem:[%s1520_s26 + $0x80] sm:$0xff] %vm1001_vm2, %v774_v20  ;;  %v889_v26 = vsel %vm888_vm5, %v1230_v55, %v885_v19  ;;  %v540_v33 = vadd.f32 %v1234_v8, %v539_v27  ;;  %vm662_vm8 = vweird.f32 %v1236_v14  ;;  %v1587_v35 = vadd.f32 1.0, %v1238_v29  ;;  %v360_v55 = vpop.f32.mrf.mxu2 }
  0xb7   : > { %v894_v30 = vsel %vm1539_vm13, %v893_v1, %v889_v26  ;;  %v1240_v37 = vpop.eup %1239  ;;  %v668_v38 = vor.u32 1.1754944e-38, %v667_v24  ;;  %vm781_vm10 = vweird.f32 %v1551_v7  ;;  %1243 = vpow2.f32 %v1513_v50  ;;  %vm663_vm12 = vmor %vm661_vm4, %vm662_vm8 }
  0xb8   : > { %1026 = vst.msk [vmem:[%s1520_s26 + $0xc0] sm:$0xff] %vm1001_vm2, %v894_v30  ;;  %v1162_v39 = vmul.f32 -1.442695, %v359_v3  ;;  %v544_v40 = vsel %vm543_vm9, %v1234_v8, %v540_v33  ;;  %v660_v41 = vadd.f32 %v1236_v14, %v659_v34  ;;  %v777_v44 = vmul.f32 %v1240_v37, %v1551_v7  ;;  %v323_v34 = vpop.f32.mrf.mxu0 }
  0xb9   : > { %vm1595_vm11 = vcmp.eq.f32.partialorder %v785_v25, 8.507059e+37  ;;  %v379_v46 = vadd.f32 %v1464_v49, %v378_v17  ;;  %v549_v42 = vsel %vm1560_vm3, %v548_v31, %v544_v40  ;;  %v788_v47 = vor.u32 1.1754944e-38, %v787_v32  ;;  %v1242_v50 = vpop.eup %1241 }
  0xba   : > { %1245 = vrcp.f32 %v1587_v35  ;;  %v321_v48 = vadd.f32 %v1464_v49, %v320_v36  ;;  %1003 = vst.msk [vmem:[%s1520_s26 + $0x8] sm:$0xff] %vm1001_vm2, %v549_v42  ;;  %v664_v51 = vsel %vm663_vm12, %v1236_v14, %v660_v41  ;;  %v778_v52 = vsub.f32 1.0, %v777_v44 }
  0xbb   : > { %vm901_vm13 = vweird.f32 %v1556_v13  ;;  %v905_v53 = vand.u32 2147483647, %v1556_v13  ;;  %v669_v43 = vsel %vm1580_vm7, %v668_v38, %v664_v51  ;;  %v897_v56 = vmul.f32 %v1242_v50, %v1556_v13 }
  0xbc   : > { %v907_v57 = vand.u32 2147483648, %v1556_v13  ;;  %1247 = vpow2.f32 %v1162_v39  ;;  %1011 = vst.msk [vmem:[%s1520_s26 + $0x48] sm:$0xff] %vm1001_vm2, %v669_v43  ;;  %v779_v59 = vmul.f32 %v1240_v37, %v778_v52  ;;  %vm782_vm14 = vweird.f32 %v1240_v37 }
  0xbd   : > { %vm902_vm15 = vweird.f32 %v1242_v50  ;;  %v1170_v60 = vmul.f32 -1.442695, %v379_v46  ;;  %v1244_v61 = vpop.eup %1243  ;;  %v898_v62 = vsub.f32 1.0, %v897_v56  ;;  %v1147_v63 = vmul.f32 -1.442695, %v321_v48  ;;  %vm783_vm0 = vmor %vm781_vm10, %vm782_vm14 }
  0xbe   : > { %v341_v0 = vadd.f32 %v1464_v49, %v340_v54  ;;  %v361_v1 = vadd.f32 %v1464_v49, %v360_v55  ;;  %v780_v2 = vadd.f32 %v1240_v37, %v779_v59  ;;  %v1619_v3 = vadd.f32 1.0, %v1244_v61  ;;  %vm903_vm4 = vmor %vm901_vm13, %vm902_vm15 }
  0xbf   : > { %1249 = vpow2.f32 %v1170_v60  ;;  %v381_v4 = vadd.f32 %v1464_v49, %v380_v58  ;;  %v899_v6 = vmul.f32 %v1242_v50, %v898_v62  ;;  %vm1624_vm1 = vcmp.eq.f32.partialorder %v905_v53, 8.507059e+37 }
  0xc0   : > { %v1246_v5 = vpop.eup %1245  ;;  %1251 = vpow2.f32 %v1147_v63  ;;  %v1155_v8 = vmul.f32 -1.442695, %v341_v0  ;;  %v1163_v9 = vmul.f32 -1.442695, %v361_v1  ;;  %v784_v10 = vsel %vm783_vm0, %v1240_v37, %v780_v2 }
  0xc1   : > { %v552_v12 = vmul.f32 %v1246_v5, %v1587_v35  ;;  %1253 = vrcp.f32 %v1619_v3  ;;  %v789_v15 = vsel %vm1595_vm11, %v788_v47, %v784_v10  ;;  %v900_v16 = vadd.f32 %v1242_v50, %v899_v6 }
  0xc2   : > { %v1248_v14 = vpop.eup %1247  ;;  %v908_v7 = vor.u32 1.1754944e-38, %v907_v57  ;;  %vm556_vm3 = vweird.f32 %v1587_v35  ;;  %1019 = vst.msk [vmem:[%s1520_s26 + $0x88] sm:$0xff] %vm1001_vm2, %v789_v15  ;;  %v560_v18 = vand.u32 2147483647, %v1587_v35  ;;  %1255 = vpow2.f32 %v1155_v8 }
  0xc3   : > { %v553_v17 = vsub.f32 1.0, %v552_v12  ;;  %v1639_v19 = vadd.f32 1.0, %v1248_v14  ;;  %v904_v21 = vsel %vm903_vm4, %v1242_v50, %v900_v16  ;;  %v562_v23 = vand.u32 2147483648, %v1587_v35 }
  0xc4   : > { %1257 = vpow2.f32 %v1163_v9  ;;  %v1171_v20 = vmul.f32 -1.442695, %v381_v4  ;;  %v909_v25 = vsel %vm1624_vm1, %v908_v7, %v904_v21  ;;  %vm557_vm5 = vweird.f32 %v1246_v5 }
  0xc5   : > { %v1250_v24 = vpop.eup %1249  ;;  %v554_v26 = vmul.f32 %v1246_v5, %v553_v17  ;;  %1259 = vrcp.f32 %v1639_v19  ;;  %1027 = vst.msk [vmem:[%s1520_s26 + $0xc8] sm:$0xff] %vm1001_vm2, %v909_v25  ;;  %v680_v27 = vand.u32 2147483647, %v1619_v3  ;;  %v682_v31 = vand.u32 2147483648, %v1619_v3  ;;  %vm558_vm6 = vmor %vm556_vm3, %vm557_vm5 }
  0xc6   : > { %v1252_v13 = vpop.eup %1251  ;;  %v1648_v28 = vadd.f32 1.0, %v1250_v24  ;;  %1261 = vpow2.f32 %v1171_v20  ;;  %vm561_vm7 = vcmp.eq.f32.partialorder %v560_v18, 8.507059e+37  ;;  %v563_v32 = vor.u32 1.1754944e-38, %v562_v23  ;;  %v363_v18 = vpop.f32.mrf.mxu2 }
  0xc7   : > { %v1254_v29 = vpop.eup %1253  ;;  %v555_v30 = vadd.f32 %v1246_v5, %v554_v26  ;;  %v1651_v22 = vadd.f32 1.0, %v1252_v13  ;;  %v800_v38 = vand.u32 2147483647, %v1639_v19  ;;  %v802_v39 = vand.u32 2147483648, %v1639_v19 }
  0xc8   : > { %v672_v33 = vmul.f32 %v1254_v29, %v1619_v3  ;;  %v1256_v36 = vpop.eup %1255  ;;  %1263 = vrcp.f32 %v1648_v28  ;;  %vm676_vm8 = vweird.f32 %v1619_v3  ;;  %vm1663_vm9 = vcmp.eq.f32.partialorder %v680_v27, 8.507059e+37  ;;  %v343_v3 = vpop.f32.mrf.mxu1 }
  0xc9   : > { %v559_v37 = vsel %vm558_vm6, %v1246_v5, %v555_v30  ;;  %1265 = vrcp.f32 %v1651_v22  ;;  %v683_v46 = vor.u32 1.1754944e-38, %v682_v31  ;;  %vm796_vm10 = vweird.f32 %v1639_v19 }
  0xca   : > { %v1258_v40 = vpop.eup %1257  ;;  %v564_v41 = vsel %vm561_vm7, %v563_v32, %v559_v37  ;;  %v673_v44 = vsub.f32 1.0, %v672_v33  ;;  %v324_v42 = vadd.f32 %v1464_v49, %v323_v34  ;;  %vm677_vm11 = vweird.f32 %v1254_v29 }
  0xcb   : > { %v1260_v35 = vpop.eup %1259  ;;  %1004 = vst.msk [vmem:[%s1520_s26 + $0x10] sm:$0xff] %vm1001_vm2, %v564_v41  ;;  %v920_v50 = vand.u32 2147483647, %v1648_v28  ;;  %vm1671_vm12 = vcmp.eq.f32.partialorder %v800_v38, 8.507059e+37  ;;  %v803_v53 = vor.u32 1.1754944e-38, %v802_v39  ;;  %v922_v54 = vand.u32 2147483648, %v1648_v28  ;;  %vm678_vm14 = vmor %vm676_vm8, %vm677_vm11  ;;  %v383_v39 = vpop.f32.mrf.mxu3 }
  0xcc   : > { %v674_v47 = vmul.f32 %v1254_v29, %v673_v44  ;;  %v792_v48 = vmul.f32 %v1260_v35, %v1639_v19  ;;  %v1262_v51 = vpop.eup %1261  ;;  %v1676_v55 = vadd.f32 1.0, %v1256_v36  ;;  %vm916_vm13 = vweird.f32 %v1648_v28 }
  0xcd   : > { %v1679_v57 = vadd.f32 1.0, %v1258_v40  ;;  %vm797_vm15 = vweird.f32 %v1260_v35  ;;  %vm571_vm0 = vweird.f32 %v1651_v22  ;;  %v575_v59 = vand.u32 2147483647, %v1651_v22  ;;  %v325_v40 = vpop.f32.mrf.mxu0 }
  0xce   : > { %v675_v43 = vadd.f32 %v1254_v29, %v674_v47  ;;  %v793_v56 = vsub.f32 1.0, %v792_v48  ;;  %v1264_v58 = vpop.eup %1263  ;;  %v577_v60 = vand.u32 2147483648, %v1651_v22  ;;  %1267 = vrcp.f32 %v1676_v55  ;;  %vm798_vm3 = vmor %vm796_vm10, %vm797_vm15 }
  0xcf   : > { %v1266_v61 = vpop.eup %1265  ;;  %v912_v0 = vmul.f32 %v1264_v58, %v1648_v28  ;;  %vm1688_vm1 = vcmp.eq.f32.partialorder %v920_v50, 8.507059e+37  ;;  %v1692_v2 = vadd.f32 1.0, %v1262_v51  ;;  %v923_v5 = vor.u32 1.1754944e-38, %v922_v54 }
  0xd0   : > { %v679_v62 = vsel %vm678_vm14, %v1254_v29, %v675_v43  ;;  %v794_v63 = vmul.f32 %v1260_v35, %v793_v56  ;;  %v567_v6 = vmul.f32 %v1266_v61, %v1651_v22  ;;  %v695_v8 = vand.u32 2147483647, %v1676_v55 }
  0xd1   : > { %v684_v4 = vsel %vm1663_vm9, %v683_v46, %v679_v62  ;;  %v913_v10 = vsub.f32 1.0, %v912_v0  ;;  %v697_v11 = vand.u32 2147483648, %v1676_v55  ;;  %1269 = vrcp.f32 %v1679_v57  ;;  %v345_v46 = vpop.f32.mrf.mxu1  ;;  %v365_v62 = vpop.f32.mrf.mxu2 }
  0xd2   : > { %1012 = vst.msk [vmem:[%s1520_s26 + $0x50] sm:$0xff] %vm1001_vm2, %v684_v4  ;;  %v795_v9 = vadd.f32 %v1260_v35, %v794_v63  ;;  %v568_v12 = vsub.f32 1.0, %v567_v6  ;;  %vm1705_vm4 = vcmp.eq.f32.partialorder %v575_v59, 8.507059e+37  ;;  %v578_v15 = vor.u32 1.1754944e-38, %v577_v60 }
  0xd3   : > { %v1148_v16 = vmul.f32 -1.442695, %v324_v42  ;;  %v914_v17 = vmul.f32 %v1264_v58, %v913_v10  ;;  %vm917_vm5 = vweird.f32 %v1264_v58  ;;  %1271 = vrcp.f32 %v1692_v2 }
  0xd4   : > { %v799_v7 = vsel %vm798_vm3, %v1260_v35, %v795_v9  ;;  %v1268_v21 = vpop.eup %1267  ;;  %v569_v19 = vmul.f32 %v1266_v61, %v568_v12  ;;  %vm572_vm6 = vweird.f32 %v1266_v61  ;;  %vm691_vm7 = vweird.f32 %v1676_v55  ;;  %vm918_vm9 = vmor %vm916_vm13, %vm917_vm5 }
  0xd5   : > { %v804_v23 = vsel %vm1671_vm12, %v803_v53, %v799_v7  ;;  %v915_v20 = vadd.f32 %v1264_v58, %v914_v17  ;;  %v687_v24 = vmul.f32 %v1268_v21, %v1676_v55  ;;  %vm1716_vm8 = vcmp.eq.f32.partialorder %v695_v8, 8.507059e+37  ;;  %vm573_vm11 = vmor %vm571_vm0, %vm572_vm6 }
  0xd6   : > { %1020 = vst.msk [vmem:[%s1520_s26 + $0x90] sm:$0xff] %vm1001_vm2, %v804_v23  ;;  %v698_v26 = vor.u32 1.1754944e-38, %v697_v11  ;;  %v815_v13 = vand.u32 2147483647, %v1679_v57  ;;  %v570_v27 = vadd.f32 %v1266_v61, %v569_v19  ;;  %vm811_vm10 = vweird.f32 %v1679_v57 }
  0xd7   : > { %v817_v29 = vand.u32 2147483648, %v1679_v57  ;;  %1273 = vpow2.f32 %v1148_v16  ;;  %v344_v30 = vadd.f32 %v1464_v49, %v343_v3  ;;  %v1270_v31 = vpop.eup %1269  ;;  %v919_v32 = vsel %vm918_vm9, %v1264_v58, %v915_v20 }
  0xd8   : > { %v688_v33 = vsub.f32 1.0, %v687_v24  ;;  %vm692_vm12 = vweird.f32 %v1268_v21  ;;  %v364_v28 = vadd.f32 %v1464_v49, %v363_v18  ;;  %v924_v34 = vsel %vm1688_vm1, %v923_v5, %v919_v32 }
  0xd9   : > { %v574_v36 = vsel %vm573_vm11, %v1266_v61, %v570_v27  ;;  %v807_v37 = vmul.f32 %v1270_v31, %v1679_v57  ;;  %vm931_vm13 = vweird.f32 %v1692_v2  ;;  %v935_v38 = vand.u32 2147483647, %v1692_v2  ;;  %v1272_v41 = vpop.eup %1271  ;;  %1028 = vst.msk [vmem:[%s1520_s26 + $0xd0] sm:$0xff] %vm1001_vm2, %v924_v34  ;;  %vm693_vm15 = vmor %vm691_vm7, %vm692_vm12 }
  0xda   : > { %v579_v22 = vsel %vm1705_vm4, %v578_v15, %v574_v36  ;;  %v689_v44 = vmul.f32 %v1268_v21, %v688_v33  ;;  %v937_v35 = vand.u32 2147483648, %v1692_v2  ;;  %v1156_v45 = vmul.f32 -1.442695, %v344_v30  ;;  %v385_v15 = vpop.f32.mrf.mxu3 }
  0xdb   : > { %1005 = vst.msk [vmem:[%s1520_s26 + $0x18] sm:$0xff] %vm1001_vm2, %v579_v22  ;;  %v808_v42 = vsub.f32 1.0, %v807_v37  ;;  %vm812_vm14 = vweird.f32 %v1270_v31  ;;  %v927_v47 = vmul.f32 %v1272_v41, %v1692_v2  ;;  %v1164_v48 = vmul.f32 -1.442695, %v364_v28  ;;  %v328_v2 = vpop.f32.mrf.mxu0 }
  0xdc   : > { %v690_v50 = vadd.f32 %v1268_v21, %v689_v44  ;;  %1275 = vpow2.f32 %v1156_v45  ;;  %v384_v51 = vadd.f32 %v1464_v49, %v383_v39  ;;  %v326_v52 = vadd.f32 %v1464_v49, %v325_v40  ;;  %vm813_vm1 = vmor %vm811_vm10, %vm812_vm14 }
  0xdd   : > { %v1274_v53 = vpop.eup %1273  ;;  %v809_v54 = vmul.f32 %v1270_v31, %v808_v42  ;;  %v928_v43 = vsub.f32 1.0, %v927_v47  ;;  %1277 = vpow2.f32 %v1164_v48  ;;  %v346_v56 = vadd.f32 %v1464_v49, %v345_v46 }
  0xde   : > { %v694_v58 = vsel %vm693_vm15, %v1268_v21, %v690_v50  ;;  %v1749_v59 = vadd.f32 1.0, %v1274_v53  ;;  %v1172_v60 = vmul.f32 -1.442695, %v384_v51  ;;  %v1149_v61 = vmul.f32 -1.442695, %v326_v52 }
  0xdf   : > { %v699_v63 = vsel %vm1716_vm8, %v698_v26, %v694_v58  ;;  %v810_v0 = vadd.f32 %v1270_v31, %v809_v54  ;;  %v929_v1 = vmul.f32 %v1272_v41, %v928_v43  ;;  %vm932_vm0 = vweird.f32 %v1272_v41 }
  0xe0   : > { %1013 = vst.msk [vmem:[%s1520_s26 + $0x58] sm:$0xff] %vm1001_vm2, %v699_v63  ;;  %vm816_vm3 = vcmp.eq.f32.partialorder %v815_v13, 8.507059e+37  ;;  %v818_v55 = vor.u32 1.1754944e-38, %v817_v29  ;;  %1279 = vrcp.f32 %v1749_v59  ;;  %v1157_v3 = vmul.f32 -1.442695, %v346_v56  ;;  %vm933_vm4 = vmor %vm931_vm13, %vm932_vm0 }
  0xe1   : > { %v814_v4 = vsel %vm813_vm1, %v1270_v31, %v810_v0  ;;  %v930_v5 = vadd.f32 %v1272_v41, %v929_v1  ;;  %1281 = vpow2.f32 %v1172_v60  ;;  %v366_v6 = vadd.f32 %v1464_v49, %v365_v62 }
  0xe2   : > { %v1276_v8 = vpop.eup %1275  ;;  %v819_v9 = vsel %vm816_vm3, %v818_v55, %v814_v4  ;;  %v938_v10 = vor.u32 1.1754944e-38, %v937_v35  ;;  %1283 = vpow2.f32 %v1149_v61  ;;  %vm936_vm5 = vcmp.eq.f32.partialorder %v935_v38, 8.507059e+37 }
  0xe3   : > { %v1278_v57 = vpop.eup %1277  ;;  %1021 = vst.msk [vmem:[%s1520_s26 + $0x98] sm:$0xff] %vm1001_vm2, %v819_v9  ;;  %v934_v11 = vsel %vm933_vm4, %v1272_v41, %v930_v5  ;;  %v590_v12 = vand.u32 2147483647, %v1749_v59  ;;  %v1765_v14 = vadd.f32 1.0, %v1276_v8  ;;  %1285 = vpow2.f32 %v1157_v3 }
  0xe4   : > { %v939_v16 = vsel %vm936_vm5, %v938_v10, %v934_v11  ;;  %v1767_v7 = vadd.f32 1.0, %v1278_v57  ;;  %v1165_v17 = vmul.f32 -1.442695, %v366_v6  ;;  %v592_v21 = vand.u32 2147483648, %v1749_v59  ;;  %v348_v10 = vpop.f32.mrf.mxu1  ;;  %v368_v57 = vpop.f32.mrf.mxu2 }
  0xe5   : > { %1029 = vst.msk [vmem:[%s1520_s26 + $0xd8] sm:$0xff] %vm1001_vm2, %v939_v16  ;;  %1287 = vrcp.f32 %v1765_v14  ;;  %v386_v23 = vadd.f32 %v1464_v49, %v385_v15  ;;  %vm586_vm6 = vweird.f32 %v1749_v59  ;;  %vm1777_vm7 = vcmp.eq.f32.partialorder %v590_v12, 8.507059e+37 }
  0xe6   : > { %v1280_v18 = vpop.eup %1279  ;;  %1289 = vrcp.f32 %v1767_v7  ;;  %v329_v25 = vadd.f32 %v1464_v49, %v328_v2  ;;  %v710_v13 = vand.u32 2147483647, %v1765_v14  ;;  %v712_v27 = vand.u32 2147483648, %v1765_v14 }
  0xe7   : > { %v1282_v19 = vpop.eup %1281  ;;  %v582_v20 = vmul.f32 %v1280_v18, %v1749_v59  ;;  %1291 = vpow2.f32 %v1165_v17  ;;  %v830_v31 = vand.u32 2147483647, %v1767_v7  ;;  %v832_v32 = vand.u32 2147483648, %v1767_v7 }
  0xe8   : > { %v1284_v26 = vpop.eup %1283  ;;  %v1784_v29 = vadd.f32 1.0, %v1282_v19  ;;  %v593_v34 = vor.u32 1.1754944e-38, %v592_v21  ;;  %vm706_vm8 = vweird.f32 %v1765_v14  ;;  %v1173_v49 = vmul.f32 -1.442695, %v386_v23 }
  0xe9   : > { %v583_v30 = vsub.f32 1.0, %v582_v20  ;;  %v1788_v33 = vadd.f32 1.0, %v1284_v26  ;;  %v1286_v28 = vpop.eup %1285  ;;  %vm587_vm9 = vweird.f32 %v1280_v18  ;;  %v1150_v38 = vmul.f32 -1.442695, %v329_v25 }
  0xea   : > { %1293 = vrcp.f32 %v1784_v29  ;;  %vm1794_vm10 = vcmp.eq.f32.partialorder %v710_v13, 8.507059e+37  ;;  %v713_v22 = vor.u32 1.1754944e-38, %v712_v27  ;;  %vm826_vm11 = vweird.f32 %v1767_v7  ;;  %vm588_vm13 = vmor %vm586_vm6, %vm587_vm9 }
  0xeb   : > { %v1288_v36 = vpop.eup %1287  ;;  %v584_v37 = vmul.f32 %v1280_v18, %v583_v30  ;;  %1295 = vrcp.f32 %v1788_v33  ;;  %vm1800_vm12 = vcmp.eq.f32.partialorder %v830_v31, 8.507059e+37  ;;  %v833_v46 = vor.u32 1.1754944e-38, %v832_v32 }
  0xec   : > { %v1290_v39 = vpop.eup %1289  ;;  %v702_v40 = vmul.f32 %v1288_v36, %v1765_v14  ;;  %v950_v42 = vand.u32 2147483647, %v1784_v29  ;;  %v952_v50 = vand.u32 2147483648, %v1784_v29  ;;  %v1808_v51 = vadd.f32 1.0, %v1286_v28 }
  0xed   : > { %v585_v44 = vadd.f32 %v1280_v18, %v584_v37  ;;  %v822_v35 = vmul.f32 %v1290_v39, %v1767_v7  ;;  %v1292_v47 = vpop.eup %1291  ;;  %1297 = vpow2.f32 %v1173_v49  ;;  %vm707_vm14 = vweird.f32 %v1288_v36 }
  0xee   : > { %v703_v48 = vsub.f32 1.0, %v702_v40  ;;  %v1810_v54 = vadd.f32 1.0, %v1292_v47  ;;  %1299 = vpow2.f32 %v1150_v38  ;;  %vm827_vm15 = vweird.f32 %v1290_v39  ;;  %vm708_vm3 = vmor %vm706_vm8, %vm707_vm14  ;;  %v330_v38 = vpop.f32.mrf.mxu0  ;;  %v370_v47 = vpop.f32.mrf.mxu2 }
  0xef   : > { %v589_v52 = vsel %vm588_vm13, %v1280_v18, %v585_v44  ;;  %v823_v53 = vsub.f32 1.0, %v822_v35  ;;  %1301 = vrcp.f32 %v1808_v51  ;;  %vm946_vm0 = vweird.f32 %v1784_v29  ;;  %vm828_vm4 = vmor %vm826_vm11, %vm827_vm15  ;;  %v1337_v35 = vld [vmem:[%s2008_s2] ss:$0 sm:$0xff] }
  0xf0   : > { %v1294_v43 = vpop.eup %1293  ;;  %v594_v56 = vsel %vm1777_vm7, %v593_v34, %v589_v52  ;;  %v704_v58 = vmul.f32 %v1288_v36, %v703_v48  ;;  %vm601_vm1 = vweird.f32 %v1788_v33  ;;  %v607_v0 = vand.u32 2147483648, %v1788_v33  ;;  %v388_v34 = vpop.f32.mrf.mxu3 }
  0xf1   : > { %v1296_v59 = vpop.eup %1295  ;;  %1006 = vst.msk [vmem:[%s1520_s26 + $0x20] sm:$0xff] %vm1001_vm2, %v594_v56  ;;  %v824_v60 = vmul.f32 %v1290_v39, %v823_v53  ;;  %v942_v61 = vmul.f32 %v1294_v43, %v1784_v29  ;;  %v605_v3 = vand.u32 2147483647, %v1788_v33  ;;  %1303 = vrcp.f32 %v1810_v54 }
  0xf2   : > { %v705_v62 = vadd.f32 %v1288_v36, %v704_v58  ;;  %v597_v63 = vmul.f32 %v1296_v59, %v1788_v33  ;;  %vm1828_vm5 = vcmp.eq.f32.partialorder %v950_v42, 8.507059e+37  ;;  %v953_v8 = vor.u32 1.1754944e-38, %v952_v50  ;;  %v350_v42 = vpop.f32.mrf.mxu1 }
  0xf3   : > { %v825_v1 = vadd.f32 %v1290_v39, %v824_v60  ;;  %v943_v55 = vsub.f32 1.0, %v942_v61  ;;  %v1298_v4 = vpop.eup %1297  ;;  %vm947_vm6 = vweird.f32 %v1294_v43  ;;  %vm602_vm7 = vweird.f32 %v1296_v59 }
  0xf4   : > { %v709_v5 = vsel %vm708_vm3, %v1288_v36, %v705_v62  ;;  %v598_v9 = vsub.f32 1.0, %v597_v63  ;;  %v1300_v11 = vpop.eup %1299  ;;  %v608_v2 = vor.u32 1.1754944e-38, %v607_v0  ;;  %v725_v23 = vand.u32 2147483647, %v1808_v51  ;;  %vm948_vm8 = vmor %vm946_vm0, %vm947_vm6 }
  0xf5   : > { %v714_v12 = vsel %vm1794_vm10, %v713_v22, %v709_v5  ;;  %v829_v14 = vsel %vm828_vm4, %v1290_v39, %v825_v1  ;;  %v944_v15 = vmul.f32 %v1294_v43, %v943_v55  ;;  %v1302_v16 = vpop.eup %1301  ;;  %v1842_v19 = vadd.f32 1.0, %v1298_v4  ;;  %vm603_vm9 = vmor %vm601_vm1, %vm602_vm7 }
  0xf6   : > { %1014 = vst.msk [vmem:[%s1520_s26 + $0x60] sm:$0xff] %vm1001_vm2, %v714_v12  ;;  %v834_v7 = vsel %vm1800_vm12, %v833_v46, %v829_v14  ;;  %v599_v17 = vmul.f32 %v1296_v59, %v598_v9  ;;  %v717_v21 = vmul.f32 %v1302_v16, %v1808_v51  ;;  %v727_v24 = vand.u32 2147483648, %v1808_v51 }
  0xf7   : > { %1022 = vst.msk [vmem:[%s1520_s26 + $0xa0] sm:$0xff] %vm1001_vm2, %v834_v7  ;;  %v945_v18 = vadd.f32 %v1294_v43, %v944_v15  ;;  %v845_v25 = vand.u32 2147483647, %v1810_v54  ;;  %v1848_v26 = vadd.f32 1.0, %v1300_v11  ;;  %v1304_v13 = vpop.eup %1303  ;;  %v847_v31 = vand.u32 2147483648, %v1810_v54 }
  0xf8   : > { %v600_v20 = vadd.f32 %v1296_v59, %v599_v17  ;;  %v718_v30 = vsub.f32 1.0, %v717_v21  ;;  %1305 = vrcp.f32 %v1842_v19  ;;  %vm606_vm10 = vcmp.eq.f32.partialorder %v605_v3, 8.507059e+37 }
  0xf9   : > { %v949_v27 = vsel %vm948_vm8, %v1294_v43, %v945_v18  ;;  %v837_v28 = vmul.f32 %v1304_v13, %v1810_v54  ;;  %vm721_vm11 = vweird.f32 %v1808_v51  ;;  %vm722_vm12 = vweird.f32 %v1302_v16 }
  0xfa   : > { %v954_v29 = vsel %vm1828_vm5, %v953_v8, %v949_v27  ;;  %v604_v32 = vsel %vm603_vm9, %v1296_v59, %v600_v20  ;;  %v719_v36 = vmul.f32 %v1302_v16, %v718_v30  ;;  %vm1862_vm13 = vcmp.eq.f32.partialorder %v725_v23, 8.507059e+37  ;;  %vm723_vm0 = vmor %vm721_vm11, %vm722_vm12 }
  0xfb   : > { %1030 = vst.msk [vmem:[%s1520_s26 + $0xe0] sm:$0xff] %vm1001_vm2, %v954_v29  ;;  %v609_v49 = vsel %vm606_vm10, %v608_v2, %v604_v32  ;;  %v838_v37 = vsub.f32 1.0, %v837_v28  ;;  %vm841_vm14 = vweird.f32 %v1810_v54  ;;  %1307 = vrcp.f32 %v1848_v26 }
  0xfc   : > { %1007 = vst.msk [vmem:[%s1520_s26 + $0x28] sm:$0xff] %vm1001_vm2, %v609_v49  ;;  %v720_v39 = vadd.f32 %v1302_v16, %v719_v36  ;;  %v728_v40 = vor.u32 1.1754944e-38, %v727_v24  ;;  %vm1868_vm15 = vcmp.eq.f32.partialorder %v845_v25, 8.507059e+37  ;;  %v848_v22 = vor.u32 1.1754944e-38, %v847_v31 }
  0xfd   : > { %v839_v44 = vmul.f32 %v1304_v13, %v838_v37  ;;  %vm842_vm1 = vweird.f32 %v1304_v13  ;;  %vm961_vm3 = vweird.f32 %v1842_v19  ;;  %v349_v45 = vadd.f32 %v1337_v35, %v348_v10  ;;  %v390_v10 = vpop.f32.mrf.mxu3 }
  0xfe   : > { %v369_v46 = vadd.f32 %v1337_v35, %v368_v57  ;;  %v1306_v48 = vpop.eup %1305  ;;  %v724_v50 = vsel %vm723_vm0, %v1302_v16, %v720_v39  ;;  %v965_v51 = vand.u32 2147483647, %v1842_v19  ;;  %v389_v52 = vadd.f32 %v1337_v35, %v388_v34  ;;  %vm843_vm4 = vmor %vm841_vm14, %vm842_vm1 }
  0xff   : > { %v331_v53 = vadd.f32 %v1337_v35, %v330_v38  ;;  %v729_v43 = vsel %vm1862_vm13, %v728_v40, %v724_v50  ;;  %v840_v56 = vadd.f32 %v1304_v13, %v839_v44  ;;  %v957_v58 = vmul.f32 %v1306_v48, %v1842_v19 }
 0x100   : > { %v967_v59 = vand.u32 2147483648, %v1842_v19  ;;  %1015 = vst.msk [vmem:[%s1520_s26 + $0x68] sm:$0xff] %vm1001_vm2, %v729_v43  ;;  %v1158_v60 = vmul.f32 -1.442695, %v349_v45  ;;  %v1166_v61 = vmul.f32 -1.442695, %v369_v46  ;;  %v351_v62 = vadd.f32 %v1337_v35, %v350_v42 }
 0x101   : > { %v371_v63 = vadd.f32 %v1337_v35, %v370_v47  ;;  %v1308_v0 = vpop.eup %1307  ;;  %v844_v1 = vsel %vm843_vm4, %v1304_v13, %v840_v56  ;;  %v958_v55 = vsub.f32 1.0, %v957_v58  ;;  %v1174_v3 = vmul.f32 -1.442695, %v389_v52 }
 0x102   : > { %v1151_v4 = vmul.f32 -1.442695, %v331_v53  ;;  %v849_v5 = vsel %vm1868_vm15, %v848_v22, %v844_v1  ;;  %vm962_vm5 = vweird.f32 %v1306_v48  ;;  %v612_v6 = vmul.f32 %v1308_v0, %v1848_v26 }
 0x103   : > { %1309 = vpow2.f32 %v1158_v60  ;;  %1023 = vst.msk [vmem:[%s1520_s26 + $0xa8] sm:$0xff] %vm1001_vm2, %v849_v5  ;;  %v959_v54 = vmul.f32 %v1306_v48, %v958_v55  ;;  %v1159_v8 = vmul.f32 -1.442695, %v351_v62  ;;  %v1167_v9 = vmul.f32 -1.442695, %v371_v63  ;;  %vm963_vm7 = vmor %vm961_vm3, %vm962_vm5 }
 0x104   : > { %1311 = vpow2.f32 %v1166_v61  ;;  %v613_v57 = vsub.f32 1.0, %v612_v6  ;;  %vm616_vm6 = vweird.f32 %v1848_v26  ;;  %v620_v11 = vand.u32 2147483647, %v1848_v26 }
 0x105   : > { %1313 = vpow2.f32 %v1174_v3  ;;  %v960_v12 = vadd.f32 %v1306_v48, %v959_v54  ;;  %v968_v14 = vor.u32 1.1754944e-38, %v967_v59  ;;  %v622_v15 = vand.u32 2147483648, %v1848_v26 }
 0x106   : > { %1315 = vpow2.f32 %v1151_v4  ;;  %v614_v16 = vmul.f32 %v1308_v0, %v613_v57  ;;  %vm617_vm8 = vweird.f32 %v1308_v0  ;;  %v391_v7 = vadd.f32 %v1337_v35, %v390_v10 }
 0x107   : > { %1317 = vpow2.f32 %v1159_v8  ;;  %v964_v17 = vsel %vm963_vm7, %v1306_v48, %v960_v12  ;;  %vm966_vm9 = vcmp.eq.f32.partialorder %v965_v51, 8.507059e+37  ;;  %vm618_vm10 = vmor %vm616_vm6, %vm617_vm8  ;;  %v623_v20 = vor.u32 1.1754944e-38, %v622_v15 }
 0x108   : > { %1319 = vpow2.f32 %v1167_v9  ;;  %v969_v18 = vsel %vm966_vm9, %v968_v14, %v964_v17  ;;  %v615_v21 = vadd.f32 %v1308_v0, %v614_v16  ;;  %vm621_vm11 = vcmp.eq.f32.partialorder %v620_v11, 8.507059e+37 }
 0x109   : > { %v1310_v2 = vpop.eup %1309  ;;  %1031 = vst.msk [vmem:[%s1520_s26 + $0xe8] sm:$0xff] %vm1001_vm2, %v969_v18  ;;  %v1175_v27 = vmul.f32 -1.442695, %v391_v7 }
 0x10a   : > { %v1312_v23 = vpop.eup %1311  ;;  %v1901_v19 = vadd.f32 1.0, %v1310_v2  ;;  %v619_v25 = vsel %vm618_vm10, %v1308_v0, %v615_v21 }
 0x10b   : > { %v1314_v24 = vpop.eup %1313  ;;  %v1903_v13 = vadd.f32 1.0, %v1312_v23  ;;  %v624_v31 = vsel %vm621_vm11, %v623_v20, %v619_v25 }
 0x10c   : > { %v1316_v30 = vpop.eup %1315  ;;  %1321 = vrcp.f32 %v1901_v19  ;;  %1008 = vst.msk [vmem:[%s1520_s26 + $0x30] sm:$0xff] %vm1001_vm2, %v624_v31  ;;  %v1909_v32 = vadd.f32 1.0, %v1314_v24  ;;  %v740_v34 = vand.u32 2147483647, %v1901_v19  ;;  %v742_v36 = vand.u32 2147483648, %v1901_v19 }
 0x10d   : > { %v1318_v29 = vpop.eup %1317  ;;  %1323 = vrcp.f32 %v1903_v13  ;;  %v1911_v28 = vadd.f32 1.0, %v1316_v30  ;;  %v860_v33 = vand.u32 2147483647, %v1903_v13  ;;  %v862_v37 = vand.u32 2147483648, %v1903_v13 }
 0x10e   : > { %v1320_v26 = vpop.eup %1319  ;;  %v1914_v49 = vadd.f32 1.0, %v1318_v29  ;;  %1325 = vpow2.f32 %v1175_v27  ;;  %vm736_vm12 = vweird.f32 %v1901_v19  ;;  %vm856_vm13 = vweird.f32 %v1903_v13 }
 0x10f   : > { %1327 = vrcp.f32 %v1909_v32  ;;  %v1921_v38 = vadd.f32 1.0, %v1320_v26  ;;  %vm1927_vm14 = vcmp.eq.f32.partialorder %v740_v34, 8.507059e+37  ;;  %v980_v44 = vand.u32 2147483647, %v1909_v32 }
 0x110   : > { %1329 = vrcp.f32 %v1911_v28  ;;  %v982_v35 = vand.u32 2147483648, %v1909_v32  ;;  %v743_v45 = vor.u32 1.1754944e-38, %v742_v36  ;;  %v635_v42 = vand.u32 2147483647, %v1911_v28 }
 0x111   : > { %1331 = vrcp.f32 %v1914_v49  ;;  %v637_v47 = vand.u32 2147483648, %v1911_v28  ;;  %vm1936_vm15 = vcmp.eq.f32.partialorder %v860_v33, 8.507059e+37  ;;  %v863_v52 = vor.u32 1.1754944e-38, %v862_v37 }
 0x112   : > { %v1322_v39 = vpop.eup %1321  ;;  %1333 = vrcp.f32 %v1921_v38  ;;  %vm976_vm1 = vweird.f32 %v1909_v32  ;;  %vm631_vm3 = vweird.f32 %v1911_v28  ;;  %vm1944_vm5 = vcmp.eq.f32.partialorder %v980_v44, 8.507059e+37 }
 0x113   : > { %v1324_v40 = vpop.eup %1323  ;;  %v732_v41 = vmul.f32 %v1322_v39, %v1901_v19  ;;  %vm737_vm0 = vweird.f32 %v1322_v39  ;;  %v983_v61 = vor.u32 1.1754944e-38, %v982_v35  ;;  %vm751_vm6 = vweird.f32 %v1914_v49 }
 0x114   : > { %v852_v46 = vmul.f32 %v1324_v40, %v1903_v13  ;;  %v1326_v48 = vpop.eup %1325  ;;  %vm857_vm4 = vweird.f32 %v1324_v40  ;;  %vm1950_vm7 = vcmp.eq.f32.partialorder %v635_v42, 8.507059e+37  ;;  %v638_v55 = vor.u32 1.1754944e-38, %v637_v47  ;;  %vm738_vm8 = vmor %vm736_vm12, %vm737_vm0 }
 0x115   : > { %v733_v50 = vsub.f32 1.0, %v732_v41  ;;  %v1328_v53 = vpop.eup %1327  ;;  %v755_v3 = vand.u32 2147483647, %v1914_v49  ;;  %v757_v54 = vand.u32 2147483648, %v1914_v49  ;;  %v520_v10 = vadd.f32 1.0, %v1326_v48  ;;  %vm858_vm10 = vmor %vm856_vm13, %vm857_vm4 }
 0x116   : > { %v853_v43 = vsub.f32 1.0, %v852_v46  ;;  %v1330_v56 = vpop.eup %1329  ;;  %v972_v59 = vmul.f32 %v1328_v53, %v1909_v32  ;;  %vm977_vm9 = vweird.f32 %v1328_v53  ;;  %v875_v19 = vand.u32 2147483647, %v1921_v38 }
 0x117   : > { %v734_v58 = vmul.f32 %v1322_v39, %v733_v50  ;;  %v1332_v62 = vpop.eup %1331  ;;  %v627_v0 = vmul.f32 %v1330_v56, %v1911_v28  ;;  %vm632_vm11 = vweird.f32 %v1330_v56  ;;  %vm978_vm13 = vmor %vm976_vm1, %vm977_vm9  ;;  %1335 = vrcp.f32 %v520_v10 }
 0x118   : > { %v854_v63 = vmul.f32 %v1324_v40, %v853_v43  ;;  %v973_v5 = vsub.f32 1.0, %v972_v59  ;;  %v747_v6 = vmul.f32 %v1332_v62, %v1914_v49  ;;  %v1334_v57 = vpop.eup %1333  ;;  %vm752_vm12 = vweird.f32 %v1332_v62 }
 0x119   : > { %v735_v4 = vadd.f32 %v1322_v39, %v734_v58  ;;  %v628_v9 = vsub.f32 1.0, %v627_v0  ;;  %v867_v17 = vmul.f32 %v1334_v57, %v1921_v38  ;;  %v758_v13 = vor.u32 1.1754944e-38, %v757_v54 }
 0x11a   : > { %v855_v8 = vadd.f32 %v1324_v40, %v854_v63  ;;  %v974_v12 = vmul.f32 %v1328_v53, %v973_v5  ;;  %v748_v14 = vsub.f32 1.0, %v747_v6  ;;  %v877_v27 = vand.u32 2147483648, %v1921_v38 }
 0x11b   : > { %v739_v11 = vsel %vm738_vm8, %v1322_v39, %v735_v4  ;;  %v629_v7 = vmul.f32 %v1330_v56, %v628_v9  ;;  %v868_v20 = vsub.f32 1.0, %v867_v17  ;;  %vm872_vm0 = vweird.f32 %v1334_v57 }
 0x11c   : > { %v744_v15 = vsel %vm1927_vm14, %v743_v45, %v739_v11  ;;  %v859_v16 = vsel %vm858_vm10, %v1324_v40, %v855_v8  ;;  %v975_v18 = vadd.f32 %v1328_v53, %v974_v12  ;;  %v749_v21 = vmul.f32 %v1332_v62, %v748_v14  ;;  %vm633_vm14 = vmor %vm631_vm3, %vm632_vm11 }
 0x11d   : > { %1016 = vst.msk [vmem:[%s1520_s26 + $0x70] sm:$0xff] %vm1001_vm2, %v744_v15  ;;  %v864_v2 = vsel %vm1936_vm15, %v863_v52, %v859_v16  ;;  %v630_v23 = vadd.f32 %v1330_v56, %v629_v7  ;;  %vm753_vm15 = vmor %vm751_vm6, %vm752_vm12  ;;  %v869_v29 = vmul.f32 %v1334_v57, %v868_v20  ;;  %vm756_vm1 = vcmp.eq.f32.partialorder %v755_v3, 8.507059e+37  ;;  %v1336_v36 = vpop.eup %1335 }
 0x11e   : > { %1024 = vst.msk [vmem:[%s1520_s26 + $0xb0] sm:$0xff] %vm1001_vm2, %v864_v2  ;;  %v979_v24 = vsel %vm978_vm13, %v1328_v53, %v975_v18  ;;  %v750_v25 = vadd.f32 %v1332_v62, %v749_v21  ;;  %vm871_vm3 = vweird.f32 %v1921_v38  ;;  %v878_v49 = vor.u32 1.1754944e-38, %v877_v27 }
 0x11f   : > { %v984_v30 = vsel %vm1944_vm5, %v983_v61, %v979_v24  ;;  %v634_v31 = vsel %vm633_vm14, %v1330_v56, %v630_v23  ;;  %v870_v34 = vadd.f32 %v1334_v57, %v869_v29  ;;  %vm873_vm4 = vmor %vm871_vm3, %vm872_vm0  ;;  %vm876_vm5 = vcmp.eq.f32.partialorder %v875_v19, 8.507059e+37 }
 0x120   : > { %1032 = vst.msk [vmem:[%s1520_s26 + $0xf0] sm:$0xff] %vm1001_vm2, %v984_v30  ;;  %v639_v26 = vsel %vm1950_vm7, %v638_v55, %v634_v31  ;;  %v754_v32 = vsel %vm753_vm15, %v1332_v62, %v750_v25  ;;  %v987_v39 = vmul.f32 %v1336_v36, %v520_v10  ;;  %v997_v41 = vand.u32 2147483648, %v520_v10 }
 0x121   : > { %1009 = vst.msk [vmem:[%s1520_s26 + $0x38] sm:$0xff] %vm1001_vm2, %v639_v26  ;;  %v759_v28 = vsel %vm756_vm1, %v758_v13, %v754_v32  ;;  %v874_v33 = vsel %vm873_vm4, %v1334_v57, %v870_v34  ;;  %vm992_vm6 = vweird.f32 %v1336_v36  ;;  %v995_v44 = vand.u32 2147483647, %v520_v10 }
 0x122   : > { %1017 = vst.msk [vmem:[%s1520_s26 + $0x78] sm:$0xff] %vm1001_vm2, %v759_v28  ;;  %v879_v37 = vsel %vm876_vm5, %v878_v49, %v874_v33  ;;  %v988_v40 = vsub.f32 1.0, %v987_v39  ;;  %vm991_vm7 = vweird.f32 %v520_v10  ;;  %v998_v38 = vor.u32 1.1754944e-38, %v997_v41 }
 0x123   : > { %1025 = vst.msk [vmem:[%s1520_s26 + $0xb8] sm:$0xff] %vm1001_vm2, %v879_v37  ;;  %vm993_vm8 = vmor %vm991_vm7, %vm992_vm6  ;;  %vm996_vm9 = vcmp.eq.f32.partialorder %v995_v44, 8.507059e+37 }
 0x124   : > { %v989_v22 = vmul.f32 %v1336_v36, %v988_v40 }
 0x126   : > { %v990_v35 = vadd.f32 %v1336_v36, %v989_v22 }
 0x128   : > { %v994_v45 = vsel %vm993_vm8, %v1336_v36, %v990_v35 }
 0x129   : > { %v999_v46 = vsel %vm996_vm9, %v998_v38, %v994_v45 }
 0x12a   : > { %1033 = vst.msk [vmem:[%s1520_s26 + $0xf8] sm:$0xff] %vm1001_vm2, %v999_v46 }
 0x12b PF: > { %s13_s14 = sadd.s32 1, %s1360_s14   ;;  %s2056_s12 = smov %s1356_s13 }
 0x12c   : > { %p10_p5 = scmp.ge.s32.totalorder %s13_s14, 4   ;;  %s2057_s13 = smov %s2059_s15 }
 0x12e   :  { %12 = sbr.rel (!%p10_p5) target bundleno = 2 (0x2), region = 62 }

// kernel: matrix_forward.10
= control target key start
LH: loop header
LB: loop body
LE: loop exit
PB: predicated region body
PF: predicated region fallthrough
CT: control target
= control target key end

     0   :  { %s5612_s18 = smov 0   ;;  %s5614_s19 = smov 0   ;;  %s7166_s0 = inlined_call_operand.vmem [shape: f32[2,328,32], index: 0, kind: input, shape index: {}]   ;;  %s7167_s1 = inlined_call_operand.vmem [shape: f32[2,328,16], index: 1, kind: input, shape index: {}]   ;;  %s7168_s2 = inlined_call_operand.vmem [shape: bf16[9,32,16], index: 2, kind: input, shape index: {}]   ;;  %s7169_s3 = inlined_call_operand.vmem [shape: bf16[9,16,16], index: 3, kind: input, shape index: {}]   ;;  %s7170_s4 = inlined_call_operand.vmem [shape: f32[1,16], index: 4, kind: input, shape index: {}]   ;;  %s7171_s5 = inlined_call_operand.vmem [shape: f32[2,288,16], index: 5, kind: output, shape index: {}]  }
   0x1   :  { %s5616_s20 = smov 0  }
   0x2 LB: > { %s27_s21 = sadd.s32 1, %s5576_s19  ;;  %p5014_p0 = scmp.ge.s32.totalorder %s5580_s20, 1  ;;  %s5580_s20 = sphi %s5616_s20, %s15_s20   ;;  %s5576_s19 = sphi %s5614_s19, %s7173_s19   ;;  %s5572_s18 = sphi %s5612_s18, %s7172_s18  }
   0x3   : > { %p29_p1 = scmp.ge.s32.totalorder %s27_s21, 2  ;;  %p211_p2 = scmp.lt.s32.totalorder %s5580_s20, 3 }
   0x5   : > { %s7175_s21 = smov (%p29_p1, %s27_s21), 0  ;;  %p212_p3 = pnand %p5014_p0, %p211_p2 }
   0x6   : > { %p248_p4 = scmp.lt.s32.totalorder (!%p212_p3), %s5572_s18, 1 }
   0x7   : > { %215 = sbr.rel (%p212_p3) target bundleno = 1453 (0x5ad), region = 40 }
   0xc   : > { %v5503_v0 = vld [vmem:[%s7168_s2 + $0x18] sm:$0xff]  ;;  %v5501_v1 = vld [vmem:[%s7168_s2 + $0x8] sm:$0xff]  ;;  %v5502_v2 = vld [vmem:[%s7168_s2 + $0x10] sm:$0xff]  ;;  %s7177_s18 = smov (!%p248_p4, %s5572_s18), 1  ;;  %vm398_vm0 = vcmask 261120   ;;  %vm2599_vm1 = vcmask 130048  }
   0xd   : > { %5527 = vmatpush.bf16.msra.mxu2 %v5503_v0  ;;  %5529 = vmatpush.bf16.msra.mxu3 %v5501_v1  ;;  %v5500_v3 = vld [vmem:[%s7168_s2] sm:$0xff]  ;;  %s5531_s30 = smul.u32 328, %s7177_s18  ;;  %v5505_v4 = vld [vmem:[%s7168_s2 + $0x28] sm:$0xff]  ;;  %v5507_v5 = vld [vmem:[%s7168_s2 + $0x38] sm:$0xff] }
   0xe   : > { %459 = vmatpush.bf16.msra.mxu0 %v5503_v0  ;;  %624 = vmatpush.bf16.msra.mxu1 %v5501_v1  ;;  %v5509_v6 = vld [vmem:[%s7168_s2 + $0x48] sm:$0xff]  ;;  %v5511_v7 = vld [vmem:[%s7168_s2 + $0x58] sm:$0xff]  ;;  %v5504_v44 = vld [vmem:[%s7168_s2 + $0x20] sm:$0xff]  ;;  %s5532_s24 = smul.u32 288, %s7177_s18 }
   0xf   : > { %s5662_s16 = scalar_lea.vmem %s7166_s0, %s5531_s30  ;;  %v5506_v45 = vld [vmem:[%s7168_s2 + $0x30] sm:$0xff]  ;;  %v5508_v58 = vld [vmem:[%s7168_s2 + $0x40] sm:$0xff]  ;;  %s6143_s10 = scalar_lea.vmem %s7167_s1, %s5531_s30 }
  0x10   : > { %v345_v8 = vld [vmem:[%s5662_s16 + $0x91] sm:$0xff]  ;;  %v346_v9 = vld [vmem:[%s5662_s16 + $0x99] sm:$0xff]  ;;  %v327_v13 = vld [vmem:[%s5662_s16 + $0x1] sm:$0xff]  ;;  %s6930_s27 = scalar_lea.vmem %s7171_s5, %s5532_s24 }
  0x11   : > { %5528 = vmatpush.bf16.msra.mxu2 %v5502_v2  ;;  %5530 = vmatpush.bf16.msra.mxu3 %v5500_v3  ;;  %v287_v10 = vld [vmem:[%s5662_s16 + $0x90] sm:$0xff]  ;;  %v372_v11 = vpack.c.bf16 %v346_v9, %v345_v8  ;;  %v288_v12 = vld [vmem:[%s5662_s16 + $0x98] sm:$0xff]  ;;  %v269_v17 = vld [vmem:[%s5662_s16] sm:$0xff] }
  0x12   : > { %460 = vmatpush.bf16.msra.mxu0 %v5502_v2  ;;  %625 = vmatpush.bf16.msra.mxu1 %v5500_v3  ;;  %v328_v14 = vld [vmem:[%s5662_s16 + $0x9] sm:$0xff]  ;;  %v314_v15 = vpack.c.bf16 %v288_v12, %v287_v10  ;;  %v347_v20 = vld [vmem:[%s5662_s16 + $0xa1] sm:$0xff]  ;;  %v329_v24 = vld [vmem:[%s5662_s16 + $0x11] sm:$0xff] }
  0x13   : > { %v363_v16 = vpack.c.bf16 %v328_v14, %v327_v13  ;;  %v270_v18 = vld [vmem:[%s5662_s16 + $0x8] sm:$0xff]  ;;  %v289_v22 = vld [vmem:[%s5662_s16 + $0xa0] sm:$0xff]  ;;  %v271_v26 = vld [vmem:[%s5662_s16 + $0x10] sm:$0xff] }
  0x14   : > { %5039 = vmatmul.msk.bf16.vlgmr.msra.gmra.mxu2 %vm398_vm0, %v372_v11  ;;  %v305_v19 = vpack.c.bf16 %v270_v18, %v269_v17  ;;  %5065 = vmatmul.msk.bf16.vlgmr.msra.gmra.mxu3 %vm398_vm0, %v314_v15  ;;  %v348_v21 = vld [vmem:[%s5662_s16 + $0xa9] sm:$0xff]  ;;  %v330_v25 = vld [vmem:[%s5662_s16 + $0x19] sm:$0xff]  ;;  %v349_v32 = vld [vmem:[%s5662_s16 + $0xb1] sm:$0xff] }
  0x15   : > { %848 = vmatpush.bf16.msrb.mxu2 %v5505_v4  ;;  %1108 = vmatpush.bf16.msrb.mxu3 %v5507_v5  ;;  %v290_v23 = vld [vmem:[%s5662_s16 + $0xa8] sm:$0xff]  ;;  %v272_v27 = vld [vmem:[%s5662_s16 + $0x18] sm:$0xff]  ;;  %v373_v28 = vpack.c.bf16 %v348_v21, %v347_v20  ;;  %v364_v30 = vpack.c.bf16 %v330_v25, %v329_v24  ;;  %v291_v34 = vld [vmem:[%s5662_s16 + $0xb0] sm:$0xff] }
  0x16   : > { %1368 = vmatpush.bf16.msrb.mxu0 %v5509_v6  ;;  %1628 = vmatpush.bf16.msrb.mxu1 %v5511_v7  ;;  %v315_v29 = vpack.c.bf16 %v290_v23, %v289_v22  ;;  %v306_v31 = vpack.c.bf16 %v272_v27, %v271_v26  ;;  %v350_v33 = vld [vmem:[%s5662_s16 + $0xb9] sm:$0xff]  ;;  %v331_v36 = vld [vmem:[%s5662_s16 + $0x21] sm:$0xff]  ;;  %v332_v37 = vld [vmem:[%s5662_s16 + $0x29] sm:$0xff] }
  0x17   : > { %5030 = vmatmul.msk.bf16.vlgmr.msra.gmra.mxu0 %vm398_vm0, %v363_v16  ;;  %5056 = vmatmul.msk.bf16.vlgmr.msra.gmra.mxu1 %vm398_vm0, %v305_v19  ;;  %v292_v35 = vld [vmem:[%s5662_s16 + $0xb8] sm:$0xff]  ;;  %v273_v38 = vld [vmem:[%s5662_s16 + $0x20] sm:$0xff]  ;;  %v274_v39 = vld [vmem:[%s5662_s16 + $0x28] sm:$0xff]  ;;  %v374_v40 = vpack.c.bf16 %v350_v33, %v349_v32  ;;  %v365_v42 = vpack.c.bf16 %v332_v37, %v331_v36 }
  0x18   : > { %v316_v41 = vpack.c.bf16 %v292_v35, %v291_v34  ;;  %v307_v43 = vpack.c.bf16 %v274_v39, %v273_v38  ;;  %v351_v46 = vld [vmem:[%s5662_s16 + $0xc1] sm:$0xff]  ;;  %v352_v47 = vld [vmem:[%s5662_s16 + $0xc9] sm:$0xff]  ;;  %v333_v50 = vld [vmem:[%s5662_s16 + $0x31] sm:$0xff] }
  0x19   : > { %849 = vmatpush.bf16.msrb.mxu2 %v5504_v44  ;;  %1109 = vmatpush.bf16.msrb.mxu3 %v5506_v45  ;;  %v293_v48 = vld [vmem:[%s5662_s16 + $0xc0] sm:$0xff]  ;;  %v294_v49 = vld [vmem:[%s5662_s16 + $0xc8] sm:$0xff]  ;;  %v275_v52 = vld [vmem:[%s5662_s16 + $0x30] sm:$0xff]  ;;  %v375_v54 = vpack.c.bf16 %v352_v47, %v351_v46 }
  0x1a   : > { %v334_v51 = vld [vmem:[%s5662_s16 + $0x39] sm:$0xff]  ;;  %v317_v55 = vpack.c.bf16 %v294_v49, %v293_v48  ;;  %v5510_v59 = vld [vmem:[%s7168_s2 + $0x50] sm:$0xff]  ;;  %1369 = vmatpush.bf16.msrb.mxu0 %v5508_v58  ;;  %v335_v0 = vld [vmem:[%s5662_s16 + $0x41] sm:$0xff] }
  0x1b   : > { %v276_v53 = vld [vmem:[%s5662_s16 + $0x38] sm:$0xff]  ;;  %v366_v56 = vpack.c.bf16 %v334_v51, %v333_v50  ;;  %1629 = vmatpush.bf16.msrb.mxu1 %v5510_v59  ;;  %v295_v62 = vld [vmem:[%s5662_s16 + $0xd0] sm:$0xff]  ;;  %v277_v2 = vld [vmem:[%s5662_s16 + $0x40] sm:$0xff] }
  0x1c   : > { %v308_v57 = vpack.c.bf16 %v276_v53, %v275_v52  ;;  %v353_v60 = vld [vmem:[%s5662_s16 + $0xd1] sm:$0xff]  ;;  %v354_v61 = vld [vmem:[%s5662_s16 + $0xd9] sm:$0xff]  ;;  %v336_v1 = vld [vmem:[%s5662_s16 + $0x49] sm:$0xff] }
  0x1d   : > { %v296_v63 = vld [vmem:[%s5662_s16 + $0xd8] sm:$0xff]  ;;  %v278_v3 = vld [vmem:[%s5662_s16 + $0x48] sm:$0xff]  ;;  %v376_v4 = vpack.c.bf16 %v354_v61, %v353_v60  ;;  %v367_v6 = vpack.c.bf16 %v336_v1, %v335_v0  ;;  %v297_v10 = vld [vmem:[%s5662_s16 + $0xe0] sm:$0xff] }
  0x1e   : > { %v318_v5 = vpack.c.bf16 %v296_v63, %v295_v62  ;;  %v309_v7 = vpack.c.bf16 %v278_v3, %v277_v2  ;;  %v355_v8 = vld [vmem:[%s5662_s16 + $0xe1] sm:$0xff]  ;;  %v356_v9 = vld [vmem:[%s5662_s16 + $0xe9] sm:$0xff]  ;;  %v337_v12 = vld [vmem:[%s5662_s16 + $0x51] sm:$0xff] }
  0x1f   : > { %v298_v11 = vld [vmem:[%s5662_s16 + $0xe8] sm:$0xff]  ;;  %v338_v13 = vld [vmem:[%s5662_s16 + $0x59] sm:$0xff]  ;;  %v279_v14 = vld [vmem:[%s5662_s16 + $0x50] sm:$0xff]  ;;  %v377_v16 = vpack.c.bf16 %v356_v9, %v355_v8 }
  0x20   : > { %v280_v15 = vld [vmem:[%s5662_s16 + $0x58] sm:$0xff]  ;;  %v319_v17 = vpack.c.bf16 %v298_v11, %v297_v10  ;;  %v368_v18 = vpack.c.bf16 %v338_v13, %v337_v12  ;;  %v299_v22 = vld [vmem:[%s5662_s16 + $0xf0] sm:$0xff]  ;;  %v339_v24 = vld [vmem:[%s5662_s16 + $0x61] sm:$0xff] }
  0x21   : > { %v310_v19 = vpack.c.bf16 %v280_v15, %v279_v14  ;;  %v357_v20 = vld [vmem:[%s5662_s16 + $0xf1] sm:$0xff]  ;;  %v358_v21 = vld [vmem:[%s5662_s16 + $0xf9] sm:$0xff]  ;;  %v340_v25 = vld [vmem:[%s5662_s16 + $0x69] sm:$0xff] }
  0x22   : > { %v300_v23 = vld [vmem:[%s5662_s16 + $0xf8] sm:$0xff]  ;;  %v281_v26 = vld [vmem:[%s5662_s16 + $0x60] sm:$0xff]  ;;  %v282_v27 = vld [vmem:[%s5662_s16 + $0x68] sm:$0xff] }
  0x23   : > { %v359_v32 = vld [vmem:[%s5662_s16 + $0x101] sm:$0xff]  ;;  %v360_v33 = vld [vmem:[%s5662_s16 + $0x109] sm:$0xff]  ;;  %v341_v36 = vld [vmem:[%s5662_s16 + $0x71] sm:$0xff] }
  0x24   : > { %5040 = vmatmul.msk.bf16.gmra.mxu2 %vm398_vm0, %v373_v28  ;;  %5066 = vmatmul.msk.bf16.gmra.mxu3 %vm398_vm0, %v315_v29  ;;  %v378_v28 = vpack.c.bf16 %v358_v21, %v357_v20  ;;  %v320_v29 = vpack.c.bf16 %v300_v23, %v299_v22  ;;  %v301_v34 = vld [vmem:[%s5662_s16 + $0x100] sm:$0xff]  ;;  %v302_v35 = vld [vmem:[%s5662_s16 + $0x108] sm:$0xff]  ;;  %v283_v38 = vld [vmem:[%s5662_s16 + $0x70] sm:$0xff] }
  0x25   : > { %v342_v37 = vld [vmem:[%s5662_s16 + $0x79] sm:$0xff]  ;;  %v5513_v44 = vld [vmem:[%s7168_s2 + $0x68] sm:$0xff]  ;;  %v361_v47 = vld [vmem:[%s5662_s16 + $0x111] sm:$0xff] }
  0x26   : > { %v284_v39 = vld [vmem:[%s5662_s16 + $0x78] sm:$0xff]  ;;  %1888 = vmatpush.bf16.msra.mxu2 %v5513_v44  ;;  %v5517_v46 = vld [vmem:[%s7168_s2 + $0x88] sm:$0xff]  ;;  %v303_v49 = vld [vmem:[%s5662_s16 + $0x110] sm:$0xff] }
  0x27   : > { %5031 = vmatmul.msk.bf16.gmra.mxu0 %vm398_vm0, %v364_v30  ;;  %5057 = vmatmul.msk.bf16.gmra.mxu1 %vm398_vm0, %v306_v31  ;;  %v369_v30 = vpack.c.bf16 %v340_v25, %v339_v24  ;;  %v311_v31 = vpack.c.bf16 %v282_v27, %v281_v26  ;;  %v5515_v45 = vld [vmem:[%s7168_s2 + $0x78] sm:$0xff]  ;;  %v343_v51 = vld [vmem:[%s5662_s16 + $0x81] sm:$0xff]  ;;  %v344_v52 = vld [vmem:[%s5662_s16 + $0x89] sm:$0xff] }
  0x28   : > { %2148 = vmatpush.bf16.msra.mxu3 %v5515_v45  ;;  %v362_v48 = vld [vmem:[%s5662_s16 + $0x119] sm:$0xff]  ;;  %2408 = vmatpush.bf16.msra.mxu0 %v5517_v46 }
  0x29   : > { %v304_v50 = vld [vmem:[%s5662_s16 + $0x118] sm:$0xff]  ;;  %v285_v53 = vld [vmem:[%s5662_s16 + $0x80] sm:$0xff] }
  0x2a   : > { %v5518_v58 = vld [vmem:[%s7169_s3] sm:$0xff]  ;;  %v1237_v9 = vld [vmem:[%s5662_s16 + $0x13] sm:$0xff] }
  0x2b   : > { %2661 = vmatpush.bf16.msra.mxu1 %v5518_v58  ;;  %v978_v8 = vld [vmem:[%s5662_s16 + $0x1a] sm:$0xff] }
  0x2c   : > { %v1238_v10 = vld [vmem:[%s5662_s16 + $0x1b] sm:$0xff] }
  0x2d   : > { %v1497_v12 = vld [vmem:[%s5662_s16 + $0x14] sm:$0xff]  ;;  %v1498_v13 = vld [vmem:[%s5662_s16 + $0x1c] sm:$0xff] }
  0x2e   : > { %v1533_v20 = vpack.c.bf16 %v1498_v13, %v1497_v12  ;;  %v1243_v12 = vld [vmem:[%s5662_s16 + $0x43] sm:$0xff]  ;;  %v1244_v13 = vld [vmem:[%s5662_s16 + $0x4b] sm:$0xff] }
  0x34   : > { %5041 = vmatmul.msk.bf16.gmra.mxu2 %vm398_vm0, %v374_v40  ;;  %5067 = vmatmul.msk.bf16.gmra.mxu3 %vm398_vm0, %v316_v41  ;;  %v379_v40 = vpack.c.bf16 %v360_v33, %v359_v32  ;;  %v321_v41 = vpack.c.bf16 %v302_v35, %v301_v34  ;;  %v1240_v32 = vld [vmem:[%s5662_s16 + $0x2b] sm:$0xff] }
  0x35   : > { %v1499_v34 = vld [vmem:[%s5662_s16 + $0x24] sm:$0xff]  ;;  %v1500_v35 = vld [vmem:[%s5662_s16 + $0x2c] sm:$0xff] }
  0x37   : > { %5032 = vmatmul.msk.bf16.gmra.mxu0 %vm398_vm0, %v365_v42  ;;  %5058 = vmatmul.msk.bf16.gmra.mxu1 %vm398_vm0, %v307_v43  ;;  %v370_v42 = vpack.c.bf16 %v342_v37, %v341_v36  ;;  %v312_v43 = vpack.c.bf16 %v284_v39, %v283_v38 }
  0x44   : > { %5042 = vmatmul.msk.bf16.gmra.mxu2 %vm398_vm0, %v375_v54  ;;  %5068 = vmatmul.msk.bf16.gmra.mxu3 %vm398_vm0, %v317_v55  ;;  %v286_v54 = vld [vmem:[%s5662_s16 + $0x88] sm:$0xff]  ;;  %v380_v55 = vpack.c.bf16 %v362_v48, %v361_v47 }
  0x45   : > { %v313_v60 = vpack.c.bf16 %v286_v54, %v285_v53  ;;  %v1242_v53 = vld [vmem:[%s5662_s16 + $0x3b] sm:$0xff] }
  0x47   : > { %5033 = vmatmul.msk.bf16.gmra.mxu0 %vm398_vm0, %v366_v56  ;;  %5059 = vmatmul.msk.bf16.gmra.mxu1 %vm398_vm0, %v308_v57  ;;  %v322_v56 = vpack.c.bf16 %v304_v50, %v303_v49  ;;  %v371_v57 = vpack.c.bf16 %v344_v52, %v343_v51  ;;  %v981_v50 = vld [vmem:[%s5662_s16 + $0x32] sm:$0xff]  ;;  %v982_v51 = vld [vmem:[%s5662_s16 + $0x3a] sm:$0xff] }
  0x48   : > { %v1241_v52 = vld [vmem:[%s5662_s16 + $0x33] sm:$0xff] }
  0x54   : > { %5043 = vmatmul.msk.bf16.gmra.mxu2 %vm398_vm0, %v376_v4  ;;  %5069 = vmatmul.msk.bf16.gmra.mxu3 %vm398_vm0, %v318_v5  ;;  %v717_v5 = vld [vmem:[%s5662_s16 + $0x2] sm:$0xff] }
  0x57   : > { %5034 = vmatmul.msk.bf16.gmra.mxu0 %vm398_vm0, %v367_v6  ;;  %5060 = vmatmul.msk.bf16.gmra.mxu1 %vm398_vm0, %v309_v7  ;;  %v718_v6 = vld [vmem:[%s5662_s16 + $0xa] sm:$0xff]  ;;  %v977_v7 = vld [vmem:[%s5662_s16 + $0x12] sm:$0xff] }
  0x58   : > { %v753_v15 = vpack.c.bf16 %v718_v6, %v717_v5 }
  0x64   : > { %5044 = vmatmul.msk.bf16.gmra.mxu2 %vm398_vm0, %v377_v16  ;;  %5070 = vmatmul.msk.bf16.gmra.mxu3 %vm398_vm0, %v319_v17  ;;  %v1013_v17 = vpack.c.bf16 %v978_v8, %v977_v7 }
  0x67   : > { %5035 = vmatmul.msk.bf16.gmra.mxu0 %vm398_vm0, %v368_v18  ;;  %5061 = vmatmul.msk.bf16.gmra.mxu1 %vm398_vm0, %v310_v19  ;;  %v1273_v18 = vpack.c.bf16 %v1238_v10, %v1237_v9  ;;  %v983_v10 = vld [vmem:[%s5662_s16 + $0x42] sm:$0xff] }
  0x74   : > { %5045 = vmatmul.msk.bf16.gmra.mxu2 %vm398_vm0, %v378_v28  ;;  %5071 = vmatmul.msk.bf16.gmra.mxu3 %vm398_vm0, %v320_v29  ;;  %v979_v29 = vld [vmem:[%s5662_s16 + $0x22] sm:$0xff] }
  0x77   : > { %5036 = vmatmul.msk.bf16.gmra.mxu0 %vm398_vm0, %v369_v30  ;;  %5062 = vmatmul.msk.bf16.gmra.mxu1 %vm398_vm0, %v311_v31  ;;  %v980_v30 = vld [vmem:[%s5662_s16 + $0x2a] sm:$0xff] }
  0x78   : > { %v1239_v31 = vld [vmem:[%s5662_s16 + $0x23] sm:$0xff]  ;;  %v1014_v38 = vpack.c.bf16 %v980_v30, %v979_v29 }
  0x79   : > { %v1274_v39 = vpack.c.bf16 %v1240_v32, %v1239_v31 }
  0x84   : > { %5046 = vmatmul.msk.bf16.gmra.mxu2 %vm398_vm0, %v379_v40  ;;  %5072 = vmatmul.msk.bf16.gmra.mxu3 %vm398_vm0, %v321_v41  ;;  %v5830_v41 = vpack.c.bf16 %v1500_v35, %v1499_v34  ;;  %v985_v35 = vld [vmem:[%s5662_s16 + $0x52] sm:$0xff] }
  0x87   : > { %5037 = vmatmul.msk.bf16.gmra.mxu0 %vm398_vm0, %v370_v42  ;;  %5063 = vmatmul.msk.bf16.gmra.mxu1 %vm398_vm0, %v312_v43 }
  0x94   : > { %v462_v59 = vpop.f32.mrf.mxu0  ;;  %v627_v61 = vpop.f32.mrf.mxu1  ;;  %5047 = vmatmul.msk.bf16.gmra.mxu2 %vm398_vm0, %v380_v55  ;;  %5073 = vmatmul.msk.bf16.gmra.mxu3 %vm398_vm0, %v322_v56  ;;  %v1501_v55 = vld [vmem:[%s5662_s16 + $0x34] sm:$0xff]  ;;  %v1502_v56 = vld [vmem:[%s5662_s16 + $0x3c] sm:$0xff] }
  0x95   : > { %v5792_v62 = vadd.f32 %v627_v61, %v462_v59  ;;  %v1015_v59 = vpack.c.bf16 %v982_v51, %v981_v50 }
  0x97   : > { %5038 = vmatmul.msk.bf16.gmra.mxu0 %vm398_vm0, %v371_v57  ;;  %5064 = vmatmul.msk.bf16.gmra.mxu1 %vm398_vm0, %v313_v60  ;;  %v507_v63 = vpop.f32.mrf.mxu2  ;;  %v672_v0 = vpop.f32.mrf.mxu3  ;;  %v1275_v60 = vpack.c.bf16 %v1242_v53, %v1241_v52 }
  0x98   : > { %v5798_v1 = vadd.f32 %v672_v0, %v507_v63  ;;  %v5851_v63 = vpack.c.bf16 %v1502_v56, %v1501_v55 }
  0x9c   : > { %v464_v2 = vpop.f32.mrf.mxu0  ;;  %v629_v3 = vpop.f32.mrf.mxu1 }
  0x9d   : > { %v5800_v4 = vadd.f32 %v629_v3, %v464_v2 }
  0x9f   : > { %v509_v11 = vpop.f32.mrf.mxu2  ;;  %v674_v14 = vpop.f32.mrf.mxu3 }
  0xa0   : > { %v5810_v16 = vadd.f32 %v674_v14, %v509_v11  ;;  %v984_v11 = vld [vmem:[%s5662_s16 + $0x4a] sm:$0xff] }
  0xa4   : > { %v467_v19 = vpop.f32.mrf.mxu0  ;;  %v632_v21 = vpop.f32.mrf.mxu1  ;;  %5086 = vmatmul.msk.bf16.vlgmr.msrb.gmra.mxu2 %vm398_vm0, %v753_v15  ;;  %5116 = vmatmul.msk.bf16.vlgmr.msrb.gmra.mxu3 %vm398_vm0, %v1013_v17  ;;  %v1503_v15 = vld [vmem:[%s5662_s16 + $0x44] sm:$0xff] }
  0xa5   : > { %v5812_v22 = vadd.f32 %v632_v21, %v467_v19  ;;  %v1276_v21 = vpack.c.bf16 %v1244_v13, %v1243_v12 }
  0xa7   : > { %5146 = vmatmul.msk.bf16.vlgmr.msrb.gmra.mxu0 %vm398_vm0, %v1273_v18  ;;  %5176 = vmatmul.msk.bf16.vlgmr.msrb.gmra.mxu1 %vm398_vm0, %v1533_v20  ;;  %v512_v23 = vpop.f32.mrf.mxu2  ;;  %v677_v24 = vpop.f32.mrf.mxu3  ;;  %v1016_v20 = vpack.c.bf16 %v984_v11, %v983_v10  ;;  %v1507_v10 = vld [vmem:[%s5662_s16 + $0x64] sm:$0xff]  ;;  %v1508_v11 = vld [vmem:[%s5662_s16 + $0x6c] sm:$0xff] }
  0xa8   : > { %v5818_v25 = vadd.f32 %v677_v24, %v512_v23 }
  0xac   : > { %v469_v26 = vpop.f32.mrf.mxu0  ;;  %v634_v27 = vpop.f32.mrf.mxu1 }
  0xad   : > { %v5820_v28 = vadd.f32 %v634_v27, %v469_v26 }
  0xaf   : > { %v514_v33 = vpop.f32.mrf.mxu2  ;;  %v679_v36 = vpop.f32.mrf.mxu3 }
  0xb0   : > { %v5828_v37 = vadd.f32 %v679_v36, %v514_v33  ;;  %v986_v36 = vld [vmem:[%s5662_s16 + $0x5a] sm:$0xff] }
  0xb4   : > { %v472_v40 = vpop.f32.mrf.mxu0  ;;  %v637_v42 = vpop.f32.mrf.mxu1  ;;  %5087 = vmatmul.msk.bf16.gmra.mxu2 %vm398_vm0, %v1013_v17  ;;  %5117 = vmatmul.msk.bf16.gmra.mxu3 %vm398_vm0, %v1014_v38  ;;  %v1504_v17 = vld [vmem:[%s5662_s16 + $0x4c] sm:$0xff] }
  0xb5   : > { %v5832_v43 = vadd.f32 %v637_v42, %v472_v40  ;;  %v5872_v24 = vpack.c.bf16 %v1504_v17, %v1503_v15  ;;  %v1505_v42 = vld [vmem:[%s5662_s16 + $0x54] sm:$0xff] }
  0xb7   : > { %5147 = vmatmul.msk.bf16.gmra.mxu0 %vm398_vm0, %v1274_v39  ;;  %5177 = vmatmul.msk.bf16.gmra.mxu1 %vm398_vm0, %v5830_v41  ;;  %v517_v44 = vpop.f32.mrf.mxu2  ;;  %v682_v45 = vpop.f32.mrf.mxu3  ;;  %v1246_v39 = vld [vmem:[%s5662_s16 + $0x5b] sm:$0xff] }
  0xb8   : > { %v5839_v46 = vadd.f32 %v682_v45, %v517_v44  ;;  %v1506_v44 = vld [vmem:[%s5662_s16 + $0x5c] sm:$0xff] }
  0xb9   : > { %v1537_v52 = vpack.c.bf16 %v1506_v44, %v1505_v42  ;;  %v1509_v42 = vld [vmem:[%s5662_s16 + $0x74] sm:$0xff]  ;;  %v1510_v44 = vld [vmem:[%s5662_s16 + $0x7c] sm:$0xff] }
  0xbc   : > { %v474_v47 = vpop.f32.mrf.mxu0  ;;  %v639_v48 = vpop.f32.mrf.mxu1 }
  0xbd   : > { %v5841_v49 = vadd.f32 %v639_v48, %v474_v47  ;;  %v1017_v48 = vpack.c.bf16 %v986_v36, %v985_v35  ;;  %v989_v35 = vld [vmem:[%s5662_s16 + $0x72] sm:$0xff]  ;;  %v990_v36 = vld [vmem:[%s5662_s16 + $0x7a] sm:$0xff] }
  0xbf   : > { %v519_v54 = vpop.f32.mrf.mxu2  ;;  %v684_v57 = vpop.f32.mrf.mxu3 }
  0xc0   : > { %v5849_v58 = vadd.f32 %v684_v57, %v519_v54 }
  0xc4   : > { %v477_v61 = vpop.f32.mrf.mxu0  ;;  %v642_v0 = vpop.f32.mrf.mxu1  ;;  %5088 = vmatmul.msk.bf16.gmra.mxu2 %vm398_vm0, %v1014_v38  ;;  %5118 = vmatmul.msk.bf16.gmra.mxu3 %vm398_vm0, %v1015_v59  ;;  %v1245_v38 = vld [vmem:[%s5662_s16 + $0x53] sm:$0xff] }
  0xc5   : > { %v5853_v2 = vadd.f32 %v642_v0, %v477_v61  ;;  %v1277_v50 = vpack.c.bf16 %v1246_v39, %v1245_v38  ;;  %v987_v0 = vld [vmem:[%s5662_s16 + $0x62] sm:$0xff]  ;;  %v1249_v38 = vld [vmem:[%s5662_s16 + $0x73] sm:$0xff] }
  0xc6   : > { %v1250_v39 = vld [vmem:[%s5662_s16 + $0x7b] sm:$0xff] }
  0xc7   : > { %5148 = vmatmul.msk.bf16.gmra.mxu0 %vm398_vm0, %v1275_v60  ;;  %5178 = vmatmul.msk.bf16.gmra.mxu1 %vm398_vm0, %v5851_v63  ;;  %v522_v3 = vpop.f32.mrf.mxu2  ;;  %v687_v5 = vpop.f32.mrf.mxu3 }
  0xc8   : > { %v5860_v6 = vadd.f32 %v687_v5, %v522_v3  ;;  %v988_v3 = vld [vmem:[%s5662_s16 + $0x6a] sm:$0xff] }
  0xc9   : > { %v1247_v5 = vld [vmem:[%s5662_s16 + $0x63] sm:$0xff] }
  0xcc   : > { %v479_v7 = vpop.f32.mrf.mxu0  ;;  %v644_v8 = vpop.f32.mrf.mxu1 }
  0xcd   : > { %v5862_v9 = vadd.f32 %v644_v8, %v479_v7  ;;  %v1248_v7 = vld [vmem:[%s5662_s16 + $0x6b] sm:$0xff] }
  0xce   : > { %v1278_v15 = vpack.c.bf16 %v1248_v7, %v1247_v5 }
  0xcf   : > { %v524_v14 = vpop.f32.mrf.mxu2  ;;  %v689_v18 = vpop.f32.mrf.mxu3 }
  0xd0   : > { %v5870_v19 = vadd.f32 %v689_v18, %v524_v14  ;;  %v1018_v14 = vpack.c.bf16 %v988_v3, %v987_v0  ;;  %v1538_v18 = vpack.c.bf16 %v1508_v11, %v1507_v10  ;;  %v992_v10 = vld [vmem:[%s5662_s16 + $0x8a] sm:$0xff] }
  0xd1   : > { %v1251_v11 = vld [vmem:[%s5662_s16 + $0x83] sm:$0xff] }
  0xd4   : > { %v482_v23 = vpop.f32.mrf.mxu0  ;;  %v647_v26 = vpop.f32.mrf.mxu1  ;;  %5089 = vmatmul.msk.bf16.gmra.mxu2 %vm398_vm0, %v1015_v59  ;;  %5119 = vmatmul.msk.bf16.gmra.mxu3 %vm398_vm0, %v1016_v20 }
  0xd5   : > { %v5874_v27 = vadd.f32 %v647_v26, %v482_v23 }
  0xd7   : > { %5149 = vmatmul.msk.bf16.gmra.mxu0 %vm398_vm0, %v1276_v21  ;;  %5179 = vmatmul.msk.bf16.gmra.mxu1 %vm398_vm0, %v5872_v24  ;;  %v527_v29 = vpop.f32.mrf.mxu2  ;;  %v692_v30 = vpop.f32.mrf.mxu3 }
  0xd8   : > { %v5881_v31 = vadd.f32 %v692_v30, %v527_v29 }
  0xdc   : > { %v484_v32 = vpop.f32.mrf.mxu0  ;;  %v649_v33 = vpop.f32.mrf.mxu1 }
  0xdd   : > { %v5883_v34 = vadd.f32 %v649_v33, %v484_v32 }
  0xdf   : > { %v529_v40 = vpop.f32.mrf.mxu2  ;;  %v694_v45 = vpop.f32.mrf.mxu3 }
  0xe0   : > { %v5891_v47 = vadd.f32 %v694_v45, %v529_v40 }
  0xe4   : > { %v487_v51 = vpop.f32.mrf.mxu0  ;;  %v652_v53 = vpop.f32.mrf.mxu1  ;;  %5090 = vmatmul.msk.bf16.gmra.mxu2 %vm398_vm0, %v1016_v20  ;;  %5120 = vmatmul.msk.bf16.gmra.mxu3 %vm398_vm0, %v1017_v48 }
  0xe5   : > { %v5893_v54 = vadd.f32 %v652_v53, %v487_v51  ;;  %v1279_v51 = vpack.c.bf16 %v1250_v39, %v1249_v38  ;;  %v1539_v53 = vpack.c.bf16 %v1510_v44, %v1509_v42  ;;  %v5512_v38 = vld [vmem:[%s7168_s2 + $0x60] sm:$0xff]  ;;  %v5514_v39 = vld [vmem:[%s7168_s2 + $0x70] sm:$0xff] }
  0xe6   : > { %1889 = vmatpush.bf16.msra.mxu2 %v5512_v38  ;;  %2149 = vmatpush.bf16.msra.mxu3 %v5514_v39 }
  0xe7   : > { %5150 = vmatmul.msk.bf16.gmra.mxu0 %vm398_vm0, %v1277_v50  ;;  %5180 = vmatmul.msk.bf16.gmra.mxu1 %vm398_vm0, %v1537_v52  ;;  %v532_v55 = vpop.f32.mrf.mxu2  ;;  %v697_v56 = vpop.f32.mrf.mxu3  ;;  %v1019_v50 = vpack.c.bf16 %v990_v36, %v989_v35 }
  0xe8   : > { %v5899_v57 = vadd.f32 %v697_v56, %v532_v55 }
  0xec   : > { %v489_v59 = vpop.f32.mrf.mxu0  ;;  %v654_v60 = vpop.f32.mrf.mxu1 }
  0xed   : > { %v5901_v61 = vadd.f32 %v654_v60, %v489_v59 }
  0xef   : > { %v534_v8 = vpop.f32.mrf.mxu2  ;;  %v699_v12 = vpop.f32.mrf.mxu3 }
  0xf0   : > { %v5909_v13 = vadd.f32 %v699_v12, %v534_v8  ;;  %v991_v8 = vld [vmem:[%s5662_s16 + $0x82] sm:$0xff]  ;;  %v1252_v12 = vld [vmem:[%s5662_s16 + $0x8b] sm:$0xff] }
  0xf4   : > { %v492_v17 = vpop.f32.mrf.mxu0  ;;  %v657_v20 = vpop.f32.mrf.mxu1  ;;  %5091 = vmatmul.msk.bf16.gmra.mxu2 %vm398_vm0, %v1017_v48  ;;  %5121 = vmatmul.msk.bf16.gmra.mxu3 %vm398_vm0, %v1018_v14 }
  0xf5   : > { %v5911_v21 = vadd.f32 %v657_v20, %v492_v17  ;;  %v1512_v17 = vld [vmem:[%s5662_s16 + $0x8c] sm:$0xff] }
  0xf7   : > { %5151 = vmatmul.msk.bf16.gmra.mxu0 %vm398_vm0, %v1278_v15  ;;  %5181 = vmatmul.msk.bf16.gmra.mxu1 %vm398_vm0, %v1538_v18  ;;  %v537_v23 = vpop.f32.mrf.mxu2  ;;  %v702_v26 = vpop.f32.mrf.mxu3  ;;  %v1511_v15 = vld [vmem:[%s5662_s16 + $0x84] sm:$0xff] }
  0xf8   : > { %v5917_v29 = vadd.f32 %v702_v26, %v537_v23  ;;  %v1020_v23 = vpack.c.bf16 %v992_v10, %v991_v8  ;;  %v1280_v26 = vpack.c.bf16 %v1252_v12, %v1251_v11  ;;  %v1514_v8 = vld [vmem:[%s5662_s16 + $0x9c] sm:$0xff] }
  0xfc   : > { %v494_v30 = vpop.f32.mrf.mxu0  ;;  %v659_v32 = vpop.f32.mrf.mxu1 }
  0xfd   : > { %v5919_v33 = vadd.f32 %v659_v32, %v494_v30  ;;  %v1540_v32 = vpack.c.bf16 %v1512_v17, %v1511_v15 }
  0xff   : > { %v539_v40 = vpop.f32.mrf.mxu2  ;;  %v704_v45 = vpop.f32.mrf.mxu3 }
 0x100   : > { %v5927_v48 = vadd.f32 %v704_v45, %v539_v40 }
 0x104   : > { %v497_v52 = vpop.f32.mrf.mxu0  ;;  %v662_v55 = vpop.f32.mrf.mxu1  ;;  %5092 = vmatmul.msk.bf16.gmra.mxu2 %vm398_vm0, %v1018_v14  ;;  %5122 = vmatmul.msk.bf16.gmra.mxu3 %vm398_vm0, %v1019_v50 }
 0x105   : > { %v5929_v56 = vadd.f32 %v662_v55, %v497_v52  ;;  %v5516_v52 = vld [vmem:[%s7168_s2 + $0x80] sm:$0xff] }
 0x106   : > { %v994_v55 = vld [vmem:[%s5662_s16 + $0x9a] sm:$0xff]  ;;  %2409 = vmatpush.bf16.msra.mxu0 %v5516_v52 }
 0x107   : > { %5152 = vmatmul.msk.bf16.gmra.mxu0 %vm398_vm0, %v1279_v51  ;;  %5182 = vmatmul.msk.bf16.gmra.mxu1 %vm398_vm0, %v1539_v53  ;;  %v542_v59 = vpop.f32.mrf.mxu2  ;;  %v707_v60 = vpop.f32.mrf.mxu3  ;;  %v993_v53 = vld [vmem:[%s5662_s16 + $0x92] sm:$0xff] }
 0x108   : > { %v5935_v0 = vadd.f32 %v707_v60, %v542_v59  ;;  %v1253_v59 = vld [vmem:[%s5662_s16 + $0x93] sm:$0xff]  ;;  %v1254_v60 = vld [vmem:[%s5662_s16 + $0x9b] sm:$0xff]  ;;  %v1021_v12 = vpack.c.bf16 %v994_v55, %v993_v53  ;;  %v1515_v55 = vld [vmem:[%s5662_s16 + $0xa4] sm:$0xff] }
 0x10c   : > { %v499_v3 = vpop.f32.mrf.mxu0  ;;  %v664_v5 = vpop.f32.mrf.mxu1 }
 0x10d   : > { %v5937_v7 = vadd.f32 %v664_v5, %v499_v3  ;;  %v1513_v5 = vld [vmem:[%s5662_s16 + $0x94] sm:$0xff] }
 0x10e   : > { %v1541_v17 = vpack.c.bf16 %v1514_v8, %v1513_v5 }
 0x10f   : > { %v544_v14 = vpop.f32.mrf.mxu2  ;;  %v709_v18 = vpop.f32.mrf.mxu3 }
 0x110   : > { %v5945_v20 = vadd.f32 %v709_v18, %v544_v14  ;;  %v1281_v14 = vpack.c.bf16 %v1254_v60, %v1253_v59  ;;  %v1516_v59 = vld [vmem:[%s5662_s16 + $0xac] sm:$0xff] }
 0x114   : > { %v502_v30 = vpop.f32.mrf.mxu0  ;;  %v667_v35 = vpop.f32.mrf.mxu1  ;;  %5093 = vmatmul.msk.bf16.gmra.mxu2 %vm398_vm0, %v1019_v50  ;;  %5123 = vmatmul.msk.bf16.gmra.mxu3 %vm398_vm0, %v1020_v23 }
 0x115   : > { %v5947_v36 = vadd.f32 %v667_v35, %v502_v30 }
 0x117   : > { %5153 = vmatmul.msk.bf16.gmra.mxu0 %vm398_vm0, %v1280_v26  ;;  %5183 = vmatmul.msk.bf16.gmra.mxu1 %vm398_vm0, %v1540_v32  ;;  %v547_v40 = vpop.f32.mrf.mxu2  ;;  %v712_v42 = vpop.f32.mrf.mxu3 }
 0x118   : > { %v5959_v44 = vadd.f32 %v712_v42, %v547_v40  ;;  %v995_v42 = vld [vmem:[%s5662_s16 + $0xa2] sm:$0xff] }
 0x11c   : > { %v504_v45 = vpop.f32.mrf.mxu0  ;;  %v669_v50 = vpop.f32.mrf.mxu1 }
 0x11d   : > { %v5961_v51 = vadd.f32 %v669_v50, %v504_v45  ;;  %v996_v45 = vld [vmem:[%s5662_s16 + $0xaa] sm:$0xff] }
 0x11e   : > { %v1255_v50 = vld [vmem:[%s5662_s16 + $0xa3] sm:$0xff]  ;;  %v1022_v5 = vpack.c.bf16 %v996_v45, %v995_v42  ;;  %v997_v42 = vld [vmem:[%s5662_s16 + $0xb2] sm:$0xff] }
 0x11f   : > { %v549_v3 = vpop.f32.mrf.mxu2  ;;  %v714_v10 = vpop.f32.mrf.mxu3  ;;  %v1257_v45 = vld [vmem:[%s5662_s16 + $0xb3] sm:$0xff] }
 0x120   : > { %v5972_v11 = vadd.f32 %v714_v10, %v549_v3 }
 0x124   : > { %v1371_v15 = vpop.f32.mrf.mxu0  ;;  %v1631_v18 = vpop.f32.mrf.mxu1  ;;  %5094 = vmatmul.msk.bf16.gmra.mxu2 %vm398_vm0, %v1020_v23  ;;  %5124 = vmatmul.msk.bf16.gmra.mxu3 %vm398_vm0, %v1021_v12  ;;  %v1256_v23 = vld [vmem:[%s5662_s16 + $0xab] sm:$0xff] }
 0x125   : > { %v1282_v8 = vpack.c.bf16 %v1256_v23, %v1255_v50  ;;  %v1258_v50 = vld [vmem:[%s5662_s16 + $0xbb] sm:$0xff] }
 0x127   : > { %5154 = vmatmul.msk.bf16.gmra.mxu0 %vm398_vm0, %v1281_v14  ;;  %5184 = vmatmul.msk.bf16.gmra.mxu1 %vm398_vm0, %v1541_v17  ;;  %v851_v26 = vpop.f32.mrf.mxu2  ;;  %v1111_v32 = vpop.f32.mrf.mxu3  ;;  %v1542_v14 = vpack.c.bf16 %v1516_v59, %v1515_v55  ;;  %v1517_v55 = vld [vmem:[%s5662_s16 + $0xb4] sm:$0xff]  ;;  %v1518_v59 = vld [vmem:[%s5662_s16 + $0xbc] sm:$0xff] }
 0x128   : > { %v941_v30 = vadd.f32 %v851_v26, %v5792_v62 }
 0x12a   : > { %v1201_v35 = vadd.f32 %v1111_v32, %v941_v30 }
 0x12c   : > { %v1373_v38 = vpop.f32.mrf.mxu0  ;;  %v1633_v39 = vpop.f32.mrf.mxu1  ;;  %v1461_v40 = vadd.f32 %v1371_v15, %v1201_v35 }
 0x12e   : > { %v5983_v52 = vadd.f32 %v1631_v18, %v1461_v40 }
 0x12f   : > { %v853_v53 = vpop.f32.mrf.mxu2  ;;  %v1113_v3 = vpop.f32.mrf.mxu3 }
 0x130   : > { %v942_v60 = vadd.f32 %v853_v53, %v5800_v4 }
 0x132   : > { %v1202_v62 = vadd.f32 %v1113_v3, %v942_v60 }
 0x134   : > { %v1376_v10 = vpop.f32.mrf.mxu0  ;;  %v1636_v15 = vpop.f32.mrf.mxu1  ;;  %v1462_v17 = vadd.f32 %v1373_v38, %v1202_v62  ;;  %5095 = vmatmul.msk.bf16.gmra.mxu2 %vm398_vm0, %v1021_v12  ;;  %5125 = vmatmul.msk.bf16.gmra.mxu3 %vm398_vm0, %v1022_v5  ;;  %v998_v12 = vld [vmem:[%s5662_s16 + $0xba] sm:$0xff] }
 0x135   : > { %v1023_v3 = vpack.c.bf16 %v998_v12, %v997_v42  ;;  %v1000_v42 = vld [vmem:[%s5662_s16 + $0xca] sm:$0xff] }
 0x136   : > { %v5992_v4 = vadd.f32 %v1633_v39, %v1462_v17  ;;  %v1259_v12 = vld [vmem:[%s5662_s16 + $0xc3] sm:$0xff] }
 0x137   : > { %5155 = vmatmul.msk.bf16.gmra.mxu0 %vm398_vm0, %v1282_v8  ;;  %5185 = vmatmul.msk.bf16.gmra.mxu1 %vm398_vm0, %v1542_v14  ;;  %v856_v18 = vpop.f32.mrf.mxu2  ;;  %v1116_v30 = vpop.f32.mrf.mxu3  ;;  %v1283_v8 = vpack.c.bf16 %v1258_v50, %v1257_v45  ;;  %v6004_v14 = vpack.c.bf16 %v1518_v59, %v1517_v55  ;;  %v1260_v45 = vld [vmem:[%s5662_s16 + $0xcb] sm:$0xff] }
 0x138   : > { %v943_v26 = vadd.f32 %v856_v18, %v5812_v22  ;;  %v1519_v55 = vld [vmem:[%s5662_s16 + $0xc4] sm:$0xff]  ;;  %v1520_v59 = vld [vmem:[%s5662_s16 + $0xcc] sm:$0xff] }
 0x13a   : > { %v1203_v32 = vadd.f32 %v1116_v30, %v943_v26 }
 0x13c   : > { %v1378_v35 = vpop.f32.mrf.mxu0  ;;  %v1638_v38 = vpop.f32.mrf.mxu1  ;;  %v1463_v40 = vadd.f32 %v1376_v10, %v1203_v32 }
 0x13e   : > { %v5999_v23 = vadd.f32 %v1636_v15, %v1463_v40 }
 0x13f   : > { %v858_v53 = vpop.f32.mrf.mxu2  ;;  %v1118_v60 = vpop.f32.mrf.mxu3 }
 0x140   : > { %v944_v39 = vadd.f32 %v858_v53, %v5820_v28 }
 0x142   : > { %v1204_v22 = vadd.f32 %v1118_v60, %v944_v39 }
 0x144   : > { %v1381_v62 = vpop.f32.mrf.mxu0  ;;  %v1641_v10 = vpop.f32.mrf.mxu1  ;;  %v1464_v17 = vadd.f32 %v1378_v35, %v1204_v22  ;;  %5096 = vmatmul.msk.bf16.gmra.mxu2 %vm398_vm0, %v1022_v5  ;;  %5126 = vmatmul.msk.bf16.gmra.mxu3 %vm398_vm0, %v1023_v3  ;;  %v999_v5 = vld [vmem:[%s5662_s16 + $0xc2] sm:$0xff] }
 0x145   : > { %v1024_v60 = vpack.c.bf16 %v1000_v42, %v999_v5  ;;  %v1001_v42 = vld [vmem:[%s5662_s16 + $0xd2] sm:$0xff] }
 0x146   : > { %v6011_v28 = vadd.f32 %v1638_v38, %v1464_v17  ;;  %v1544_v17 = vpack.c.bf16 %v1520_v59, %v1519_v55  ;;  %v1521_v59 = vld [vmem:[%s5662_s16 + $0xd4] sm:$0xff] }
 0x147   : > { %5156 = vmatmul.msk.bf16.gmra.mxu0 %vm398_vm0, %v1283_v8  ;;  %5186 = vmatmul.msk.bf16.gmra.mxu1 %vm398_vm0, %v6004_v14  ;;  %v861_v15 = vpop.f32.mrf.mxu2  ;;  %v1121_v26 = vpop.f32.mrf.mxu3  ;;  %v1284_v8 = vpack.c.bf16 %v1260_v45, %v1259_v12  ;;  %v1261_v12 = vld [vmem:[%s5662_s16 + $0xd3] sm:$0xff]  ;;  %v1262_v45 = vld [vmem:[%s5662_s16 + $0xdb] sm:$0xff] }
 0x148   : > { %v945_v18 = vadd.f32 %v861_v15, %v5832_v43 }
 0x14a   : > { %v1205_v30 = vadd.f32 %v1121_v26, %v945_v18 }
 0x14c   : > { %v1383_v32 = vpop.f32.mrf.mxu0  ;;  %v1643_v35 = vpop.f32.mrf.mxu1  ;;  %v1465_v40 = vadd.f32 %v1381_v62, %v1205_v30 }
 0x14e   : > { %v6018_v50 = vadd.f32 %v1641_v10, %v1465_v40 }
 0x14f   : > { %v863_v53 = vpop.f32.mrf.mxu2  ;;  %v1123_v39 = vpop.f32.mrf.mxu3 }
 0x150   : > { %v946_v38 = vadd.f32 %v863_v53, %v5841_v49 }
 0x152   : > { %v1206_v43 = vadd.f32 %v1123_v39, %v946_v38  ;;  %v1522_v38 = vld [vmem:[%s5662_s16 + $0xdc] sm:$0xff] }
 0x154   : > { %v1386_v22 = vpop.f32.mrf.mxu0  ;;  %v1646_v62 = vpop.f32.mrf.mxu1  ;;  %v1466_v15 = vadd.f32 %v1383_v32, %v1206_v43  ;;  %5097 = vmatmul.msk.bf16.gmra.mxu2 %vm398_vm0, %v1023_v3  ;;  %5127 = vmatmul.msk.bf16.gmra.mxu3 %vm398_vm0, %v1024_v60  ;;  %v1002_v3 = vld [vmem:[%s5662_s16 + $0xda] sm:$0xff]  ;;  %v1285_v43 = vpack.c.bf16 %v1262_v45, %v1261_v12  ;;  %v1263_v12 = vld [vmem:[%s5662_s16 + $0xe3] sm:$0xff]  ;;  %v1264_v45 = vld [vmem:[%s5662_s16 + $0xeb] sm:$0xff] }
 0x156   : > { %v6027_v49 = vadd.f32 %v1643_v35, %v1466_v15  ;;  %v1545_v15 = vpack.c.bf16 %v1522_v38, %v1521_v59  ;;  %v1523_v38 = vld [vmem:[%s5662_s16 + $0xe4] sm:$0xff] }
 0x157   : > { %5157 = vmatmul.msk.bf16.gmra.mxu0 %vm398_vm0, %v1284_v8  ;;  %5187 = vmatmul.msk.bf16.gmra.mxu1 %vm398_vm0, %v1544_v17  ;;  %v866_v10 = vpop.f32.mrf.mxu2  ;;  %v1126_v26 = vpop.f32.mrf.mxu3  ;;  %v1025_v8 = vpack.c.bf16 %v1002_v3, %v1001_v42  ;;  %v1003_v3 = vld [vmem:[%s5662_s16 + $0xe2] sm:$0xff] }
 0x158   : > { %v947_v18 = vadd.f32 %v866_v10, %v5853_v2 }
 0x15a   : > { %v1207_v30 = vadd.f32 %v1126_v26, %v947_v18 }
 0x15c   : > { %v1388_v40 = vpop.f32.mrf.mxu0  ;;  %v1648_v32 = vpop.f32.mrf.mxu1  ;;  %v1467_v5 = vadd.f32 %v1386_v22, %v1207_v30 }
 0x15e   : > { %v6034_v53 = vadd.f32 %v1646_v62, %v1467_v5 }
 0x15f   : > { %v868_v55 = vpop.f32.mrf.mxu2  ;;  %v1128_v39 = vpop.f32.mrf.mxu3 }
 0x160   : > { %v948_v35 = vadd.f32 %v868_v55, %v5862_v9 }
 0x162   : > { %v1208_v2 = vadd.f32 %v1128_v39, %v948_v35  ;;  %v1524_v35 = vld [vmem:[%s5662_s16 + $0xec] sm:$0xff] }
 0x164   : > { %v1391_v17 = vpop.f32.mrf.mxu0  ;;  %v1651_v22 = vpop.f32.mrf.mxu1  ;;  %v1468_v10 = vadd.f32 %v1388_v40, %v1208_v2  ;;  %5098 = vmatmul.msk.bf16.gmra.mxu2 %vm398_vm0, %v1024_v60  ;;  %5128 = vmatmul.msk.bf16.gmra.mxu3 %vm398_vm0, %v1025_v8  ;;  %v1004_v60 = vld [vmem:[%s5662_s16 + $0xea] sm:$0xff]  ;;  %v1286_v2 = vpack.c.bf16 %v1264_v45, %v1263_v12  ;;  %v1265_v12 = vld [vmem:[%s5662_s16 + $0xf3] sm:$0xff]  ;;  %v1266_v45 = vld [vmem:[%s5662_s16 + $0xfb] sm:$0xff] }
 0x166   : > { %v6043_v9 = vadd.f32 %v1648_v32, %v1468_v10  ;;  %v1546_v10 = vpack.c.bf16 %v1524_v35, %v1523_v38  ;;  %v1525_v35 = vld [vmem:[%s5662_s16 + $0xf4] sm:$0xff] }
 0x167   : > { %5158 = vmatmul.msk.bf16.gmra.mxu0 %vm398_vm0, %v1285_v43  ;;  %5188 = vmatmul.msk.bf16.gmra.mxu1 %vm398_vm0, %v1545_v15  ;;  %v871_v62 = vpop.f32.mrf.mxu2  ;;  %v1131_v26 = vpop.f32.mrf.mxu3  ;;  %v1026_v43 = vpack.c.bf16 %v1004_v60, %v1003_v3  ;;  %v1005_v60 = vld [vmem:[%s5662_s16 + $0xf2] sm:$0xff] }
 0x168   : > { %v949_v18 = vadd.f32 %v871_v62, %v5874_v27 }
 0x16a   : > { %v1209_v30 = vadd.f32 %v1131_v26, %v949_v18 }
 0x16c   : > { %v1393_v5 = vpop.f32.mrf.mxu0  ;;  %v1653_v40 = vpop.f32.mrf.mxu1  ;;  %v1469_v42 = vadd.f32 %v1391_v17, %v1209_v30 }
 0x16e   : > { %v6050_v55 = vadd.f32 %v1651_v22, %v1469_v42 }
 0x16f   : > { %v873_v59 = vpop.f32.mrf.mxu2  ;;  %v1133_v39 = vpop.f32.mrf.mxu3 }
 0x170   : > { %v950_v32 = vadd.f32 %v873_v59, %v5883_v34 }
 0x172   : > { %v1210_v27 = vadd.f32 %v1133_v39, %v950_v32  ;;  %v1526_v32 = vld [vmem:[%s5662_s16 + $0xfc] sm:$0xff] }
 0x174   : > { %v1396_v15 = vpop.f32.mrf.mxu0  ;;  %v1656_v17 = vpop.f32.mrf.mxu1  ;;  %v1470_v62 = vadd.f32 %v1393_v5, %v1210_v27  ;;  %5099 = vmatmul.msk.bf16.gmra.mxu2 %vm398_vm0, %v1025_v8  ;;  %5129 = vmatmul.msk.bf16.gmra.mxu3 %vm398_vm0, %v1026_v43  ;;  %v1006_v8 = vld [vmem:[%s5662_s16 + $0xfa] sm:$0xff]  ;;  %v1287_v27 = vpack.c.bf16 %v1266_v45, %v1265_v12  ;;  %v1267_v12 = vld [vmem:[%s5662_s16 + $0x103] sm:$0xff]  ;;  %v1268_v45 = vld [vmem:[%s5662_s16 + $0x10b] sm:$0xff] }
 0x176   : > { %v6059_v34 = vadd.f32 %v1653_v40, %v1470_v62  ;;  %v1547_v62 = vpack.c.bf16 %v1526_v32, %v1525_v35  ;;  %v1527_v32 = vld [vmem:[%s5662_s16 + $0x104] sm:$0xff] }
 0x177   : > { %5159 = vmatmul.msk.bf16.gmra.mxu0 %vm398_vm0, %v1286_v2  ;;  %5189 = vmatmul.msk.bf16.gmra.mxu1 %vm398_vm0, %v1546_v10  ;;  %v876_v22 = vpop.f32.mrf.mxu2  ;;  %v1136_v26 = vpop.f32.mrf.mxu3  ;;  %v1027_v2 = vpack.c.bf16 %v1006_v8, %v1005_v60  ;;  %v1007_v8 = vld [vmem:[%s5662_s16 + $0x102] sm:$0xff] }
 0x178   : > { %v951_v18 = vadd.f32 %v876_v22, %v5893_v54 }
 0x17a   : > { %v1211_v30 = vadd.f32 %v1136_v26, %v951_v18 }
 0x17c   : > { %v1398_v42 = vpop.f32.mrf.mxu0  ;;  %v1658_v5 = vpop.f32.mrf.mxu1  ;;  %v1471_v3 = vadd.f32 %v1396_v15, %v1211_v30 }
 0x17e   : > { %v6066_v59 = vadd.f32 %v1656_v17, %v1471_v3 }
 0x17f   : > { %v878_v38 = vpop.f32.mrf.mxu2  ;;  %v1138_v39 = vpop.f32.mrf.mxu3 }
 0x180   : > { %v952_v40 = vadd.f32 %v878_v38, %v5901_v61 }
 0x182   : > { %v1212_v54 = vadd.f32 %v1138_v39, %v952_v40  ;;  %v1528_v40 = vld [vmem:[%s5662_s16 + $0x10c] sm:$0xff] }
 0x184   : > { %v1401_v10 = vpop.f32.mrf.mxu0  ;;  %v1661_v15 = vpop.f32.mrf.mxu1  ;;  %v1472_v22 = vadd.f32 %v1398_v42, %v1212_v54  ;;  %5100 = vmatmul.msk.bf16.gmra.mxu2 %vm398_vm0, %v1026_v43  ;;  %5130 = vmatmul.msk.bf16.gmra.mxu3 %vm398_vm0, %v1027_v2  ;;  %v1008_v43 = vld [vmem:[%s5662_s16 + $0x10a] sm:$0xff]  ;;  %v1288_v54 = vpack.c.bf16 %v1268_v45, %v1267_v12  ;;  %v1269_v12 = vld [vmem:[%s5662_s16 + $0x113] sm:$0xff]  ;;  %v1270_v45 = vld [vmem:[%s5662_s16 + $0x11b] sm:$0xff] }
 0x186   : > { %v6075_v61 = vadd.f32 %v1658_v5, %v1472_v22  ;;  %v1548_v22 = vpack.c.bf16 %v1528_v40, %v1527_v32  ;;  %v1529_v40 = vld [vmem:[%s5662_s16 + $0x114] sm:$0xff] }
 0x187   : > { %5160 = vmatmul.msk.bf16.gmra.mxu0 %vm398_vm0, %v1287_v27  ;;  %5190 = vmatmul.msk.bf16.gmra.mxu1 %vm398_vm0, %v1547_v62  ;;  %v881_v17 = vpop.f32.mrf.mxu2  ;;  %v1141_v26 = vpop.f32.mrf.mxu3  ;;  %v1028_v27 = vpack.c.bf16 %v1008_v43, %v1007_v8  ;;  %v1009_v43 = vld [vmem:[%s5662_s16 + $0x112] sm:$0xff] }
 0x188   : > { %v953_v18 = vadd.f32 %v881_v17, %v5911_v21 }
 0x18a   : > { %v1213_v30 = vadd.f32 %v1141_v26, %v953_v18 }
 0x18c   : > { %v1403_v3 = vpop.f32.mrf.mxu0  ;;  %v1663_v42 = vpop.f32.mrf.mxu1  ;;  %v1473_v60 = vadd.f32 %v1401_v10, %v1213_v30 }
 0x18e   : > { %v6082_v38 = vadd.f32 %v1661_v15, %v1473_v60 }
 0x18f   : > { %v883_v35 = vpop.f32.mrf.mxu2  ;;  %v1143_v39 = vpop.f32.mrf.mxu3 }
 0x190   : > { %v954_v5 = vadd.f32 %v883_v35, %v5919_v33 }
 0x192   : > { %v1214_v21 = vadd.f32 %v1143_v39, %v954_v5  ;;  %v1530_v5 = vld [vmem:[%s5662_s16 + $0x11c] sm:$0xff] }
 0x194   : > { %v1406_v62 = vpop.f32.mrf.mxu0  ;;  %v1666_v10 = vpop.f32.mrf.mxu1  ;;  %v1474_v17 = vadd.f32 %v1403_v3, %v1214_v21  ;;  %5101 = vmatmul.msk.bf16.gmra.mxu2 %vm398_vm0, %v1027_v2  ;;  %5131 = vmatmul.msk.bf16.gmra.mxu3 %vm398_vm0, %v1028_v27  ;;  %v1010_v2 = vld [vmem:[%s5662_s16 + $0x11a] sm:$0xff]  ;;  %v1289_v21 = vpack.c.bf16 %v1270_v45, %v1269_v12  ;;  %v1011_v45 = vld [vmem:[%s5662_s16 + $0x122] sm:$0xff] }
 0x195   : > { %v5521_v12 = vld [vmem:[%s7169_s3 + $0x18] sm:$0xff] }
 0x196   : > { %v6091_v33 = vadd.f32 %v1663_v42, %v1474_v17  ;;  %v1549_v17 = vpack.c.bf16 %v1530_v5, %v1529_v40  ;;  %v1272_v40 = vld [vmem:[%s5662_s16 + $0x12b] sm:$0xff]  ;;  %3417 = vmatpush.bf16.msrb.mxu0 %v5521_v12 }
 0x197   : > { %5161 = vmatmul.msk.bf16.gmra.mxu0 %vm398_vm0, %v1288_v54  ;;  %5191 = vmatmul.msk.bf16.gmra.mxu1 %vm398_vm0, %v1548_v22  ;;  %v886_v15 = vpop.f32.mrf.mxu2  ;;  %v1146_v26 = vpop.f32.mrf.mxu3  ;;  %v1029_v54 = vpack.c.bf16 %v1010_v2, %v1009_v43 }
 0x198   : > { %v955_v18 = vadd.f32 %v886_v15, %v5929_v56 }
 0x19a   : > { %v1215_v30 = vadd.f32 %v1146_v26, %v955_v18 }
 0x19c   : > { %v1408_v60 = vpop.f32.mrf.mxu0  ;;  %v1668_v3 = vpop.f32.mrf.mxu1  ;;  %v1475_v8 = vadd.f32 %v1406_v62, %v1215_v30  ;;  %v5520_v62 = vld [vmem:[%s7169_s3 + $0x10] sm:$0xff] }
 0x19d   : > { %3165 = vmatpush.bf16.msrb.mxu3 %v5520_v62 }
 0x19e   : > { %v6098_v35 = vadd.f32 %v1666_v10, %v1475_v8 }
 0x19f   : > { %v888_v32 = vpop.f32.mrf.mxu2  ;;  %v1148_v39 = vpop.f32.mrf.mxu3 }
 0x1a0   : > { %v956_v42 = vadd.f32 %v888_v32, %v5937_v7  ;;  %v5519_v7 = vld [vmem:[%s7169_s3 + $0x8] sm:$0xff] }
 0x1a1   : > { %2913 = vmatpush.bf16.msrb.mxu2 %v5519_v7  ;;  %v1012_v32 = vld [vmem:[%s5662_s16 + $0x12a] sm:$0xff] }
 0x1a2   : > { %v1216_v56 = vadd.f32 %v1148_v39, %v956_v42  ;;  %v1531_v39 = vld [vmem:[%s5662_s16 + $0x124] sm:$0xff] }
 0x1a4   : > { %v1411_v22 = vpop.f32.mrf.mxu0  ;;  %v1671_v15 = vpop.f32.mrf.mxu1  ;;  %v1476_v18 = vadd.f32 %v1408_v60, %v1216_v56  ;;  %5102 = vmatmul.msk.bf16.gmra.mxu2 %vm398_vm0, %v1028_v27  ;;  %5132 = vmatmul.msk.bf16.gmra.mxu3 %vm398_vm0, %v1029_v54 }
 0x1a6   : > { %v6113_v10 = vadd.f32 %v1668_v3, %v1476_v18  ;;  %v1271_v3 = vld [vmem:[%s5662_s16 + $0x123] sm:$0xff] }
 0x1a7   : > { %5162 = vmatmul.msk.bf16.gmra.mxu0 %vm398_vm0, %v1289_v21  ;;  %5192 = vmatmul.msk.bf16.gmra.mxu1 %vm398_vm0, %v1549_v17  ;;  %v891_v27 = vpop.f32.mrf.mxu2  ;;  %v1151_v30 = vpop.f32.mrf.mxu3  ;;  %v1532_v21 = vld [vmem:[%s5662_s16 + $0x12c] sm:$0xff]  ;;  %v1030_v17 = vpack.c.bf16 %v1012_v32, %v1011_v45  ;;  %v1290_v18 = vpack.c.bf16 %v1272_v40, %v1271_v3 }
 0x1a8   : > { %v957_v26 = vadd.f32 %v891_v27, %v5947_v36  ;;  %v1550_v62 = vpack.c.bf16 %v1532_v21, %v1531_v39  ;;  %v2017_v32 = vld [vmem:[%s5662_s16 + $0x25] sm:$0xff]  ;;  %v2278_v40 = vld [vmem:[%s5662_s16 + $0x2e] sm:$0xff] }
 0x1a9   : > { %v2277_v3 = vld [vmem:[%s5662_s16 + $0x26] sm:$0xff] }
 0x1aa   : > { %v1217_v60 = vadd.f32 %v1151_v30, %v957_v26  ;;  %v2537_v39 = vld [vmem:[%s6143_s10] sm:$0xff]  ;;  %v2538_v21 = vld [vmem:[%s6143_s10 + $0x8] sm:$0xff] }
 0x1ac   : > { %v1413_v8 = vpop.f32.mrf.mxu0  ;;  %v1673_v43 = vpop.f32.mrf.mxu1  ;;  %v1477_v2 = vadd.f32 %v1411_v22, %v1217_v60 }
 0x1ae   : > { %v6123_v5 = vadd.f32 %v1671_v15, %v1477_v2  ;;  %v5522_v15 = vld [vmem:[%s7169_s3 + $0x20] sm:$0xff] }
 0x1af   : > { %v893_v42 = vpop.f32.mrf.mxu2  ;;  %v1153_v56 = vpop.f32.mrf.mxu3  ;;  %3669 = vmatpush.bf16.msrb.mxu1 %v5522_v15 }
 0x1b0   : > { %v958_v36 = vadd.f32 %v893_v42, %v5961_v51 }
 0x1b2   : > { %v1218_v22 = vadd.f32 %v1153_v56, %v958_v36 }
 0x1b4   : > { %v1416_v7 = vpop.f32.mrf.mxu0  ;;  %v1676_v27 = vpop.f32.mrf.mxu1  ;;  %v1478_v26 = vadd.f32 %v1413_v8, %v1218_v22  ;;  %5103 = vmatmul.msk.bf16.gmra.mxu2 %vm398_vm0, %v1029_v54  ;;  %5133 = vmatmul.msk.bf16.gmra.mxu3 %vm398_vm0, %v1030_v17 }
 0x1b6   : > { %v6135_v51 = vadd.f32 %v1673_v43, %v1478_v26  ;;  %v2018_v43 = vld [vmem:[%s5662_s16 + $0x2d] sm:$0xff]  ;;  %v2573_v26 = vpack.c.bf16 %v2538_v21, %v2537_v39  ;;  %v2540_v21 = vld [vmem:[%s6143_s10 + $0x18] sm:$0xff] }
 0x1b7   : > { %5163 = vmatmul.msk.bf16.gmra.mxu0 %vm398_vm0, %v1290_v18  ;;  %5193 = vmatmul.msk.bf16.gmra.mxu1 %vm398_vm0, %v1550_v62  ;;  %v896_v30 = vpop.f32.mrf.mxu2  ;;  %v1156_v54 = vpop.f32.mrf.mxu3  ;;  %v2053_v17 = vpack.c.bf16 %v2018_v43, %v2017_v32  ;;  %v2313_v18 = vpack.c.bf16 %v2278_v40, %v2277_v3  ;;  %v2019_v32 = vld [vmem:[%s5662_s16 + $0x35] sm:$0xff]  ;;  %v2280_v3 = vld [vmem:[%s5662_s16 + $0x3e] sm:$0xff] }
 0x1b8   : > { %v959_v60 = vadd.f32 %v896_v30, %v5798_v1  ;;  %v2279_v43 = vld [vmem:[%s5662_s16 + $0x36] sm:$0xff] }
 0x1b9   : > { %v2539_v39 = vld [vmem:[%s6143_s10 + $0x10] sm:$0xff] }
 0x1ba   : > { %v1219_v8 = vadd.f32 %v1156_v54, %v959_v60 }
 0x1bc   : > { %v1418_v2 = vpop.f32.mrf.mxu0  ;;  %v1678_v12 = vpop.f32.mrf.mxu1  ;;  %v1479_v45 = vadd.f32 %v1416_v7, %v1219_v8 }
 0x1be   : > { %v6149_v42 = vadd.f32 %v1676_v27, %v1479_v45 }
 0x1bf   : > { %v898_v1 = vpop.f32.mrf.mxu2  ;;  %v1158_v56 = vpop.f32.mrf.mxu3 }
 0x1c0   : > { %v960_v36 = vadd.f32 %v898_v1, %v5810_v16 }
 0x1c2   : > { %v1220_v22 = vadd.f32 %v1158_v56, %v960_v36 }
 0x1c4   : > { %v1421_v62 = vpop.f32.mrf.mxu0  ;;  %v1681_v15 = vpop.f32.mrf.mxu1  ;;  %v1480_v7 = vadd.f32 %v1418_v2, %v1220_v22  ;;  %5206 = vmatmul.msk.bf16.vlgmr.msra.gmra.mxu2 %vm398_vm0, %v5830_v41  ;;  %5236 = vmatmul.msk.bf16.vlgmr.msra.gmra.mxu3 %vm398_vm0, %v2053_v17  ;;  %v2020_v41 = vld [vmem:[%s5662_s16 + $0x3d] sm:$0xff]  ;;  %v2314_v17 = vpack.c.bf16 %v2280_v3, %v2279_v43  ;;  %v2574_v22 = vpack.c.bf16 %v2540_v21, %v2539_v39  ;;  %v2542_v39 = vld [vmem:[%s6143_s10 + $0x28] sm:$0xff] }
 0x1c5   : > { %v2054_v56 = vpack.c.bf16 %v2020_v41, %v2019_v32  ;;  %v2281_v32 = vld [vmem:[%s5662_s16 + $0x46] sm:$0xff]  ;;  %v2282_v41 = vld [vmem:[%s5662_s16 + $0x4e] sm:$0xff] }
 0x1c6   : > { %v6159_v16 = vadd.f32 %v1678_v12, %v1480_v7 }
 0x1c7   : > { %5266 = vmatmul.msk.bf16.vlgmr.msra.gmra.mxu0 %vm398_vm0, %v2313_v18  ;;  %5288 = vmatmul.msk.bf16.vlgmr.msra.gmra.mxu1 %vm2599_vm1, %v2573_v26  ;;  %v901_v27 = vpop.f32.mrf.mxu2  ;;  %v1161_v60 = vpop.f32.mrf.mxu3 }
 0x1c8   : > { %v961_v30 = vadd.f32 %v901_v27, %v5818_v25 }
 0x1ca   : > { %v1221_v54 = vadd.f32 %v1161_v60, %v961_v30 }
 0x1cc   : > { %v1423_v8 = vpop.f32.mrf.mxu0  ;;  %v1683_v2 = vpop.f32.mrf.mxu1  ;;  %v1481_v45 = vadd.f32 %v1421_v62, %v1221_v54 }
 0x1ce   : > { %v6166_v40 = vadd.f32 %v1681_v15, %v1481_v45  ;;  %v2021_v45 = vld [vmem:[%s5662_s16 + $0x45] sm:$0xff] }
 0x1cf   : > { %v903_v1 = vpop.f32.mrf.mxu2  ;;  %v1163_v36 = vpop.f32.mrf.mxu3 }
 0x1d0   : > { %v962_v12 = vadd.f32 %v903_v1, %v5828_v37  ;;  %v2541_v1 = vld [vmem:[%s6143_s10 + $0x20] sm:$0xff] }
 0x1d2   : > { %v1222_v25 = vadd.f32 %v1163_v36, %v962_v12  ;;  %v2315_v36 = vpack.c.bf16 %v2282_v41, %v2281_v32  ;;  %v2284_v32 = vld [vmem:[%s5662_s16 + $0x5e] sm:$0xff] }
 0x1d4   : > { %v1426_v18 = vpop.f32.mrf.mxu0  ;;  %v1686_v62 = vpop.f32.mrf.mxu1  ;;  %v1482_v26 = vadd.f32 %v1423_v8, %v1222_v25  ;;  %5207 = vmatmul.msk.bf16.gmra.mxu2 %vm398_vm0, %v5851_v63  ;;  %5237 = vmatmul.msk.bf16.gmra.mxu3 %vm398_vm0, %v2054_v56  ;;  %v2022_v63 = vld [vmem:[%s5662_s16 + $0x4d] sm:$0xff] }
 0x1d5   : > { %v2055_v12 = vpack.c.bf16 %v2022_v63, %v2021_v45  ;;  %v2024_v45 = vld [vmem:[%s5662_s16 + $0x5d] sm:$0xff] }
 0x1d6   : > { %v6176_v37 = vadd.f32 %v1683_v2, %v1482_v26  ;;  %v2283_v63 = vld [vmem:[%s5662_s16 + $0x56] sm:$0xff] }
 0x1d7   : > { %5267 = vmatmul.msk.bf16.gmra.mxu0 %vm398_vm0, %v2314_v17  ;;  %5289 = vmatmul.msk.bf16.gmra.mxu1 %vm2599_vm1, %v2574_v22  ;;  %v906_v15 = vpop.f32.mrf.mxu2  ;;  %v1166_v27 = vpop.f32.mrf.mxu3  ;;  %v2575_v17 = vpack.c.bf16 %v2542_v39, %v2541_v1  ;;  %v2544_v1 = vld [vmem:[%s6143_s10 + $0x38] sm:$0xff] }
 0x1d8   : > { %v963_v7 = vadd.f32 %v906_v15, %v5839_v46 }
 0x1da   : > { %v1223_v30 = vadd.f32 %v1166_v27, %v963_v7 }
 0x1dc   : > { %v1428_v60 = vpop.f32.mrf.mxu0  ;;  %v1688_v54 = vpop.f32.mrf.mxu1  ;;  %v1483_v8 = vadd.f32 %v1426_v18, %v1223_v30  ;;  %v1763_v30 = vld [vmem:[%s5662_s16 + $0x54] sm:$0xff] }
 0x1de   : > { %v6183_v43 = vadd.f32 %v1686_v62, %v1483_v8  ;;  %v2023_v8 = vld [vmem:[%s5662_s16 + $0x55] sm:$0xff] }
 0x1df   : > { %v908_v3 = vpop.f32.mrf.mxu2  ;;  %v1168_v21 = vpop.f32.mrf.mxu3 }
 0x1e0   : > { %v964_v2 = vadd.f32 %v908_v3, %v5849_v58  ;;  %v2543_v3 = vld [vmem:[%s6143_s10 + $0x30] sm:$0xff] }
 0x1e2   : > { %v1224_v46 = vadd.f32 %v1168_v21, %v964_v2  ;;  %v2056_v21 = vpack.c.bf16 %v2024_v45, %v2023_v8  ;;  %v2025_v8 = vld [vmem:[%s5662_s16 + $0x65] sm:$0xff]  ;;  %v2026_v45 = vld [vmem:[%s5662_s16 + $0x6d] sm:$0xff] }
 0x1e4   : > { %v1431_v56 = vpop.f32.mrf.mxu0  ;;  %v1691_v25 = vpop.f32.mrf.mxu1  ;;  %v1484_v18 = vadd.f32 %v1428_v60, %v1224_v46  ;;  %5208 = vmatmul.msk.bf16.gmra.mxu2 %vm398_vm0, %v5872_v24  ;;  %5238 = vmatmul.msk.bf16.gmra.mxu3 %vm398_vm0, %v2055_v12  ;;  %v1764_v60 = vld [vmem:[%s5662_s16 + $0x5c] sm:$0xff]  ;;  %v2316_v12 = vpack.c.bf16 %v2284_v32, %v2283_v63  ;;  %v2285_v63 = vld [vmem:[%s5662_s16 + $0x66] sm:$0xff]  ;;  %v2286_v32 = vld [vmem:[%s5662_s16 + $0x6e] sm:$0xff] }
 0x1e6   : > { %v6193_v58 = vadd.f32 %v1688_v54, %v1484_v18 }
 0x1e7   : > { %5268 = vmatmul.msk.bf16.gmra.mxu0 %vm398_vm0, %v2315_v36  ;;  %5290 = vmatmul.msk.bf16.gmra.mxu1 %vm2599_vm1, %v2575_v17  ;;  %v911_v22 = vpop.f32.mrf.mxu2  ;;  %v1171_v26 = vpop.f32.mrf.mxu3 }
 0x1e8   : > { %v965_v62 = vadd.f32 %v911_v22, %v5860_v6  ;;  %v1796_v6 = vpack.c.bf16 %v1764_v60, %v1763_v30  ;;  %v1765_v30 = vld [vmem:[%s5662_s16 + $0x64] sm:$0xff]  ;;  %v1766_v60 = vld [vmem:[%s5662_s16 + $0x6c] sm:$0xff] }
 0x1ea   : > { %v1225_v15 = vadd.f32 %v1171_v26, %v965_v62 }
 0x1ec   : > { %v1433_v7 = vpop.f32.mrf.mxu0  ;;  %v1693_v27 = vpop.f32.mrf.mxu1  ;;  %v1485_v24 = vadd.f32 %v1431_v56, %v1225_v15  ;;  %v2576_v56 = vpack.c.bf16 %v2544_v1, %v2543_v3  ;;  %v2545_v3 = vld [vmem:[%s6143_s10 + $0x40] sm:$0xff]  ;;  %v2546_v1 = vld [vmem:[%s6143_s10 + $0x48] sm:$0xff] }
 0x1ee   : > { %v6202_v41 = vadd.f32 %v1691_v25, %v1485_v24 }
 0x1ef   : > { %v913_v54 = vpop.f32.mrf.mxu2  ;;  %v1173_v2 = vpop.f32.mrf.mxu3 }
 0x1f0   : > { %v966_v39 = vadd.f32 %v913_v54, %v5870_v19 }
 0x1f2   : > { %v1226_v36 = vadd.f32 %v1173_v2, %v966_v39 }
 0x1f4   : > { %v1436_v46 = vpop.f32.mrf.mxu0  ;;  %v1696_v17 = vpop.f32.mrf.mxu1  ;;  %v1486_v18 = vadd.f32 %v1433_v7, %v1226_v36  ;;  %5209 = vmatmul.msk.bf16.gmra.mxu2 %vm398_vm0, %v1796_v6  ;;  %5239 = vmatmul.msk.bf16.gmra.mxu3 %vm398_vm0, %v2056_v21  ;;  %v2057_v6 = vpack.c.bf16 %v2026_v45, %v2025_v8  ;;  %v2317_v21 = vpack.c.bf16 %v2286_v32, %v2285_v63  ;;  %v2027_v8 = vld [vmem:[%s5662_s16 + $0x75] sm:$0xff]  ;;  %v2028_v45 = vld [vmem:[%s5662_s16 + $0x7d] sm:$0xff] }
 0x1f5   : > { %v2287_v63 = vld [vmem:[%s5662_s16 + $0x76] sm:$0xff]  ;;  %v2288_v32 = vld [vmem:[%s5662_s16 + $0x7e] sm:$0xff] }
 0x1f6   : > { %v6211_v19 = vadd.f32 %v1693_v27, %v1486_v18 }
 0x1f7   : > { %5269 = vmatmul.msk.bf16.gmra.mxu0 %vm398_vm0, %v2316_v12  ;;  %5291 = vmatmul.msk.bf16.gmra.mxu1 %vm2599_vm1, %v2576_v56  ;;  %v916_v25 = vpop.f32.mrf.mxu2  ;;  %v1176_v62 = vpop.f32.mrf.mxu3 }
 0x1f8   : > { %v967_v22 = vadd.f32 %v916_v25, %v5881_v31  ;;  %v1797_v31 = vpack.c.bf16 %v1766_v60, %v1765_v30  ;;  %v1767_v30 = vld [vmem:[%s5662_s16 + $0x74] sm:$0xff]  ;;  %v1768_v60 = vld [vmem:[%s5662_s16 + $0x7c] sm:$0xff] }
 0x1fa   : > { %v1227_v26 = vadd.f32 %v1176_v62, %v967_v22 }
 0x1fc   : > { %v1438_v15 = vpop.f32.mrf.mxu0  ;;  %v1698_v7 = vpop.f32.mrf.mxu1  ;;  %v1487_v24 = vadd.f32 %v1436_v46, %v1227_v26  ;;  %v2577_v46 = vpack.c.bf16 %v2546_v1, %v2545_v3  ;;  %v2547_v3 = vld [vmem:[%s6143_s10 + $0x50] sm:$0xff]  ;;  %v2548_v1 = vld [vmem:[%s6143_s10 + $0x58] sm:$0xff] }
 0x1fe   : > { %v6220_v54 = vadd.f32 %v1696_v17, %v1487_v24 }
 0x1ff   : > { %v918_v27 = vpop.f32.mrf.mxu2  ;;  %v1178_v2 = vpop.f32.mrf.mxu3 }
 0x200   : > { %v968_v39 = vadd.f32 %v918_v27, %v5891_v47 }
 0x202   : > { %v1228_v12 = vadd.f32 %v1178_v2, %v968_v39 }
 0x204   : > { %v1441_v36 = vpop.f32.mrf.mxu0  ;;  %v1701_v56 = vpop.f32.mrf.mxu1  ;;  %v1488_v18 = vadd.f32 %v1438_v15, %v1228_v12  ;;  %5210 = vmatmul.msk.bf16.gmra.mxu2 %vm398_vm0, %v1797_v31  ;;  %5240 = vmatmul.msk.bf16.gmra.mxu3 %vm398_vm0, %v2057_v6  ;;  %v2058_v31 = vpack.c.bf16 %v2028_v45, %v2027_v8  ;;  %v2318_v6 = vpack.c.bf16 %v2288_v32, %v2287_v63  ;;  %v2029_v8 = vld [vmem:[%s5662_s16 + $0x85] sm:$0xff]  ;;  %v2030_v45 = vld [vmem:[%s5662_s16 + $0x8d] sm:$0xff] }
 0x205   : > { %v2289_v63 = vld [vmem:[%s5662_s16 + $0x86] sm:$0xff]  ;;  %v2290_v32 = vld [vmem:[%s5662_s16 + $0x8e] sm:$0xff] }
 0x206   : > { %v6229_v47 = vadd.f32 %v1698_v7, %v1488_v18 }
 0x207   : > { %5270 = vmatmul.msk.bf16.gmra.mxu0 %vm398_vm0, %v2317_v21  ;;  %5292 = vmatmul.msk.bf16.gmra.mxu1 %vm2599_vm1, %v2577_v46  ;;  %v921_v17 = vpop.f32.mrf.mxu2  ;;  %v1181_v22 = vpop.f32.mrf.mxu3 }
 0x208   : > { %v969_v25 = vadd.f32 %v921_v17, %v5899_v57  ;;  %v1798_v57 = vpack.c.bf16 %v1768_v60, %v1767_v30  ;;  %v1769_v30 = vld [vmem:[%s5662_s16 + $0x84] sm:$0xff]  ;;  %v1770_v60 = vld [vmem:[%s5662_s16 + $0x8c] sm:$0xff] }
 0x20a   : > { %v1229_v62 = vadd.f32 %v1181_v22, %v969_v25 }
 0x20c   : > { %v1443_v26 = vpop.f32.mrf.mxu0  ;;  %v1703_v15 = vpop.f32.mrf.mxu1  ;;  %v1489_v24 = vadd.f32 %v1441_v36, %v1229_v62  ;;  %v2578_v36 = vpack.c.bf16 %v2548_v1, %v2547_v3  ;;  %v2549_v3 = vld [vmem:[%s6143_s10 + $0x60] sm:$0xff]  ;;  %v2550_v1 = vld [vmem:[%s6143_s10 + $0x68] sm:$0xff] }
 0x20e   : > { %v6238_v27 = vadd.f32 %v1701_v56, %v1489_v24 }
 0x20f   : > { %v923_v7 = vpop.f32.mrf.mxu2  ;;  %v1183_v2 = vpop.f32.mrf.mxu3 }
 0x210   : > { %v970_v39 = vadd.f32 %v923_v7, %v5909_v13 }
 0x212   : > { %v1230_v21 = vadd.f32 %v1183_v2, %v970_v39 }
 0x214   : > { %v1446_v12 = vpop.f32.mrf.mxu0  ;;  %v1706_v46 = vpop.f32.mrf.mxu1  ;;  %v1490_v18 = vadd.f32 %v1443_v26, %v1230_v21  ;;  %5211 = vmatmul.msk.bf16.gmra.mxu2 %vm398_vm0, %v1798_v57  ;;  %5241 = vmatmul.msk.bf16.gmra.mxu3 %vm398_vm0, %v2058_v31  ;;  %v2059_v57 = vpack.c.bf16 %v2030_v45, %v2029_v8  ;;  %v2319_v31 = vpack.c.bf16 %v2290_v32, %v2289_v63  ;;  %v2031_v8 = vld [vmem:[%s5662_s16 + $0x95] sm:$0xff]  ;;  %v2032_v45 = vld [vmem:[%s5662_s16 + $0x9d] sm:$0xff] }
 0x215   : > { %v2291_v63 = vld [vmem:[%s5662_s16 + $0x96] sm:$0xff]  ;;  %v2292_v32 = vld [vmem:[%s5662_s16 + $0x9e] sm:$0xff] }
 0x216   : > { %v6247_v13 = vadd.f32 %v1703_v15, %v1490_v18 }
 0x217   : > { %5271 = vmatmul.msk.bf16.gmra.mxu0 %vm398_vm0, %v2318_v6  ;;  %5293 = vmatmul.msk.bf16.gmra.mxu1 %vm2599_vm1, %v2578_v36  ;;  %v926_v56 = vpop.f32.mrf.mxu2  ;;  %v1186_v25 = vpop.f32.mrf.mxu3 }
 0x218   : > { %v971_v17 = vadd.f32 %v926_v56, %v5917_v29  ;;  %v1799_v29 = vpack.c.bf16 %v1770_v60, %v1769_v30  ;;  %v1771_v30 = vld [vmem:[%s5662_s16 + $0x94] sm:$0xff]  ;;  %v1772_v60 = vld [vmem:[%s5662_s16 + $0x9c] sm:$0xff] }
 0x21a   : > { %v1231_v22 = vadd.f32 %v1186_v25, %v971_v17 }
 0x21c   : > { %v1448_v62 = vpop.f32.mrf.mxu0  ;;  %v1708_v26 = vpop.f32.mrf.mxu1  ;;  %v1491_v24 = vadd.f32 %v1446_v12, %v1231_v22  ;;  %v2579_v12 = vpack.c.bf16 %v2550_v1, %v2549_v3  ;;  %v2551_v3 = vld [vmem:[%s6143_s10 + $0x70] sm:$0xff]  ;;  %v2552_v1 = vld [vmem:[%s6143_s10 + $0x78] sm:$0xff] }
 0x21e   : > { %v6256_v7 = vadd.f32 %v1706_v46, %v1491_v24 }
 0x21f   : > { %v928_v15 = vpop.f32.mrf.mxu2  ;;  %v1188_v2 = vpop.f32.mrf.mxu3 }
 0x220   : > { %v972_v39 = vadd.f32 %v928_v15, %v5927_v48 }
 0x222   : > { %v1232_v6 = vadd.f32 %v1188_v2, %v972_v39 }
 0x224   : > { %v1451_v21 = vpop.f32.mrf.mxu0  ;;  %v1711_v36 = vpop.f32.mrf.mxu1  ;;  %v1492_v18 = vadd.f32 %v1448_v62, %v1232_v6  ;;  %5212 = vmatmul.msk.bf16.gmra.mxu2 %vm398_vm0, %v1799_v29  ;;  %5242 = vmatmul.msk.bf16.gmra.mxu3 %vm398_vm0, %v2059_v57  ;;  %v2060_v29 = vpack.c.bf16 %v2032_v45, %v2031_v8  ;;  %v2320_v57 = vpack.c.bf16 %v2292_v32, %v2291_v63  ;;  %v2033_v8 = vld [vmem:[%s5662_s16 + $0xa5] sm:$0xff]  ;;  %v2034_v45 = vld [vmem:[%s5662_s16 + $0xad] sm:$0xff] }
 0x225   : > { %v2293_v63 = vld [vmem:[%s5662_s16 + $0xa6] sm:$0xff]  ;;  %v2294_v32 = vld [vmem:[%s5662_s16 + $0xae] sm:$0xff] }
 0x226   : > { %v6265_v48 = vadd.f32 %v1708_v26, %v1492_v18 }
 0x227   : > { %5272 = vmatmul.msk.bf16.gmra.mxu0 %vm398_vm0, %v2319_v31  ;;  %5294 = vmatmul.msk.bf16.gmra.mxu1 %vm2599_vm1, %v2579_v12  ;;  %v931_v46 = vpop.f32.mrf.mxu2  ;;  %v1191_v17 = vpop.f32.mrf.mxu3 }
 0x228   : > { %v973_v56 = vadd.f32 %v931_v46, %v5935_v0  ;;  %v1800_v0 = vpack.c.bf16 %v1772_v60, %v1771_v30  ;;  %v1773_v30 = vld [vmem:[%s5662_s16 + $0xa4] sm:$0xff]  ;;  %v1774_v60 = vld [vmem:[%s5662_s16 + $0xac] sm:$0xff] }
 0x22a   : > { %v1233_v25 = vadd.f32 %v1191_v17, %v973_v56 }
 0x22c   : > { %v1453_v22 = vpop.f32.mrf.mxu0  ;;  %v1713_v62 = vpop.f32.mrf.mxu1  ;;  %v1493_v24 = vadd.f32 %v1451_v21, %v1233_v25  ;;  %v2580_v21 = vpack.c.bf16 %v2552_v1, %v2551_v3  ;;  %v2553_v3 = vld [vmem:[%s6143_s10 + $0x80] sm:$0xff]  ;;  %v2554_v1 = vld [vmem:[%s6143_s10 + $0x88] sm:$0xff] }
 0x22e   : > { %v6274_v15 = vadd.f32 %v1711_v36, %v1493_v24 }
 0x22f   : > { %v933_v26 = vpop.f32.mrf.mxu2  ;;  %v1193_v2 = vpop.f32.mrf.mxu3 }
 0x230   : > { %v974_v39 = vadd.f32 %v933_v26, %v5945_v20 }
 0x232   : > { %v1234_v31 = vadd.f32 %v1193_v2, %v974_v39 }
 0x234   : > { %v1456_v6 = vpop.f32.mrf.mxu0  ;;  %v1716_v12 = vpop.f32.mrf.mxu1  ;;  %v1494_v18 = vadd.f32 %v1453_v22, %v1234_v31  ;;  %5213 = vmatmul.msk.bf16.gmra.mxu2 %vm398_vm0, %v1800_v0  ;;  %5243 = vmatmul.msk.bf16.gmra.mxu3 %vm398_vm0, %v2060_v29  ;;  %v2061_v0 = vpack.c.bf16 %v2034_v45, %v2033_v8  ;;  %v2321_v29 = vpack.c.bf16 %v2294_v32, %v2293_v63  ;;  %v2295_v8 = vld [vmem:[%s5662_s16 + $0xb6] sm:$0xff]  ;;  %v2296_v45 = vld [vmem:[%s5662_s16 + $0xbe] sm:$0xff] }
 0x236   : > { %v6283_v20 = vadd.f32 %v1713_v62, %v1494_v18 }
 0x237   : > { %5273 = vmatmul.msk.bf16.gmra.mxu0 %vm398_vm0, %v2320_v57  ;;  %5295 = vmatmul.msk.bf16.gmra.mxu1 %vm2599_vm1, %v2580_v21  ;;  %v936_v36 = vpop.f32.mrf.mxu2  ;;  %v1196_v56 = vpop.f32.mrf.mxu3 }
 0x238   : > { %v975_v46 = vadd.f32 %v936_v36, %v5959_v44  ;;  %v1801_v44 = vpack.c.bf16 %v1774_v60, %v1773_v30  ;;  %v2035_v30 = vld [vmem:[%s5662_s16 + $0xb5] sm:$0xff]  ;;  %v2036_v60 = vld [vmem:[%s5662_s16 + $0xbd] sm:$0xff] }
 0x23a   : > { %v1235_v17 = vadd.f32 %v1196_v56, %v975_v46 }
 0x23c   : > { %v1458_v25 = vpop.f32.mrf.mxu0  ;;  %v1718_v22 = vpop.f32.mrf.mxu1  ;;  %v1495_v24 = vadd.f32 %v1456_v6, %v1235_v17  ;;  %v2581_v6 = vpack.c.bf16 %v2554_v1, %v2553_v3  ;;  %v2556_v3 = vld [vmem:[%s6143_s10 + $0x98] sm:$0xff] }
 0x23e   : > { %v6292_v26 = vadd.f32 %v1716_v12, %v1495_v24 }
 0x23f   : > { %v938_v62 = vpop.f32.mrf.mxu2  ;;  %v1198_v2 = vpop.f32.mrf.mxu3 }
 0x240   : > { %v976_v39 = vadd.f32 %v938_v62, %v5972_v11  ;;  %v2555_v62 = vld [vmem:[%s6143_s10 + $0x90] sm:$0xff] }
 0x242   : > { %v1236_v57 = vadd.f32 %v1198_v2, %v976_v39  ;;  %v2062_v39 = vpack.c.bf16 %v2036_v60, %v2035_v30  ;;  %v2322_v2 = vpack.c.bf16 %v2296_v45, %v2295_v8  ;;  %v2297_v30 = vld [vmem:[%s5662_s16 + $0xc6] sm:$0xff]  ;;  %v2298_v60 = vld [vmem:[%s5662_s16 + $0xce] sm:$0xff] }
 0x243   : > { %v2557_v45 = vld [vmem:[%s6143_s10 + $0xa0] sm:$0xff] }
 0x244   : > { %v2411_v31 = vpop.f32.mrf.mxu0  ;;  %v2663_v21 = vpop.f32.mrf.mxu1  ;;  %v1496_v18 = vadd.f32 %v1458_v25, %v1236_v57  ;;  %5214 = vmatmul.msk.bf16.gmra.mxu2 %vm398_vm0, %v1801_v44  ;;  %5244 = vmatmul.msk.bf16.gmra.mxu3 %vm398_vm0, %v2061_v0  ;;  %v2582_v0 = vpack.c.bf16 %v2556_v3, %v2555_v62 }
 0x246   : > { %v6301_v11 = vadd.f32 %v1718_v22, %v1496_v18 }
 0x247   : > { %5274 = vmatmul.msk.bf16.gmra.mxu0 %vm398_vm0, %v2321_v29  ;;  %5296 = vmatmul.msk.bf16.gmra.mxu1 %vm2599_vm1, %v2581_v6  ;;  %v1891_v12 = vpop.f32.mrf.mxu2  ;;  %v2151_v46 = vpop.f32.mrf.mxu3 }
 0x248   : > { %v1981_v36 = vadd.f32 %v1891_v12, %v5983_v52 }
 0x24a   : > { %v2241_v56 = vadd.f32 %v2151_v46, %v1981_v36  ;;  %v1777_v46 = vld [vmem:[%s5662_s16 + $0xc4] sm:$0xff] }
 0x24c   : > { %v2413_v17 = vpop.f32.mrf.mxu0  ;;  %v2665_v25 = vpop.f32.mrf.mxu1  ;;  %v2501_v24 = vadd.f32 %v2411_v31, %v2241_v56  ;;  %v1778_v56 = vld [vmem:[%s5662_s16 + $0xcc] sm:$0xff] }
 0x24e   : > { %v6308_v63 = vadd.f32 %v2663_v21, %v2501_v24  ;;  %v2038_v24 = vld [vmem:[%s5662_s16 + $0xcd] sm:$0xff] }
 0x24f   : > { %v1893_v32 = vpop.f32.mrf.mxu2  ;;  %v2153_v1 = vpop.f32.mrf.mxu3 }
 0x250   : > { %v1982_v22 = vadd.f32 %v1893_v32, %v5992_v4  ;;  %v2558_v32 = vld [vmem:[%s6143_s10 + $0xa8] sm:$0xff] }
 0x252   : > { %v2242_v52 = vadd.f32 %v2153_v1, %v1982_v22  ;;  %v2323_v1 = vpack.c.bf16 %v2298_v60, %v2297_v30  ;;  %v2300_v30 = vld [vmem:[%s5662_s16 + $0xde] sm:$0xff] }
 0x254   : > { %v2416_v44 = vpop.f32.mrf.mxu0  ;;  %v2668_v29 = vpop.f32.mrf.mxu1  ;;  %v2502_v57 = vadd.f32 %v2413_v17, %v2242_v52  ;;  %5215 = vmatmul.msk.bf16.gmra.mxu2 %vm398_vm0, %v6004_v14  ;;  %5245 = vmatmul.msk.bf16.gmra.mxu3 %vm398_vm0, %v2062_v39  ;;  %v2037_v17 = vld [vmem:[%s5662_s16 + $0xc5] sm:$0xff]  ;;  %v2583_v52 = vpack.c.bf16 %v2558_v32, %v2557_v45  ;;  %v2560_v45 = vld [vmem:[%s6143_s10 + $0xb8] sm:$0xff] }
 0x255   : > { %v2063_v22 = vpack.c.bf16 %v2038_v24, %v2037_v17  ;;  %v2040_v17 = vld [vmem:[%s5662_s16 + $0xdd] sm:$0xff] }
 0x256   : > { %v6318_v4 = vadd.f32 %v2665_v25, %v2502_v57  ;;  %v2299_v24 = vld [vmem:[%s5662_s16 + $0xd6] sm:$0xff] }
 0x257   : > { %5275 = vmatmul.msk.bf16.gmra.mxu0 %vm398_vm0, %v2322_v2  ;;  %5297 = vmatmul.msk.bf16.gmra.mxu1 %vm2599_vm1, %v2582_v0  ;;  %v1896_v31 = vpop.f32.mrf.mxu2  ;;  %v2156_v21 = vpop.f32.mrf.mxu3 }
 0x258   : > { %v1983_v6 = vadd.f32 %v1896_v31, %v5999_v23  ;;  %v1803_v23 = vpack.c.bf16 %v1778_v56, %v1777_v46  ;;  %v1780_v46 = vld [vmem:[%s5662_s16 + $0xdc] sm:$0xff] }
 0x259   : > { %v2039_v56 = vld [vmem:[%s5662_s16 + $0xd5] sm:$0xff] }
 0x25a   : > { %v2243_v18 = vadd.f32 %v2156_v21, %v1983_v6 }
 0x25c   : > { %v2418_v12 = vpop.f32.mrf.mxu0  ;;  %v2670_v36 = vpop.f32.mrf.mxu1  ;;  %v2503_v14 = vadd.f32 %v2416_v44, %v2243_v18 }
 0x25e   : > { %v6327_v8 = vadd.f32 %v2668_v29, %v2503_v14  ;;  %v1779_v14 = vld [vmem:[%s5662_s16 + $0xd4] sm:$0xff] }
 0x25f   : > { %v1898_v25 = vpop.f32.mrf.mxu2  ;;  %v2158_v3 = vpop.f32.mrf.mxu3 }
 0x260   : > { %v1984_v62 = vadd.f32 %v1898_v25, %v6011_v28  ;;  %v2559_v25 = vld [vmem:[%s6143_s10 + $0xb0] sm:$0xff] }
 0x262   : > { %v2244_v39 = vadd.f32 %v2158_v3, %v1984_v62  ;;  %v2064_v3 = vpack.c.bf16 %v2040_v17, %v2039_v56  ;;  %v2042_v56 = vld [vmem:[%s5662_s16 + $0xed] sm:$0xff] }
 0x263   : > { %v2301_v17 = vld [vmem:[%s5662_s16 + $0xe6] sm:$0xff] }
 0x264   : > { %v2421_v2 = vpop.f32.mrf.mxu0  ;;  %v2673_v44 = vpop.f32.mrf.mxu1  ;;  %v2504_v0 = vadd.f32 %v2418_v12, %v2244_v39  ;;  %5216 = vmatmul.msk.bf16.gmra.mxu2 %vm398_vm0, %v1803_v23  ;;  %5246 = vmatmul.msk.bf16.gmra.mxu3 %vm398_vm0, %v2063_v22  ;;  %v2324_v23 = vpack.c.bf16 %v2300_v30, %v2299_v24  ;;  %v2584_v39 = vpack.c.bf16 %v2560_v45, %v2559_v25  ;;  %v2302_v24 = vld [vmem:[%s5662_s16 + $0xee] sm:$0xff] }
 0x265   : > { %v2562_v25 = vld [vmem:[%s6143_s10 + $0xc8] sm:$0xff] }
 0x266   : > { %v6336_v28 = vadd.f32 %v2670_v36, %v2504_v0 }
 0x267   : > { %5276 = vmatmul.msk.bf16.gmra.mxu0 %vm398_vm0, %v2323_v1  ;;  %5298 = vmatmul.msk.bf16.gmra.mxu1 %vm2599_vm1, %v2583_v52  ;;  %v1901_v29 = vpop.f32.mrf.mxu2  ;;  %v2161_v31 = vpop.f32.mrf.mxu3 }
 0x268   : > { %v1985_v57 = vadd.f32 %v1901_v29, %v6018_v50  ;;  %v1804_v50 = vpack.c.bf16 %v1780_v46, %v1779_v14  ;;  %v1782_v14 = vld [vmem:[%s5662_s16 + $0xec] sm:$0xff] }
 0x269   : > { %v2041_v46 = vld [vmem:[%s5662_s16 + $0xe5] sm:$0xff] }
 0x26a   : > { %v2245_v6 = vadd.f32 %v2161_v31, %v1985_v57 }
 0x26c   : > { %v2423_v21 = vpop.f32.mrf.mxu0  ;;  %v2675_v18 = vpop.f32.mrf.mxu1  ;;  %v2505_v12 = vadd.f32 %v2421_v2, %v2245_v6 }
 0x26e   : > { %v6345_v60 = vadd.f32 %v2673_v44, %v2505_v12  ;;  %v1781_v12 = vld [vmem:[%s5662_s16 + $0xe4] sm:$0xff] }
 0x26f   : > { %v1903_v36 = vpop.f32.mrf.mxu2  ;;  %v2163_v62 = vpop.f32.mrf.mxu3 }
 0x270   : > { %v1986_v32 = vadd.f32 %v1903_v36, %v6027_v49  ;;  %v2561_v36 = vld [vmem:[%s6143_s10 + $0xc0] sm:$0xff] }
 0x272   : > { %v2246_v22 = vadd.f32 %v2163_v62, %v1986_v32  ;;  %v2065_v62 = vpack.c.bf16 %v2042_v56, %v2041_v46  ;;  %v2044_v46 = vld [vmem:[%s5662_s16 + $0xfd] sm:$0xff] }
 0x273   : > { %v2303_v56 = vld [vmem:[%s5662_s16 + $0xf6] sm:$0xff] }
 0x274   : > { %v2426_v1 = vpop.f32.mrf.mxu0  ;;  %v2678_v2 = vpop.f32.mrf.mxu1  ;;  %v2506_v52 = vadd.f32 %v2423_v21, %v2246_v22  ;;  %5217 = vmatmul.msk.bf16.gmra.mxu2 %vm398_vm0, %v1804_v50  ;;  %5247 = vmatmul.msk.bf16.gmra.mxu3 %vm398_vm0, %v2064_v3  ;;  %v2325_v50 = vpack.c.bf16 %v2302_v24, %v2301_v17  ;;  %v2585_v22 = vpack.c.bf16 %v2562_v25, %v2561_v36  ;;  %v2304_v17 = vld [vmem:[%s5662_s16 + $0xfe] sm:$0xff] }
 0x275   : > { %v2564_v36 = vld [vmem:[%s6143_s10 + $0xd8] sm:$0xff] }
 0x276   : > { %v6354_v49 = vadd.f32 %v2675_v18, %v2506_v52 }
 0x277   : > { %5277 = vmatmul.msk.bf16.gmra.mxu0 %vm398_vm0, %v2324_v23  ;;  %5299 = vmatmul.msk.bf16.gmra.mxu1 %vm2599_vm1, %v2584_v39  ;;  %v1906_v44 = vpop.f32.mrf.mxu2  ;;  %v2166_v29 = vpop.f32.mrf.mxu3 }
 0x278   : > { %v1987_v0 = vadd.f32 %v1906_v44, %v6034_v53  ;;  %v1805_v53 = vpack.c.bf16 %v1782_v14, %v1781_v12  ;;  %v1784_v12 = vld [vmem:[%s5662_s16 + $0xfc] sm:$0xff] }
 0x279   : > { %v2043_v14 = vld [vmem:[%s5662_s16 + $0xf5] sm:$0xff] }
 0x27a   : > { %v2247_v57 = vadd.f32 %v2166_v29, %v1987_v0 }
 0x27c   : > { %v2428_v31 = vpop.f32.mrf.mxu0  ;;  %v2680_v6 = vpop.f32.mrf.mxu1  ;;  %v2507_v21 = vadd.f32 %v2426_v1, %v2247_v57 }
 0x27e   : > { %v6363_v30 = vadd.f32 %v2678_v2, %v2507_v21  ;;  %v1783_v21 = vld [vmem:[%s5662_s16 + $0xf4] sm:$0xff] }
 0x27f   : > { %v1908_v18 = vpop.f32.mrf.mxu2  ;;  %v2168_v32 = vpop.f32.mrf.mxu3 }
 0x280   : > { %v1988_v45 = vadd.f32 %v1908_v18, %v6043_v9  ;;  %v2563_v18 = vld [vmem:[%s6143_s10 + $0xd0] sm:$0xff] }
 0x282   : > { %v2248_v3 = vadd.f32 %v2168_v32, %v1988_v45  ;;  %v2066_v32 = vpack.c.bf16 %v2044_v46, %v2043_v14  ;;  %v2046_v14 = vld [vmem:[%s5662_s16 + $0x10d] sm:$0xff] }
 0x283   : > { %v2305_v46 = vld [vmem:[%s5662_s16 + $0x106] sm:$0xff] }
 0x284   : > { %v2431_v23 = vpop.f32.mrf.mxu0  ;;  %v2683_v1 = vpop.f32.mrf.mxu1  ;;  %v2508_v39 = vadd.f32 %v2428_v31, %v2248_v3  ;;  %5218 = vmatmul.msk.bf16.gmra.mxu2 %vm398_vm0, %v1805_v53  ;;  %5248 = vmatmul.msk.bf16.gmra.mxu3 %vm398_vm0, %v2065_v62  ;;  %v2326_v53 = vpack.c.bf16 %v2304_v17, %v2303_v56  ;;  %v2586_v3 = vpack.c.bf16 %v2564_v36, %v2563_v18  ;;  %v2306_v56 = vld [vmem:[%s5662_s16 + $0x10e] sm:$0xff] }
 0x285   : > { %v2566_v18 = vld [vmem:[%s6143_s10 + $0xe8] sm:$0xff] }
 0x286   : > { %v6372_v9 = vadd.f32 %v2680_v6, %v2508_v39 }
 0x287   : > { %5278 = vmatmul.msk.bf16.gmra.mxu0 %vm398_vm0, %v2325_v50  ;;  %5300 = vmatmul.msk.bf16.gmra.mxu1 %vm2599_vm1, %v2585_v22  ;;  %v1911_v2 = vpop.f32.mrf.mxu2  ;;  %v2171_v44 = vpop.f32.mrf.mxu3 }
 0x288   : > { %v1989_v52 = vadd.f32 %v1911_v2, %v6050_v55  ;;  %v1806_v55 = vpack.c.bf16 %v1784_v12, %v1783_v21  ;;  %v1786_v21 = vld [vmem:[%s5662_s16 + $0x10c] sm:$0xff] }
 0x289   : > { %v2045_v12 = vld [vmem:[%s5662_s16 + $0x105] sm:$0xff] }
 0x28a   : > { %v2249_v0 = vadd.f32 %v2171_v44, %v1989_v52 }
 0x28c   : > { %v2433_v29 = vpop.f32.mrf.mxu0  ;;  %v2685_v57 = vpop.f32.mrf.mxu1  ;;  %v2509_v31 = vadd.f32 %v2431_v23, %v2249_v0 }
 0x28e   : > { %v6381_v24 = vadd.f32 %v2683_v1, %v2509_v31  ;;  %v1785_v31 = vld [vmem:[%s5662_s16 + $0x104] sm:$0xff] }
 0x28f   : > { %v1913_v6 = vpop.f32.mrf.mxu2  ;;  %v2173_v45 = vpop.f32.mrf.mxu3 }
 0x290   : > { %v1990_v25 = vadd.f32 %v1913_v6, %v6059_v34  ;;  %v2565_v6 = vld [vmem:[%s6143_s10 + $0xe0] sm:$0xff] }
 0x292   : > { %v2250_v62 = vadd.f32 %v2173_v45, %v1990_v25  ;;  %v2067_v45 = vpack.c.bf16 %v2046_v14, %v2045_v12  ;;  %v2048_v12 = vld [vmem:[%s5662_s16 + $0x11d] sm:$0xff] }
 0x293   : > { %v2307_v14 = vld [vmem:[%s5662_s16 + $0x116] sm:$0xff] }
 0x294   : > { %v2436_v50 = vpop.f32.mrf.mxu0  ;;  %v2688_v23 = vpop.f32.mrf.mxu1  ;;  %v2510_v22 = vadd.f32 %v2433_v29, %v2250_v62  ;;  %5219 = vmatmul.msk.bf16.gmra.mxu2 %vm398_vm0, %v1806_v55  ;;  %5249 = vmatmul.msk.bf16.gmra.mxu3 %vm398_vm0, %v2066_v32  ;;  %v2327_v55 = vpack.c.bf16 %v2306_v56, %v2305_v46  ;;  %v2587_v62 = vpack.c.bf16 %v2566_v18, %v2565_v6  ;;  %v2308_v46 = vld [vmem:[%s5662_s16 + $0x11e] sm:$0xff] }
 0x295   : > { %v2568_v6 = vld [vmem:[%s6143_s10 + $0xf8] sm:$0xff] }
 0x296   : > { %v6390_v34 = vadd.f32 %v2685_v57, %v2510_v22 }
 0x297   : > { %5279 = vmatmul.msk.bf16.gmra.mxu0 %vm398_vm0, %v2326_v53  ;;  %5301 = vmatmul.msk.bf16.gmra.mxu1 %vm2599_vm1, %v2586_v3  ;;  %v1916_v1 = vpop.f32.mrf.mxu2  ;;  %v2176_v2 = vpop.f32.mrf.mxu3 }
 0x298   : > { %v1991_v39 = vadd.f32 %v1916_v1, %v6066_v59  ;;  %v1807_v59 = vpack.c.bf16 %v1786_v21, %v1785_v31  ;;  %v1788_v31 = vld [vmem:[%s5662_s16 + $0x11c] sm:$0xff] }
 0x299   : > { %v2047_v21 = vld [vmem:[%s5662_s16 + $0x115] sm:$0xff] }
 0x29a   : > { %v2251_v52 = vadd.f32 %v2176_v2, %v1991_v39 }
 0x29c   : > { %v2438_v44 = vpop.f32.mrf.mxu0  ;;  %v2690_v0 = vpop.f32.mrf.mxu1  ;;  %v2511_v29 = vadd.f32 %v2436_v50, %v2251_v52 }
 0x29e   : > { %v6399_v17 = vadd.f32 %v2688_v23, %v2511_v29  ;;  %v1787_v29 = vld [vmem:[%s5662_s16 + $0x114] sm:$0xff] }
 0x29f   : > { %v1918_v57 = vpop.f32.mrf.mxu2  ;;  %v2178_v25 = vpop.f32.mrf.mxu3 }
 0x2a0   : > { %v1992_v36 = vadd.f32 %v1918_v57, %v6075_v61  ;;  %v2567_v57 = vld [vmem:[%s6143_s10 + $0xf0] sm:$0xff] }
 0x2a2   : > { %v2252_v32 = vadd.f32 %v2178_v25, %v1992_v36  ;;  %v2068_v25 = vpack.c.bf16 %v2048_v12, %v2047_v21  ;;  %v2050_v21 = vld [vmem:[%s5662_s16 + $0x12d] sm:$0xff] }
 0x2a3   : > { %v2309_v12 = vld [vmem:[%s5662_s16 + $0x126] sm:$0xff] }
 0x2a4   : > { %v2441_v53 = vpop.f32.mrf.mxu0  ;;  %v2693_v50 = vpop.f32.mrf.mxu1  ;;  %v2512_v3 = vadd.f32 %v2438_v44, %v2252_v32  ;;  %5220 = vmatmul.msk.bf16.gmra.mxu2 %vm398_vm0, %v1807_v59  ;;  %5250 = vmatmul.msk.bf16.gmra.mxu3 %vm398_vm0, %v2067_v45  ;;  %v2328_v59 = vpack.c.bf16 %v2308_v46, %v2307_v14  ;;  %v2588_v32 = vpack.c.bf16 %v2568_v6, %v2567_v57  ;;  %v2310_v14 = vld [vmem:[%s5662_s16 + $0x12e] sm:$0xff] }
 0x2a5   : > { %v2570_v57 = vld [vmem:[%s6143_s10 + $0x108] sm:$0xff] }
 0x2a6   : > { %v6408_v61 = vadd.f32 %v2690_v0, %v2512_v3 }
 0x2a7   : > { %5280 = vmatmul.msk.bf16.gmra.mxu0 %vm398_vm0, %v2327_v55  ;;  %5302 = vmatmul.msk.bf16.gmra.mxu1 %vm2599_vm1, %v2587_v62  ;;  %v1921_v23 = vpop.f32.mrf.mxu2  ;;  %v2181_v1 = vpop.f32.mrf.mxu3 }
 0x2a8   : > { %v1993_v22 = vadd.f32 %v1921_v23, %v6082_v38  ;;  %v1808_v38 = vpack.c.bf16 %v1788_v31, %v1787_v29  ;;  %v1790_v29 = vld [vmem:[%s5662_s16 + $0x12c] sm:$0xff] }
 0x2a9   : > { %v2049_v31 = vld [vmem:[%s5662_s16 + $0x125] sm:$0xff] }
 0x2aa   : > { %v2253_v39 = vadd.f32 %v2181_v1, %v1993_v22 }
 0x2ac   : > { %v2443_v2 = vpop.f32.mrf.mxu0  ;;  %v2695_v52 = vpop.f32.mrf.mxu1  ;;  %v2513_v44 = vadd.f32 %v2441_v53, %v2253_v39 }
 0x2ae   : > { %v6417_v56 = vadd.f32 %v2693_v50, %v2513_v44  ;;  %v1789_v44 = vld [vmem:[%s5662_s16 + $0x124] sm:$0xff] }
 0x2af   : > { %v1923_v0 = vpop.f32.mrf.mxu2  ;;  %v2183_v36 = vpop.f32.mrf.mxu3 }
 0x2b0   : > { %v1994_v18 = vadd.f32 %v1923_v0, %v6091_v33  ;;  %v2569_v0 = vld [vmem:[%s6143_s10 + $0x100] sm:$0xff] }
 0x2b2   : > { %v2254_v45 = vadd.f32 %v2183_v36, %v1994_v18  ;;  %v2069_v36 = vpack.c.bf16 %v2050_v21, %v2049_v31  ;;  %v1791_v31 = vld [vmem:[%s5662_s16 + $0x134] sm:$0xff] }
 0x2b3   : > { %v2051_v21 = vld [vmem:[%s5662_s16 + $0x135] sm:$0xff] }
 0x2b4   : > { %v2446_v55 = vpop.f32.mrf.mxu0  ;;  %v2698_v53 = vpop.f32.mrf.mxu1  ;;  %v2514_v62 = vadd.f32 %v2443_v2, %v2254_v45  ;;  %5221 = vmatmul.msk.bf16.gmra.mxu2 %vm398_vm0, %v1808_v38  ;;  %5251 = vmatmul.msk.bf16.gmra.mxu3 %vm398_vm0, %v2068_v25  ;;  %v2329_v38 = vpack.c.bf16 %v2310_v14, %v2309_v12  ;;  %v2589_v45 = vpack.c.bf16 %v2570_v57, %v2569_v0  ;;  %v2052_v12 = vld [vmem:[%s5662_s16 + $0x13d] sm:$0xff]  ;;  %v2571_v57 = vld [vmem:[%s6143_s10 + $0x110] sm:$0xff] }
 0x2b5   : > { %v2311_v14 = vld [vmem:[%s5662_s16 + $0x136] sm:$0xff] }
 0x2b6   : > { %v6426_v33 = vadd.f32 %v2695_v52, %v2514_v62 }
 0x2b7   : > { %5281 = vmatmul.msk.bf16.gmra.mxu0 %vm398_vm0, %v2328_v59  ;;  %5303 = vmatmul.msk.bf16.gmra.mxu1 %vm2599_vm1, %v2588_v32  ;;  %v1926_v50 = vpop.f32.mrf.mxu2  ;;  %v2186_v23 = vpop.f32.mrf.mxu3 }
 0x2b8   : > { %v1995_v3 = vadd.f32 %v1926_v50, %v6098_v35  ;;  %v1809_v35 = vpack.c.bf16 %v1790_v29, %v1789_v44  ;;  %v5525_v29 = vld [vmem:[%s7169_s3 + $0x38] sm:$0xff] }
 0x2b9   : > { %4425 = vmatpush.bf16.msra.mxu0 %v5525_v29 }
 0x2ba   : > { %v2255_v22 = vadd.f32 %v2186_v23, %v1995_v3 }
 0x2bc   : > { %v2448_v1 = vpop.f32.mrf.mxu0  ;;  %v2700_v39 = vpop.f32.mrf.mxu1  ;;  %v2515_v2 = vadd.f32 %v2446_v55, %v2255_v22 }
 0x2be   : > { %v6435_v46 = vadd.f32 %v2698_v53, %v2515_v2  ;;  %v5524_v53 = vld [vmem:[%s7169_s3 + $0x30] sm:$0xff] }
 0x2bf   : > { %v1928_v52 = vpop.f32.mrf.mxu2  ;;  %v2188_v18 = vpop.f32.mrf.mxu3  ;;  %4173 = vmatpush.bf16.msra.mxu3 %v5524_v53 }
 0x2c0   : > { %v1996_v6 = vadd.f32 %v1928_v52, %v6113_v10  ;;  %v5523_v10 = vld [vmem:[%s7169_s3 + $0x28] sm:$0xff]  ;;  %v2312_v52 = vld [vmem:[%s5662_s16 + $0x13e] sm:$0xff] }
 0x2c1   : > { %3921 = vmatpush.bf16.msra.mxu2 %v5523_v10 }
 0x2c2   : > { %v2256_v25 = vadd.f32 %v2188_v18, %v1996_v6  ;;  %v2572_v6 = vld [vmem:[%s6143_s10 + $0x118] sm:$0xff] }
 0x2c4   : > { %v2451_v59 = vpop.f32.mrf.mxu0  ;;  %v2703_v55 = vpop.f32.mrf.mxu1  ;;  %v2516_v32 = vadd.f32 %v2448_v1, %v2256_v25  ;;  %5222 = vmatmul.msk.bf16.gmra.mxu2 %vm398_vm0, %v1809_v35  ;;  %5252 = vmatmul.msk.bf16.gmra.mxu3 %vm398_vm0, %v2069_v36  ;;  %v2330_v25 = vpack.c.bf16 %v2312_v52, %v2311_v14  ;;  %v3293_v14 = vld [vmem:[%s6143_s10 + $0x12] sm:$0xff]  ;;  %v3294_v52 = vld [vmem:[%s6143_s10 + $0x1a] sm:$0xff] }
 0x2c6   : > { %v6450_v62 = vadd.f32 %v2700_v39, %v2516_v32  ;;  %v1792_v39 = vld [vmem:[%s5662_s16 + $0x13c] sm:$0xff]  ;;  %v2590_v32 = vpack.c.bf16 %v2572_v6, %v2571_v57  ;;  %v3545_v57 = vld [vmem:[%s6143_s10 + $0x13] sm:$0xff] }
 0x2c7   : > { %5282 = vmatmul.msk.bf16.gmra.mxu0 %vm398_vm0, %v2329_v38  ;;  %5304 = vmatmul.msk.bf16.gmra.mxu1 %vm2599_vm1, %v2589_v45  ;;  %v1931_v50 = vpop.f32.mrf.mxu2  ;;  %v2191_v23 = vpop.f32.mrf.mxu3  ;;  %v1810_v36 = vpack.c.bf16 %v1792_v39, %v1791_v31  ;;  %v2070_v38 = vpack.c.bf16 %v2052_v12, %v2051_v21  ;;  %v2789_v31 = vld [vmem:[%s6143_s10 + $0x1] sm:$0xff]  ;;  %v2790_v39 = vld [vmem:[%s6143_s10 + $0x9] sm:$0xff] }
 0x2c8   : > { %v1997_v3 = vadd.f32 %v1931_v50, %v6123_v5  ;;  %v3041_v21 = vld [vmem:[%s6143_s10 + $0x2] sm:$0xff]  ;;  %v3042_v12 = vld [vmem:[%s6143_s10 + $0xa] sm:$0xff] }
 0x2c9   : > { %v3546_v6 = vld [vmem:[%s6143_s10 + $0x1b] sm:$0xff] }
 0x2ca   : > { %v2257_v22 = vadd.f32 %v2191_v23, %v1997_v3 }
 0x2cc   : > { %v2453_v1 = vpop.f32.mrf.mxu0  ;;  %v2705_v2 = vpop.f32.mrf.mxu1  ;;  %v2517_v44 = vadd.f32 %v2451_v59, %v2257_v22 }
 0x2ce   : > { %v6462_v0 = vadd.f32 %v2703_v55, %v2517_v44  ;;  %v5526_v55 = vld [vmem:[%s7169_s3 + $0x40] sm:$0xff] }
 0x2cf   : > { %v1933_v5 = vpop.f32.mrf.mxu2  ;;  %v2193_v35 = vpop.f32.mrf.mxu3  ;;  %4677 = vmatpush.bf16.msra.mxu1 %v5526_v55 }
 0x2d0   : > { %v1998_v18 = vadd.f32 %v1933_v5, %v6135_v51 }
 0x2d2   : > { %v2258_v59 = vadd.f32 %v2193_v35, %v1998_v18 }
 0x2d4   : > { %v2456_v45 = vpop.f32.mrf.mxu0  ;;  %v2708_v10 = vpop.f32.mrf.mxu1  ;;  %v2518_v53 = vadd.f32 %v2453_v1, %v2258_v59  ;;  %5223 = vmatmul.msk.bf16.gmra.mxu2 %vm398_vm0, %v1810_v36  ;;  %5253 = vmatmul.msk.bf16.gmra.mxu3 %vm398_vm0, %v2070_v38  ;;  %v3077_v36 = vpack.c.bf16 %v3042_v12, %v3041_v21  ;;  %v3329_v38 = vpack.c.bf16 %v3294_v52, %v3293_v14  ;;  %v3296_v21 = vld [vmem:[%s6143_s10 + $0x2a] sm:$0xff] }
 0x2d5   : > { %v3547_v52 = vld [vmem:[%s6143_s10 + $0x23] sm:$0xff] }
 0x2d6   : > { %v6474_v51 = vadd.f32 %v2705_v2, %v2518_v53 }
 0x2d7   : > { %5283 = vmatmul.msk.bf16.gmra.mxu0 %vm398_vm0, %v2330_v25  ;;  %5305 = vmatmul.msk.bf16.gmra.mxu1 %vm2599_vm1, %v2590_v32  ;;  %v1936_v50 = vpop.f32.mrf.mxu2  ;;  %v2196_v23 = vpop.f32.mrf.mxu3 }
 0x2d8   : > { %v1999_v3 = vadd.f32 %v1936_v50, %v6149_v42  ;;  %v2825_v42 = vpack.c.bf16 %v2790_v39, %v2789_v31  ;;  %v2792_v31 = vld [vmem:[%s6143_s10 + $0x19] sm:$0xff]  ;;  %v3295_v39 = vld [vmem:[%s6143_s10 + $0x22] sm:$0xff] }
 0x2da   : > { %v2259_v22 = vadd.f32 %v2196_v23, %v1999_v3 }
 0x2dc   : > { %v2458_v1 = vpop.f32.mrf.mxu0  ;;  %v2710_v44 = vpop.f32.mrf.mxu1  ;;  %v2519_v29 = vadd.f32 %v2456_v45, %v2259_v22  ;;  %v3581_v45 = vpack.c.bf16 %v3546_v6, %v3545_v57 }
 0x2de   : > { %v6483_v5 = vadd.f32 %v2708_v10, %v2519_v29  ;;  %v2791_v29 = vld [vmem:[%s6143_s10 + $0x11] sm:$0xff] }
 0x2df   : > { %v1938_v2 = vpop.f32.mrf.mxu2  ;;  %v2198_v35 = vpop.f32.mrf.mxu3  ;;  %v2826_v6 = vpack.c.bf16 %v2792_v31, %v2791_v29 }
 0x2e0   : > { %v2000_v18 = vadd.f32 %v1938_v2, %v6159_v16  ;;  %v3548_v2 = vld [vmem:[%s6143_s10 + $0x2b] sm:$0xff] }
 0x2e2   : > { %v2260_v25 = vadd.f32 %v2198_v35, %v2000_v18  ;;  %v3330_v18 = vpack.c.bf16 %v3296_v21, %v3295_v39  ;;  %v3549_v39 = vld [vmem:[%s6143_s10 + $0x33] sm:$0xff]  ;;  %v3550_v21 = vld [vmem:[%s6143_s10 + $0x3b] sm:$0xff] }
 0x2e4   : > { %v2461_v59 = vpop.f32.mrf.mxu0  ;;  %v2713_v32 = vpop.f32.mrf.mxu1  ;;  %v2520_v53 = vadd.f32 %v2458_v1, %v2260_v25  ;;  %5312 = vmatmul.msk.bf16.vlgmr.msrb.gmra.mxu2 %vm2599_vm1, %v2825_v42  ;;  %5336 = vmatmul.msk.bf16.vlgmr.msrb.gmra.mxu3 %vm2599_vm1, %v3077_v36  ;;  %v3582_v42 = vpack.c.bf16 %v3548_v2, %v3547_v52 }
 0x2e6   : > { %v6492_v16 = vadd.f32 %v2710_v44, %v2520_v53 }
 0x2e7   : > { %5360 = vmatmul.msk.bf16.vlgmr.msrb.gmra.mxu0 %vm2599_vm1, %v3329_v38  ;;  %5384 = vmatmul.msk.bf16.vlgmr.msrb.gmra.mxu1 %vm2599_vm1, %v3581_v45  ;;  %v1941_v10 = vpop.f32.mrf.mxu2  ;;  %v2201_v50 = vpop.f32.mrf.mxu3 }
 0x2e8   : > { %v2001_v55 = vadd.f32 %v1941_v10, %v6166_v40 }
 0x2ea   : > { %v2261_v3 = vadd.f32 %v2201_v50, %v2001_v55 }
 0x2ec   : > { %v2463_v23 = vpop.f32.mrf.mxu0  ;;  %v2715_v22 = vpop.f32.mrf.mxu1  ;;  %v2521_v1 = vadd.f32 %v2461_v59, %v2261_v3  ;;  %v2793_v3 = vld [vmem:[%s6143_s10 + $0x21] sm:$0xff] }
 0x2ee   : > { %v6499_v12 = vadd.f32 %v2713_v32, %v2521_v1  ;;  %v3297_v1 = vld [vmem:[%s6143_s10 + $0x32] sm:$0xff] }
 0x2ef   : > { %v1943_v14 = vpop.f32.mrf.mxu2  ;;  %v2203_v57 = vpop.f32.mrf.mxu3 }
 0x2f0   : > { %v2002_v44 = vadd.f32 %v1943_v14, %v6176_v37 }
 0x2f2   : > { %v2262_v40 = vadd.f32 %v2203_v57, %v2002_v44  ;;  %v3583_v57 = vpack.c.bf16 %v3550_v21, %v3549_v39 }
 0x2f4   : > { %v2466_v35 = vpop.f32.mrf.mxu0  ;;  %v2718_v36 = vpop.f32.mrf.mxu1  ;;  %v2522_v25 = vadd.f32 %v2463_v23, %v2262_v40  ;;  %5313 = vmatmul.msk.bf16.gmra.mxu2 %vm2599_vm1, %v2826_v6  ;;  %5337 = vmatmul.msk.bf16.gmra.mxu3 %vm2599_vm1, %v3329_v38  ;;  %v2794_v23 = vld [vmem:[%s6143_s10 + $0x29] sm:$0xff]  ;;  %v3298_v38 = vld [vmem:[%s6143_s10 + $0x3a] sm:$0xff] }
 0x2f5   : > { %v2827_v52 = vpack.c.bf16 %v2794_v23, %v2793_v3  ;;  %v3331_v2 = vpack.c.bf16 %v3298_v38, %v3297_v1  ;;  %v3551_v1 = vld [vmem:[%s6143_s10 + $0x43] sm:$0xff]  ;;  %v3552_v38 = vld [vmem:[%s6143_s10 + $0x4b] sm:$0xff] }
 0x2f6   : > { %v6508_v37 = vadd.f32 %v2715_v22, %v2522_v25 }
 0x2f7   : > { %5361 = vmatmul.msk.bf16.gmra.mxu0 %vm2599_vm1, %v3330_v18  ;;  %5385 = vmatmul.msk.bf16.gmra.mxu1 %vm2599_vm1, %v3582_v42  ;;  %v1946_v59 = vpop.f32.mrf.mxu2  ;;  %v2206_v32 = vpop.f32.mrf.mxu3 }
 0x2f8   : > { %v2003_v45 = vadd.f32 %v1946_v59, %v6183_v43 }
 0x2fa   : > { %v2263_v53 = vadd.f32 %v2206_v32, %v2003_v45 }
 0x2fc   : > { %v2468_v10 = vpop.f32.mrf.mxu0  ;;  %v2720_v55 = vpop.f32.mrf.mxu1  ;;  %v2523_v50 = vadd.f32 %v2466_v35, %v2263_v53  ;;  %v2795_v53 = vld [vmem:[%s6143_s10 + $0x31] sm:$0xff] }
 0x2fe   : > { %v6515_v29 = vadd.f32 %v2718_v36, %v2523_v50  ;;  %v3299_v50 = vld [vmem:[%s6143_s10 + $0x42] sm:$0xff] }
 0x2ff   : > { %v1948_v31 = vpop.f32.mrf.mxu2  ;;  %v2208_v14 = vpop.f32.mrf.mxu3 }
 0x300   : > { %v2004_v22 = vadd.f32 %v1948_v31, %v6193_v58 }
 0x302   : > { %v2264_v43 = vadd.f32 %v2208_v14, %v2004_v22  ;;  %v3584_v14 = vpack.c.bf16 %v3552_v38, %v3551_v1 }
 0x304   : > { %v2471_v44 = vpop.f32.mrf.mxu0  ;;  %v2723_v6 = vpop.f32.mrf.mxu1  ;;  %v2524_v40 = vadd.f32 %v2468_v10, %v2264_v43  ;;  %5314 = vmatmul.msk.bf16.gmra.mxu2 %vm2599_vm1, %v2827_v52  ;;  %5338 = vmatmul.msk.bf16.gmra.mxu3 %vm2599_vm1, %v3330_v18  ;;  %v2796_v10 = vld [vmem:[%s6143_s10 + $0x39] sm:$0xff]  ;;  %v3300_v18 = vld [vmem:[%s6143_s10 + $0x4a] sm:$0xff] }
 0x305   : > { %v2828_v39 = vpack.c.bf16 %v2796_v10, %v2795_v53  ;;  %v3332_v21 = vpack.c.bf16 %v3300_v18, %v3299_v50  ;;  %v3553_v50 = vld [vmem:[%s6143_s10 + $0x53] sm:$0xff]  ;;  %v3554_v18 = vld [vmem:[%s6143_s10 + $0x5b] sm:$0xff] }
 0x306   : > { %v6524_v58 = vadd.f32 %v2720_v55, %v2524_v40 }
 0x307   : > { %5362 = vmatmul.msk.bf16.gmra.mxu0 %vm2599_vm1, %v3331_v2  ;;  %5386 = vmatmul.msk.bf16.gmra.mxu1 %vm2599_vm1, %v3583_v57  ;;  %v1951_v35 = vpop.f32.mrf.mxu2  ;;  %v2211_v36 = vpop.f32.mrf.mxu3 }
 0x308   : > { %v2005_v42 = vadd.f32 %v1951_v35, %v6202_v41 }
 0x30a   : > { %v2265_v25 = vadd.f32 %v2211_v36, %v2005_v42 }
 0x30c   : > { %v2473_v59 = vpop.f32.mrf.mxu0  ;;  %v2725_v45 = vpop.f32.mrf.mxu1  ;;  %v2525_v32 = vadd.f32 %v2471_v44, %v2265_v25  ;;  %v2797_v25 = vld [vmem:[%s6143_s10 + $0x41] sm:$0xff] }
 0x30e   : > { %v6531_v3 = vadd.f32 %v2723_v6, %v2525_v32  ;;  %v3301_v32 = vld [vmem:[%s6143_s10 + $0x52] sm:$0xff] }
 0x30f   : > { %v1953_v23 = vpop.f32.mrf.mxu2  ;;  %v2213_v31 = vpop.f32.mrf.mxu3 }
 0x310   : > { %v2006_v55 = vadd.f32 %v1953_v23, %v6211_v19 }
 0x312   : > { %v2266_v41 = vadd.f32 %v2213_v31, %v2006_v55  ;;  %v3585_v31 = vpack.c.bf16 %v3554_v18, %v3553_v50 }
 0x314   : > { %v2476_v22 = vpop.f32.mrf.mxu0  ;;  %v2728_v52 = vpop.f32.mrf.mxu1  ;;  %v2526_v43 = vadd.f32 %v2473_v59, %v2266_v41  ;;  %5315 = vmatmul.msk.bf16.gmra.mxu2 %vm2599_vm1, %v2828_v39  ;;  %5339 = vmatmul.msk.bf16.gmra.mxu3 %vm2599_vm1, %v3331_v2  ;;  %v2798_v59 = vld [vmem:[%s6143_s10 + $0x49] sm:$0xff]  ;;  %v3302_v2 = vld [vmem:[%s6143_s10 + $0x5a] sm:$0xff] }
 0x315   : > { %v2829_v1 = vpack.c.bf16 %v2798_v59, %v2797_v25  ;;  %v3333_v38 = vpack.c.bf16 %v3302_v2, %v3301_v32  ;;  %v3555_v32 = vld [vmem:[%s6143_s10 + $0x63] sm:$0xff]  ;;  %v3556_v2 = vld [vmem:[%s6143_s10 + $0x6b] sm:$0xff] }
 0x316   : > { %v6540_v19 = vadd.f32 %v2725_v45, %v2526_v43 }
 0x317   : > { %5363 = vmatmul.msk.bf16.gmra.mxu0 %vm2599_vm1, %v3332_v21  ;;  %5387 = vmatmul.msk.bf16.gmra.mxu1 %vm2599_vm1, %v3584_v14  ;;  %v1956_v44 = vpop.f32.mrf.mxu2  ;;  %v2216_v6 = vpop.f32.mrf.mxu3 }
 0x318   : > { %v2007_v57 = vadd.f32 %v1956_v44, %v6220_v54 }
 0x31a   : > { %v2267_v40 = vadd.f32 %v2216_v6, %v2007_v57 }
 0x31c   : > { %v2478_v35 = vpop.f32.mrf.mxu0  ;;  %v2730_v42 = vpop.f32.mrf.mxu1  ;;  %v2527_v36 = vadd.f32 %v2476_v22, %v2267_v40  ;;  %v2799_v40 = vld [vmem:[%s6143_s10 + $0x51] sm:$0xff] }
 0x31e   : > { %v6547_v53 = vadd.f32 %v2728_v52, %v2527_v36  ;;  %v3303_v36 = vld [vmem:[%s6143_s10 + $0x62] sm:$0xff] }
 0x31f   : > { %v1958_v10 = vpop.f32.mrf.mxu2  ;;  %v2218_v23 = vpop.f32.mrf.mxu3 }
 0x320   : > { %v2008_v45 = vadd.f32 %v1958_v10, %v6229_v47 }
 0x322   : > { %v2268_v54 = vadd.f32 %v2218_v23, %v2008_v45  ;;  %v3586_v23 = vpack.c.bf16 %v3556_v2, %v3555_v32 }
 0x324   : > { %v2481_v55 = vpop.f32.mrf.mxu0  ;;  %v2733_v39 = vpop.f32.mrf.mxu1  ;;  %v2528_v41 = vadd.f32 %v2478_v35, %v2268_v54  ;;  %5316 = vmatmul.msk.bf16.gmra.mxu2 %vm2599_vm1, %v2829_v1  ;;  %5340 = vmatmul.msk.bf16.gmra.mxu3 %vm2599_vm1, %v3332_v21  ;;  %v2800_v35 = vld [vmem:[%s6143_s10 + $0x59] sm:$0xff]  ;;  %v3304_v21 = vld [vmem:[%s6143_s10 + $0x6a] sm:$0xff] }
 0x325   : > { %v2830_v50 = vpack.c.bf16 %v2800_v35, %v2799_v40  ;;  %v3334_v18 = vpack.c.bf16 %v3304_v21, %v3303_v36  ;;  %v3557_v36 = vld [vmem:[%s6143_s10 + $0x73] sm:$0xff]  ;;  %v3558_v21 = vld [vmem:[%s6143_s10 + $0x7b] sm:$0xff] }
 0x326   : > { %v6556_v47 = vadd.f32 %v2730_v42, %v2528_v41 }
 0x327   : > { %5364 = vmatmul.msk.bf16.gmra.mxu0 %vm2599_vm1, %v3333_v38  ;;  %5388 = vmatmul.msk.bf16.gmra.mxu1 %vm2599_vm1, %v3585_v31  ;;  %v1961_v22 = vpop.f32.mrf.mxu2  ;;  %v2221_v52 = vpop.f32.mrf.mxu3 }
 0x328   : > { %v2009_v14 = vadd.f32 %v1961_v22, %v6238_v27 }
 0x32a   : > { %v2269_v43 = vadd.f32 %v2221_v52, %v2009_v14 }
 0x32c   : > { %v2483_v44 = vpop.f32.mrf.mxu0  ;;  %v2735_v57 = vpop.f32.mrf.mxu1  ;;  %v2529_v6 = vadd.f32 %v2481_v55, %v2269_v43  ;;  %v2801_v43 = vld [vmem:[%s6143_s10 + $0x61] sm:$0xff] }
 0x32e   : > { %v6563_v25 = vadd.f32 %v2733_v39, %v2529_v6  ;;  %v3305_v6 = vld [vmem:[%s6143_s10 + $0x72] sm:$0xff] }
 0x32f   : > { %v1963_v59 = vpop.f32.mrf.mxu2  ;;  %v2223_v10 = vpop.f32.mrf.mxu3 }
 0x330   : > { %v2010_v42 = vadd.f32 %v1963_v59, %v6247_v13 }
 0x332   : > { %v2270_v27 = vadd.f32 %v2223_v10, %v2010_v42  ;;  %v3587_v10 = vpack.c.bf16 %v3558_v21, %v3557_v36 }
 0x334   : > { %v2486_v45 = vpop.f32.mrf.mxu0  ;;  %v2738_v1 = vpop.f32.mrf.mxu1  ;;  %v2530_v54 = vadd.f32 %v2483_v44, %v2270_v27  ;;  %5317 = vmatmul.msk.bf16.gmra.mxu2 %vm2599_vm1, %v2830_v50  ;;  %5341 = vmatmul.msk.bf16.gmra.mxu3 %vm2599_vm1, %v3333_v38  ;;  %v2802_v44 = vld [vmem:[%s6143_s10 + $0x69] sm:$0xff]  ;;  %v3306_v38 = vld [vmem:[%s6143_s10 + $0x7a] sm:$0xff] }
 0x335   : > { %v2831_v32 = vpack.c.bf16 %v2802_v44, %v2801_v43  ;;  %v3335_v2 = vpack.c.bf16 %v3306_v38, %v3305_v6  ;;  %v3559_v6 = vld [vmem:[%s6143_s10 + $0x83] sm:$0xff]  ;;  %v3560_v38 = vld [vmem:[%s6143_s10 + $0x8b] sm:$0xff] }
 0x336   : > { %v6572_v13 = vadd.f32 %v2735_v57, %v2530_v54 }
 0x337   : > { %5365 = vmatmul.msk.bf16.gmra.mxu0 %vm2599_vm1, %v3334_v18  ;;  %5389 = vmatmul.msk.bf16.gmra.mxu1 %vm2599_vm1, %v3586_v23  ;;  %v1966_v55 = vpop.f32.mrf.mxu2  ;;  %v2226_v39 = vpop.f32.mrf.mxu3 }
 0x338   : > { %v2011_v31 = vadd.f32 %v1966_v55, %v6256_v7 }
 0x33a   : > { %v2271_v41 = vadd.f32 %v2226_v39, %v2011_v31 }
 0x33c   : > { %v2488_v22 = vpop.f32.mrf.mxu0  ;;  %v2740_v14 = vpop.f32.mrf.mxu1  ;;  %v2531_v52 = vadd.f32 %v2486_v45, %v2271_v41  ;;  %v2803_v41 = vld [vmem:[%s6143_s10 + $0x71] sm:$0xff] }
 0x33e   : > { %v6579_v40 = vadd.f32 %v2738_v1, %v2531_v52  ;;  %v3307_v52 = vld [vmem:[%s6143_s10 + $0x82] sm:$0xff] }
 0x33f   : > { %v1968_v35 = vpop.f32.mrf.mxu2  ;;  %v2228_v59 = vpop.f32.mrf.mxu3 }
 0x340   : > { %v2012_v57 = vadd.f32 %v1968_v35, %v6265_v48 }
 0x342   : > { %v2272_v7 = vadd.f32 %v2228_v59, %v2012_v57  ;;  %v3588_v59 = vpack.c.bf16 %v3560_v38, %v3559_v6 }
 0x344   : > { %v2491_v42 = vpop.f32.mrf.mxu0  ;;  %v2743_v50 = vpop.f32.mrf.mxu1  ;;  %v2532_v27 = vadd.f32 %v2488_v22, %v2272_v7  ;;  %5318 = vmatmul.msk.bf16.gmra.mxu2 %vm2599_vm1, %v2831_v32  ;;  %5342 = vmatmul.msk.bf16.gmra.mxu3 %vm2599_vm1, %v3334_v18  ;;  %v2804_v22 = vld [vmem:[%s6143_s10 + $0x79] sm:$0xff]  ;;  %v3308_v18 = vld [vmem:[%s6143_s10 + $0x8a] sm:$0xff] }
 0x345   : > { %v2832_v36 = vpack.c.bf16 %v2804_v22, %v2803_v41  ;;  %v3336_v21 = vpack.c.bf16 %v3308_v18, %v3307_v52  ;;  %v3561_v52 = vld [vmem:[%s6143_s10 + $0x93] sm:$0xff]  ;;  %v3562_v18 = vld [vmem:[%s6143_s10 + $0x9b] sm:$0xff] }
 0x346   : > { %v6588_v48 = vadd.f32 %v2740_v14, %v2532_v27 }
 0x347   : > { %5366 = vmatmul.msk.bf16.gmra.mxu0 %vm2599_vm1, %v3335_v2  ;;  %5390 = vmatmul.msk.bf16.gmra.mxu1 %vm2599_vm1, %v3587_v10  ;;  %v1971_v45 = vpop.f32.mrf.mxu2  ;;  %v2231_v1 = vpop.f32.mrf.mxu3 }
 0x348   : > { %v2013_v23 = vadd.f32 %v1971_v45, %v6274_v15 }
 0x34a   : > { %v2273_v54 = vadd.f32 %v2231_v1, %v2013_v23 }
 0x34c   : > { %v2493_v55 = vpop.f32.mrf.mxu0  ;;  %v2745_v31 = vpop.f32.mrf.mxu1  ;;  %v2533_v39 = vadd.f32 %v2491_v42, %v2273_v54  ;;  %v2805_v54 = vld [vmem:[%s6143_s10 + $0x81] sm:$0xff] }
 0x34e   : > { %v6595_v43 = vadd.f32 %v2743_v50, %v2533_v39  ;;  %v3309_v39 = vld [vmem:[%s6143_s10 + $0x92] sm:$0xff] }
 0x34f   : > { %v1973_v44 = vpop.f32.mrf.mxu2  ;;  %v2233_v35 = vpop.f32.mrf.mxu3 }
 0x350   : > { %v2014_v14 = vadd.f32 %v1973_v44, %v6283_v20 }
 0x352   : > { %v2274_v15 = vadd.f32 %v2233_v35, %v2014_v14  ;;  %v3589_v35 = vpack.c.bf16 %v3562_v18, %v3561_v52 }
 0x354   : > { %v2496_v57 = vpop.f32.mrf.mxu0  ;;  %v2748_v32 = vpop.f32.mrf.mxu1  ;;  %v2534_v7 = vadd.f32 %v2493_v55, %v2274_v15  ;;  %5319 = vmatmul.msk.bf16.gmra.mxu2 %vm2599_vm1, %v2832_v36  ;;  %5343 = vmatmul.msk.bf16.gmra.mxu3 %vm2599_vm1, %v3335_v2  ;;  %v2806_v55 = vld [vmem:[%s6143_s10 + $0x89] sm:$0xff]  ;;  %v3310_v2 = vld [vmem:[%s6143_s10 + $0x9a] sm:$0xff] }
 0x355   : > { %v2833_v6 = vpack.c.bf16 %v2806_v55, %v2805_v54  ;;  %v3337_v38 = vpack.c.bf16 %v3310_v2, %v3309_v39  ;;  %v3563_v39 = vld [vmem:[%s6143_s10 + $0xa3] sm:$0xff]  ;;  %v3564_v2 = vld [vmem:[%s6143_s10 + $0xab] sm:$0xff] }
 0x356   : > { %v6604_v20 = vadd.f32 %v2745_v31, %v2534_v7 }
 0x357   : > { %5367 = vmatmul.msk.bf16.gmra.mxu0 %vm2599_vm1, %v3336_v21  ;;  %5391 = vmatmul.msk.bf16.gmra.mxu1 %vm2599_vm1, %v3588_v59  ;;  %v1976_v42 = vpop.f32.mrf.mxu2  ;;  %v2236_v50 = vpop.f32.mrf.mxu3 }
 0x358   : > { %v2015_v10 = vadd.f32 %v1976_v42, %v6292_v26 }
 0x35a   : > { %v2275_v27 = vadd.f32 %v2236_v50, %v2015_v10 }
 0x35c   : > { %v2498_v45 = vpop.f32.mrf.mxu0  ;;  %v2750_v23 = vpop.f32.mrf.mxu1  ;;  %v2535_v1 = vadd.f32 %v2496_v57, %v2275_v27  ;;  %v2807_v27 = vld [vmem:[%s6143_s10 + $0x91] sm:$0xff] }
 0x35e   : > { %v6611_v41 = vadd.f32 %v2748_v32, %v2535_v1  ;;  %v3311_v1 = vld [vmem:[%s6143_s10 + $0xa2] sm:$0xff] }
 0x35f   : > { %v1978_v22 = vpop.f32.mrf.mxu2  ;;  %v2238_v44 = vpop.f32.mrf.mxu3 }
 0x360   : > { %v2016_v31 = vadd.f32 %v1978_v22, %v6301_v11 }
 0x362   : > { %v2276_v26 = vadd.f32 %v2238_v44, %v2016_v31  ;;  %v3590_v44 = vpack.c.bf16 %v3564_v2, %v3563_v39 }
 0x364   : > { %v3419_v14 = vpop.f32.mrf.mxu0  ;;  %v3671_v36 = vpop.f32.mrf.mxu1  ;;  %v2536_v15 = vadd.f32 %v2498_v45, %v2276_v26  ;;  %5320 = vmatmul.msk.bf16.gmra.mxu2 %vm2599_vm1, %v2833_v6  ;;  %5344 = vmatmul.msk.bf16.gmra.mxu3 %vm2599_vm1, %v3336_v21  ;;  %v2808_v45 = vld [vmem:[%s6143_s10 + $0x99] sm:$0xff]  ;;  %v3312_v21 = vld [vmem:[%s6143_s10 + $0xaa] sm:$0xff] }
 0x365   : > { %v2834_v52 = vpack.c.bf16 %v2808_v45, %v2807_v27  ;;  %v3338_v18 = vpack.c.bf16 %v3312_v21, %v3311_v1  ;;  %v3565_v1 = vld [vmem:[%s6143_s10 + $0xb3] sm:$0xff]  ;;  %v3566_v21 = vld [vmem:[%s6143_s10 + $0xbb] sm:$0xff] }
 0x366   : > { %v6620_v11 = vadd.f32 %v2750_v23, %v2536_v15 }
 0x367   : > { %5368 = vmatmul.msk.bf16.gmra.mxu0 %vm2599_vm1, %v3337_v38  ;;  %5392 = vmatmul.msk.bf16.gmra.mxu1 %vm2599_vm1, %v3589_v35  ;;  %v2915_v57 = vpop.f32.mrf.mxu2  ;;  %v3167_v32 = vpop.f32.mrf.mxu3 }
 0x368   : > { %v3005_v59 = vadd.f32 %v2915_v57, %v6308_v63 }
 0x36a   : > { %v3257_v7 = vadd.f32 %v3167_v32, %v3005_v59 }
 0x36c   : > { %v3421_v42 = vpop.f32.mrf.mxu0  ;;  %v3673_v10 = vpop.f32.mrf.mxu1  ;;  %v3509_v50 = vadd.f32 %v3419_v14, %v3257_v7  ;;  %v2809_v7 = vld [vmem:[%s6143_s10 + $0xa1] sm:$0xff] }
 0x36e   : > { %v6627_v54 = vadd.f32 %v3671_v36, %v3509_v50  ;;  %v3313_v50 = vld [vmem:[%s6143_s10 + $0xb2] sm:$0xff] }
 0x36f   : > { %v2917_v55 = vpop.f32.mrf.mxu2  ;;  %v3169_v22 = vpop.f32.mrf.mxu3 }
 0x370   : > { %v3006_v23 = vadd.f32 %v2917_v55, %v6318_v4 }
 0x372   : > { %v3258_v63 = vadd.f32 %v3169_v22, %v3006_v23  ;;  %v3591_v22 = vpack.c.bf16 %v3566_v21, %v3565_v1 }
 0x374   : > { %v3424_v31 = vpop.f32.mrf.mxu0  ;;  %v3676_v6 = vpop.f32.mrf.mxu1  ;;  %v3510_v26 = vadd.f32 %v3421_v42, %v3258_v63  ;;  %5321 = vmatmul.msk.bf16.gmra.mxu2 %vm2599_vm1, %v2834_v52  ;;  %5345 = vmatmul.msk.bf16.gmra.mxu3 %vm2599_vm1, %v3337_v38  ;;  %v2810_v42 = vld [vmem:[%s6143_s10 + $0xa9] sm:$0xff]  ;;  %v3314_v38 = vld [vmem:[%s6143_s10 + $0xba] sm:$0xff] }
 0x375   : > { %v2835_v39 = vpack.c.bf16 %v2810_v42, %v2809_v7  ;;  %v3339_v2 = vpack.c.bf16 %v3314_v38, %v3313_v50  ;;  %v3567_v50 = vld [vmem:[%s6143_s10 + $0xc3] sm:$0xff]  ;;  %v3568_v38 = vld [vmem:[%s6143_s10 + $0xcb] sm:$0xff] }
 0x376   : > { %v6636_v4 = vadd.f32 %v3673_v10, %v3510_v26 }
 0x377   : > { %5369 = vmatmul.msk.bf16.gmra.mxu0 %vm2599_vm1, %v3338_v18  ;;  %5393 = vmatmul.msk.bf16.gmra.mxu1 %vm2599_vm1, %v3590_v44  ;;  %v2920_v14 = vpop.f32.mrf.mxu2  ;;  %v3172_v36 = vpop.f32.mrf.mxu3 }
 0x378   : > { %v3007_v35 = vadd.f32 %v2920_v14, %v6327_v8 }
 0x37a   : > { %v3259_v15 = vadd.f32 %v3172_v36, %v3007_v35 }
 0x37c   : > { %v3426_v57 = vpop.f32.mrf.mxu0  ;;  %v3678_v59 = vpop.f32.mrf.mxu1  ;;  %v3511_v32 = vadd.f32 %v3424_v31, %v3259_v15  ;;  %v2811_v15 = vld [vmem:[%s6143_s10 + $0xb1] sm:$0xff] }
 0x37e   : > { %v6643_v27 = vadd.f32 %v3676_v6, %v3511_v32  ;;  %v3315_v32 = vld [vmem:[%s6143_s10 + $0xc2] sm:$0xff] }
 0x37f   : > { %v2922_v45 = vpop.f32.mrf.mxu2  ;;  %v3174_v55 = vpop.f32.mrf.mxu3 }
 0x380   : > { %v3008_v10 = vadd.f32 %v2922_v45, %v6336_v28 }
 0x382   : > { %v3260_v8 = vadd.f32 %v3174_v55, %v3008_v10  ;;  %v3592_v55 = vpack.c.bf16 %v3568_v38, %v3567_v50 }
 0x384   : > { %v3429_v23 = vpop.f32.mrf.mxu0  ;;  %v3681_v52 = vpop.f32.mrf.mxu1  ;;  %v3512_v63 = vadd.f32 %v3426_v57, %v3260_v8  ;;  %5322 = vmatmul.msk.bf16.gmra.mxu2 %vm2599_vm1, %v2835_v39  ;;  %5346 = vmatmul.msk.bf16.gmra.mxu3 %vm2599_vm1, %v3338_v18  ;;  %v2812_v57 = vld [vmem:[%s6143_s10 + $0xb9] sm:$0xff]  ;;  %v3316_v18 = vld [vmem:[%s6143_s10 + $0xca] sm:$0xff] }
 0x385   : > { %v2836_v1 = vpack.c.bf16 %v2812_v57, %v2811_v15  ;;  %v3340_v21 = vpack.c.bf16 %v3316_v18, %v3315_v32  ;;  %v3569_v32 = vld [vmem:[%s6143_s10 + $0xd3] sm:$0xff]  ;;  %v3570_v18 = vld [vmem:[%s6143_s10 + $0xdb] sm:$0xff] }
 0x386   : > { %v6652_v28 = vadd.f32 %v3678_v59, %v3512_v63 }
 0x387   : > { %5370 = vmatmul.msk.bf16.gmra.mxu0 %vm2599_vm1, %v3339_v2  ;;  %5394 = vmatmul.msk.bf16.gmra.mxu1 %vm2599_vm1, %v3591_v22  ;;  %v2925_v31 = vpop.f32.mrf.mxu2  ;;  %v3177_v6 = vpop.f32.mrf.mxu3 }
 0x388   : > { %v3009_v44 = vadd.f32 %v2925_v31, %v6345_v60 }
 0x38a   : > { %v3261_v26 = vadd.f32 %v3177_v6, %v3009_v44 }
 0x38c   : > { %v3431_v14 = vpop.f32.mrf.mxu0  ;;  %v3683_v35 = vpop.f32.mrf.mxu1  ;;  %v3513_v36 = vadd.f32 %v3429_v23, %v3261_v26  ;;  %v2813_v26 = vld [vmem:[%s6143_s10 + $0xc1] sm:$0xff] }
 0x38e   : > { %v6659_v7 = vadd.f32 %v3681_v52, %v3513_v36  ;;  %v3317_v36 = vld [vmem:[%s6143_s10 + $0xd2] sm:$0xff] }
 0x38f   : > { %v2927_v42 = vpop.f32.mrf.mxu2  ;;  %v3179_v45 = vpop.f32.mrf.mxu3 }
 0x390   : > { %v3010_v59 = vadd.f32 %v2927_v42, %v6354_v49 }
 0x392   : > { %v3262_v60 = vadd.f32 %v3179_v45, %v3010_v59  ;;  %v3593_v45 = vpack.c.bf16 %v3570_v18, %v3569_v32 }
 0x394   : > { %v3434_v10 = vpop.f32.mrf.mxu0  ;;  %v3686_v39 = vpop.f32.mrf.mxu1  ;;  %v3514_v8 = vadd.f32 %v3431_v14, %v3262_v60  ;;  %5323 = vmatmul.msk.bf16.gmra.mxu2 %vm2599_vm1, %v2836_v1  ;;  %5347 = vmatmul.msk.bf16.gmra.mxu3 %vm2599_vm1, %v3339_v2  ;;  %v2814_v14 = vld [vmem:[%s6143_s10 + $0xc9] sm:$0xff]  ;;  %v3318_v2 = vld [vmem:[%s6143_s10 + $0xda] sm:$0xff] }
 0x395   : > { %v2837_v50 = vpack.c.bf16 %v2814_v14, %v2813_v26  ;;  %v3341_v38 = vpack.c.bf16 %v3318_v2, %v3317_v36  ;;  %v3571_v36 = vld [vmem:[%s6143_s10 + $0xe3] sm:$0xff]  ;;  %v3572_v2 = vld [vmem:[%s6143_s10 + $0xeb] sm:$0xff] }
 0x396   : > { %v6668_v49 = vadd.f32 %v3683_v35, %v3514_v8 }
 0x397   : > { %5371 = vmatmul.msk.bf16.gmra.mxu0 %vm2599_vm1, %v3340_v21  ;;  %5395 = vmatmul.msk.bf16.gmra.mxu1 %vm2599_vm1, %v3592_v55  ;;  %v2930_v23 = vpop.f32.mrf.mxu2  ;;  %v3182_v52 = vpop.f32.mrf.mxu3 }
 0x398   : > { %v3011_v22 = vadd.f32 %v2930_v23, %v6363_v30 }
 0x39a   : > { %v3263_v63 = vadd.f32 %v3182_v52, %v3011_v22 }
 0x39c   : > { %v3436_v31 = vpop.f32.mrf.mxu0  ;;  %v3688_v44 = vpop.f32.mrf.mxu1  ;;  %v3515_v6 = vadd.f32 %v3434_v10, %v3263_v63  ;;  %v2815_v63 = vld [vmem:[%s6143_s10 + $0xd1] sm:$0xff] }
 0x39e   : > { %v6675_v15 = vadd.f32 %v3686_v39, %v3515_v6  ;;  %v3319_v6 = vld [vmem:[%s6143_s10 + $0xe2] sm:$0xff] }
 0x39f   : > { %v2932_v57 = vpop.f32.mrf.mxu2  ;;  %v3184_v42 = vpop.f32.mrf.mxu3 }
 0x3a0   : > { %v3012_v35 = vadd.f32 %v2932_v57, %v6372_v9 }
 0x3a2   : > { %v3264_v30 = vadd.f32 %v3184_v42, %v3012_v35  ;;  %v3594_v42 = vpack.c.bf16 %v3572_v2, %v3571_v36 }
 0x3a4   : > { %v3439_v59 = vpop.f32.mrf.mxu0  ;;  %v3691_v1 = vpop.f32.mrf.mxu1  ;;  %v3516_v60 = vadd.f32 %v3436_v31, %v3264_v30  ;;  %5324 = vmatmul.msk.bf16.gmra.mxu2 %vm2599_vm1, %v2837_v50  ;;  %5348 = vmatmul.msk.bf16.gmra.mxu3 %vm2599_vm1, %v3340_v21  ;;  %v2816_v31 = vld [vmem:[%s6143_s10 + $0xd9] sm:$0xff]  ;;  %v3320_v21 = vld [vmem:[%s6143_s10 + $0xea] sm:$0xff] }
 0x3a5   : > { %v2838_v32 = vpack.c.bf16 %v2816_v31, %v2815_v63  ;;  %v3342_v18 = vpack.c.bf16 %v3320_v21, %v3319_v6  ;;  %v3573_v6 = vld [vmem:[%s6143_s10 + $0xf3] sm:$0xff]  ;;  %v3574_v21 = vld [vmem:[%s6143_s10 + $0xfb] sm:$0xff] }
 0x3a6   : > { %v6684_v9 = vadd.f32 %v3688_v44, %v3516_v60 }
 0x3a7   : > { %5372 = vmatmul.msk.bf16.gmra.mxu0 %vm2599_vm1, %v3341_v38  ;;  %5396 = vmatmul.msk.bf16.gmra.mxu1 %vm2599_vm1, %v3593_v45  ;;  %v2935_v10 = vpop.f32.mrf.mxu2  ;;  %v3187_v39 = vpop.f32.mrf.mxu3 }
 0x3a8   : > { %v3013_v55 = vadd.f32 %v2935_v10, %v6381_v24 }
 0x3aa   : > { %v3265_v8 = vadd.f32 %v3187_v39, %v3013_v55 }
 0x3ac   : > { %v3441_v23 = vpop.f32.mrf.mxu0  ;;  %v3693_v22 = vpop.f32.mrf.mxu1  ;;  %v3517_v52 = vadd.f32 %v3439_v59, %v3265_v8  ;;  %v2817_v8 = vld [vmem:[%s6143_s10 + $0xe1] sm:$0xff] }
 0x3ae   : > { %v6691_v26 = vadd.f32 %v3691_v1, %v3517_v52  ;;  %v3321_v52 = vld [vmem:[%s6143_s10 + $0xf2] sm:$0xff] }
 0x3af   : > { %v2937_v14 = vpop.f32.mrf.mxu2  ;;  %v3189_v57 = vpop.f32.mrf.mxu3 }
 0x3b0   : > { %v3014_v44 = vadd.f32 %v2937_v14, %v6390_v34 }
 0x3b2   : > { %v3266_v24 = vadd.f32 %v3189_v57, %v3014_v44  ;;  %v3595_v57 = vpack.c.bf16 %v3574_v21, %v3573_v6 }
 0x3b4   : > { %v3444_v35 = vpop.f32.mrf.mxu0  ;;  %v3696_v50 = vpop.f32.mrf.mxu1  ;;  %v3518_v30 = vadd.f32 %v3441_v23, %v3266_v24  ;;  %5325 = vmatmul.msk.bf16.gmra.mxu2 %vm2599_vm1, %v2838_v32  ;;  %5349 = vmatmul.msk.bf16.gmra.mxu3 %vm2599_vm1, %v3341_v38  ;;  %v2818_v23 = vld [vmem:[%s6143_s10 + $0xe9] sm:$0xff]  ;;  %v3322_v38 = vld [vmem:[%s6143_s10 + $0xfa] sm:$0xff] }
 0x3b5   : > { %v2839_v36 = vpack.c.bf16 %v2818_v23, %v2817_v8  ;;  %v3343_v2 = vpack.c.bf16 %v3322_v38, %v3321_v52  ;;  %v3575_v52 = vld [vmem:[%s6143_s10 + $0x103] sm:$0xff]  ;;  %v3576_v38 = vld [vmem:[%s6143_s10 + $0x10b] sm:$0xff] }
 0x3b6   : > { %v6700_v34 = vadd.f32 %v3693_v22, %v3518_v30 }
 0x3b7   : > { %5373 = vmatmul.msk.bf16.gmra.mxu0 %vm2599_vm1, %v3342_v18  ;;  %5397 = vmatmul.msk.bf16.gmra.mxu1 %vm2599_vm1, %v3594_v42  ;;  %v2940_v59 = vpop.f32.mrf.mxu2  ;;  %v3192_v1 = vpop.f32.mrf.mxu3 }
 0x3b8   : > { %v3015_v45 = vadd.f32 %v2940_v59, %v6399_v17 }
 0x3ba   : > { %v3267_v60 = vadd.f32 %v3192_v1, %v3015_v45 }
 0x3bc   : > { %v3446_v10 = vpop.f32.mrf.mxu0  ;;  %v3698_v55 = vpop.f32.mrf.mxu1  ;;  %v3519_v39 = vadd.f32 %v3444_v35, %v3267_v60  ;;  %v2819_v60 = vld [vmem:[%s6143_s10 + $0xf1] sm:$0xff] }
 0x3be   : > { %v6707_v63 = vadd.f32 %v3696_v50, %v3519_v39  ;;  %v3323_v39 = vld [vmem:[%s6143_s10 + $0x102] sm:$0xff] }
 0x3bf   : > { %v2942_v31 = vpop.f32.mrf.mxu2  ;;  %v3194_v14 = vpop.f32.mrf.mxu3 }
 0x3c0   : > { %v3016_v22 = vadd.f32 %v2942_v31, %v6408_v61 }
 0x3c2   : > { %v3268_v17 = vadd.f32 %v3194_v14, %v3016_v22  ;;  %v3596_v14 = vpack.c.bf16 %v3576_v38, %v3575_v52 }
 0x3c4   : > { %v3449_v44 = vpop.f32.mrf.mxu0  ;;  %v3701_v32 = vpop.f32.mrf.mxu1  ;;  %v3520_v24 = vadd.f32 %v3446_v10, %v3268_v17  ;;  %5326 = vmatmul.msk.bf16.gmra.mxu2 %vm2599_vm1, %v2839_v36  ;;  %5350 = vmatmul.msk.bf16.gmra.mxu3 %vm2599_vm1, %v3342_v18  ;;  %v2820_v10 = vld [vmem:[%s6143_s10 + $0xf9] sm:$0xff]  ;;  %v3324_v18 = vld [vmem:[%s6143_s10 + $0x10a] sm:$0xff] }
 0x3c5   : > { %v2840_v6 = vpack.c.bf16 %v2820_v10, %v2819_v60  ;;  %v3344_v21 = vpack.c.bf16 %v3324_v18, %v3323_v39  ;;  %v3577_v39 = vld [vmem:[%s6143_s10 + $0x113] sm:$0xff]  ;;  %v3578_v18 = vld [vmem:[%s6143_s10 + $0x11b] sm:$0xff] }
 0x3c6   : > { %v6716_v61 = vadd.f32 %v3698_v55, %v3520_v24 }
 0x3c7   : > { %5374 = vmatmul.msk.bf16.gmra.mxu0 %vm2599_vm1, %v3343_v2  ;;  %5398 = vmatmul.msk.bf16.gmra.mxu1 %vm2599_vm1, %v3595_v57  ;;  %v2945_v35 = vpop.f32.mrf.mxu2  ;;  %v3197_v50 = vpop.f32.mrf.mxu3 }
 0x3c8   : > { %v3017_v42 = vadd.f32 %v2945_v35, %v6417_v56 }
 0x3ca   : > { %v3269_v30 = vadd.f32 %v3197_v50, %v3017_v42 }
 0x3cc   : > { %v3451_v59 = vpop.f32.mrf.mxu0  ;;  %v3703_v45 = vpop.f32.mrf.mxu1  ;;  %v3521_v1 = vadd.f32 %v3449_v44, %v3269_v30  ;;  %v2821_v30 = vld [vmem:[%s6143_s10 + $0x101] sm:$0xff] }
 0x3ce   : > { %v6723_v8 = vadd.f32 %v3701_v32, %v3521_v1  ;;  %v3325_v1 = vld [vmem:[%s6143_s10 + $0x112] sm:$0xff] }
 0x3cf   : > { %v2947_v23 = vpop.f32.mrf.mxu2  ;;  %v3199_v31 = vpop.f32.mrf.mxu3 }
 0x3d0   : > { %v3018_v55 = vadd.f32 %v2947_v23, %v6426_v33 }
 0x3d2   : > { %v3270_v56 = vadd.f32 %v3199_v31, %v3018_v55  ;;  %v3597_v31 = vpack.c.bf16 %v3578_v18, %v3577_v39 }
 0x3d4   : > { %v3454_v22 = vpop.f32.mrf.mxu0  ;;  %v3706_v36 = vpop.f32.mrf.mxu1  ;;  %v3522_v17 = vadd.f32 %v3451_v59, %v3270_v56  ;;  %5327 = vmatmul.msk.bf16.gmra.mxu2 %vm2599_vm1, %v2840_v6  ;;  %5351 = vmatmul.msk.bf16.gmra.mxu3 %vm2599_vm1, %v3343_v2  ;;  %v2822_v59 = vld [vmem:[%s6143_s10 + $0x109] sm:$0xff]  ;;  %v3326_v2 = vld [vmem:[%s6143_s10 + $0x11a] sm:$0xff] }
 0x3d5   : > { %v2841_v52 = vpack.c.bf16 %v2822_v59, %v2821_v30  ;;  %v3345_v38 = vpack.c.bf16 %v3326_v2, %v3325_v1  ;;  %v3579_v1 = vld [vmem:[%s6143_s10 + $0x123] sm:$0xff]  ;;  %v3580_v2 = vld [vmem:[%s6143_s10 + $0x12b] sm:$0xff] }
 0x3d6   : > { %v6732_v33 = vadd.f32 %v3703_v45, %v3522_v17 }
 0x3d7   : > { %5375 = vmatmul.msk.bf16.gmra.mxu0 %vm2599_vm1, %v3344_v21  ;;  %5399 = vmatmul.msk.bf16.gmra.mxu1 %vm2599_vm1, %v3596_v14  ;;  %v2950_v44 = vpop.f32.mrf.mxu2  ;;  %v3202_v32 = vpop.f32.mrf.mxu3 }
 0x3d8   : > { %v3019_v57 = vadd.f32 %v2950_v44, %v6435_v46 }
 0x3da   : > { %v3271_v24 = vadd.f32 %v3202_v32, %v3019_v57 }
 0x3dc   : > { %v3456_v35 = vpop.f32.mrf.mxu0  ;;  %v3708_v42 = vpop.f32.mrf.mxu1  ;;  %v3523_v50 = vadd.f32 %v3454_v22, %v3271_v24  ;;  %v2823_v24 = vld [vmem:[%s6143_s10 + $0x111] sm:$0xff] }
 0x3de   : > { %v6739_v60 = vadd.f32 %v3706_v36, %v3523_v50  ;;  %v3327_v50 = vld [vmem:[%s6143_s10 + $0x122] sm:$0xff] }
 0x3df   : > { %v2952_v10 = vpop.f32.mrf.mxu2  ;;  %v3204_v23 = vpop.f32.mrf.mxu3 }
 0x3e0   : > { %v3020_v45 = vadd.f32 %v2952_v10, %v6450_v62 }
 0x3e2   : > { %v3272_v46 = vadd.f32 %v3204_v23, %v3020_v45  ;;  %v3598_v23 = vpack.c.bf16 %v3580_v2, %v3579_v1 }
 0x3e4   : > { %v3459_v55 = vpop.f32.mrf.mxu0  ;;  %v3711_v6 = vpop.f32.mrf.mxu1  ;;  %v3524_v56 = vadd.f32 %v3456_v35, %v3272_v46  ;;  %5328 = vmatmul.msk.bf16.gmra.mxu2 %vm2599_vm1, %v2841_v52  ;;  %5352 = vmatmul.msk.bf16.gmra.mxu3 %vm2599_vm1, %v3344_v21  ;;  %v2824_v35 = vld [vmem:[%s6143_s10 + $0x119] sm:$0xff]  ;;  %v3328_v21 = vld [vmem:[%s6143_s10 + $0x12a] sm:$0xff] }
 0x3e5   : > { %v2842_v39 = vpack.c.bf16 %v2824_v35, %v2823_v24  ;;  %v3346_v18 = vpack.c.bf16 %v3328_v21, %v3327_v50  ;;  %v4301_v24 = vld [vmem:[%s6143_s10 + $0x25] sm:$0xff]  ;;  %v4302_v35 = vld [vmem:[%s6143_s10 + $0x2d] sm:$0xff] }
 0x3e6   : > { %v6748_v62 = vadd.f32 %v3708_v42, %v3524_v56  ;;  %v4553_v21 = vld [vmem:[%s6143_s10 + $0x26] sm:$0xff] }
 0x3e7   : > { %5376 = vmatmul.msk.bf16.gmra.mxu0 %vm2599_vm1, %v3345_v38  ;;  %5400 = vmatmul.msk.bf16.gmra.mxu1 %vm2599_vm1, %v3597_v31  ;;  %v2955_v22 = vpop.f32.mrf.mxu2  ;;  %v3207_v36 = vpop.f32.mrf.mxu3 }
 0x3e8   : > { %v3021_v14 = vadd.f32 %v2955_v22, %v6462_v0 }
 0x3ea   : > { %v3273_v17 = vadd.f32 %v3207_v36, %v3021_v14 }
 0x3ec   : > { %v3461_v44 = vpop.f32.mrf.mxu0  ;;  %v3713_v57 = vpop.f32.mrf.mxu1  ;;  %v3525_v32 = vadd.f32 %v3459_v55, %v3273_v17  ;;  %v3797_v17 = vld [vmem:[%s6143_s10 + $0x14] sm:$0xff] }
 0x3ee   : > { %v6755_v30 = vadd.f32 %v3711_v6, %v3525_v32  ;;  %v4050_v32 = vld [vmem:[%s6143_s10 + $0x2c] sm:$0xff] }
 0x3ef   : > { %v2957_v59 = vpop.f32.mrf.mxu2  ;;  %v3209_v10 = vpop.f32.mrf.mxu3 }
 0x3f0   : > { %v3022_v42 = vadd.f32 %v2957_v59, %v6474_v51  ;;  %v4554_v59 = vld [vmem:[%s6143_s10 + $0x2e] sm:$0xff] }
 0x3f2   : > { %v3274_v0 = vadd.f32 %v3209_v10, %v3022_v42  ;;  %v4337_v10 = vpack.c.bf16 %v4302_v35, %v4301_v24  ;;  %v4555_v35 = vld [vmem:[%s6143_s10 + $0x36] sm:$0xff] }
 0x3f4   : > { %v3464_v45 = vpop.f32.mrf.mxu0  ;;  %v3716_v52 = vpop.f32.mrf.mxu1  ;;  %v3526_v46 = vadd.f32 %v3461_v44, %v3274_v0  ;;  %5329 = vmatmul.msk.bf16.gmra.mxu2 %vm2599_vm1, %v2842_v39  ;;  %5353 = vmatmul.msk.bf16.gmra.mxu3 %vm2599_vm1, %v3345_v38  ;;  %v3798_v44 = vld [vmem:[%s6143_s10 + $0x1c] sm:$0xff]  ;;  %v4049_v38 = vld [vmem:[%s6143_s10 + $0x24] sm:$0xff]  ;;  %v4589_v0 = vpack.c.bf16 %v4554_v59, %v4553_v21 }
 0x3f5   : > { %v4085_v42 = vpack.c.bf16 %v4050_v32, %v4049_v38  ;;  %v4304_v38 = vld [vmem:[%s6143_s10 + $0x3d] sm:$0xff] }
 0x3f6   : > { %v6764_v51 = vadd.f32 %v3713_v57, %v3526_v46 }
 0x3f7   : > { %5377 = vmatmul.msk.bf16.gmra.mxu0 %vm2599_vm1, %v3346_v18  ;;  %5401 = vmatmul.msk.bf16.gmra.mxu1 %vm2599_vm1, %v3598_v23  ;;  %v2960_v55 = vpop.f32.mrf.mxu2  ;;  %v3212_v6 = vpop.f32.mrf.mxu3 }
 0x3f8   : > { %v3023_v31 = vadd.f32 %v2960_v55, %v6483_v5  ;;  %v3833_v5 = vpack.c.bf16 %v3798_v44, %v3797_v17  ;;  %v4052_v17 = vld [vmem:[%s6143_s10 + $0x3c] sm:$0xff] }
 0x3f9   : > { %v4303_v44 = vld [vmem:[%s6143_s10 + $0x35] sm:$0xff] }
 0x3fa   : > { %v3275_v56 = vadd.f32 %v3212_v6, %v3023_v31 }
 0x3fc   : > { %v3466_v22 = vpop.f32.mrf.mxu0  ;;  %v3718_v14 = vpop.f32.mrf.mxu1  ;;  %v3527_v36 = vadd.f32 %v3464_v45, %v3275_v56 }
 0x3fe   : > { %v6773_v50 = vadd.f32 %v3716_v52, %v3527_v36  ;;  %v4051_v36 = vld [vmem:[%s6143_s10 + $0x34] sm:$0xff] }
 0x3ff   : > { %v2962_v57 = vpop.f32.mrf.mxu2  ;;  %v3214_v2 = vpop.f32.mrf.mxu3  ;;  %v4086_v59 = vpack.c.bf16 %v4052_v17, %v4051_v36 }
 0x400   : > { %v3024_v1 = vadd.f32 %v2962_v57, %v6492_v16  ;;  %v4556_v57 = vld [vmem:[%s6143_s10 + $0x3e] sm:$0xff] }
 0x402   : > { %v3276_v39 = vadd.f32 %v3214_v2, %v3024_v1  ;;  %v4338_v1 = vpack.c.bf16 %v4304_v38, %v4303_v44  ;;  %v4557_v44 = vld [vmem:[%s6143_s10 + $0x46] sm:$0xff]  ;;  %v4558_v38 = vld [vmem:[%s6143_s10 + $0x4e] sm:$0xff] }
 0x404   : > { %v3469_v18 = vpop.f32.mrf.mxu0  ;;  %v3721_v45 = vpop.f32.mrf.mxu1  ;;  %v3528_v23 = vadd.f32 %v3466_v22, %v3276_v39  ;;  %5408 = vmatmul.msk.bf16.vlgmr.msra.gmra.mxu2 %vm2599_vm1, %v3833_v5  ;;  %5432 = vmatmul.msk.bf16.vlgmr.msra.gmra.mxu3 %vm2599_vm1, %v4085_v42  ;;  %v4590_v5 = vpack.c.bf16 %v4556_v57, %v4555_v35 }
 0x406   : > { %v6782_v16 = vadd.f32 %v3718_v14, %v3528_v23 }
 0x407   : > { %5456 = vmatmul.msk.bf16.vlgmr.msra.gmra.mxu0 %vm2599_vm1, %v4337_v10  ;;  %5480 = vmatmul.msk.bf16.vlgmr.msra.gmra.mxu1 %vm2599_vm1, %v4589_v0  ;;  %v2965_v52 = vpop.f32.mrf.mxu2  ;;  %v3217_v55 = vpop.f32.mrf.mxu3 }
 0x408   : > { %v3025_v46 = vadd.f32 %v2965_v52, %v6499_v12 }
 0x40a   : > { %v3277_v31 = vadd.f32 %v3217_v55, %v3025_v46 }
 0x40c   : > { %v3471_v6 = vpop.f32.mrf.mxu0  ;;  %v3723_v56 = vpop.f32.mrf.mxu1  ;;  %v3529_v22 = vadd.f32 %v3469_v18, %v3277_v31  ;;  %v4053_v31 = vld [vmem:[%s6143_s10 + $0x44] sm:$0xff] }
 0x40e   : > { %v6789_v32 = vadd.f32 %v3721_v45, %v3529_v22  ;;  %v4306_v22 = vld [vmem:[%s6143_s10 + $0x4d] sm:$0xff] }
 0x40f   : > { %v2967_v24 = vpop.f32.mrf.mxu2  ;;  %v3219_v21 = vpop.f32.mrf.mxu3 }
 0x410   : > { %v3026_v14 = vadd.f32 %v2967_v24, %v6508_v37 }
 0x412   : > { %v3278_v12 = vadd.f32 %v3219_v21, %v3026_v14  ;;  %v4591_v21 = vpack.c.bf16 %v4558_v38, %v4557_v44 }
 0x414   : > { %v3474_v2 = vpop.f32.mrf.mxu0  ;;  %v3726_v10 = vpop.f32.mrf.mxu1  ;;  %v3530_v39 = vadd.f32 %v3471_v6, %v3278_v12  ;;  %5409 = vmatmul.msk.bf16.gmra.mxu2 %vm2599_vm1, %v4085_v42  ;;  %5433 = vmatmul.msk.bf16.gmra.mxu3 %vm2599_vm1, %v4086_v59  ;;  %v4054_v42 = vld [vmem:[%s6143_s10 + $0x4c] sm:$0xff] }
 0x415   : > { %v4305_v6 = vld [vmem:[%s6143_s10 + $0x45] sm:$0xff]  ;;  %v4087_v35 = vpack.c.bf16 %v4054_v42, %v4053_v31 }
 0x416   : > { %v6798_v37 = vadd.f32 %v3723_v56, %v3530_v39  ;;  %v4339_v57 = vpack.c.bf16 %v4306_v22, %v4305_v6  ;;  %v4559_v6 = vld [vmem:[%s6143_s10 + $0x56] sm:$0xff]  ;;  %v4560_v22 = vld [vmem:[%s6143_s10 + $0x5e] sm:$0xff] }
 0x417   : > { %5457 = vmatmul.msk.bf16.gmra.mxu0 %vm2599_vm1, %v4338_v1  ;;  %5481 = vmatmul.msk.bf16.gmra.mxu1 %vm2599_vm1, %v4590_v5  ;;  %v2970_v18 = vpop.f32.mrf.mxu2  ;;  %v3222_v45 = vpop.f32.mrf.mxu3 }
 0x418   : > { %v3027_v0 = vadd.f32 %v2970_v18, %v6515_v29 }
 0x41a   : > { %v3279_v23 = vadd.f32 %v3222_v45, %v3027_v0 }
 0x41c   : > { %v3476_v52 = vpop.f32.mrf.mxu0  ;;  %v3728_v46 = vpop.f32.mrf.mxu1  ;;  %v3531_v55 = vadd.f32 %v3474_v2, %v3279_v23  ;;  %v4055_v23 = vld [vmem:[%s6143_s10 + $0x54] sm:$0xff] }
 0x41e   : > { %v6805_v36 = vadd.f32 %v3726_v10, %v3531_v55  ;;  %v4308_v55 = vld [vmem:[%s6143_s10 + $0x5d] sm:$0xff] }
 0x41f   : > { %v2972_v17 = vpop.f32.mrf.mxu2  ;;  %v3224_v24 = vpop.f32.mrf.mxu3 }
 0x420   : > { %v3028_v56 = vadd.f32 %v2972_v17, %v6524_v58 }
 0x422   : > { %v3280_v29 = vadd.f32 %v3224_v24, %v3028_v56  ;;  %v4592_v24 = vpack.c.bf16 %v4560_v22, %v4559_v6 }
 0x424   : > { %v3479_v14 = vpop.f32.mrf.mxu0  ;;  %v3731_v1 = vpop.f32.mrf.mxu1  ;;  %v3532_v12 = vadd.f32 %v3476_v52, %v3280_v29  ;;  %5410 = vmatmul.msk.bf16.gmra.mxu2 %vm2599_vm1, %v4086_v59  ;;  %5434 = vmatmul.msk.bf16.gmra.mxu3 %vm2599_vm1, %v4087_v35  ;;  %v4056_v59 = vld [vmem:[%s6143_s10 + $0x5c] sm:$0xff] }
 0x425   : > { %v4307_v52 = vld [vmem:[%s6143_s10 + $0x55] sm:$0xff]  ;;  %v4088_v44 = vpack.c.bf16 %v4056_v59, %v4055_v23 }
 0x426   : > { %v6814_v58 = vadd.f32 %v3728_v46, %v3532_v12  ;;  %v4340_v38 = vpack.c.bf16 %v4308_v55, %v4307_v52  ;;  %v4561_v52 = vld [vmem:[%s6143_s10 + $0x66] sm:$0xff]  ;;  %v4562_v55 = vld [vmem:[%s6143_s10 + $0x6e] sm:$0xff] }
 0x427   : > { %5458 = vmatmul.msk.bf16.gmra.mxu0 %vm2599_vm1, %v4339_v57  ;;  %5482 = vmatmul.msk.bf16.gmra.mxu1 %vm2599_vm1, %v4591_v21  ;;  %v2975_v2 = vpop.f32.mrf.mxu2  ;;  %v3227_v10 = vpop.f32.mrf.mxu3 }
 0x428   : > { %v3029_v5 = vadd.f32 %v2975_v2, %v6531_v3 }
 0x42a   : > { %v3281_v39 = vadd.f32 %v3227_v10, %v3029_v5 }
 0x42c   : > { %v3481_v18 = vpop.f32.mrf.mxu0  ;;  %v3733_v0 = vpop.f32.mrf.mxu1  ;;  %v3533_v45 = vadd.f32 %v3479_v14, %v3281_v39  ;;  %v4057_v39 = vld [vmem:[%s6143_s10 + $0x64] sm:$0xff] }
 0x42e   : > { %v6821_v31 = vadd.f32 %v3731_v1, %v3533_v45  ;;  %v4310_v45 = vld [vmem:[%s6143_s10 + $0x6d] sm:$0xff] }
 0x42f   : > { %v2977_v42 = vpop.f32.mrf.mxu2  ;;  %v3229_v17 = vpop.f32.mrf.mxu3 }
 0x430   : > { %v3030_v46 = vadd.f32 %v2977_v42, %v6540_v19 }
 0x432   : > { %v3282_v3 = vadd.f32 %v3229_v17, %v3030_v46  ;;  %v4593_v17 = vpack.c.bf16 %v4562_v55, %v4561_v52 }
 0x434   : > { %v3484_v56 = vpop.f32.mrf.mxu0  ;;  %v3736_v57 = vpop.f32.mrf.mxu1  ;;  %v3534_v29 = vadd.f32 %v3481_v18, %v3282_v3  ;;  %5411 = vmatmul.msk.bf16.gmra.mxu2 %vm2599_vm1, %v4087_v35  ;;  %5435 = vmatmul.msk.bf16.gmra.mxu3 %vm2599_vm1, %v4088_v44  ;;  %v4058_v35 = vld [vmem:[%s6143_s10 + $0x6c] sm:$0xff] }
 0x435   : > { %v4309_v18 = vld [vmem:[%s6143_s10 + $0x65] sm:$0xff]  ;;  %v4089_v6 = vpack.c.bf16 %v4058_v35, %v4057_v39 }
 0x436   : > { %v6830_v19 = vadd.f32 %v3733_v0, %v3534_v29  ;;  %v4341_v22 = vpack.c.bf16 %v4310_v45, %v4309_v18  ;;  %v4563_v18 = vld [vmem:[%s6143_s10 + $0x76] sm:$0xff]  ;;  %v4564_v45 = vld [vmem:[%s6143_s10 + $0x7e] sm:$0xff] }
 0x437   : > { %5459 = vmatmul.msk.bf16.gmra.mxu0 %vm2599_vm1, %v4340_v38  ;;  %5483 = vmatmul.msk.bf16.gmra.mxu1 %vm2599_vm1, %v4592_v24  ;;  %v2980_v14 = vpop.f32.mrf.mxu2  ;;  %v3232_v1 = vpop.f32.mrf.mxu3 }
 0x438   : > { %v3031_v21 = vadd.f32 %v2980_v14, %v6547_v53 }
 0x43a   : > { %v3283_v12 = vadd.f32 %v3232_v1, %v3031_v21 }
 0x43c   : > { %v3486_v2 = vpop.f32.mrf.mxu0  ;;  %v3738_v5 = vpop.f32.mrf.mxu1  ;;  %v3535_v10 = vadd.f32 %v3484_v56, %v3283_v12  ;;  %v4059_v12 = vld [vmem:[%s6143_s10 + $0x74] sm:$0xff] }
 0x43e   : > { %v6837_v23 = vadd.f32 %v3736_v57, %v3535_v10  ;;  %v4312_v10 = vld [vmem:[%s6143_s10 + $0x7d] sm:$0xff] }
 0x43f   : > { %v2982_v59 = vpop.f32.mrf.mxu2  ;;  %v3234_v42 = vpop.f32.mrf.mxu3 }
 0x440   : > { %v3032_v0 = vadd.f32 %v2982_v59, %v6556_v47 }
 0x442   : > { %v3284_v53 = vadd.f32 %v3234_v42, %v3032_v0  ;;  %v4594_v42 = vpack.c.bf16 %v4564_v45, %v4563_v18 }
 0x444   : > { %v3489_v46 = vpop.f32.mrf.mxu0  ;;  %v3741_v38 = vpop.f32.mrf.mxu1  ;;  %v3536_v3 = vadd.f32 %v3486_v2, %v3284_v53  ;;  %5412 = vmatmul.msk.bf16.gmra.mxu2 %vm2599_vm1, %v4088_v44  ;;  %5436 = vmatmul.msk.bf16.gmra.mxu3 %vm2599_vm1, %v4089_v6  ;;  %v4060_v44 = vld [vmem:[%s6143_s10 + $0x7c] sm:$0xff] }
 0x445   : > { %v4311_v2 = vld [vmem:[%s6143_s10 + $0x75] sm:$0xff]  ;;  %v4090_v52 = vpack.c.bf16 %v4060_v44, %v4059_v12 }
 0x446   : > { %v6846_v47 = vadd.f32 %v3738_v5, %v3536_v3  ;;  %v4342_v55 = vpack.c.bf16 %v4312_v10, %v4311_v2  ;;  %v4565_v2 = vld [vmem:[%s6143_s10 + $0x86] sm:$0xff]  ;;  %v4566_v10 = vld [vmem:[%s6143_s10 + $0x8e] sm:$0xff] }
 0x447   : > { %5460 = vmatmul.msk.bf16.gmra.mxu0 %vm2599_vm1, %v4341_v22  ;;  %5484 = vmatmul.msk.bf16.gmra.mxu1 %vm2599_vm1, %v4593_v17  ;;  %v2985_v56 = vpop.f32.mrf.mxu2  ;;  %v3237_v57 = vpop.f32.mrf.mxu3 }
 0x448   : > { %v3033_v24 = vadd.f32 %v2985_v56, %v6563_v25 }
 0x44a   : > { %v3285_v29 = vadd.f32 %v3237_v57, %v3033_v24 }
 0x44c   : > { %v3491_v14 = vpop.f32.mrf.mxu0  ;;  %v3743_v21 = vpop.f32.mrf.mxu1  ;;  %v3537_v1 = vadd.f32 %v3489_v46, %v3285_v29  ;;  %v4061_v29 = vld [vmem:[%s6143_s10 + $0x84] sm:$0xff] }
 0x44e   : > { %v6853_v39 = vadd.f32 %v3741_v38, %v3537_v1  ;;  %v4314_v1 = vld [vmem:[%s6143_s10 + $0x8d] sm:$0xff] }
 0x44f   : > { %v2987_v35 = vpop.f32.mrf.mxu2  ;;  %v3239_v59 = vpop.f32.mrf.mxu3 }
 0x450   : > { %v3034_v5 = vadd.f32 %v2987_v35, %v6572_v13 }
 0x452   : > { %v3286_v25 = vadd.f32 %v3239_v59, %v3034_v5  ;;  %v4595_v59 = vpack.c.bf16 %v4566_v10, %v4565_v2 }
 0x454   : > { %v3494_v0 = vpop.f32.mrf.mxu0  ;;  %v3746_v22 = vpop.f32.mrf.mxu1  ;;  %v3538_v53 = vadd.f32 %v3491_v14, %v3286_v25  ;;  %5413 = vmatmul.msk.bf16.gmra.mxu2 %vm2599_vm1, %v4089_v6  ;;  %5437 = vmatmul.msk.bf16.gmra.mxu3 %vm2599_vm1, %v4090_v52  ;;  %v4062_v6 = vld [vmem:[%s6143_s10 + $0x8c] sm:$0xff] }
 0x455   : > { %v4313_v14 = vld [vmem:[%s6143_s10 + $0x85] sm:$0xff]  ;;  %v4091_v18 = vpack.c.bf16 %v4062_v6, %v4061_v29 }
 0x456   : > { %v6862_v13 = vadd.f32 %v3743_v21, %v3538_v53  ;;  %v4343_v45 = vpack.c.bf16 %v4314_v1, %v4313_v14  ;;  %v4567_v14 = vld [vmem:[%s6143_s10 + $0x96] sm:$0xff]  ;;  %v4568_v1 = vld [vmem:[%s6143_s10 + $0x9e] sm:$0xff] }
 0x457   : > { %5461 = vmatmul.msk.bf16.gmra.mxu0 %vm2599_vm1, %v4342_v55  ;;  %5485 = vmatmul.msk.bf16.gmra.mxu1 %vm2599_vm1, %v4594_v42  ;;  %v2990_v46 = vpop.f32.mrf.mxu2  ;;  %v3242_v38 = vpop.f32.mrf.mxu3 }
 0x458   : > { %v3035_v17 = vadd.f32 %v2990_v46, %v6579_v40 }
 0x45a   : > { %v3287_v3 = vadd.f32 %v3242_v38, %v3035_v17 }
 0x45c   : > { %v3496_v56 = vpop.f32.mrf.mxu0  ;;  %v3748_v24 = vpop.f32.mrf.mxu1  ;;  %v3539_v57 = vadd.f32 %v3494_v0, %v3287_v3  ;;  %v4063_v3 = vld [vmem:[%s6143_s10 + $0x94] sm:$0xff] }
 0x45e   : > { %v6869_v12 = vadd.f32 %v3746_v22, %v3539_v57  ;;  %v4316_v57 = vld [vmem:[%s6143_s10 + $0x9d] sm:$0xff] }
 0x45f   : > { %v2992_v44 = vpop.f32.mrf.mxu2  ;;  %v3244_v35 = vpop.f32.mrf.mxu3 }
 0x460   : > { %v3036_v21 = vadd.f32 %v2992_v44, %v6588_v48 }
 0x462   : > { %v3288_v40 = vadd.f32 %v3244_v35, %v3036_v21  ;;  %v4596_v35 = vpack.c.bf16 %v4568_v1, %v4567_v14 }
 0x464   : > { %v3499_v5 = vpop.f32.mrf.mxu0  ;;  %v3751_v55 = vpop.f32.mrf.mxu1  ;;  %v3540_v25 = vadd.f32 %v3496_v56, %v3288_v40  ;;  %5414 = vmatmul.msk.bf16.gmra.mxu2 %vm2599_vm1, %v4090_v52  ;;  %5438 = vmatmul.msk.bf16.gmra.mxu3 %vm2599_vm1, %v4091_v18  ;;  %v4064_v52 = vld [vmem:[%s6143_s10 + $0x9c] sm:$0xff] }
 0x465   : > { %v4315_v56 = vld [vmem:[%s6143_s10 + $0x95] sm:$0xff]  ;;  %v4092_v2 = vpack.c.bf16 %v4064_v52, %v4063_v3 }
 0x466   : > { %v6878_v48 = vadd.f32 %v3748_v24, %v3540_v25  ;;  %v4344_v10 = vpack.c.bf16 %v4316_v57, %v4315_v56  ;;  %v4569_v56 = vld [vmem:[%s6143_s10 + $0xa6] sm:$0xff]  ;;  %v4570_v57 = vld [vmem:[%s6143_s10 + $0xae] sm:$0xff] }
 0x467   : > { %5462 = vmatmul.msk.bf16.gmra.mxu0 %vm2599_vm1, %v4343_v45  ;;  %5486 = vmatmul.msk.bf16.gmra.mxu1 %vm2599_vm1, %v4595_v59  ;;  %v2995_v0 = vpop.f32.mrf.mxu2  ;;  %v3247_v22 = vpop.f32.mrf.mxu3 }
 0x468   : > { %v3037_v42 = vadd.f32 %v2995_v0, %v6595_v43 }
 0x46a   : > { %v3289_v53 = vadd.f32 %v3247_v22, %v3037_v42 }
 0x46c   : > { %v3501_v46 = vpop.f32.mrf.mxu0  ;;  %v3753_v17 = vpop.f32.mrf.mxu1  ;;  %v3541_v38 = vadd.f32 %v3499_v5, %v3289_v53  ;;  %v4065_v53 = vld [vmem:[%s6143_s10 + $0xa4] sm:$0xff] }
 0x46e   : > { %v6885_v29 = vadd.f32 %v3751_v55, %v3541_v38  ;;  %v4318_v38 = vld [vmem:[%s6143_s10 + $0xad] sm:$0xff] }
 0x46f   : > { %v2997_v6 = vpop.f32.mrf.mxu2  ;;  %v3249_v44 = vpop.f32.mrf.mxu3 }
 0x470   : > { %v3038_v24 = vadd.f32 %v2997_v6, %v6604_v20 }
 0x472   : > { %v3290_v43 = vadd.f32 %v3249_v44, %v3038_v24  ;;  %v4597_v44 = vpack.c.bf16 %v4570_v57, %v4569_v56 }
 0x474   : > { %v3504_v21 = vpop.f32.mrf.mxu0  ;;  %v3756_v45 = vpop.f32.mrf.mxu1  ;;  %v3542_v40 = vadd.f32 %v3501_v46, %v3290_v43  ;;  %5415 = vmatmul.msk.bf16.gmra.mxu2 %vm2599_vm1, %v4091_v18  ;;  %5439 = vmatmul.msk.bf16.gmra.mxu3 %vm2599_vm1, %v4092_v2  ;;  %v4066_v18 = vld [vmem:[%s6143_s10 + $0xac] sm:$0xff] }
 0x475   : > { %v4317_v46 = vld [vmem:[%s6143_s10 + $0xa5] sm:$0xff]  ;;  %v4093_v14 = vpack.c.bf16 %v4066_v18, %v4065_v53  ;;  %v4320_v53 = vld [vmem:[%s6143_s10 + $0xbd] sm:$0xff] }
 0x476   : > { %v6894_v20 = vadd.f32 %v3753_v17, %v3542_v40  ;;  %v4345_v1 = vpack.c.bf16 %v4318_v38, %v4317_v46  ;;  %v4571_v46 = vld [vmem:[%s6143_s10 + $0xb6] sm:$0xff]  ;;  %v4572_v38 = vld [vmem:[%s6143_s10 + $0xbe] sm:$0xff] }
 0x477   : > { %5463 = vmatmul.msk.bf16.gmra.mxu0 %vm2599_vm1, %v4344_v10  ;;  %5487 = vmatmul.msk.bf16.gmra.mxu1 %vm2599_vm1, %v4596_v35  ;;  %v3000_v5 = vpop.f32.mrf.mxu2  ;;  %v3252_v55 = vpop.f32.mrf.mxu3 }
 0x478   : > { %v3039_v59 = vadd.f32 %v3000_v5, %v6611_v41 }
 0x47a   : > { %v3291_v25 = vadd.f32 %v3252_v55, %v3039_v59  ;;  %v6916_v55 = vld [vmem:[%s7170_s4] ss:$0 sm:$0xff] }
 0x47c   : > { %v3506_v0 = vpop.f32.mrf.mxu0  ;;  %v3758_v42 = vpop.f32.mrf.mxu1  ;;  %v3543_v22 = vadd.f32 %v3504_v21, %v3291_v25  ;;  %v4067_v25 = vld [vmem:[%s6143_s10 + $0xb4] sm:$0xff] }
 0x47e   : > { %v6901_v3 = vadd.f32 %v3756_v45, %v3543_v22  ;;  %v4319_v22 = vld [vmem:[%s6143_s10 + $0xb5] sm:$0xff] }
 0x47f   : > { %v3002_v52 = vpop.f32.mrf.mxu2  ;;  %v3254_v6 = vpop.f32.mrf.mxu3 }
 0x480   : > { %v3040_v17 = vadd.f32 %v3002_v52, %v6620_v11 }
 0x482   : > { %v3292_v41 = vadd.f32 %v3254_v6, %v3040_v17  ;;  %v4346_v17 = vpack.c.bf16 %v4320_v53, %v4319_v22  ;;  %v4321_v22 = vld [vmem:[%s6143_s10 + $0xc5] sm:$0xff]  ;;  %v4322_v53 = vld [vmem:[%s6143_s10 + $0xcd] sm:$0xff] }
 0x484   : > { %v4427_v24 = vpop.f32.mrf.mxu0  ;;  %v4679_v10 = vpop.f32.mrf.mxu1  ;;  %v3544_v43 = vadd.f32 %v3506_v0, %v3292_v41  ;;  %5416 = vmatmul.msk.bf16.gmra.mxu2 %vm2599_vm1, %v4092_v2  ;;  %5440 = vmatmul.msk.bf16.gmra.mxu3 %vm2599_vm1, %v4093_v14 }
 0x486   : > { %v6910_v11 = vadd.f32 %v3758_v42, %v3544_v43  ;;  %v4068_v42 = vld [vmem:[%s6143_s10 + $0xbc] sm:$0xff] }
 0x487   : > { %5464 = vmatmul.msk.bf16.gmra.mxu0 %vm2599_vm1, %v4345_v1  ;;  %5488 = vmatmul.msk.bf16.gmra.mxu1 %vm2599_vm1, %v4597_v44  ;;  %v3923_v21 = vpop.f32.mrf.mxu2  ;;  %v4175_v45 = vpop.f32.mrf.mxu3  ;;  %v4094_v57 = vpack.c.bf16 %v4068_v42, %v4067_v25  ;;  %v4070_v42 = vld [vmem:[%s6143_s10 + $0xcc] sm:$0xff] }
 0x488   : > { %v4013_v35 = vadd.f32 %v3923_v21, %v6627_v54 }
 0x48a   : > { %v4265_v40 = vadd.f32 %v4175_v45, %v4013_v35 }
 0x48c   : > { %v4429_v5 = vpop.f32.mrf.mxu0  ;;  %v4681_v2 = vpop.f32.mrf.mxu1  ;;  %v4517_v59 = vadd.f32 %v4427_v24, %v4265_v40  ;;  %v4598_v24 = vpack.c.bf16 %v4572_v38, %v4571_v46  ;;  %v4573_v46 = vld [vmem:[%s6143_s10 + $0xc6] sm:$0xff]  ;;  %v4574_v38 = vld [vmem:[%s6143_s10 + $0xce] sm:$0xff] }
 0x48e   : > { %v4769_v0 = vadd.f32 %v4679_v10, %v4517_v59 }
 0x48f   : > { %v3925_v18 = vpop.f32.mrf.mxu2  ;;  %v4177_v56 = vpop.f32.mrf.mxu3 }
 0x490   : > { %v4809_v54 = vadd.f32 %v6916_v55, %v4769_v0  ;;  %v4014_v52 = vadd.f32 %v3925_v18, %v6636_v4  ;;  %v4069_v0 = vld [vmem:[%s6143_s10 + $0xc4] sm:$0xff] }
 0x492   : > { %v4845_v6 = vmax.f32 %v4809_v54, 0.0  ;;  %v4266_v1 = vadd.f32 %v4177_v56, %v4014_v52  ;;  %v4095_v56 = vpack.c.bf16 %v4070_v42, %v4069_v0  ;;  %v4072_v0 = vld [vmem:[%s6143_s10 + $0xdc] sm:$0xff] }
 0x493   : > { %v4324_v42 = vld [vmem:[%s6143_s10 + $0xdd] sm:$0xff] }
 0x494   : > { %v4432_v41 = vpop.f32.mrf.mxu0  ;;  %v4684_v44 = vpop.f32.mrf.mxu1  ;;  %4881 = vst.msk [vmem:[%s6930_s27] sm:$0xff] %vm2599_vm1, %v4845_v6  ;;  %v4518_v10 = vadd.f32 %v4429_v5, %v4266_v1  ;;  %5417 = vmatmul.msk.bf16.gmra.mxu2 %vm2599_vm1, %v4093_v14  ;;  %5441 = vmatmul.msk.bf16.gmra.mxu3 %vm2599_vm1, %v4094_v57 }
 0x496   : > { %v4770_v4 = vadd.f32 %v4681_v2, %v4518_v10 }
 0x497   : > { %5465 = vmatmul.msk.bf16.gmra.mxu0 %vm2599_vm1, %v4346_v17  ;;  %5489 = vmatmul.msk.bf16.gmra.mxu1 %vm2599_vm1, %v4598_v24  ;;  %v3928_v43 = vpop.f32.mrf.mxu2  ;;  %v4180_v45 = vpop.f32.mrf.mxu3  ;;  %v4347_v17 = vpack.c.bf16 %v4322_v53, %v4321_v22  ;;  %v4575_v53 = vld [vmem:[%s6143_s10 + $0xd6] sm:$0xff] }
 0x498   : > { %v4810_v21 = vadd.f32 %v6916_v55, %v4770_v4  ;;  %v4015_v35 = vadd.f32 %v3928_v43, %v6643_v27 }
 0x49a   : > { %v4846_v40 = vmax.f32 %v4810_v21, 0.0  ;;  %v4267_v14 = vadd.f32 %v4180_v45, %v4015_v35 }
 0x49c   : > { %v4434_v5 = vpop.f32.mrf.mxu0  ;;  %v4686_v59 = vpop.f32.mrf.mxu1  ;;  %4882 = vst.msk [vmem:[%s6930_s27 + $0x8] sm:$0xff] %vm2599_vm1, %v4846_v40  ;;  %v4519_v25 = vadd.f32 %v4432_v41, %v4267_v14  ;;  %v4599_v41 = vpack.c.bf16 %v4574_v38, %v4573_v46 }
 0x49e   : > { %v4771_v2 = vadd.f32 %v4684_v44, %v4519_v25  ;;  %v4071_v25 = vld [vmem:[%s6143_s10 + $0xd4] sm:$0xff] }
 0x49f   : > { %v3930_v18 = vpop.f32.mrf.mxu2  ;;  %v4182_v52 = vpop.f32.mrf.mxu3 }
 0x4a0   : > { %v4811_v54 = vadd.f32 %v6916_v55, %v4771_v2  ;;  %v4016_v27 = vadd.f32 %v3930_v18, %v6652_v28  ;;  %v4323_v2 = vld [vmem:[%s6143_s10 + $0xd5] sm:$0xff]  ;;  %v4576_v18 = vld [vmem:[%s6143_s10 + $0xde] sm:$0xff] }
 0x4a2   : > { %v4847_v6 = vmax.f32 %v4811_v54, 0.0  ;;  %v4268_v1 = vadd.f32 %v4182_v52, %v4016_v27  ;;  %v4096_v54 = vpack.c.bf16 %v4072_v0, %v4071_v25  ;;  %v4348_v27 = vpack.c.bf16 %v4324_v42, %v4323_v2  ;;  %v4326_v25 = vld [vmem:[%s6143_s10 + $0xed] sm:$0xff] }
 0x4a3   : > { %v4577_v0 = vld [vmem:[%s6143_s10 + $0xe6] sm:$0xff]  ;;  %v4578_v2 = vld [vmem:[%s6143_s10 + $0xee] sm:$0xff] }
 0x4a4   : > { %v4437_v24 = vpop.f32.mrf.mxu0  ;;  %v4689_v10 = vpop.f32.mrf.mxu1  ;;  %4883 = vst.msk [vmem:[%s6930_s27 + $0x10] sm:$0xff] %vm2599_vm1, %v4847_v6  ;;  %v4520_v44 = vadd.f32 %v4434_v5, %v4268_v1  ;;  %5418 = vmatmul.msk.bf16.gmra.mxu2 %vm2599_vm1, %v4094_v57  ;;  %5442 = vmatmul.msk.bf16.gmra.mxu3 %vm2599_vm1, %v4095_v56  ;;  %v4600_v1 = vpack.c.bf16 %v4576_v18, %v4575_v53 }
 0x4a6   : > { %v4772_v28 = vadd.f32 %v4686_v59, %v4520_v44 }
 0x4a7   : > { %5466 = vmatmul.msk.bf16.gmra.mxu0 %vm2599_vm1, %v4347_v17  ;;  %5490 = vmatmul.msk.bf16.gmra.mxu1 %vm2599_vm1, %v4599_v41  ;;  %v3933_v4 = vpop.f32.mrf.mxu2  ;;  %v4185_v35 = vpop.f32.mrf.mxu3 }
 0x4a8   : > { %v4812_v43 = vadd.f32 %v6916_v55, %v4772_v28  ;;  %v4017_v21 = vadd.f32 %v3933_v4, %v6659_v7 }
 0x4aa   : > { %v4848_v45 = vmax.f32 %v4812_v43, 0.0  ;;  %v4269_v57 = vadd.f32 %v4185_v35, %v4017_v21 }
 0x4ac   : > { %v4439_v40 = vpop.f32.mrf.mxu0  ;;  %v4691_v14 = vpop.f32.mrf.mxu1  ;;  %4884 = vst.msk [vmem:[%s6930_s27 + $0x18] sm:$0xff] %vm2599_vm1, %v4848_v45  ;;  %v4521_v5 = vadd.f32 %v4437_v24, %v4269_v57  ;;  %v4073_v57 = vld [vmem:[%s6143_s10 + $0xe4] sm:$0xff] }
 0x4ae   : > { %v4773_v59 = vadd.f32 %v4689_v10, %v4521_v5  ;;  %v4325_v5 = vld [vmem:[%s6143_s10 + $0xe5] sm:$0xff] }
 0x4af   : > { %v3935_v22 = vpop.f32.mrf.mxu2  ;;  %v4187_v38 = vpop.f32.mrf.mxu3  ;;  %v4349_v18 = vpack.c.bf16 %v4326_v25, %v4325_v5 }
 0x4b0   : > { %v4813_v46 = vadd.f32 %v6916_v55, %v4773_v59  ;;  %v4018_v7 = vadd.f32 %v3935_v22, %v6668_v49 }
 0x4b2   : > { %v4849_v52 = vmax.f32 %v4813_v46, 0.0  ;;  %v4270_v17 = vadd.f32 %v4187_v38, %v4018_v7 }
 0x4b4   : > { %v4442_v6 = vpop.f32.mrf.mxu0  ;;  %v4694_v24 = vpop.f32.mrf.mxu1  ;;  %4885 = vst.msk [vmem:[%s6930_s27 + $0x20] sm:$0xff] %vm2599_vm1, %v4849_v52  ;;  %v4522_v41 = vadd.f32 %v4439_v40, %v4270_v17  ;;  %5419 = vmatmul.msk.bf16.gmra.mxu2 %vm2599_vm1, %v4095_v56  ;;  %5443 = vmatmul.msk.bf16.gmra.mxu3 %vm2599_vm1, %v4096_v54 }
 0x4b6   : > { %v4774_v49 = vadd.f32 %v4691_v14, %v4522_v41  ;;  %v4074_v14 = vld [vmem:[%s6143_s10 + $0xec] sm:$0xff] }
 0x4b7   : > { %5467 = vmatmul.msk.bf16.gmra.mxu0 %vm2599_vm1, %v4348_v27  ;;  %5491 = vmatmul.msk.bf16.gmra.mxu1 %vm2599_vm1, %v4600_v1  ;;  %v3938_v10 = vpop.f32.mrf.mxu2  ;;  %v4190_v4 = vpop.f32.mrf.mxu3  ;;  %v4097_v53 = vpack.c.bf16 %v4074_v14, %v4073_v57  ;;  %v4601_v27 = vpack.c.bf16 %v4578_v2, %v4577_v0  ;;  %v4579_v57 = vld [vmem:[%s6143_s10 + $0xf6] sm:$0xff] }
 0x4b8   : > { %v4814_v44 = vadd.f32 %v6916_v55, %v4774_v49  ;;  %v4019_v28 = vadd.f32 %v3938_v10, %v6675_v15 }
 0x4ba   : > { %v4850_v43 = vmax.f32 %v4814_v44, 0.0  ;;  %v4271_v56 = vadd.f32 %v4190_v4, %v4019_v28  ;;  %v4075_v4 = vld [vmem:[%s6143_s10 + $0xf4] sm:$0xff] }
 0x4bc   : > { %v4444_v21 = vpop.f32.mrf.mxu0  ;;  %v4696_v35 = vpop.f32.mrf.mxu1  ;;  %4886 = vst.msk [vmem:[%s6930_s27 + $0x28] sm:$0xff] %vm2599_vm1, %v4850_v43  ;;  %v4523_v45 = vadd.f32 %v4442_v6, %v4271_v56  ;;  %v4076_v56 = vld [vmem:[%s6143_s10 + $0xfc] sm:$0xff] }
 0x4bd   : > { %v4098_v25 = vpack.c.bf16 %v4076_v56, %v4075_v4 }
 0x4be   : > { %v4775_v40 = vadd.f32 %v4694_v24, %v4523_v45 }
 0x4bf   : > { %v3940_v59 = vpop.f32.mrf.mxu2  ;;  %v4192_v22 = vpop.f32.mrf.mxu3 }
 0x4c0   : > { %v4815_v42 = vadd.f32 %v6916_v55, %v4775_v40  ;;  %v4020_v15 = vadd.f32 %v3940_v59, %v6684_v9  ;;  %v4580_v40 = vld [vmem:[%s6143_s10 + $0xfe] sm:$0xff] }
 0x4c2   : > { %v4851_v46 = vmax.f32 %v4815_v42, 0.0  ;;  %v4272_v7 = vadd.f32 %v4192_v22, %v4020_v15  ;;  %v4602_v15 = vpack.c.bf16 %v4580_v40, %v4579_v57 }
 0x4c4   : > { %v4447_v38 = vpop.f32.mrf.mxu0  ;;  %v4699_v52 = vpop.f32.mrf.mxu1  ;;  %4887 = vst.msk [vmem:[%s6930_s27 + $0x30] sm:$0xff] %vm2599_vm1, %v4851_v46  ;;  %v4524_v17 = vadd.f32 %v4444_v21, %v4272_v7  ;;  %5420 = vmatmul.msk.bf16.gmra.mxu2 %vm2599_vm1, %v4096_v54  ;;  %5444 = vmatmul.msk.bf16.gmra.mxu3 %vm2599_vm1, %v4097_v53  ;;  %v4327_v21 = vld [vmem:[%s6143_s10 + $0xf5] sm:$0xff] }
 0x4c6   : > { %v4776_v9 = vadd.f32 %v4696_v35, %v4524_v17  ;;  %v4328_v35 = vld [vmem:[%s6143_s10 + $0xfd] sm:$0xff] }
 0x4c7   : > { %5468 = vmatmul.msk.bf16.gmra.mxu0 %vm2599_vm1, %v4349_v18  ;;  %5492 = vmatmul.msk.bf16.gmra.mxu1 %vm2599_vm1, %v4601_v27  ;;  %v3943_v6 = vpop.f32.mrf.mxu2  ;;  %v4195_v41 = vpop.f32.mrf.mxu3  ;;  %v4350_v59 = vpack.c.bf16 %v4328_v35, %v4327_v21 }
 0x4c8   : > { %v4816_v1 = vadd.f32 %v6916_v55, %v4776_v9  ;;  %v4021_v24 = vadd.f32 %v3943_v6, %v6691_v26 }
 0x4ca   : > { %v4852_v49 = vmax.f32 %v4816_v1, 0.0  ;;  %v4273_v54 = vadd.f32 %v4195_v41, %v4021_v24  ;;  %v4077_v1 = vld [vmem:[%s6143_s10 + $0x104] sm:$0xff]  ;;  %v4078_v41 = vld [vmem:[%s6143_s10 + $0x10c] sm:$0xff] }
 0x4cb   : > { %v4099_v56 = vpack.c.bf16 %v4078_v41, %v4077_v1 }
 0x4cc   : > { %v4449_v10 = vpop.f32.mrf.mxu0  ;;  %v4701_v44 = vpop.f32.mrf.mxu1  ;;  %4888 = vst.msk [vmem:[%s6930_s27 + $0x38] sm:$0xff] %vm2599_vm1, %v4852_v49  ;;  %v4525_v28 = vadd.f32 %v4447_v38, %v4273_v54  ;;  %v4329_v49 = vld [vmem:[%s6143_s10 + $0x105] sm:$0xff]  ;;  %v4330_v54 = vld [vmem:[%s6143_s10 + $0x10d] sm:$0xff] }
 0x4cd   : > { %v4351_v21 = vpack.c.bf16 %v4330_v54, %v4329_v49 }
 0x4ce   : > { %v4777_v43 = vadd.f32 %v4699_v52, %v4525_v28  ;;  %v4582_v28 = vld [vmem:[%s6143_s10 + $0x10e] sm:$0xff] }
 0x4cf   : > { %v3945_v45 = vpop.f32.mrf.mxu2  ;;  %v4197_v5 = vpop.f32.mrf.mxu3 }
 0x4d0   : > { %v4817_v14 = vadd.f32 %v6916_v55, %v4777_v43  ;;  %v4022_v26 = vadd.f32 %v3945_v45, %v6700_v34 }
 0x4d2   : > { %v4853_v0 = vmax.f32 %v4817_v14, 0.0  ;;  %v4274_v2 = vadd.f32 %v4197_v5, %v4022_v26 }
 0x4d4   : > { %v4452_v42 = vpop.f32.mrf.mxu0  ;;  %v4704_v22 = vpop.f32.mrf.mxu1  ;;  %4889 = vst.msk [vmem:[%s6930_s27 + $0x40] sm:$0xff] %vm2599_vm1, %v4853_v0  ;;  %v4526_v18 = vadd.f32 %v4449_v10, %v4274_v2  ;;  %5421 = vmatmul.msk.bf16.gmra.mxu2 %vm2599_vm1, %v4097_v53  ;;  %5445 = vmatmul.msk.bf16.gmra.mxu3 %vm2599_vm1, %v4098_v25 }
 0x4d6   : > { %v4778_v34 = vadd.f32 %v4701_v44, %v4526_v18  ;;  %v4581_v44 = vld [vmem:[%s6143_s10 + $0x106] sm:$0xff] }
 0x4d7   : > { %5469 = vmatmul.msk.bf16.gmra.mxu0 %vm2599_vm1, %v4350_v59  ;;  %5493 = vmatmul.msk.bf16.gmra.mxu1 %vm2599_vm1, %v4602_v15  ;;  %v3948_v46 = vpop.f32.mrf.mxu2  ;;  %v4200_v27 = vpop.f32.mrf.mxu3  ;;  %v4603_v40 = vpack.c.bf16 %v4582_v28, %v4581_v44 }
 0x4d8   : > { %v4818_v7 = vadd.f32 %v6916_v55, %v4778_v34  ;;  %v4023_v38 = vadd.f32 %v3948_v46, %v6707_v63  ;;  %v4079_v34 = vld [vmem:[%s6143_s10 + $0x114] sm:$0xff] }
 0x4da   : > { %v4854_v52 = vmax.f32 %v4818_v7, 0.0  ;;  %v4275_v53 = vadd.f32 %v4200_v27, %v4023_v38  ;;  %v4080_v7 = vld [vmem:[%s6143_s10 + $0x11c] sm:$0xff] }
 0x4db   : > { %v4331_v38 = vld [vmem:[%s6143_s10 + $0x115] sm:$0xff]  ;;  %v4332_v27 = vld [vmem:[%s6143_s10 + $0x11d] sm:$0xff]  ;;  %v4100_v1 = vpack.c.bf16 %v4080_v7, %v4079_v34 }
 0x4dc   : > { %v4454_v17 = vpop.f32.mrf.mxu0  ;;  %v4706_v9 = vpop.f32.mrf.mxu1  ;;  %4890 = vst.msk [vmem:[%s6930_s27 + $0x48] sm:$0xff] %vm2599_vm1, %v4854_v52  ;;  %v4527_v6 = vadd.f32 %v4452_v42, %v4275_v53  ;;  %v4583_v53 = vld [vmem:[%s6143_s10 + $0x116] sm:$0xff] }
 0x4de   : > { %v4779_v24 = vadd.f32 %v4704_v22, %v4527_v6 }
 0x4df   : > { %v3950_v10 = vpop.f32.mrf.mxu2  ;;  %v4202_v43 = vpop.f32.mrf.mxu3 }
 0x4e0   : > { %v4819_v4 = vadd.f32 %v6916_v55, %v4779_v24  ;;  %v4024_v63 = vadd.f32 %v3950_v10, %v6716_v61  ;;  %v4352_v24 = vpack.c.bf16 %v4332_v27, %v4331_v38 }
 0x4e2   : > { %v4855_v35 = vmax.f32 %v4819_v4, 0.0  ;;  %v4276_v45 = vadd.f32 %v4202_v43, %v4024_v63 }
 0x4e4   : > { %v4457_v57 = vpop.f32.mrf.mxu0  ;;  %v4709_v14 = vpop.f32.mrf.mxu1  ;;  %4891 = vst.msk [vmem:[%s6930_s27 + $0x50] sm:$0xff] %vm2599_vm1, %v4855_v35  ;;  %v4528_v26 = vadd.f32 %v4454_v17, %v4276_v45  ;;  %5422 = vmatmul.msk.bf16.gmra.mxu2 %vm2599_vm1, %v4098_v25  ;;  %5446 = vmatmul.msk.bf16.gmra.mxu3 %vm2599_vm1, %v4099_v56  ;;  %v4584_v17 = vld [vmem:[%s6143_s10 + $0x11e] sm:$0xff] }
 0x4e5   : > { %v4604_v10 = vpack.c.bf16 %v4584_v17, %v4583_v53 }
 0x4e6   : > { %v4780_v61 = vadd.f32 %v4706_v9, %v4528_v26 }
 0x4e7   : > { %5470 = vmatmul.msk.bf16.gmra.mxu0 %vm2599_vm1, %v4351_v21  ;;  %5494 = vmatmul.msk.bf16.gmra.mxu1 %vm2599_vm1, %v4603_v40  ;;  %v3953_v5 = vpop.f32.mrf.mxu2  ;;  %v4205_v2 = vpop.f32.mrf.mxu3 }
 0x4e8   : > { %v4820_v59 = vadd.f32 %v6916_v55, %v4780_v61  ;;  %v4025_v0 = vadd.f32 %v3953_v5, %v6723_v8  ;;  %v4082_v61 = vld [vmem:[%s6143_s10 + $0x12c] sm:$0xff] }
 0x4e9   : > { %v4333_v5 = vld [vmem:[%s6143_s10 + $0x125] sm:$0xff] }
 0x4ea   : > { %v4856_v42 = vmax.f32 %v4820_v59, 0.0  ;;  %v4277_v25 = vadd.f32 %v4205_v2, %v4025_v0  ;;  %v4334_v59 = vld [vmem:[%s6143_s10 + $0x12d] sm:$0xff] }
 0x4eb   : > { %v4585_v2 = vld [vmem:[%s6143_s10 + $0x126] sm:$0xff] }
 0x4ec   : > { %v4459_v15 = vpop.f32.mrf.mxu0  ;;  %v4711_v22 = vpop.f32.mrf.mxu1  ;;  %4892 = vst.msk [vmem:[%s6930_s27 + $0x58] sm:$0xff] %vm2599_vm1, %v4856_v42  ;;  %v4529_v18 = vadd.f32 %v4457_v57, %v4277_v25  ;;  %v4586_v42 = vld [vmem:[%s6143_s10 + $0x12e] sm:$0xff] }
 0x4ed   : > { %v4605_v38 = vpack.c.bf16 %v4586_v42, %v4585_v2 }
 0x4ee   : > { %v4781_v46 = vadd.f32 %v4709_v14, %v4529_v18  ;;  %v4081_v14 = vld [vmem:[%s6143_s10 + $0x124] sm:$0xff]  ;;  %v4353_v18 = vpack.c.bf16 %v4334_v59, %v4333_v5 }
 0x4ef   : > { %v3955_v52 = vpop.f32.mrf.mxu2  ;;  %v4207_v6 = vpop.f32.mrf.mxu3 }
 0x4f0   : > { %v4821_v9 = vadd.f32 %v6916_v55, %v4781_v46  ;;  %v4026_v8 = vadd.f32 %v3955_v52, %v6732_v33 }
 0x4f2   : > { %v4857_v41 = vmax.f32 %v4821_v9, 0.0  ;;  %v4278_v49 = vadd.f32 %v4207_v6, %v4026_v8 }
 0x4f4   : > { %v4462_v54 = vpop.f32.mrf.mxu0  ;;  %v4714_v44 = vpop.f32.mrf.mxu1  ;;  %4893 = vst.msk [vmem:[%s6930_s27 + $0x60] sm:$0xff] %vm2599_vm1, %v4857_v41  ;;  %v4530_v28 = vadd.f32 %v4459_v15, %v4278_v49  ;;  %5423 = vmatmul.msk.bf16.gmra.mxu2 %vm2599_vm1, %v4099_v56  ;;  %5447 = vmatmul.msk.bf16.gmra.mxu3 %vm2599_vm1, %v4100_v1 }
 0x4f6   : > { %v4782_v33 = vadd.f32 %v4711_v22, %v4530_v28  ;;  %v4101_v22 = vpack.c.bf16 %v4082_v61, %v4081_v14  ;;  %v4335_v28 = vld [vmem:[%s6143_s10 + $0x135] sm:$0xff] }
 0x4f7   : > { %5471 = vmatmul.msk.bf16.gmra.mxu0 %vm2599_vm1, %v4352_v24  ;;  %5495 = vmatmul.msk.bf16.gmra.mxu1 %vm2599_vm1, %v4604_v10  ;;  %v3958_v4 = vpop.f32.mrf.mxu2  ;;  %v4210_v21 = vpop.f32.mrf.mxu3 }
 0x4f8   : > { %v4822_v63 = vadd.f32 %v6916_v55, %v4782_v33  ;;  %v4027_v43 = vadd.f32 %v3958_v4, %v6739_v60  ;;  %v4336_v33 = vld [vmem:[%s6143_s10 + $0x13d] sm:$0xff] }
 0x4fa   : > { %v4858_v35 = vmax.f32 %v4822_v63, 0.0  ;;  %v4279_v56 = vadd.f32 %v4210_v21, %v4027_v43  ;;  %v4587_v63 = vld [vmem:[%s6143_s10 + $0x136] sm:$0xff]  ;;  %v4588_v43 = vld [vmem:[%s6143_s10 + $0x13e] sm:$0xff] }
 0x4fc   : > { %v4464_v45 = vpop.f32.mrf.mxu0  ;;  %v4716_v57 = vpop.f32.mrf.mxu1  ;;  %4894 = vst.msk [vmem:[%s6930_s27 + $0x68] sm:$0xff] %vm2599_vm1, %v4858_v35  ;;  %v4531_v40 = vadd.f32 %v4462_v54, %v4279_v56  ;;  %v4083_v54 = vld [vmem:[%s6143_s10 + $0x134] sm:$0xff] }
 0x4fe   : > { %v4783_v26 = vadd.f32 %v4714_v44, %v4531_v40  ;;  %v4084_v44 = vld [vmem:[%s6143_s10 + $0x13c] sm:$0xff] }
 0x4ff   : > { %v3960_v0 = vpop.f32.mrf.mxu2  ;;  %v4212_v15 = vpop.f32.mrf.mxu3  ;;  %v4102_v56 = vpack.c.bf16 %v4084_v44, %v4083_v54 }
 0x500   : > { %v4823_v25 = vadd.f32 %v6916_v55, %v4783_v26  ;;  %v4028_v60 = vadd.f32 %v3960_v0, %v6748_v62  ;;  %v4606_v26 = vpack.c.bf16 %v4588_v43, %v4587_v63 }
 0x502   : > { %v4859_v34 = vmax.f32 %v4823_v25, 0.0  ;;  %v4280_v46 = vadd.f32 %v4212_v15, %v4028_v60 }
 0x504   : > { %v4467_v7 = vpop.f32.mrf.mxu0  ;;  %v4719_v27 = vpop.f32.mrf.mxu1  ;;  %4895 = vst.msk [vmem:[%s6930_s27 + $0x70] sm:$0xff] %vm2599_vm1, %v4859_v34  ;;  %v4532_v52 = vadd.f32 %v4464_v45, %v4280_v46  ;;  %5424 = vmatmul.msk.bf16.gmra.mxu2 %vm2599_vm1, %v4100_v1  ;;  %5448 = vmatmul.msk.bf16.gmra.mxu3 %vm2599_vm1, %v4101_v22  ;;  %v4354_v45 = vpack.c.bf16 %v4336_v33, %v4335_v28 }
 0x506   : > { %v4784_v62 = vadd.f32 %v4716_v57, %v4532_v52 }
 0x507   : > { %5472 = vmatmul.msk.bf16.gmra.mxu0 %vm2599_vm1, %v4353_v18  ;;  %5496 = vmatmul.msk.bf16.gmra.mxu1 %vm2599_vm1, %v4605_v38  ;;  %v3963_v53 = vpop.f32.mrf.mxu2  ;;  %v4215_v8 = vpop.f32.mrf.mxu3 }
 0x508   : > { %v4824_v17 = vadd.f32 %v6916_v55, %v4784_v62  ;;  %v4029_v9 = vadd.f32 %v3963_v53, %v6755_v30 }
 0x50a   : > { %v4860_v6 = vmax.f32 %v4824_v17, 0.0  ;;  %v4281_v1 = vadd.f32 %v4215_v8, %v4029_v9 }
 0x50c   : > { %v4469_v24 = vpop.f32.mrf.mxu0  ;;  %v4721_v41 = vpop.f32.mrf.mxu1  ;;  %4896 = vst.msk [vmem:[%s6930_s27 + $0x78] sm:$0xff] %vm2599_vm1, %v4860_v6  ;;  %v4533_v49 = vadd.f32 %v4467_v7, %v4281_v1 }
 0x50e   : > { %v4785_v10 = vadd.f32 %v4719_v27, %v4533_v49 }
 0x50f   : > { %v3965_v4 = vpop.f32.mrf.mxu2  ;;  %v4217_v35 = vpop.f32.mrf.mxu3 }
 0x510   : > { %v4825_v21 = vadd.f32 %v6916_v55, %v4785_v10  ;;  %v4030_v30 = vadd.f32 %v3965_v4, %v6764_v51 }
 0x512   : > { %v4861_v57 = vmax.f32 %v4825_v21, 0.0  ;;  %v4282_v40 = vadd.f32 %v4217_v35, %v4030_v30 }
 0x514   : > { %v4472_v14 = vpop.f32.mrf.mxu0  ;;  %v4724_v61 = vpop.f32.mrf.mxu1  ;;  %4897 = vst.msk [vmem:[%s6930_s27 + $0x80] sm:$0xff] %vm2599_vm1, %v4861_v57  ;;  %v4534_v5 = vadd.f32 %v4469_v24, %v4282_v40  ;;  %5425 = vmatmul.msk.bf16.gmra.mxu2 %vm2599_vm1, %v4101_v22  ;;  %5449 = vmatmul.msk.bf16.gmra.mxu3 %vm2599_vm1, %v4102_v56 }
 0x516   : > { %v4786_v59 = vadd.f32 %v4721_v41, %v4534_v5 }
 0x517   : > { %5473 = vmatmul.msk.bf16.gmra.mxu0 %vm2599_vm1, %v4354_v45  ;;  %5497 = vmatmul.msk.bf16.gmra.mxu1 %vm2599_vm1, %v4606_v26  ;;  %v3968_v51 = vpop.f32.mrf.mxu2  ;;  %v4220_v42 = vpop.f32.mrf.mxu3 }
 0x518   : > { %v4826_v0 = vadd.f32 %v6916_v55, %v4786_v59  ;;  %v4031_v2 = vadd.f32 %v3968_v51, %v6773_v50 }
 0x51a   : > { %v4862_v25 = vmax.f32 %v4826_v0, 0.0  ;;  %v4283_v60 = vadd.f32 %v4220_v42, %v4031_v2 }
 0x51c   : > { %v4474_v15 = vpop.f32.mrf.mxu0  ;;  %v4726_v18 = vpop.f32.mrf.mxu1  ;;  %4898 = vst.msk [vmem:[%s6930_s27 + $0x88] sm:$0xff] %vm2599_vm1, %v4862_v25  ;;  %v4535_v22 = vadd.f32 %v4472_v14, %v4283_v60 }
 0x51e   : > { %v4787_v34 = vadd.f32 %v4724_v61, %v4535_v22 }
 0x51f   : > { %v3970_v46 = vpop.f32.mrf.mxu2  ;;  %v4222_v27 = vpop.f32.mrf.mxu3 }
 0x520   : > { %v4827_v7 = vadd.f32 %v6916_v55, %v4787_v34  ;;  %v4032_v38 = vadd.f32 %v3970_v46, %v6782_v16 }
 0x522   : > { %v4863_v52 = vmax.f32 %v4827_v7, 0.0  ;;  %v4284_v62 = vadd.f32 %v4222_v27, %v4032_v38 }
 0x524   : > { %v4477_v50 = vpop.f32.mrf.mxu0  ;;  %v4729_v53 = vpop.f32.mrf.mxu1  ;;  %4899 = vst.msk [vmem:[%s6930_s27 + $0x90] sm:$0xff] %vm2599_vm1, %v4863_v52  ;;  %v4536_v17 = vadd.f32 %v4474_v15, %v4284_v62 }
 0x526   : > { %v4788_v9 = vadd.f32 %v4726_v18, %v4536_v17 }
 0x527   : > { %v3973_v8 = vpop.f32.mrf.mxu2  ;;  %v4225_v24 = vpop.f32.mrf.mxu3 }
 0x528   : > { %v4828_v6 = vadd.f32 %v6916_v55, %v4788_v9  ;;  %v4033_v1 = vadd.f32 %v3973_v8, %v6789_v32 }
 0x52a   : > { %v4864_v41 = vmax.f32 %v4828_v6, 0.0  ;;  %v4285_v49 = vadd.f32 %v4225_v24, %v4033_v1 }
 0x52c   : > { %v4479_v16 = vpop.f32.mrf.mxu0  ;;  %v4731_v54 = vpop.f32.mrf.mxu1  ;;  %4900 = vst.msk [vmem:[%s6930_s27 + $0x98] sm:$0xff] %vm2599_vm1, %v4864_v41  ;;  %v4537_v10 = vadd.f32 %v4477_v50, %v4285_v49 }
 0x52e   : > { %v4789_v44 = vadd.f32 %v4729_v53, %v4537_v10 }
 0x52f   : > { %v3975_v28 = vpop.f32.mrf.mxu2  ;;  %v4227_v63 = vpop.f32.mrf.mxu3 }
 0x530   : > { %v4829_v33 = vadd.f32 %v6916_v55, %v4789_v44  ;;  %v4034_v4 = vadd.f32 %v3975_v28, %v6798_v37 }
 0x532   : > { %v4865_v43 = vmax.f32 %v4829_v33, 0.0  ;;  %v4286_v21 = vadd.f32 %v4227_v63, %v4034_v4 }
 0x534   : > { %v4482_v32 = vpop.f32.mrf.mxu0  ;;  %v4734_v30 = vpop.f32.mrf.mxu1  ;;  %4901 = vst.msk [vmem:[%s6930_s27 + $0xa0] sm:$0xff] %vm2599_vm1, %v4865_v43  ;;  %v4538_v35 = vadd.f32 %v4479_v16, %v4286_v21 }
 0x536   : > { %v4790_v56 = vadd.f32 %v4731_v54, %v4538_v35 }
 0x537   : > { %v3978_v45 = vpop.f32.mrf.mxu2  ;;  %v4230_v14 = vpop.f32.mrf.mxu3 }
 0x538   : > { %v4830_v57 = vadd.f32 %v6916_v55, %v4790_v56  ;;  %v4035_v40 = vadd.f32 %v3978_v45, %v6805_v36 }
 0x53a   : > { %v4866_v26 = vmax.f32 %v4830_v57, 0.0  ;;  %v4287_v61 = vadd.f32 %v4230_v14, %v4035_v40 }
 0x53c   : > { %v4484_v37 = vpop.f32.mrf.mxu0  ;;  %v4736_v5 = vpop.f32.mrf.mxu1  ;;  %4902 = vst.msk [vmem:[%s6930_s27 + $0xa8] sm:$0xff] %vm2599_vm1, %v4866_v26  ;;  %v4539_v59 = vadd.f32 %v4482_v32, %v4287_v61 }
 0x53e   : > { %v4791_v51 = vadd.f32 %v4734_v30, %v4539_v59 }
 0x53f   : > { %v3980_v0 = vpop.f32.mrf.mxu2  ;;  %v4232_v25 = vpop.f32.mrf.mxu3 }
 0x540   : > { %v4831_v2 = vadd.f32 %v6916_v55, %v4791_v51  ;;  %v4036_v42 = vadd.f32 %v3980_v0, %v6814_v58 }
 0x542   : > { %v4867_v60 = vmax.f32 %v4831_v2, 0.0  ;;  %v4288_v15 = vadd.f32 %v4232_v25, %v4036_v42 }
 0x544   : > { %v4487_v36 = vpop.f32.mrf.mxu0  ;;  %v4739_v18 = vpop.f32.mrf.mxu1  ;;  %4903 = vst.msk [vmem:[%s6930_s27 + $0xb0] sm:$0xff] %vm2599_vm1, %v4867_v60  ;;  %v4540_v22 = vadd.f32 %v4484_v37, %v4288_v15 }
 0x546   : > { %v4792_v34 = vadd.f32 %v4736_v5, %v4540_v22 }
 0x547   : > { %v3983_v46 = vpop.f32.mrf.mxu2  ;;  %v4235_v27 = vpop.f32.mrf.mxu3 }
 0x548   : > { %v4832_v7 = vadd.f32 %v6916_v55, %v4792_v34  ;;  %v4037_v38 = vadd.f32 %v3983_v46, %v6821_v31 }
 0x54a   : > { %v4868_v52 = vmax.f32 %v4832_v7, 0.0  ;;  %v4289_v62 = vadd.f32 %v4235_v27, %v4037_v38 }
 0x54c   : > { %v4489_v58 = vpop.f32.mrf.mxu0  ;;  %v4741_v50 = vpop.f32.mrf.mxu1  ;;  %4904 = vst.msk [vmem:[%s6930_s27 + $0xb8] sm:$0xff] %vm2599_vm1, %v4868_v52  ;;  %v4541_v53 = vadd.f32 %v4487_v36, %v4289_v62 }
 0x54e   : > { %v4793_v17 = vadd.f32 %v4739_v18, %v4541_v53 }
 0x54f   : > { %v3985_v9 = vpop.f32.mrf.mxu2  ;;  %v4237_v1 = vpop.f32.mrf.mxu3 }
 0x550   : > { %v4833_v8 = vadd.f32 %v6916_v55, %v4793_v17  ;;  %v4038_v6 = vadd.f32 %v3985_v9, %v6830_v19 }
 0x552   : > { %v4869_v24 = vmax.f32 %v4833_v8, 0.0  ;;  %v4290_v41 = vadd.f32 %v4237_v1, %v4038_v6 }
 0x554   : > { %v4492_v31 = vpop.f32.mrf.mxu0  ;;  %v4744_v49 = vpop.f32.mrf.mxu1  ;;  %4905 = vst.msk [vmem:[%s6930_s27 + $0xc0] sm:$0xff] %vm2599_vm1, %v4869_v24  ;;  %v4542_v16 = vadd.f32 %v4489_v58, %v4290_v41 }
 0x556   : > { %v4794_v54 = vadd.f32 %v4741_v50, %v4542_v16 }
 0x557   : > { %v3988_v10 = vpop.f32.mrf.mxu2  ;;  %v4240_v33 = vpop.f32.mrf.mxu3 }
 0x558   : > { %v4834_v44 = vadd.f32 %v6916_v55, %v4794_v54  ;;  %v4039_v28 = vadd.f32 %v3988_v10, %v6837_v23 }
 0x55a   : > { %v4870_v4 = vmax.f32 %v4834_v44, 0.0  ;;  %v4291_v63 = vadd.f32 %v4240_v33, %v4039_v28 }
 0x55c   : > { %v4494_v19 = vpop.f32.mrf.mxu0  ;;  %v4746_v43 = vpop.f32.mrf.mxu1  ;;  %4906 = vst.msk [vmem:[%s6930_s27 + $0xc8] sm:$0xff] %vm2599_vm1, %v4870_v4  ;;  %v4543_v21 = vadd.f32 %v4492_v31, %v4291_v63 }
 0x55e   : > { %v4795_v32 = vadd.f32 %v4744_v49, %v4543_v21 }
 0x55f   : > { %v3990_v30 = vpop.f32.mrf.mxu2  ;;  %v4242_v45 = vpop.f32.mrf.mxu3 }
 0x560   : > { %v4835_v35 = vadd.f32 %v6916_v55, %v4795_v32  ;;  %v4040_v56 = vadd.f32 %v3990_v30, %v6846_v47 }
 0x562   : > { %v4871_v57 = vmax.f32 %v4835_v35, 0.0  ;;  %v4292_v40 = vadd.f32 %v4242_v45, %v4040_v56 }
 0x564   : > { %v4497_v23 = vpop.f32.mrf.mxu0  ;;  %v4749_v14 = vpop.f32.mrf.mxu1  ;;  %4907 = vst.msk [vmem:[%s6930_s27 + $0xd0] sm:$0xff] %vm2599_vm1, %v4871_v57  ;;  %v4544_v26 = vadd.f32 %v4494_v19, %v4292_v40 }
 0x566   : > { %v4796_v61 = vadd.f32 %v4746_v43, %v4544_v26 }
 0x567   : > { %v3993_v37 = vpop.f32.mrf.mxu2  ;;  %v4245_v51 = vpop.f32.mrf.mxu3 }
 0x568   : > { %v4836_v5 = vadd.f32 %v6916_v55, %v4796_v61  ;;  %v4041_v59 = vadd.f32 %v3993_v37, %v6853_v39 }
 0x56a   : > { %v4872_v0 = vmax.f32 %v4836_v5, 0.0  ;;  %v4293_v2 = vadd.f32 %v4245_v51, %v4041_v59 }
 0x56c   : > { %v4499_v47 = vpop.f32.mrf.mxu0  ;;  %v4751_v42 = vpop.f32.mrf.mxu1  ;;  %4908 = vst.msk [vmem:[%s6930_s27 + $0xd8] sm:$0xff] %vm2599_vm1, %v4872_v0  ;;  %v4545_v25 = vadd.f32 %v4497_v23, %v4293_v2 }
 0x56e   : > { %v4797_v60 = vadd.f32 %v4749_v14, %v4545_v25 }
 0x56f   : > { %v3995_v15 = vpop.f32.mrf.mxu2  ;;  %v4247_v22 = vpop.f32.mrf.mxu3 }
 0x570   : > { %v4837_v36 = vadd.f32 %v6916_v55, %v4797_v60  ;;  %v4042_v18 = vadd.f32 %v3995_v15, %v6862_v13 }
 0x572   : > { %v4873_v34 = vmax.f32 %v4837_v36, 0.0  ;;  %v4294_v46 = vadd.f32 %v4247_v22, %v4042_v18 }
 0x574   : > { %v4502_v39 = vpop.f32.mrf.mxu0  ;;  %v4754_v7 = vpop.f32.mrf.mxu1  ;;  %4909 = vst.msk [vmem:[%s6930_s27 + $0xe0] sm:$0xff] %vm2599_vm1, %v4873_v34  ;;  %v4546_v38 = vadd.f32 %v4499_v47, %v4294_v46 }
 0x576   : > { %v4798_v27 = vadd.f32 %v4751_v42, %v4546_v38 }
 0x577   : > { %v3998_v52 = vpop.f32.mrf.mxu2  ;;  %v4250_v50 = vpop.f32.mrf.mxu3 }
 0x578   : > { %v4838_v62 = vadd.f32 %v6916_v55, %v4798_v27  ;;  %v4043_v58 = vadd.f32 %v3998_v52, %v6869_v12 }
 0x57a   : > { %v4874_v53 = vmax.f32 %v4838_v62, 0.0  ;;  %v4295_v17 = vadd.f32 %v4250_v50, %v4043_v58 }
 0x57c   : > { %v4504_v13 = vpop.f32.mrf.mxu0  ;;  %4910 = vst.msk [vmem:[%s6930_s27 + $0xe8] sm:$0xff] %vm2599_vm1, %v4874_v53  ;;  %v4547_v9 = vadd.f32 %v4502_v39, %v4295_v17  ;;  %v4756_v8 = vpop.f32.mrf.mxu1 }
 0x57e   : > { %v4799_v6 = vadd.f32 %v4754_v7, %v4547_v9 }
 0x57f   : > { %v4000_v1 = vpop.f32.mrf.mxu2  ;;  %v4252_v31 = vpop.f32.mrf.mxu3 }
 0x580   : > { %v4839_v24 = vadd.f32 %v6916_v55, %v4799_v6  ;;  %v4044_v41 = vadd.f32 %v4000_v1, %v6878_v48 }
 0x582   : > { %v4875_v49 = vmax.f32 %v4839_v24, 0.0  ;;  %v4296_v16 = vadd.f32 %v4252_v31, %v4044_v41 }
 0x584   : > { %4911 = vst.msk [vmem:[%s6930_s27 + $0xf0] sm:$0xff] %vm2599_vm1, %v4875_v49  ;;  %v4548_v12 = vadd.f32 %v4504_v13, %v4296_v16  ;;  %v4507_v54 = vpop.f32.mrf.mxu0  ;;  %v4759_v44 = vpop.f32.mrf.mxu1 }
 0x586   : > { %v4800_v10 = vadd.f32 %v4756_v8, %v4548_v12 }
 0x587   : > { %v4003_v28 = vpop.f32.mrf.mxu2  ;;  %v4255_v63 = vpop.f32.mrf.mxu3 }
 0x588   : > { %v4840_v33 = vadd.f32 %v6916_v55, %v4800_v10  ;;  %v4045_v4 = vadd.f32 %v4003_v28, %v6885_v29 }
 0x58a   : > { %v4876_v19 = vmax.f32 %v4840_v33, 0.0  ;;  %v4297_v43 = vadd.f32 %v4255_v63, %v4045_v4 }
 0x58c   : > { %4912 = vst.msk [vmem:[%s6930_s27 + $0xf8] sm:$0xff] %vm2599_vm1, %v4876_v19  ;;  %v4549_v48 = vadd.f32 %v4507_v54, %v4297_v43  ;;  %v4509_v32 = vpop.f32.mrf.mxu0  ;;  %v4761_v57 = vpop.f32.mrf.mxu1 }
 0x58e   : > { %v4801_v21 = vadd.f32 %v4759_v44, %v4549_v48 }
 0x58f   : > { %v4005_v30 = vpop.f32.mrf.mxu2  ;;  %v4257_v45 = vpop.f32.mrf.mxu3 }
 0x590   : > { %v4841_v35 = vadd.f32 %v6916_v55, %v4801_v21  ;;  %v4046_v56 = vadd.f32 %v4005_v30, %v6894_v20 }
 0x592   : > { %v4877_v40 = vmax.f32 %v4841_v35, 0.0  ;;  %v4298_v23 = vadd.f32 %v4257_v45, %v4046_v56 }
 0x594   : > { %4913 = vst.msk [vmem:[%s6930_s27 + $0x100] sm:$0xff] %vm2599_vm1, %v4877_v40  ;;  %v4550_v29 = vadd.f32 %v4509_v32, %v4298_v23  ;;  %v4512_v59 = vpop.f32.mrf.mxu0  ;;  %v4764_v20 = vpop.f32.mrf.mxu1 }
 0x596   : > { %v4802_v14 = vadd.f32 %v4761_v57, %v4550_v29 }
 0x597   : > { %v4008_v26 = vpop.f32.mrf.mxu2  ;;  %v4260_v5 = vpop.f32.mrf.mxu3 }
 0x598   : > { %v4842_v61 = vadd.f32 %v6916_v55, %v4802_v14  ;;  %v4047_v37 = vadd.f32 %v4008_v26, %v6901_v3 }
 0x59a   : > { %v4878_v51 = vmax.f32 %v4842_v61, 0.0  ;;  %v4299_v0 = vadd.f32 %v4260_v5, %v4047_v37 }
 0x59c   : > { %4914 = vst.msk [vmem:[%s6930_s27 + $0x108] sm:$0xff] %vm2599_vm1, %v4878_v51  ;;  %v4551_v2 = vadd.f32 %v4512_v59, %v4299_v0  ;;  %v4514_v3 = vpop.f32.mrf.mxu0  ;;  %v4766_v34 = vpop.f32.mrf.mxu1 }
 0x59e   : > { %v4803_v47 = vadd.f32 %v4764_v20, %v4551_v2 }
 0x59f   : > { %v4010_v42 = vpop.f32.mrf.mxu2  ;;  %v4262_v15 = vpop.f32.mrf.mxu3 }
 0x5a0   : > { %v4843_v25 = vadd.f32 %v6916_v55, %v4803_v47  ;;  %v4048_v60 = vadd.f32 %v4010_v42, %v6910_v11 }
 0x5a2   : > { %v4879_v36 = vmax.f32 %v4843_v25, 0.0  ;;  %v4300_v18 = vadd.f32 %v4262_v15, %v4048_v60 }
 0x5a4   : > { %4915 = vst.msk [vmem:[%s6930_s27 + $0x110] sm:$0xff] %vm2599_vm1, %v4879_v36  ;;  %v4552_v22 = vadd.f32 %v4514_v3, %v4300_v18 }
 0x5a6   : > { %v4804_v46 = vadd.f32 %v4766_v34, %v4552_v22 }
 0x5a8   : > { %v4844_v39 = vadd.f32 %v6916_v55, %v4804_v46 }
 0x5aa   : > { %v4880_v7 = vmax.f32 %v4844_v39, 0.0 }
 0x5ac   : > { %4916 = vst.msk [vmem:[%s6930_s27 + $0x118] sm:$0xff] %vm2599_vm1, %v4880_v7 }
 0x5ad PF: > { %s15_s20 = sadd.s32 1, %s5580_s20   ;;  %s7172_s18 = smov %s5576_s19 }
 0x5ae   : > { %p12_p5 = scmp.ge.s32.totalorder %s15_s20, 4   ;;  %s7173_s19 = smov %s7175_s21 }
 0x5b0   :  { %14 = sbr.rel (!%p12_p5) target bundleno = 2 (0x2), region = 89 }

</bundles_post_ra>
